<compile_context>
chip_gen: v7x
topology: tpu7x:2x2x1
jax: 0.10.0
libtpu: 0.0.40
codegen_flags: <defaults>
</compile_context>

<pallas_src>
import math
import numpy as np
import jax
import jax.numpy as jnp
from jax.experimental import pallas as pl
from jax.experimental.pallas import tpu as pltpu

# ---------------- scaled-down SwinV2-tiny-like config ----------------
IMG = 32          # input spatial size (original module uses 256 -> 37632 features)
IN_CH = 3
PATCH = 4
EMBED = 32
DEPTHS = (2, 2)
HEADS = (2, 4)
WINDOW = 4
MLP_RATIO = 4
CPB_HIDDEN = 512  # continuous-position-bias MLP hidden size (as in SwinV2)
NUM_CLASSES = 10
NUM_CLASSES_PAD = 128   # lane-dense classifier output, sliced back to NUM_CLASSES
LN_EPS = 1e-5
NEG_INF = -1e9          # cross-window mask (exp underflows to exactly 0 in f32)


# ============================ in-kernel math helpers ============================

def _bf(x):
    return x.astype(jnp.bfloat16)


def _ln(x, g, b):
    """Two-pass LayerNorm over the last axis, f32 math (matches torch.nn.LayerNorm)."""
    mu = jnp.mean(x, axis=-1, keepdims=True)
    d = x - mu
    var = jnp.mean(d * d, axis=-1, keepdims=True)
    return d * jax.lax.rsqrt(var + LN_EPS) * g + b


def _erf(x):
    """Abramowitz-Stegun 7.1.26 polynomial erf, |abs err| <= 1.5e-7."""
    a1, a2, a3, a4, a5 = 0.254829592, -0.284496736, 1.421413741, -1.453152027, 1.061405429
    p = 0.3275911
    z = jnp.abs(x)
    t = 1.0 / (1.0 + p * z)
    poly = ((((a5 * t + a4) * t + a3) * t + a2) * t + a1) * t
    y = 1.0 - poly * jnp.exp(-z * z)
    return jnp.where(x >= 0.0, y, -y)


def _gelu(x):
    # exact (erf) GELU, matching torch.nn.functional.gelu default
    return 0.5 * x * (1.0 + _erf(x * 0.7071067811865476))


# ============================ fused forward kernel bodies ============================

def _swin_block_body(t, scales_ref, bidx, heads, C, nxt):
    """One SwinV2 block on (M, C) tokens kept in original (H*W) row-major order.
    Window structure + shift mask are entirely encoded in the precomputed bias."""
    D = C // heads
    bias_ref = nxt()                                  # (heads, M, M) f32: CPB + masks
    wqkv = nxt()[...]; bqkv = nxt()[...]              # fused QKV (K has no bias in SwinV2)
    projw = nxt()[...]; projb = nxt()[...]
    l1g = nxt()[...]; l1b = nxt()[...]
    f1w = nxt()[...]; f1b = nxt()[...]
    f2w = nxt()[...]; f2b = nxt()[...]
    l2g = nxt()[...]; l2b = nxt()[...]

    qkv = jnp.dot(_bf(t), wqkv, preferred_element_type=jnp.float32) + bqkv   # (M, 3C)

    ctx_parts = []
    for h in range(heads):                            # static unroll over 2/4 heads
        q = qkv[:, h * D:(h + 1) * D]
        k = qkv[:, C + h * D:C + (h + 1) * D]
        v = qkv[:, 2 * C + h * D:2 * C + (h + 1) * D]
        # F.normalize(eps=1e-12)  ==  x * rsqrt(max(sum(x^2), 1e-24))
        qn = q * jax.lax.rsqrt(jnp.maximum(jnp.sum(q * q, -1, keepdims=True), 1e-24))
        kn = k * jax.lax.rsqrt(jnp.maximum(jnp.sum(k * k, -1, keepdims=True), 1e-24))
        qn = qn * scales_ref[4 * bidx + h]            # fold per-head logit scale into q
        s = jax.lax.dot_general(_bf(qn), _bf(kn), (((1,), (1,)), ((), ())),
                                preferred_element_type=jnp.float32)          # (M, M)
        s = s + bias_ref[h]
        s = s - jnp.max(s, axis=-1, keepdims=True)
        p = jnp.exp(s)
        p = p / jnp.sum(p, axis=-1, keepdims=True)    # exact softmax (f32)
        ctx_parts.append(jnp.dot(_bf(p), _bf(v), preferred_element_type=jnp.float32))
    ctx = jnp.concatenate(ctx_parts, axis=-1)         # (M, C)

    attn_out = jnp.dot(_bf(ctx), projw, preferred_element_type=jnp.float32) + projb

    # SwinV2 res-post-norm residual #1
    x1 = t + _ln(attn_out, l1g, l1b)
    # MLP: fc1 + exact GELU + fc2, res-post-norm residual #2
    h1 = jnp.dot(_bf(x1), f1w, preferred_element_type=jnp.float32) + f1b
    h1 = _gelu(h1)
    h2 = jnp.dot(_bf(h1), f2w, preferred_element_type=jnp.float32) + f2b
    return x1 + _ln(h2, l2g, l2b)


def _patch_merge_body(t, Cin, Mout, nxt):
    """2x2 concat -> Linear(4C->2C, no bias) -> LayerNorm, via 0/1 selection matmuls."""
    sel_ref = nxt()                                   # (4, Mout, Min) f32 one-hot rows
    red_w = nxt()[...]                                # (4C, 2C) bf16
    mg = nxt()[...]; mb = nxt()[...]
    acc = jnp.zeros((Mout, 2 * Cin), jnp.float32)
    for k in range(4):
        gathered = jnp.dot(sel_ref[k], t, preferred_element_type=jnp.float32)   # exact row gather
        acc = acc + jnp.dot(_bf(gathered), red_w[k * Cin:(k + 1) * Cin, :],
                            preferred_element_type=jnp.float32)
    return _ln(acc, mg, mb)


def _build_kernel(block_meta):
    """block_meta: tuple of (heads, dim) per block in execution order."""
    def kernel(scales_ref, x_ref, *refs):
        refs = list(refs)
        o_ref = refs.pop()
        it = iter(refs)
        nxt = lambda: next(it)

        # ---- patch embed: Conv2d(k=4, s=4) as matmul + LayerNorm ----
        ew = nxt()[...]; eb = nxt()[...]; eg = nxt()[...]; eb2 = nxt()[...]
        t = jnp.dot(_bf(x_ref[0]), ew, preferred_element_type=jnp.float32) + eb
        t = _ln(t, eg, eb2)                            # (64, 32) tokens, row-major (H, W)

        # ---- stages ----
        bidx = 0
        for s, depth in enumerate(DEPTHS):
            for _ in range(depth):
                heads, C = block_meta[bidx]
                t = _swin_block_body(t, scales_ref, bidx, heads, C, nxt)
                bidx += 1
            if s < len(DEPTHS) - 1:
                Cin = block_meta[bidx - 1][1]
                t = _patch_merge_body(t, Cin, t.shape[0] // 4, nxt)

        # ---- final LayerNorm ----
        fg = nxt()[...]; fb = nxt()[...]
        t = _ln(t, fg, fb)                             # (16, 64) = last_hidden_state of one image

        # ---- flatten(start_dim=1) + classifier (lane-dense 128-wide padded logits) ----
        cw_ref = nxt(); cb = nxt()[...]
        Lf, Cf = t.shape
        tb = _bf(t)
        logits = cb
        for r in range(Lf):
            logits = logits + jnp.dot(tb[r:r + 1, :], cw_ref[r * Cf:(r + 1) * Cf, :],
                                      preferred_element_type=jnp.float32)
        o_ref[0] = logits                              # (1, 128), unmasked lane-dense store
    return kernel


# ============================ host-side precompute (one time) ============================

def _make_rel_tables(window):
    """SwinV2 continuous relative-position-bias inputs (static per window size)."""
    ws = window
    c = np.arange(-(ws - 1), ws, dtype=np.float32)
    table = np.stack(np.meshgrid(c, c, indexing='ij'), axis=-1)          # (2w-1, 2w-1, 2)
    table /= max(ws - 1, 1)
    table *= 8.0
    table = np.sign(table) * np.log2(np.abs(table) + 1.0) / np.log2(8.0)

    coords = np.stack(np.meshgrid(np.arange(ws), np.arange(ws), indexing='ij'))
    cf = coords.reshape(2, -1)
    rel = (cf[:, :, None] - cf[:, None, :]).transpose(1, 2, 0).copy()
    rel[:, :, 0] += ws - 1
    rel[:, :, 1] += ws - 1
    rel[:, :, 0] *= 2 * ws - 1
    index = rel.sum(-1)
    return jnp.asarray(table.reshape(-1, 2), jnp.float32), index


def _cpb_bias(bp, window, heads):
    """16 * sigmoid(cpb_mlp(log-spaced coords))[rel_index] -> (heads, N, N)."""
    table, index = _make_rel_tables(window)
    h = jnp.maximum(table @ bp['cpb1_w'] + bp['cpb1_b'], 0.0)
    tb = h @ bp['cpb2_w']                                      # ((2w-1)^2, heads)
    N = window * window
    bias = tb[index.reshape(-1)].reshape(N, N, heads).transpose(2, 0, 1)
    return 16.0 * jax.nn.sigmoid(bias)


def _token_window_layout(H, W, window, shift):
    """Per original token: shifted-window id, in-window flat index, shift-mask region label."""
    hh, ww = np.meshgrid(np.arange(H), np.arange(W), indexing='ij')
    sh = (hh - shift) % H
    sw = (ww - shift) % W
    win = (sh // window) * (W // window) + (sw // window)
    inwin = (sh % window) * window + (sw % window)
    if shift > 0:
        def lab(v, size):
            out = np.zeros_like(v)
            out = np.where(v >= size - window, 1, out)
            out = np.where(v >= size - shift, 2, out)
            return out
        label = lab(sh, H) * 3 + lab(sw, W)
    else:
        label = np.zeros_like(sh)
    return win.reshape(-1), inwin.reshape(-1), label.reshape(-1)


def _full_token_bias(cpb, H, W, window, shift):
    """(heads, H*W, H*W) bias in original token order: CPB within the (shifted) window,
    -100 shifted-window mask for cross-region pairs, NEG_INF across windows."""
    win, inwin, label = _token_window_layout(H, W, window, shift)
    same_win = win[:, None] == win[None, :]
    same_lab = label[:, None] == label[None, :]
    add = np.where(same_win, np.where(same_lab, 0.0, -100.0), NEG_INF).astype(np.float32)
    gathered = cpb[:, inwin[:, None], inwin[None, :]]          # (heads, M, M)
    return (gathered + jnp.asarray(add)[None]).astype(jnp.float32)


def precompute_derived(params):
    """Hoist everything parameter-dependent out of the hot path; build the flat weight list
    (bf16 matmul weights, f32 biases / LN params / biases-with-masks) consumed by the kernel."""
    weights = []
    block_meta = []
    scales = []

    def row(a):
        return a.reshape(1, -1).astype(jnp.float32)

    ep = params['embed']
    embed_w = ep['proj_w'].reshape(EMBED, IN_CH * PATCH * PATCH).T
    weights += [_bf(embed_w), row(ep['proj_b']), row(ep['ln_g']), row(ep['ln_b'])]

    H = W = IMG // PATCH
    dim = EMBED
    for s, depth in enumerate(DEPTHS):
        heads = HEADS[s]
        for bi in range(depth):
            bp = params['stages'][s]['blocks'][bi]
            if H <= WINDOW:                      # window covers the full feature map
                window, shift = H, 0
            else:
                window = WINDOW
                shift = 0 if bi % 2 == 0 else WINDOW // 2
            cpb = _cpb_bias(bp, window, heads)
            bias_full = _full_token_bias(cpb, H, W, window, shift)          # (heads, M, M)
            wqkv = jnp.concatenate([bp['q_w'], bp['k_w'], bp['v_w']], axis=1)
            bqkv = jnp.concatenate([bp['q_b'], jnp.zeros((dim,), jnp.float32), bp['v_b']])
            weights += [bias_full,
                        _bf(wqkv), row(bqkv),
                        _bf(bp['proj_w']), row(bp['proj_b']),
                        row(bp['ln1_g']), row(bp['ln1_b']),
                        _bf(bp['fc1_w']), row(bp['fc1_b']),
                        _bf(bp['fc2_w']), row(bp['fc2_b']),
                        row(bp['ln2_g']), row(bp['ln2_b'])]
            sc = jnp.exp(jnp.minimum(bp['logit_scale'], math.log(1.0 / 0.01))).reshape(-1)
            scales.append(jnp.zeros((4,), jnp.float32).at[:heads].set(sc))
            block_meta.append((heads, dim))
        if s < len(DEPTHS) - 1:
            dp = params['stages'][s]['downsample']
            Hn, Wn = H // 2, W // 2
            sel = np.zeros((4, Hn * Wn, H * W), np.float32)    # 2x2-neighbourhood row selectors
            for m in range(Hn * Wn):
                i, j = divmod(m, Wn)
                for k, (si, sj) in enumerate([(2 * i, 2 * j), (2 * i + 1, 2 * j),
                                              (2 * i, 2 * j + 1), (2 * i + 1, 2 * j + 1)]):
                    sel[k, m, si * W + sj] = 1.0
            weights += [jnp.asarray(sel), _bf(dp['red_w']), row(dp['ln_g']), row(dp['ln_b'])]
            dim *= 2
            H //= 2
            W //= 2

    weights += [row(params['final_ln_g']), row(params['final_ln_b'])]
    feat_dim = params['cls_w'].shape[0]
    cls_w = jnp.zeros((feat_dim, NUM_CLASSES_PAD), jnp.float32).at[:, :NUM_CLASSES].set(params['cls_w'])
    cls_b = jnp.zeros((1, NUM_CLASSES_PAD), jnp.float32).at[0, :NUM_CLASSES].set(params['cls_b'])
    weights += [_bf(cls_w), cls_b]

    return dict(weights=weights, scales=jnp.concatenate(scales), block_meta=tuple(block_meta))


# ============================ wrapper: one pallas_call per forward ============================

def build_forward(params):
    derived = precompute_derived(params)
    weights = derived['weights']
    kernel = _build_kernel(derived['block_meta'])
    n_patches = (IMG // PATCH) ** 2
    patch_dim = IN_CH * PATCH * PATCH

    def wspec(w):
        if w.ndim == 3:
            return pl.BlockSpec(w.shape, lambda g: (0, 0, 0))
        return pl.BlockSpec(w.shape, lambda g: (0, 0))

    in_specs = ([pl.BlockSpec(memory_space=pltpu.MemorySpace.SMEM),                # logit scales
                 pl.BlockSpec((1, n_patches, patch_dim), lambda g: (g, 0, 0))]     # image patches
                + [wspec(w) for w in weights])

    def forward(x_nchw):
        B = x_nchw.shape[0]
        P = PATCH
        # conv-as-matmul patch flatten (pure index plumbing, single XLA op)
        xp = x_nchw.reshape(B, IN_CH, IMG // P, P, IMG // P, P)
        xp = xp.transpose(0, 2, 4, 1, 3, 5).reshape(B, n_patches, patch_dim)
        out = pl.pallas_call(
            kernel,
            out_shape=jax.ShapeDtypeStruct((B, 1, NUM_CLASSES_PAD), jnp.float32),
            grid=(B,),
            in_specs=in_specs,
            out_specs=pl.BlockSpec((1, 1, NUM_CLASSES_PAD), lambda g: (g, 0, 0)),
            compiler_params=pltpu.CompilerParams(dimension_semantics=("parallel",)),
        )(derived['scales'], xp, *weights)
        return out[:, 0, :NUM_CLASSES]

    return forward


# ============================ deterministic parameter init ============================

def init_params(key):
    keys = iter(jax.random.split(key, 256))

    def nrm(shape, std=0.02):
        return jax.random.normal(next(keys), shape, jnp.float32) * std

    params = {
        'embed': {
            'proj_w': nrm((EMBED, IN_CH, PATCH, PATCH)),
            'proj_b': jnp.zeros((EMBED,), jnp.float32),
            'ln_g': jnp.ones((EMBED,), jnp.float32),
            'ln_b': jnp.zeros((EMBED,), jnp.float32),
        }
    }
    stages = []
    dim = EMBED
    res = IMG // PATCH
    for s, depth in enumerate(DEPTHS):
        heads = HEADS[s]
        blocks = []
        for _ in range(depth):
            blocks.append({
                'q_w': nrm((dim, dim)), 'q_b': jnp.zeros((dim,), jnp.float32),
                'k_w': nrm((dim, dim)),
                'v_w': nrm((dim, dim)), 'v_b': jnp.zeros((dim,), jnp.float32),
                'proj_w': nrm((dim, dim)), 'proj_b': jnp.zeros((dim,), jnp.float32),
                'logit_scale': jnp.full((heads, 1, 1), math.log(10.0), jnp.float32),
                'cpb1_w': nrm((2, CPB_HIDDEN)), 'cpb1_b': jnp.zeros((CPB_HIDDEN,), jnp.float32),
                'cpb2_w': nrm((CPB_HIDDEN, heads)),
                'ln1_g': jnp.ones((dim,), jnp.float32), 'ln1_b': jnp.zeros((dim,), jnp.float32),
                'fc1_w': nrm((dim, dim * MLP_RATIO)),
                'fc1_b': jnp.zeros((dim * MLP_RATIO,), jnp.float32),
                'fc2_w': nrm((dim * MLP_RATIO, dim)),
                'fc2_b': jnp.zeros((dim,), jnp.float32),
                'ln2_g': jnp.ones((dim,), jnp.float32), 'ln2_b': jnp.zeros((dim,), jnp.float32),
            })
        stage = {'blocks': blocks}
        if s < len(DEPTHS) - 1:
            stage['downsample'] = {
                'red_w': nrm((4 * dim, 2 * dim)),
                'ln_g': jnp.ones((2 * dim,), jnp.float32),
                'ln_b': jnp.zeros((2 * dim,), jnp.float32),
            }
            dim *= 2
            res //= 2
        stages.append(stage)
    params['stages'] = stages
    params['final_ln_g'] = jnp.ones((dim,), jnp.float32)
    params['final_ln_b'] = jnp.zeros((dim,), jnp.float32)
    feat_dim = dim * res * res        # analogue of 37632 in the original module
    params['cls_w'] = nrm((feat_dim, NUM_CLASSES))
    params['cls_b'] = jnp.zeros((NUM_CLASSES,), jnp.float32)
    return params


# TODO(synk): pretrained 'microsoft/swinv2-tiny-patch4-window8-256' weights cannot be
# loaded here (no file/network access); parameters are synthetic (deterministic PRNGKey
# init) at scaled-down sizes, but the forward-pass structure matches SwinV2.

if __name__ == "__main__":
    key = jax.random.PRNGKey(0)
    pkey, xkey = jax.random.split(key)
    params = init_params(pkey)
    fwd = jax.jit(build_forward(params))          # whole forward = one pallas_call
    x = jax.random.normal(xkey, (2, IN_CH, IMG, IMG), jnp.float32)   # NCHW like PyTorch
    logits = fwd(x)
    jax.block_until_ready(logits)
    assert logits.shape == (2, NUM_CLASSES)
    assert bool(jnp.all(jnp.isfinite(logits)))
    print("KERNEL_OK")
</pallas_src>

<mosaic_0001>
module attributes {stable_mosaic.version = 11 : i64} {
  func.func @kernel(%arg0: i32, %arg1: memref<16xf32, #tpu.memory_space<smem>>, %arg2: memref<1x64x48xf32, #tpu.memory_space<vmem>>, %arg3: memref<48x32xbf16, #tpu.memory_space<vmem>>, %arg4: memref<1x32xf32, #tpu.memory_space<vmem>>, %arg5: memref<1x32xf32, #tpu.memory_space<vmem>>, %arg6: memref<1x32xf32, #tpu.memory_space<vmem>>, %arg7: memref<2x64x64xf32, #tpu.memory_space<vmem>>, %arg8: memref<32x96xbf16, #tpu.memory_space<vmem>>, %arg9: memref<1x96xf32, #tpu.memory_space<vmem>>, %arg10: memref<32x32xbf16, #tpu.memory_space<vmem>>, %arg11: memref<1x32xf32, #tpu.memory_space<vmem>>, %arg12: memref<1x32xf32, #tpu.memory_space<vmem>>, %arg13: memref<1x32xf32, #tpu.memory_space<vmem>>, %arg14: memref<32x128xbf16, #tpu.memory_space<vmem>>, %arg15: memref<1x128xf32, #tpu.memory_space<vmem>>, %arg16: memref<128x32xbf16, #tpu.memory_space<vmem>>, %arg17: memref<1x32xf32, #tpu.memory_space<vmem>>, %arg18: memref<1x32xf32, #tpu.memory_space<vmem>>, %arg19: memref<1x32xf32, #tpu.memory_space<vmem>>, %arg20: memref<2x64x64xf32, #tpu.memory_space<vmem>>, %arg21: memref<32x96xbf16, #tpu.memory_space<vmem>>, %arg22: memref<1x96xf32, #tpu.memory_space<vmem>>, %arg23: memref<32x32xbf16, #tpu.memory_space<vmem>>, %arg24: memref<1x32xf32, #tpu.memory_space<vmem>>, %arg25: memref<1x32xf32, #tpu.memory_space<vmem>>, %arg26: memref<1x32xf32, #tpu.memory_space<vmem>>, %arg27: memref<32x128xbf16, #tpu.memory_space<vmem>>, %arg28: memref<1x128xf32, #tpu.memory_space<vmem>>, %arg29: memref<128x32xbf16, #tpu.memory_space<vmem>>, %arg30: memref<1x32xf32, #tpu.memory_space<vmem>>, %arg31: memref<1x32xf32, #tpu.memory_space<vmem>>, %arg32: memref<1x32xf32, #tpu.memory_space<vmem>>, %arg33: memref<4x16x64xf32, #tpu.memory_space<vmem>>, %arg34: memref<128x64xbf16, #tpu.memory_space<vmem>>, %arg35: memref<1x64xf32, #tpu.memory_space<vmem>>, %arg36: memref<1x64xf32, #tpu.memory_space<vmem>>, %arg37: memref<4x16x16xf32, #tpu.memory_space<vmem>>, %arg38: memref<64x192xbf16, #tpu.memory_space<vmem>>, %arg39: memref<1x192xf32, #tpu.memory_space<vmem>>, %arg40: memref<64x64xbf16, #tpu.memory_space<vmem>>, %arg41: memref<1x64xf32, #tpu.memory_space<vmem>>, %arg42: memref<1x64xf32, #tpu.memory_space<vmem>>, %arg43: memref<1x64xf32, #tpu.memory_space<vmem>>, %arg44: memref<64x256xbf16, #tpu.memory_space<vmem>>, %arg45: memref<1x256xf32, #tpu.memory_space<vmem>>, %arg46: memref<256x64xbf16, #tpu.memory_space<vmem>>, %arg47: memref<1x64xf32, #tpu.memory_space<vmem>>, %arg48: memref<1x64xf32, #tpu.memory_space<vmem>>, %arg49: memref<1x64xf32, #tpu.memory_space<vmem>>, %arg50: memref<4x16x16xf32, #tpu.memory_space<vmem>>, %arg51: memref<64x192xbf16, #tpu.memory_space<vmem>>, %arg52: memref<1x192xf32, #tpu.memory_space<vmem>>, %arg53: memref<64x64xbf16, #tpu.memory_space<vmem>>, %arg54: memref<1x64xf32, #tpu.memory_space<vmem>>, %arg55: memref<1x64xf32, #tpu.memory_space<vmem>>, %arg56: memref<1x64xf32, #tpu.memory_space<vmem>>, %arg57: memref<64x256xbf16, #tpu.memory_space<vmem>>, %arg58: memref<1x256xf32, #tpu.memory_space<vmem>>, %arg59: memref<256x64xbf16, #tpu.memory_space<vmem>>, %arg60: memref<1x64xf32, #tpu.memory_space<vmem>>, %arg61: memref<1x64xf32, #tpu.memory_space<vmem>>, %arg62: memref<1x64xf32, #tpu.memory_space<vmem>>, %arg63: memref<1x64xf32, #tpu.memory_space<vmem>>, %arg64: memref<1x64xf32, #tpu.memory_space<vmem>>, %arg65: memref<1024x128xbf16, #tpu.memory_space<vmem>>, %arg66: memref<1x128xf32, #tpu.memory_space<vmem>>, %arg67: memref<1x1x128xf32, #tpu.memory_space<vmem>>) attributes {dimension_semantics = [#tpu.dimension_semantics<parallel>], iteration_bounds = array<i64: 2>, scalar_prefetch = 0 : i64, scratch_operands = 0 : i64, tpu.core_type = #tpu.core_type<tc>, window_params = [{transform_indices = @transform_0, window_bounds = array<i64: 16>}, {transform_indices = @transform_1, window_bounds = array<i64: 1, 64, 48>}, {pipeline_mode = #tpu.pipeline_mode<synchronous>, transform_indices = @transform_2, window_bounds = array<i64: 48, 32>}, {pipeline_mode = #tpu.pipeline_mode<synchronous>, transform_indices = @transform_3, window_bounds = array<i64: 1, 32>}, {pipeline_mode = #tpu.pipeline_mode<synchronous>, transform_indices = @transform_4, window_bounds = array<i64: 1, 32>}, {pipeline_mode = #tpu.pipeline_mode<synchronous>, transform_indices = @transform_5, window_bounds = array<i64: 1, 32>}, {pipeline_mode = #tpu.pipeline_mode<synchronous>, transform_indices = @transform_6, window_bounds = array<i64: 2, 64, 64>}, {pipeline_mode = #tpu.pipeline_mode<synchronous>, transform_indices = @transform_7, window_bounds = array<i64: 32, 96>}, {pipeline_mode = #tpu.pipeline_mode<synchronous>, transform_indices = @transform_8, window_bounds = array<i64: 1, 96>}, {pipeline_mode = #tpu.pipeline_mode<synchronous>, transform_indices = @transform_9, window_bounds = array<i64: 32, 32>}, {pipeline_mode = #tpu.pipeline_mode<synchronous>, transform_indices = @transform_10, window_bounds = array<i64: 1, 32>}, {pipeline_mode = #tpu.pipeline_mode<synchronous>, transform_indices = @transform_11, window_bounds = array<i64: 1, 32>}, {pipeline_mode = #tpu.pipeline_mode<synchronous>, transform_indices = @transform_12, window_bounds = array<i64: 1, 32>}, {pipeline_mode = #tpu.pipeline_mode<synchronous>, transform_indices = @transform_13, window_bounds = array<i64: 32, 128>}, {pipeline_mode = #tpu.pipeline_mode<synchronous>, transform_indices = @transform_14, window_bounds = array<i64: 1, 128>}, {pipeline_mode = #tpu.pipeline_mode<synchronous>, transform_indices = @transform_15, window_bounds = array<i64: 128, 32>}, {pipeline_mode = #tpu.pipeline_mode<synchronous>, transform_indices = @transform_16, window_bounds = array<i64: 1, 32>}, {pipeline_mode = #tpu.pipeline_mode<synchronous>, transform_indices = @transform_17, window_bounds = array<i64: 1, 32>}, {pipeline_mode = #tpu.pipeline_mode<synchronous>, transform_indices = @transform_18, window_bounds = array<i64: 1, 32>}, {pipeline_mode = #tpu.pipeline_mode<synchronous>, transform_indices = @transform_19, window_bounds = array<i64: 2, 64, 64>}, {pipeline_mode = #tpu.pipeline_mode<synchronous>, transform_indices = @transform_20, window_bounds = array<i64: 32, 96>}, {pipeline_mode = #tpu.pipeline_mode<synchronous>, transform_indices = @transform_21, window_bounds = array<i64: 1, 96>}, {pipeline_mode = #tpu.pipeline_mode<synchronous>, transform_indices = @transform_22, window_bounds = array<i64: 32, 32>}, {pipeline_mode = #tpu.pipeline_mode<synchronous>, transform_indices = @transform_23, window_bounds = array<i64: 1, 32>}, {pipeline_mode = #tpu.pipeline_mode<synchronous>, transform_indices = @transform_24, window_bounds = array<i64: 1, 32>}, {pipeline_mode = #tpu.pipeline_mode<synchronous>, transform_indices = @transform_25, window_bounds = array<i64: 1, 32>}, {pipeline_mode = #tpu.pipeline_mode<synchronous>, transform_indices = @transform_26, window_bounds = array<i64: 32, 128>}, {pipeline_mode = #tpu.pipeline_mode<synchronous>, transform_indices = @transform_27, window_bounds = array<i64: 1, 128>}, {pipeline_mode = #tpu.pipeline_mode<synchronous>, transform_indices = @transform_28, window_bounds = array<i64: 128, 32>}, {pipeline_mode = #tpu.pipeline_mode<synchronous>, transform_indices = @transform_29, window_bounds = array<i64: 1, 32>}, {pipeline_mode = #tpu.pipeline_mode<synchronous>, transform_indices = @transform_30, window_bounds = array<i64: 1, 32>}, {pipeline_mode = #tpu.pipeline_mode<synchronous>, transform_indices = @transform_31, window_bounds = array<i64: 1, 32>}, {pipeline_mode = #tpu.pipeline_mode<synchronous>, transform_indices = @transform_32, window_bounds = array<i64: 4, 16, 64>}, {pipeline_mode = #tpu.pipeline_mode<synchronous>, transform_indices = @transform_33, window_bounds = array<i64: 128, 64>}, {pipeline_mode = #tpu.pipeline_mode<synchronous>, transform_indices = @transform_34, window_bounds = array<i64: 1, 64>}, {pipeline_mode = #tpu.pipeline_mode<synchronous>, transform_indices = @transform_35, window_bounds = array<i64: 1, 64>}, {pipeline_mode = #tpu.pipeline_mode<synchronous>, transform_indices = @transform_36, window_bounds = array<i64: 4, 16, 16>}, {pipeline_mode = #tpu.pipeline_mode<synchronous>, transform_indices = @transform_37, window_bounds = array<i64: 64, 192>}, {pipeline_mode = #tpu.pipeline_mode<synchronous>, transform_indices = @transform_38, window_bounds = array<i64: 1, 192>}, {pipeline_mode = #tpu.pipeline_mode<synchronous>, transform_indices = @transform_39, window_bounds = array<i64: 64, 64>}, {pipeline_mode = #tpu.pipeline_mode<synchronous>, transform_indices = @transform_40, window_bounds = array<i64: 1, 64>}, {pipeline_mode = #tpu.pipeline_mode<synchronous>, transform_indices = @transform_41, window_bounds = array<i64: 1, 64>}, {pipeline_mode = #tpu.pipeline_mode<synchronous>, transform_indices = @transform_42, window_bounds = array<i64: 1, 64>}, {pipeline_mode = #tpu.pipeline_mode<synchronous>, transform_indices = @transform_43, window_bounds = array<i64: 64, 256>}, {pipeline_mode = #tpu.pipeline_mode<synchronous>, transform_indices = @transform_44, window_bounds = array<i64: 1, 256>}, {pipeline_mode = #tpu.pipeline_mode<synchronous>, transform_indices = @transform_45, window_bounds = array<i64: 256, 64>}, {pipeline_mode = #tpu.pipeline_mode<synchronous>, transform_indices = @transform_46, window_bounds = array<i64: 1, 64>}, {pipeline_mode = #tpu.pipeline_mode<synchronous>, transform_indices = @transform_47, window_bounds = array<i64: 1, 64>}, {pipeline_mode = #tpu.pipeline_mode<synchronous>, transform_indices = @transform_48, window_bounds = array<i64: 1, 64>}, {pipeline_mode = #tpu.pipeline_mode<synchronous>, transform_indices = @transform_49, window_bounds = array<i64: 4, 16, 16>}, {pipeline_mode = #tpu.pipeline_mode<synchronous>, transform_indices = @transform_50, window_bounds = array<i64: 64, 192>}, {pipeline_mode = #tpu.pipeline_mode<synchronous>, transform_indices = @transform_51, window_bounds = array<i64: 1, 192>}, {pipeline_mode = #tpu.pipeline_mode<synchronous>, transform_indices = @transform_52, window_bounds = array<i64: 64, 64>}, {pipeline_mode = #tpu.pipeline_mode<synchronous>, transform_indices = @transform_53, window_bounds = array<i64: 1, 64>}, {pipeline_mode = #tpu.pipeline_mode<synchronous>, transform_indices = @transform_54, window_bounds = array<i64: 1, 64>}, {pipeline_mode = #tpu.pipeline_mode<synchronous>, transform_indices = @transform_55, window_bounds = array<i64: 1, 64>}, {pipeline_mode = #tpu.pipeline_mode<synchronous>, transform_indices = @transform_56, window_bounds = array<i64: 64, 256>}, {pipeline_mode = #tpu.pipeline_mode<synchronous>, transform_indices = @transform_57, window_bounds = array<i64: 1, 256>}, {pipeline_mode = #tpu.pipeline_mode<synchronous>, transform_indices = @transform_58, window_bounds = array<i64: 256, 64>}, {pipeline_mode = #tpu.pipeline_mode<synchronous>, transform_indices = @transform_59, window_bounds = array<i64: 1, 64>}, {pipeline_mode = #tpu.pipeline_mode<synchronous>, transform_indices = @transform_60, window_bounds = array<i64: 1, 64>}, {pipeline_mode = #tpu.pipeline_mode<synchronous>, transform_indices = @transform_61, window_bounds = array<i64: 1, 64>}, {pipeline_mode = #tpu.pipeline_mode<synchronous>, transform_indices = @transform_62, window_bounds = array<i64: 1, 64>}, {pipeline_mode = #tpu.pipeline_mode<synchronous>, transform_indices = @transform_63, window_bounds = array<i64: 1, 64>}, {pipeline_mode = #tpu.pipeline_mode<synchronous>, transform_indices = @transform_64, window_bounds = array<i64: 1024, 128>}, {pipeline_mode = #tpu.pipeline_mode<synchronous>, transform_indices = @transform_65, window_bounds = array<i64: 1, 128>}, {transform_indices = @transform_66, window_bounds = array<i64: 1, 1, 128>}]} {
    %c0 = arith.constant 0 : index
    %c0_0 = arith.constant 0 : index
    %0 = vector.load %arg3[%c0, %c0_0] : memref<48x32xbf16, #tpu.memory_space<vmem>>, vector<48x32xbf16>
    %c0_1 = arith.constant 0 : index
    %c0_2 = arith.constant 0 : index
    %1 = vector.load %arg4[%c0_1, %c0_2] : memref<1x32xf32, #tpu.memory_space<vmem>>, vector<1x32xf32>
    %c0_3 = arith.constant 0 : index
    %c0_4 = arith.constant 0 : index
    %2 = vector.load %arg5[%c0_3, %c0_4] : memref<1x32xf32, #tpu.memory_space<vmem>>, vector<1x32xf32>
    %c0_5 = arith.constant 0 : index
    %c0_6 = arith.constant 0 : index
    %3 = vector.load %arg6[%c0_5, %c0_6] : memref<1x32xf32, #tpu.memory_space<vmem>>, vector<1x32xf32>
    %c0_7 = arith.constant 0 : index
    %c0_8 = arith.constant 0 : index
    %c0_9 = arith.constant 0 : index
    %4 = vector.load %arg2[%c0_7, %c0_8, %c0_9] : memref<1x64x48xf32, #tpu.memory_space<vmem>>, vector<1x64x48xf32>
    %5 = vector.shape_cast %4 : vector<1x64x48xf32> to vector<64x48xf32>
    %6 = arith.truncf %5 : vector<64x48xf32> to vector<64x48xbf16>
    %cst = arith.constant dense<0.000000e+00> : vector<64x32xf32>
    %7 = tpu.matmul %6, %0, %cst {dimension_numbers = #tpu.dot_dimension_numbers<[1], [0], [0], [1], [0, 0, 1, 1], [], []>} : vector<64x48xbf16>, vector<48x32xbf16>, vector<64x32xf32> -> vector<64x32xf32>
    %8 = vector.broadcast %1 : vector<1x32xf32> to vector<64x32xf32>
    %9 = arith.addf %7, %8 : vector<64x32xf32>
    %cst_10 = arith.constant dense<0.000000e+00> : vector<64xf32>
    %10 = vector.multi_reduction <add>, %9, %cst_10 [1] : vector<64x32xf32> to vector<64xf32>
    %11 = vector.shape_cast %10 : vector<64xf32> to vector<64x1xf32>
    %cst_11 = arith.constant 3.200000e+01 : f32
    %12 = vector.broadcast %cst_11 : f32 to vector<64x1xf32>
    %13 = arith.divf %11, %12 : vector<64x1xf32>
    %14 = vector.broadcast %13 : vector<64x1xf32> to vector<64x32xf32>
    %15 = arith.subf %9, %14 : vector<64x32xf32>
    %16 = arith.mulf %15, %15 : vector<64x32xf32>
    %cst_12 = arith.constant dense<0.000000e+00> : vector<64xf32>
    %17 = vector.multi_reduction <add>, %16, %cst_12 [1] : vector<64x32xf32> to vector<64xf32>
    %18 = vector.shape_cast %17 : vector<64xf32> to vector<64x1xf32>
    %cst_13 = arith.constant 3.200000e+01 : f32
    %19 = vector.broadcast %cst_13 : f32 to vector<64x1xf32>
    %20 = arith.divf %18, %19 : vector<64x1xf32>
    %cst_14 = arith.constant 9.99999974E-6 : f32
    %21 = vector.broadcast %cst_14 : f32 to vector<64x1xf32>
    %22 = arith.addf %20, %21 : vector<64x1xf32>
    %23 = math.rsqrt %22 : vector<64x1xf32>
    %24 = vector.broadcast %23 : vector<64x1xf32> to vector<64x32xf32>
    %25 = arith.mulf %15, %24 : vector<64x32xf32>
    %26 = vector.broadcast %2 : vector<1x32xf32> to vector<64x32xf32>
    %27 = arith.mulf %25, %26 : vector<64x32xf32>
    %28 = vector.broadcast %3 : vector<1x32xf32> to vector<64x32xf32>
    %29 = arith.addf %27, %28 : vector<64x32xf32>
    %c0_15 = arith.constant 0 : index
    %c0_16 = arith.constant 0 : index
    %30 = vector.load %arg8[%c0_15, %c0_16] : memref<32x96xbf16, #tpu.memory_space<vmem>>, vector<32x96xbf16>
    %c0_17 = arith.constant 0 : index
    %c0_18 = arith.constant 0 : index
    %31 = vector.load %arg9[%c0_17, %c0_18] : memref<1x96xf32, #tpu.memory_space<vmem>>, vector<1x96xf32>
    %c0_19 = arith.constant 0 : index
    %c0_20 = arith.constant 0 : index
    %32 = vector.load %arg10[%c0_19, %c0_20] : memref<32x32xbf16, #tpu.memory_space<vmem>>, vector<32x32xbf16>
    %c0_21 = arith.constant 0 : index
    %c0_22 = arith.constant 0 : index
    %33 = vector.load %arg11[%c0_21, %c0_22] : memref<1x32xf32, #tpu.memory_space<vmem>>, vector<1x32xf32>
    %c0_23 = arith.constant 0 : index
    %c0_24 = arith.constant 0 : index
    %34 = vector.load %arg12[%c0_23, %c0_24] : memref<1x32xf32, #tpu.memory_space<vmem>>, vector<1x32xf32>
    %c0_25 = arith.constant 0 : index
    %c0_26 = arith.constant 0 : index
    %35 = vector.load %arg13[%c0_25, %c0_26] : memref<1x32xf32, #tpu.memory_space<vmem>>, vector<1x32xf32>
    %c0_27 = arith.constant 0 : index
    %c0_28 = arith.constant 0 : index
    %36 = vector.load %arg14[%c0_27, %c0_28] : memref<32x128xbf16, #tpu.memory_space<vmem>>, vector<32x128xbf16>
    %c0_29 = arith.constant 0 : index
    %c0_30 = arith.constant 0 : index
    %37 = vector.load %arg15[%c0_29, %c0_30] : memref<1x128xf32, #tpu.memory_space<vmem>>, vector<1x128xf32>
    %c0_31 = arith.constant 0 : index
    %c0_32 = arith.constant 0 : index
    %38 = vector.load %arg16[%c0_31, %c0_32] : memref<128x32xbf16, #tpu.memory_space<vmem>>, vector<128x32xbf16>
    %c0_33 = arith.constant 0 : index
    %c0_34 = arith.constant 0 : index
    %39 = vector.load %arg17[%c0_33, %c0_34] : memref<1x32xf32, #tpu.memory_space<vmem>>, vector<1x32xf32>
    %c0_35 = arith.constant 0 : index
    %c0_36 = arith.constant 0 : index
    %40 = vector.load %arg18[%c0_35, %c0_36] : memref<1x32xf32, #tpu.memory_space<vmem>>, vector<1x32xf32>
    %c0_37 = arith.constant 0 : index
    %c0_38 = arith.constant 0 : index
    %41 = vector.load %arg19[%c0_37, %c0_38] : memref<1x32xf32, #tpu.memory_space<vmem>>, vector<1x32xf32>
    %42 = arith.truncf %29 : vector<64x32xf32> to vector<64x32xbf16>
    %cst_39 = arith.constant dense<0.000000e+00> : vector<64x96xf32>
    %43 = tpu.matmul %42, %30, %cst_39 {dimension_numbers = #tpu.dot_dimension_numbers<[1], [0], [0], [1], [0, 0, 1, 1], [], []>} : vector<64x32xbf16>, vector<32x96xbf16>, vector<64x96xf32> -> vector<64x96xf32>
    %44 = vector.broadcast %31 : vector<1x96xf32> to vector<64x96xf32>
    %45 = arith.addf %43, %44 : vector<64x96xf32>
    %46 = vector.extract_strided_slice %45 {offsets = [0, 0], sizes = [64, 16], strides = [1, 1]} : vector<64x96xf32> to vector<64x16xf32>
    %47 = vector.extract_strided_slice %45 {offsets = [0, 32], sizes = [64, 16], strides = [1, 1]} : vector<64x96xf32> to vector<64x16xf32>
    %48 = vector.extract_strided_slice %45 {offsets = [0, 64], sizes = [64, 16], strides = [1, 1]} : vector<64x96xf32> to vector<64x16xf32>
    %49 = arith.mulf %46, %46 : vector<64x16xf32>
    %cst_40 = arith.constant dense<0.000000e+00> : vector<64xf32>
    %50 = vector.multi_reduction <add>, %49, %cst_40 [1] : vector<64x16xf32> to vector<64xf32>
    %51 = vector.shape_cast %50 : vector<64xf32> to vector<64x1xf32>
    %cst_41 = arith.constant 1.000000e-24 : f32
    %52 = vector.broadcast %cst_41 : f32 to vector<64x1xf32>
    %53 = arith.maximumf %51, %52 : vector<64x1xf32>
    %54 = math.rsqrt %53 : vector<64x1xf32>
    %55 = vector.broadcast %54 : vector<64x1xf32> to vector<64x16xf32>
    %56 = arith.mulf %46, %55 : vector<64x16xf32>
    %57 = arith.mulf %47, %47 : vector<64x16xf32>
    %cst_42 = arith.constant dense<0.000000e+00> : vector<64xf32>
    %58 = vector.multi_reduction <add>, %57, %cst_42 [1] : vector<64x16xf32> to vector<64xf32>
    %59 = vector.shape_cast %58 : vector<64xf32> to vector<64x1xf32>
    %cst_43 = arith.constant 1.000000e-24 : f32
    %60 = vector.broadcast %cst_43 : f32 to vector<64x1xf32>
    %61 = arith.maximumf %59, %60 : vector<64x1xf32>
    %62 = math.rsqrt %61 : vector<64x1xf32>
    %63 = vector.broadcast %62 : vector<64x1xf32> to vector<64x16xf32>
    %64 = arith.mulf %47, %63 : vector<64x16xf32>
    %c0_44 = arith.constant 0 : index
    %65 = memref.load %arg1[%c0_44] : memref<16xf32, #tpu.memory_space<smem>>
    %66 = vector.broadcast %65 : f32 to vector<64x16xf32>
    %67 = arith.mulf %56, %66 : vector<64x16xf32>
    %68 = arith.truncf %67 : vector<64x16xf32> to vector<64x16xbf16>
    %69 = arith.truncf %64 : vector<64x16xf32> to vector<64x16xbf16>
    %cst_45 = arith.constant dense<0.000000e+00> : vector<64x64xf32>
    %70 = tpu.matmul %68, %69, %cst_45 {dimension_numbers = #tpu.dot_dimension_numbers<[1], [1], [0], [0], [0, 0, 1, 0], [], []>} : vector<64x16xbf16>, vector<64x16xbf16>, vector<64x64xf32> -> vector<64x64xf32>
    %c0_46 = arith.constant 0 : index
    %c0_47 = arith.constant 0 : index
    %c0_48 = arith.constant 0 : index
    %71 = vector.load %arg7[%c0_46, %c0_47, %c0_48] : memref<2x64x64xf32, #tpu.memory_space<vmem>>, vector<1x64x64xf32>
    %72 = vector.shape_cast %71 : vector<1x64x64xf32> to vector<64x64xf32>
    %73 = arith.addf %70, %72 : vector<64x64xf32>
    %cst_49 = arith.constant dense<0xFF800000> : vector<64xf32>
    %74 = vector.multi_reduction <maximumf>, %73, %cst_49 [1] : vector<64x64xf32> to vector<64xf32>
    %75 = vector.shape_cast %74 : vector<64xf32> to vector<64x1xf32>
    %76 = vector.broadcast %75 : vector<64x1xf32> to vector<64x64xf32>
    %77 = arith.subf %73, %76 : vector<64x64xf32>
    %78 = math.exp %77 : vector<64x64xf32>
    %cst_50 = arith.constant dense<0.000000e+00> : vector<64xf32>
    %79 = vector.multi_reduction <add>, %78, %cst_50 [1] : vector<64x64xf32> to vector<64xf32>
    %80 = vector.shape_cast %79 : vector<64xf32> to vector<64x1xf32>
    %81 = vector.broadcast %80 : vector<64x1xf32> to vector<64x64xf32>
    %82 = arith.divf %78, %81 : vector<64x64xf32>
    %83 = arith.truncf %82 : vector<64x64xf32> to vector<64x64xbf16>
    %84 = arith.truncf %48 : vector<64x16xf32> to vector<64x16xbf16>
    %cst_51 = arith.constant dense<0.000000e+00> : vector<64x16xf32>
    %85 = tpu.matmul %83, %84, %cst_51 {dimension_numbers = #tpu.dot_dimension_numbers<[1], [0], [0], [1], [0, 0, 1, 1], [], []>} : vector<64x64xbf16>, vector<64x16xbf16>, vector<64x16xf32> -> vector<64x16xf32>
    %86 = vector.extract_strided_slice %45 {offsets = [0, 16], sizes = [64, 16], strides = [1, 1]} : vector<64x96xf32> to vector<64x16xf32>
    %87 = vector.extract_strided_slice %45 {offsets = [0, 48], sizes = [64, 16], strides = [1, 1]} : vector<64x96xf32> to vector<64x16xf32>
    %88 = vector.extract_strided_slice %45 {offsets = [0, 80], sizes = [64, 16], strides = [1, 1]} : vector<64x96xf32> to vector<64x16xf32>
    %89 = arith.mulf %86, %86 : vector<64x16xf32>
    %cst_52 = arith.constant dense<0.000000e+00> : vector<64xf32>
    %90 = vector.multi_reduction <add>, %89, %cst_52 [1] : vector<64x16xf32> to vector<64xf32>
    %91 = vector.shape_cast %90 : vector<64xf32> to vector<64x1xf32>
    %cst_53 = arith.constant 1.000000e-24 : f32
    %92 = vector.broadcast %cst_53 : f32 to vector<64x1xf32>
    %93 = arith.maximumf %91, %92 : vector<64x1xf32>
    %94 = math.rsqrt %93 : vector<64x1xf32>
    %95 = vector.broadcast %94 : vector<64x1xf32> to vector<64x16xf32>
    %96 = arith.mulf %86, %95 : vector<64x16xf32>
    %97 = arith.mulf %87, %87 : vector<64x16xf32>
    %cst_54 = arith.constant dense<0.000000e+00> : vector<64xf32>
    %98 = vector.multi_reduction <add>, %97, %cst_54 [1] : vector<64x16xf32> to vector<64xf32>
    %99 = vector.shape_cast %98 : vector<64xf32> to vector<64x1xf32>
    %cst_55 = arith.constant 1.000000e-24 : f32
    %100 = vector.broadcast %cst_55 : f32 to vector<64x1xf32>
    %101 = arith.maximumf %99, %100 : vector<64x1xf32>
    %102 = math.rsqrt %101 : vector<64x1xf32>
    %103 = vector.broadcast %102 : vector<64x1xf32> to vector<64x16xf32>
    %104 = arith.mulf %87, %103 : vector<64x16xf32>
    %c1 = arith.constant 1 : index
    %105 = memref.load %arg1[%c1] : memref<16xf32, #tpu.memory_space<smem>>
    %106 = vector.broadcast %105 : f32 to vector<64x16xf32>
    %107 = arith.mulf %96, %106 : vector<64x16xf32>
    %108 = arith.truncf %107 : vector<64x16xf32> to vector<64x16xbf16>
    %109 = arith.truncf %104 : vector<64x16xf32> to vector<64x16xbf16>
    %cst_56 = arith.constant dense<0.000000e+00> : vector<64x64xf32>
    %110 = tpu.matmul %108, %109, %cst_56 {dimension_numbers = #tpu.dot_dimension_numbers<[1], [1], [0], [0], [0, 0, 1, 0], [], []>} : vector<64x16xbf16>, vector<64x16xbf16>, vector<64x64xf32> -> vector<64x64xf32>
    %c1_57 = arith.constant 1 : index
    %c0_58 = arith.constant 0 : index
    %c0_59 = arith.constant 0 : index
    %111 = vector.load %arg7[%c1_57, %c0_58, %c0_59] : memref<2x64x64xf32, #tpu.memory_space<vmem>>, vector<1x64x64xf32>
    %112 = vector.shape_cast %111 : vector<1x64x64xf32> to vector<64x64xf32>
    %113 = arith.addf %110, %112 : vector<64x64xf32>
    %cst_60 = arith.constant dense<0xFF800000> : vector<64xf32>
    %114 = vector.multi_reduction <maximumf>, %113, %cst_60 [1] : vector<64x64xf32> to vector<64xf32>
    %115 = vector.shape_cast %114 : vector<64xf32> to vector<64x1xf32>
    %116 = vector.broadcast %115 : vector<64x1xf32> to vector<64x64xf32>
    %117 = arith.subf %113, %116 : vector<64x64xf32>
    %118 = math.exp %117 : vector<64x64xf32>
    %cst_61 = arith.constant dense<0.000000e+00> : vector<64xf32>
    %119 = vector.multi_reduction <add>, %118, %cst_61 [1] : vector<64x64xf32> to vector<64xf32>
    %120 = vector.shape_cast %119 : vector<64xf32> to vector<64x1xf32>
    %121 = vector.broadcast %120 : vector<64x1xf32> to vector<64x64xf32>
    %122 = arith.divf %118, %121 : vector<64x64xf32>
    %123 = arith.truncf %122 : vector<64x64xf32> to vector<64x64xbf16>
    %124 = arith.truncf %88 : vector<64x16xf32> to vector<64x16xbf16>
    %cst_62 = arith.constant dense<0.000000e+00> : vector<64x16xf32>
    %125 = tpu.matmul %123, %124, %cst_62 {dimension_numbers = #tpu.dot_dimension_numbers<[1], [0], [0], [1], [0, 0, 1, 1], [], []>} : vector<64x64xbf16>, vector<64x16xbf16>, vector<64x16xf32> -> vector<64x16xf32>
    %126 = tpu.concatenate %85, %125 in 1 : vector<64x16xf32>, vector<64x16xf32> -> vector<64x32xf32>
    %127 = arith.truncf %126 : vector<64x32xf32> to vector<64x32xbf16>
    %cst_63 = arith.constant dense<0.000000e+00> : vector<64x32xf32>
    %128 = tpu.matmul %127, %32, %cst_63 {dimension_numbers = #tpu.dot_dimension_numbers<[1], [0], [0], [1], [0, 0, 1, 1], [], []>} : vector<64x32xbf16>, vector<32x32xbf16>, vector<64x32xf32> -> vector<64x32xf32>
    %129 = vector.broadcast %33 : vector<1x32xf32> to vector<64x32xf32>
    %130 = arith.addf %128, %129 : vector<64x32xf32>
    %cst_64 = arith.constant dense<0.000000e+00> : vector<64xf32>
    %131 = vector.multi_reduction <add>, %130, %cst_64 [1] : vector<64x32xf32> to vector<64xf32>
    %132 = vector.shape_cast %131 : vector<64xf32> to vector<64x1xf32>
    %cst_65 = arith.constant 3.200000e+01 : f32
    %133 = vector.broadcast %cst_65 : f32 to vector<64x1xf32>
    %134 = arith.divf %132, %133 : vector<64x1xf32>
    %135 = vector.broadcast %134 : vector<64x1xf32> to vector<64x32xf32>
    %136 = arith.subf %130, %135 : vector<64x32xf32>
    %137 = arith.mulf %136, %136 : vector<64x32xf32>
    %cst_66 = arith.constant dense<0.000000e+00> : vector<64xf32>
    %138 = vector.multi_reduction <add>, %137, %cst_66 [1] : vector<64x32xf32> to vector<64xf32>
    %139 = vector.shape_cast %138 : vector<64xf32> to vector<64x1xf32>
    %cst_67 = arith.constant 3.200000e+01 : f32
    %140 = vector.broadcast %cst_67 : f32 to vector<64x1xf32>
    %141 = arith.divf %139, %140 : vector<64x1xf32>
    %cst_68 = arith.constant 9.99999974E-6 : f32
    %142 = vector.broadcast %cst_68 : f32 to vector<64x1xf32>
    %143 = arith.addf %141, %142 : vector<64x1xf32>
    %144 = math.rsqrt %143 : vector<64x1xf32>
    %145 = vector.broadcast %144 : vector<64x1xf32> to vector<64x32xf32>
    %146 = arith.mulf %136, %145 : vector<64x32xf32>
    %147 = vector.broadcast %34 : vector<1x32xf32> to vector<64x32xf32>
    %148 = arith.mulf %146, %147 : vector<64x32xf32>
    %149 = vector.broadcast %35 : vector<1x32xf32> to vector<64x32xf32>
    %150 = arith.addf %148, %149 : vector<64x32xf32>
    %151 = arith.addf %29, %150 : vector<64x32xf32>
    %152 = arith.truncf %151 : vector<64x32xf32> to vector<64x32xbf16>
    %cst_69 = arith.constant dense<0.000000e+00> : vector<64x128xf32>
    %153 = tpu.matmul %152, %36, %cst_69 {dimension_numbers = #tpu.dot_dimension_numbers<[1], [0], [0], [1], [0, 0, 1, 1], [], []>} : vector<64x32xbf16>, vector<32x128xbf16>, vector<64x128xf32> -> vector<64x128xf32>
    %154 = vector.broadcast %37 : vector<1x128xf32> to vector<64x128xf32>
    %155 = arith.addf %153, %154 : vector<64x128xf32>
    %cst_70 = arith.constant 5.000000e-01 : f32
    %156 = vector.broadcast %cst_70 : f32 to vector<64x128xf32>
    %157 = arith.mulf %156, %155 : vector<64x128xf32>
    %cst_71 = arith.constant 0.707106769 : f32
    %158 = vector.broadcast %cst_71 : f32 to vector<64x128xf32>
    %159 = arith.mulf %155, %158 : vector<64x128xf32>
    %160 = math.absf %159 : vector<64x128xf32>
    %cst_72 = arith.constant 0.327591091 : f32
    %161 = vector.broadcast %cst_72 : f32 to vector<64x128xf32>
    %162 = arith.mulf %161, %160 : vector<64x128xf32>
    %cst_73 = arith.constant 1.000000e+00 : f32
    %163 = vector.broadcast %cst_73 : f32 to vector<64x128xf32>
    %164 = arith.addf %163, %162 : vector<64x128xf32>
    %cst_74 = arith.constant 1.000000e+00 : f32
    %165 = vector.broadcast %cst_74 : f32 to vector<64x128xf32>
    %166 = arith.divf %165, %164 : vector<64x128xf32>
    %cst_75 = arith.constant 1.06140542 : f32
    %167 = vector.broadcast %cst_75 : f32 to vector<64x128xf32>
    %168 = arith.mulf %167, %166 : vector<64x128xf32>
    %cst_76 = arith.constant -1.45315206 : f32
    %169 = vector.broadcast %cst_76 : f32 to vector<64x128xf32>
    %170 = arith.addf %168, %169 : vector<64x128xf32>
    %171 = arith.mulf %170, %166 : vector<64x128xf32>
    %cst_77 = arith.constant 1.42141378 : f32
    %172 = vector.broadcast %cst_77 : f32 to vector<64x128xf32>
    %173 = arith.addf %171, %172 : vector<64x128xf32>
    %174 = arith.mulf %173, %166 : vector<64x128xf32>
    %cst_78 = arith.constant -0.284496725 : f32
    %175 = vector.broadcast %cst_78 : f32 to vector<64x128xf32>
    %176 = arith.addf %174, %175 : vector<64x128xf32>
    %177 = arith.mulf %176, %166 : vector<64x128xf32>
    %cst_79 = arith.constant 0.254829586 : f32
    %178 = vector.broadcast %cst_79 : f32 to vector<64x128xf32>
    %179 = arith.addf %177, %178 : vector<64x128xf32>
    %180 = arith.mulf %179, %166 : vector<64x128xf32>
    %cst_80 = arith.constant 0.000000e+00 : f32
    %181 = vector.broadcast %cst_80 : f32 to vector<64x128xf32>
    %182 = arith.subf %181, %160 : vector<64x128xf32>
    %183 = arith.mulf %182, %160 : vector<64x128xf32>
    %184 = math.exp %183 : vector<64x128xf32>
    %185 = arith.mulf %180, %184 : vector<64x128xf32>
    %cst_81 = arith.constant 1.000000e+00 : f32
    %186 = vector.broadcast %cst_81 : f32 to vector<64x128xf32>
    %187 = arith.subf %186, %185 : vector<64x128xf32>
    %cst_82 = arith.constant 0.000000e+00 : f32
    %188 = vector.broadcast %cst_82 : f32 to vector<64x128xf32>
    %189 = arith.cmpf oge, %159, %188 : vector<64x128xf32>
    %cst_83 = arith.constant 0.000000e+00 : f32
    %190 = vector.broadcast %cst_83 : f32 to vector<64x128xf32>
    %191 = arith.subf %190, %187 : vector<64x128xf32>
    %192 = arith.select %189, %187, %191 : vector<64x128xi1>, vector<64x128xf32>
    %cst_84 = arith.constant 1.000000e+00 : f32
    %193 = vector.broadcast %cst_84 : f32 to vector<64x128xf32>
    %194 = arith.addf %193, %192 : vector<64x128xf32>
    %195 = arith.mulf %157, %194 : vector<64x128xf32>
    %196 = arith.truncf %195 : vector<64x128xf32> to vector<64x128xbf16>
    %cst_85 = arith.constant dense<0.000000e+00> : vector<64x32xf32>
    %197 = tpu.matmul %196, %38, %cst_85 {dimension_numbers = #tpu.dot_dimension_numbers<[1], [0], [0], [1], [0, 0, 1, 1], [], []>} : vector<64x128xbf16>, vector<128x32xbf16>, vector<64x32xf32> -> vector<64x32xf32>
    %198 = vector.broadcast %39 : vector<1x32xf32> to vector<64x32xf32>
    %199 = arith.addf %197, %198 : vector<64x32xf32>
    %cst_86 = arith.constant dense<0.000000e+00> : vector<64xf32>
    %200 = vector.multi_reduction <add>, %199, %cst_86 [1] : vector<64x32xf32> to vector<64xf32>
    %201 = vector.shape_cast %200 : vector<64xf32> to vector<64x1xf32>
    %cst_87 = arith.constant 3.200000e+01 : f32
    %202 = vector.broadcast %cst_87 : f32 to vector<64x1xf32>
    %203 = arith.divf %201, %202 : vector<64x1xf32>
    %204 = vector.broadcast %203 : vector<64x1xf32> to vector<64x32xf32>
    %205 = arith.subf %199, %204 : vector<64x32xf32>
    %206 = arith.mulf %205, %205 : vector<64x32xf32>
    %cst_88 = arith.constant dense<0.000000e+00> : vector<64xf32>
    %207 = vector.multi_reduction <add>, %206, %cst_88 [1] : vector<64x32xf32> to vector<64xf32>
    %208 = vector.shape_cast %207 : vector<64xf32> to vector<64x1xf32>
    %cst_89 = arith.constant 3.200000e+01 : f32
    %209 = vector.broadcast %cst_89 : f32 to vector<64x1xf32>
    %210 = arith.divf %208, %209 : vector<64x1xf32>
    %cst_90 = arith.constant 9.99999974E-6 : f32
    %211 = vector.broadcast %cst_90 : f32 to vector<64x1xf32>
    %212 = arith.addf %210, %211 : vector<64x1xf32>
    %213 = math.rsqrt %212 : vector<64x1xf32>
    %214 = vector.broadcast %213 : vector<64x1xf32> to vector<64x32xf32>
    %215 = arith.mulf %205, %214 : vector<64x32xf32>
    %216 = vector.broadcast %40 : vector<1x32xf32> to vector<64x32xf32>
    %217 = arith.mulf %215, %216 : vector<64x32xf32>
    %218 = vector.broadcast %41 : vector<1x32xf32> to vector<64x32xf32>
    %219 = arith.addf %217, %218 : vector<64x32xf32>
    %220 = arith.addf %151, %219 : vector<64x32xf32>
    %c0_91 = arith.constant 0 : index
    %c0_92 = arith.constant 0 : index
    %221 = vector.load %arg21[%c0_91, %c0_92] : memref<32x96xbf16, #tpu.memory_space<vmem>>, vector<32x96xbf16>
    %c0_93 = arith.constant 0 : index
    %c0_94 = arith.constant 0 : index
    %222 = vector.load %arg22[%c0_93, %c0_94] : memref<1x96xf32, #tpu.memory_space<vmem>>, vector<1x96xf32>
    %c0_95 = arith.constant 0 : index
    %c0_96 = arith.constant 0 : index
    %223 = vector.load %arg23[%c0_95, %c0_96] : memref<32x32xbf16, #tpu.memory_space<vmem>>, vector<32x32xbf16>
    %c0_97 = arith.constant 0 : index
    %c0_98 = arith.constant 0 : index
    %224 = vector.load %arg24[%c0_97, %c0_98] : memref<1x32xf32, #tpu.memory_space<vmem>>, vector<1x32xf32>
    %c0_99 = arith.constant 0 : index
    %c0_100 = arith.constant 0 : index
    %225 = vector.load %arg25[%c0_99, %c0_100] : memref<1x32xf32, #tpu.memory_space<vmem>>, vector<1x32xf32>
    %c0_101 = arith.constant 0 : index
    %c0_102 = arith.constant 0 : index
    %226 = vector.load %arg26[%c0_101, %c0_102] : memref<1x32xf32, #tpu.memory_space<vmem>>, vector<1x32xf32>
    %c0_103 = arith.constant 0 : index
    %c0_104 = arith.constant 0 : index
    %227 = vector.load %arg27[%c0_103, %c0_104] : memref<32x128xbf16, #tpu.memory_space<vmem>>, vector<32x128xbf16>
    %c0_105 = arith.constant 0 : index
    %c0_106 = arith.constant 0 : index
    %228 = vector.load %arg28[%c0_105, %c0_106] : memref<1x128xf32, #tpu.memory_space<vmem>>, vector<1x128xf32>
    %c0_107 = arith.constant 0 : index
    %c0_108 = arith.constant 0 : index
    %229 = vector.load %arg29[%c0_107, %c0_108] : memref<128x32xbf16, #tpu.memory_space<vmem>>, vector<128x32xbf16>
    %c0_109 = arith.constant 0 : index
    %c0_110 = arith.constant 0 : index
    %230 = vector.load %arg30[%c0_109, %c0_110] : memref<1x32xf32, #tpu.memory_space<vmem>>, vector<1x32xf32>
    %c0_111 = arith.constant 0 : index
    %c0_112 = arith.constant 0 : index
    %231 = vector.load %arg31[%c0_111, %c0_112] : memref<1x32xf32, #tpu.memory_space<vmem>>, vector<1x32xf32>
    %c0_113 = arith.constant 0 : index
    %c0_114 = arith.constant 0 : index
    %232 = vector.load %arg32[%c0_113, %c0_114] : memref<1x32xf32, #tpu.memory_space<vmem>>, vector<1x32xf32>
    %233 = arith.truncf %220 : vector<64x32xf32> to vector<64x32xbf16>
    %cst_115 = arith.constant dense<0.000000e+00> : vector<64x96xf32>
    %234 = tpu.matmul %233, %221, %cst_115 {dimension_numbers = #tpu.dot_dimension_numbers<[1], [0], [0], [1], [0, 0, 1, 1], [], []>} : vector<64x32xbf16>, vector<32x96xbf16>, vector<64x96xf32> -> vector<64x96xf32>
    %235 = vector.broadcast %222 : vector<1x96xf32> to vector<64x96xf32>
    %236 = arith.addf %234, %235 : vector<64x96xf32>
    %237 = vector.extract_strided_slice %236 {offsets = [0, 0], sizes = [64, 16], strides = [1, 1]} : vector<64x96xf32> to vector<64x16xf32>
    %238 = vector.extract_strided_slice %236 {offsets = [0, 32], sizes = [64, 16], strides = [1, 1]} : vector<64x96xf32> to vector<64x16xf32>
    %239 = vector.extract_strided_slice %236 {offsets = [0, 64], sizes = [64, 16], strides = [1, 1]} : vector<64x96xf32> to vector<64x16xf32>
    %240 = arith.mulf %237, %237 : vector<64x16xf32>
    %cst_116 = arith.constant dense<0.000000e+00> : vector<64xf32>
    %241 = vector.multi_reduction <add>, %240, %cst_116 [1] : vector<64x16xf32> to vector<64xf32>
    %242 = vector.shape_cast %241 : vector<64xf32> to vector<64x1xf32>
    %cst_117 = arith.constant 1.000000e-24 : f32
    %243 = vector.broadcast %cst_117 : f32 to vector<64x1xf32>
    %244 = arith.maximumf %242, %243 : vector<64x1xf32>
    %245 = math.rsqrt %244 : vector<64x1xf32>
    %246 = vector.broadcast %245 : vector<64x1xf32> to vector<64x16xf32>
    %247 = arith.mulf %237, %246 : vector<64x16xf32>
    %248 = arith.mulf %238, %238 : vector<64x16xf32>
    %cst_118 = arith.constant dense<0.000000e+00> : vector<64xf32>
    %249 = vector.multi_reduction <add>, %248, %cst_118 [1] : vector<64x16xf32> to vector<64xf32>
    %250 = vector.shape_cast %249 : vector<64xf32> to vector<64x1xf32>
    %cst_119 = arith.constant 1.000000e-24 : f32
    %251 = vector.broadcast %cst_119 : f32 to vector<64x1xf32>
    %252 = arith.maximumf %250, %251 : vector<64x1xf32>
    %253 = math.rsqrt %252 : vector<64x1xf32>
    %254 = vector.broadcast %253 : vector<64x1xf32> to vector<64x16xf32>
    %255 = arith.mulf %238, %254 : vector<64x16xf32>
    %c4 = arith.constant 4 : index
    %256 = memref.load %arg1[%c4] : memref<16xf32, #tpu.memory_space<smem>>
    %257 = vector.broadcast %256 : f32 to vector<64x16xf32>
    %258 = arith.mulf %247, %257 : vector<64x16xf32>
    %259 = arith.truncf %258 : vector<64x16xf32> to vector<64x16xbf16>
    %260 = arith.truncf %255 : vector<64x16xf32> to vector<64x16xbf16>
    %cst_120 = arith.constant dense<0.000000e+00> : vector<64x64xf32>
    %261 = tpu.matmul %259, %260, %cst_120 {dimension_numbers = #tpu.dot_dimension_numbers<[1], [1], [0], [0], [0, 0, 1, 0], [], []>} : vector<64x16xbf16>, vector<64x16xbf16>, vector<64x64xf32> -> vector<64x64xf32>
    %c0_121 = arith.constant 0 : index
    %c0_122 = arith.constant 0 : index
    %c0_123 = arith.constant 0 : index
    %262 = vector.load %arg20[%c0_121, %c0_122, %c0_123] : memref<2x64x64xf32, #tpu.memory_space<vmem>>, vector<1x64x64xf32>
    %263 = vector.shape_cast %262 : vector<1x64x64xf32> to vector<64x64xf32>
    %264 = arith.addf %261, %263 : vector<64x64xf32>
    %cst_124 = arith.constant dense<0xFF800000> : vector<64xf32>
    %265 = vector.multi_reduction <maximumf>, %264, %cst_124 [1] : vector<64x64xf32> to vector<64xf32>
    %266 = vector.shape_cast %265 : vector<64xf32> to vector<64x1xf32>
    %267 = vector.broadcast %266 : vector<64x1xf32> to vector<64x64xf32>
    %268 = arith.subf %264, %267 : vector<64x64xf32>
    %269 = math.exp %268 : vector<64x64xf32>
    %cst_125 = arith.constant dense<0.000000e+00> : vector<64xf32>
    %270 = vector.multi_reduction <add>, %269, %cst_125 [1] : vector<64x64xf32> to vector<64xf32>
    %271 = vector.shape_cast %270 : vector<64xf32> to vector<64x1xf32>
    %272 = vector.broadcast %271 : vector<64x1xf32> to vector<64x64xf32>
    %273 = arith.divf %269, %272 : vector<64x64xf32>
    %274 = arith.truncf %273 : vector<64x64xf32> to vector<64x64xbf16>
    %275 = arith.truncf %239 : vector<64x16xf32> to vector<64x16xbf16>
    %cst_126 = arith.constant dense<0.000000e+00> : vector<64x16xf32>
    %276 = tpu.matmul %274, %275, %cst_126 {dimension_numbers = #tpu.dot_dimension_numbers<[1], [0], [0], [1], [0, 0, 1, 1], [], []>} : vector<64x64xbf16>, vector<64x16xbf16>, vector<64x16xf32> -> vector<64x16xf32>
    %277 = vector.extract_strided_slice %236 {offsets = [0, 16], sizes = [64, 16], strides = [1, 1]} : vector<64x96xf32> to vector<64x16xf32>
    %278 = vector.extract_strided_slice %236 {offsets = [0, 48], sizes = [64, 16], strides = [1, 1]} : vector<64x96xf32> to vector<64x16xf32>
    %279 = vector.extract_strided_slice %236 {offsets = [0, 80], sizes = [64, 16], strides = [1, 1]} : vector<64x96xf32> to vector<64x16xf32>
    %280 = arith.mulf %277, %277 : vector<64x16xf32>
    %cst_127 = arith.constant dense<0.000000e+00> : vector<64xf32>
    %281 = vector.multi_reduction <add>, %280, %cst_127 [1] : vector<64x16xf32> to vector<64xf32>
    %282 = vector.shape_cast %281 : vector<64xf32> to vector<64x1xf32>
    %cst_128 = arith.constant 1.000000e-24 : f32
    %283 = vector.broadcast %cst_128 : f32 to vector<64x1xf32>
    %284 = arith.maximumf %282, %283 : vector<64x1xf32>
    %285 = math.rsqrt %284 : vector<64x1xf32>
    %286 = vector.broadcast %285 : vector<64x1xf32> to vector<64x16xf32>
    %287 = arith.mulf %277, %286 : vector<64x16xf32>
    %288 = arith.mulf %278, %278 : vector<64x16xf32>
    %cst_129 = arith.constant dense<0.000000e+00> : vector<64xf32>
    %289 = vector.multi_reduction <add>, %288, %cst_129 [1] : vector<64x16xf32> to vector<64xf32>
    %290 = vector.shape_cast %289 : vector<64xf32> to vector<64x1xf32>
    %cst_130 = arith.constant 1.000000e-24 : f32
    %291 = vector.broadcast %cst_130 : f32 to vector<64x1xf32>
    %292 = arith.maximumf %290, %291 : vector<64x1xf32>
    %293 = math.rsqrt %292 : vector<64x1xf32>
    %294 = vector.broadcast %293 : vector<64x1xf32> to vector<64x16xf32>
    %295 = arith.mulf %278, %294 : vector<64x16xf32>
    %c5 = arith.constant 5 : index
    %296 = memref.load %arg1[%c5] : memref<16xf32, #tpu.memory_space<smem>>
    %297 = vector.broadcast %296 : f32 to vector<64x16xf32>
    %298 = arith.mulf %287, %297 : vector<64x16xf32>
    %299 = arith.truncf %298 : vector<64x16xf32> to vector<64x16xbf16>
    %300 = arith.truncf %295 : vector<64x16xf32> to vector<64x16xbf16>
    %cst_131 = arith.constant dense<0.000000e+00> : vector<64x64xf32>
    %301 = tpu.matmul %299, %300, %cst_131 {dimension_numbers = #tpu.dot_dimension_numbers<[1], [1], [0], [0], [0, 0, 1, 0], [], []>} : vector<64x16xbf16>, vector<64x16xbf16>, vector<64x64xf32> -> vector<64x64xf32>
    %c1_132 = arith.constant 1 : index
    %c0_133 = arith.constant 0 : index
    %c0_134 = arith.constant 0 : index
    %302 = vector.load %arg20[%c1_132, %c0_133, %c0_134] : memref<2x64x64xf32, #tpu.memory_space<vmem>>, vector<1x64x64xf32>
    %303 = vector.shape_cast %302 : vector<1x64x64xf32> to vector<64x64xf32>
    %304 = arith.addf %301, %303 : vector<64x64xf32>
    %cst_135 = arith.constant dense<0xFF800000> : vector<64xf32>
    %305 = vector.multi_reduction <maximumf>, %304, %cst_135 [1] : vector<64x64xf32> to vector<64xf32>
    %306 = vector.shape_cast %305 : vector<64xf32> to vector<64x1xf32>
    %307 = vector.broadcast %306 : vector<64x1xf32> to vector<64x64xf32>
    %308 = arith.subf %304, %307 : vector<64x64xf32>
    %309 = math.exp %308 : vector<64x64xf32>
    %cst_136 = arith.constant dense<0.000000e+00> : vector<64xf32>
    %310 = vector.multi_reduction <add>, %309, %cst_136 [1] : vector<64x64xf32> to vector<64xf32>
    %311 = vector.shape_cast %310 : vector<64xf32> to vector<64x1xf32>
    %312 = vector.broadcast %311 : vector<64x1xf32> to vector<64x64xf32>
    %313 = arith.divf %309, %312 : vector<64x64xf32>
    %314 = arith.truncf %313 : vector<64x64xf32> to vector<64x64xbf16>
    %315 = arith.truncf %279 : vector<64x16xf32> to vector<64x16xbf16>
    %cst_137 = arith.constant dense<0.000000e+00> : vector<64x16xf32>
    %316 = tpu.matmul %314, %315, %cst_137 {dimension_numbers = #tpu.dot_dimension_numbers<[1], [0], [0], [1], [0, 0, 1, 1], [], []>} : vector<64x64xbf16>, vector<64x16xbf16>, vector<64x16xf32> -> vector<64x16xf32>
    %317 = tpu.concatenate %276, %316 in 1 : vector<64x16xf32>, vector<64x16xf32> -> vector<64x32xf32>
    %318 = arith.truncf %317 : vector<64x32xf32> to vector<64x32xbf16>
    %cst_138 = arith.constant dense<0.000000e+00> : vector<64x32xf32>
    %319 = tpu.matmul %318, %223, %cst_138 {dimension_numbers = #tpu.dot_dimension_numbers<[1], [0], [0], [1], [0, 0, 1, 1], [], []>} : vector<64x32xbf16>, vector<32x32xbf16>, vector<64x32xf32> -> vector<64x32xf32>
    %320 = vector.broadcast %224 : vector<1x32xf32> to vector<64x32xf32>
    %321 = arith.addf %319, %320 : vector<64x32xf32>
    %cst_139 = arith.constant dense<0.000000e+00> : vector<64xf32>
    %322 = vector.multi_reduction <add>, %321, %cst_139 [1] : vector<64x32xf32> to vector<64xf32>
    %323 = vector.shape_cast %322 : vector<64xf32> to vector<64x1xf32>
    %cst_140 = arith.constant 3.200000e+01 : f32
    %324 = vector.broadcast %cst_140 : f32 to vector<64x1xf32>
    %325 = arith.divf %323, %324 : vector<64x1xf32>
    %326 = vector.broadcast %325 : vector<64x1xf32> to vector<64x32xf32>
    %327 = arith.subf %321, %326 : vector<64x32xf32>
    %328 = arith.mulf %327, %327 : vector<64x32xf32>
    %cst_141 = arith.constant dense<0.000000e+00> : vector<64xf32>
    %329 = vector.multi_reduction <add>, %328, %cst_141 [1] : vector<64x32xf32> to vector<64xf32>
    %330 = vector.shape_cast %329 : vector<64xf32> to vector<64x1xf32>
    %cst_142 = arith.constant 3.200000e+01 : f32
    %331 = vector.broadcast %cst_142 : f32 to vector<64x1xf32>
    %332 = arith.divf %330, %331 : vector<64x1xf32>
    %cst_143 = arith.constant 9.99999974E-6 : f32
    %333 = vector.broadcast %cst_143 : f32 to vector<64x1xf32>
    %334 = arith.addf %332, %333 : vector<64x1xf32>
    %335 = math.rsqrt %334 : vector<64x1xf32>
    %336 = vector.broadcast %335 : vector<64x1xf32> to vector<64x32xf32>
    %337 = arith.mulf %327, %336 : vector<64x32xf32>
    %338 = vector.broadcast %225 : vector<1x32xf32> to vector<64x32xf32>
    %339 = arith.mulf %337, %338 : vector<64x32xf32>
    %340 = vector.broadcast %226 : vector<1x32xf32> to vector<64x32xf32>
    %341 = arith.addf %339, %340 : vector<64x32xf32>
    %342 = arith.addf %220, %341 : vector<64x32xf32>
    %343 = arith.truncf %342 : vector<64x32xf32> to vector<64x32xbf16>
    %cst_144 = arith.constant dense<0.000000e+00> : vector<64x128xf32>
    %344 = tpu.matmul %343, %227, %cst_144 {dimension_numbers = #tpu.dot_dimension_numbers<[1], [0], [0], [1], [0, 0, 1, 1], [], []>} : vector<64x32xbf16>, vector<32x128xbf16>, vector<64x128xf32> -> vector<64x128xf32>
    %345 = vector.broadcast %228 : vector<1x128xf32> to vector<64x128xf32>
    %346 = arith.addf %344, %345 : vector<64x128xf32>
    %cst_145 = arith.constant 5.000000e-01 : f32
    %347 = vector.broadcast %cst_145 : f32 to vector<64x128xf32>
    %348 = arith.mulf %347, %346 : vector<64x128xf32>
    %cst_146 = arith.constant 0.707106769 : f32
    %349 = vector.broadcast %cst_146 : f32 to vector<64x128xf32>
    %350 = arith.mulf %346, %349 : vector<64x128xf32>
    %351 = math.absf %350 : vector<64x128xf32>
    %cst_147 = arith.constant 0.327591091 : f32
    %352 = vector.broadcast %cst_147 : f32 to vector<64x128xf32>
    %353 = arith.mulf %352, %351 : vector<64x128xf32>
    %cst_148 = arith.constant 1.000000e+00 : f32
    %354 = vector.broadcast %cst_148 : f32 to vector<64x128xf32>
    %355 = arith.addf %354, %353 : vector<64x128xf32>
    %cst_149 = arith.constant 1.000000e+00 : f32
    %356 = vector.broadcast %cst_149 : f32 to vector<64x128xf32>
    %357 = arith.divf %356, %355 : vector<64x128xf32>
    %cst_150 = arith.constant 1.06140542 : f32
    %358 = vector.broadcast %cst_150 : f32 to vector<64x128xf32>
    %359 = arith.mulf %358, %357 : vector<64x128xf32>
    %cst_151 = arith.constant -1.45315206 : f32
    %360 = vector.broadcast %cst_151 : f32 to vector<64x128xf32>
    %361 = arith.addf %359, %360 : vector<64x128xf32>
    %362 = arith.mulf %361, %357 : vector<64x128xf32>
    %cst_152 = arith.constant 1.42141378 : f32
    %363 = vector.broadcast %cst_152 : f32 to vector<64x128xf32>
    %364 = arith.addf %362, %363 : vector<64x128xf32>
    %365 = arith.mulf %364, %357 : vector<64x128xf32>
    %cst_153 = arith.constant -0.284496725 : f32
    %366 = vector.broadcast %cst_153 : f32 to vector<64x128xf32>
    %367 = arith.addf %365, %366 : vector<64x128xf32>
    %368 = arith.mulf %367, %357 : vector<64x128xf32>
    %cst_154 = arith.constant 0.254829586 : f32
    %369 = vector.broadcast %cst_154 : f32 to vector<64x128xf32>
    %370 = arith.addf %368, %369 : vector<64x128xf32>
    %371 = arith.mulf %370, %357 : vector<64x128xf32>
    %cst_155 = arith.constant 0.000000e+00 : f32
    %372 = vector.broadcast %cst_155 : f32 to vector<64x128xf32>
    %373 = arith.subf %372, %351 : vector<64x128xf32>
    %374 = arith.mulf %373, %351 : vector<64x128xf32>
    %375 = math.exp %374 : vector<64x128xf32>
    %376 = arith.mulf %371, %375 : vector<64x128xf32>
    %cst_156 = arith.constant 1.000000e+00 : f32
    %377 = vector.broadcast %cst_156 : f32 to vector<64x128xf32>
    %378 = arith.subf %377, %376 : vector<64x128xf32>
    %cst_157 = arith.constant 0.000000e+00 : f32
    %379 = vector.broadcast %cst_157 : f32 to vector<64x128xf32>
    %380 = arith.cmpf oge, %350, %379 : vector<64x128xf32>
    %cst_158 = arith.constant 0.000000e+00 : f32
    %381 = vector.broadcast %cst_158 : f32 to vector<64x128xf32>
    %382 = arith.subf %381, %378 : vector<64x128xf32>
    %383 = arith.select %380, %378, %382 : vector<64x128xi1>, vector<64x128xf32>
    %cst_159 = arith.constant 1.000000e+00 : f32
    %384 = vector.broadcast %cst_159 : f32 to vector<64x128xf32>
    %385 = arith.addf %384, %383 : vector<64x128xf32>
    %386 = arith.mulf %348, %385 : vector<64x128xf32>
    %387 = arith.truncf %386 : vector<64x128xf32> to vector<64x128xbf16>
    %cst_160 = arith.constant dense<0.000000e+00> : vector<64x32xf32>
    %388 = tpu.matmul %387, %229, %cst_160 {dimension_numbers = #tpu.dot_dimension_numbers<[1], [0], [0], [1], [0, 0, 1, 1], [], []>} : vector<64x128xbf16>, vector<128x32xbf16>, vector<64x32xf32> -> vector<64x32xf32>
    %389 = vector.broadcast %230 : vector<1x32xf32> to vector<64x32xf32>
    %390 = arith.addf %388, %389 : vector<64x32xf32>
    %cst_161 = arith.constant dense<0.000000e+00> : vector<64xf32>
    %391 = vector.multi_reduction <add>, %390, %cst_161 [1] : vector<64x32xf32> to vector<64xf32>
    %392 = vector.shape_cast %391 : vector<64xf32> to vector<64x1xf32>
    %cst_162 = arith.constant 3.200000e+01 : f32
    %393 = vector.broadcast %cst_162 : f32 to vector<64x1xf32>
    %394 = arith.divf %392, %393 : vector<64x1xf32>
    %395 = vector.broadcast %394 : vector<64x1xf32> to vector<64x32xf32>
    %396 = arith.subf %390, %395 : vector<64x32xf32>
    %397 = arith.mulf %396, %396 : vector<64x32xf32>
    %cst_163 = arith.constant dense<0.000000e+00> : vector<64xf32>
    %398 = vector.multi_reduction <add>, %397, %cst_163 [1] : vector<64x32xf32> to vector<64xf32>
    %399 = vector.shape_cast %398 : vector<64xf32> to vector<64x1xf32>
    %cst_164 = arith.constant 3.200000e+01 : f32
    %400 = vector.broadcast %cst_164 : f32 to vector<64x1xf32>
    %401 = arith.divf %399, %400 : vector<64x1xf32>
    %cst_165 = arith.constant 9.99999974E-6 : f32
    %402 = vector.broadcast %cst_165 : f32 to vector<64x1xf32>
    %403 = arith.addf %401, %402 : vector<64x1xf32>
    %404 = math.rsqrt %403 : vector<64x1xf32>
    %405 = vector.broadcast %404 : vector<64x1xf32> to vector<64x32xf32>
    %406 = arith.mulf %396, %405 : vector<64x32xf32>
    %407 = vector.broadcast %231 : vector<1x32xf32> to vector<64x32xf32>
    %408 = arith.mulf %406, %407 : vector<64x32xf32>
    %409 = vector.broadcast %232 : vector<1x32xf32> to vector<64x32xf32>
    %410 = arith.addf %408, %409 : vector<64x32xf32>
    %411 = arith.addf %342, %410 : vector<64x32xf32>
    %c0_166 = arith.constant 0 : index
    %c0_167 = arith.constant 0 : index
    %412 = vector.load %arg34[%c0_166, %c0_167] : memref<128x64xbf16, #tpu.memory_space<vmem>>, vector<128x64xbf16>
    %c0_168 = arith.constant 0 : index
    %c0_169 = arith.constant 0 : index
    %413 = vector.load %arg35[%c0_168, %c0_169] : memref<1x64xf32, #tpu.memory_space<vmem>>, vector<1x64xf32>
    %c0_170 = arith.constant 0 : index
    %c0_171 = arith.constant 0 : index
    %414 = vector.load %arg36[%c0_170, %c0_171] : memref<1x64xf32, #tpu.memory_space<vmem>>, vector<1x64xf32>
    %cst_172 = arith.constant 0.000000e+00 : f32
    %415 = vector.broadcast %cst_172 : f32 to vector<16x64xf32>
    %c0_173 = arith.constant 0 : index
    %c0_174 = arith.constant 0 : index
    %c0_175 = arith.constant 0 : index
    %416 = vector.load %arg33[%c0_173, %c0_174, %c0_175] : memref<4x16x64xf32, #tpu.memory_space<vmem>>, vector<1x16x64xf32>
    %417 = vector.shape_cast %416 : vector<1x16x64xf32> to vector<16x64xf32>
    %cst_176 = arith.constant dense<0.000000e+00> : vector<16x32xf32>
    %418 = tpu.matmul %417, %411, %cst_176 {dimension_numbers = #tpu.dot_dimension_numbers<[1], [0], [0], [1], [0, 0, 1, 1], [], []>} : vector<16x64xf32>, vector<64x32xf32>, vector<16x32xf32> -> vector<16x32xf32>
    %419 = arith.truncf %418 : vector<16x32xf32> to vector<16x32xbf16>
    %420 = vector.extract_strided_slice %412 {offsets = [0, 0], sizes = [32, 64], strides = [1, 1]} : vector<128x64xbf16> to vector<32x64xbf16>
    %cst_177 = arith.constant dense<0.000000e+00> : vector<16x64xf32>
    %421 = tpu.matmul %419, %420, %cst_177 {dimension_numbers = #tpu.dot_dimension_numbers<[1], [0], [0], [1], [0, 0, 1, 1], [], []>} : vector<16x32xbf16>, vector<32x64xbf16>, vector<16x64xf32> -> vector<16x64xf32>
    %422 = arith.addf %415, %421 : vector<16x64xf32>
    %c1_178 = arith.constant 1 : index
    %c0_179 = arith.constant 0 : index
    %c0_180 = arith.constant 0 : index
    %423 = vector.load %arg33[%c1_178, %c0_179, %c0_180] : memref<4x16x64xf32, #tpu.memory_space<vmem>>, vector<1x16x64xf32>
    %424 = vector.shape_cast %423 : vector<1x16x64xf32> to vector<16x64xf32>
    %cst_181 = arith.constant dense<0.000000e+00> : vector<16x32xf32>
    %425 = tpu.matmul %424, %411, %cst_181 {dimension_numbers = #tpu.dot_dimension_numbers<[1], [0], [0], [1], [0, 0, 1, 1], [], []>} : vector<16x64xf32>, vector<64x32xf32>, vector<16x32xf32> -> vector<16x32xf32>
    %426 = arith.truncf %425 : vector<16x32xf32> to vector<16x32xbf16>
    %427 = vector.extract_strided_slice %412 {offsets = [32, 0], sizes = [32, 64], strides = [1, 1]} : vector<128x64xbf16> to vector<32x64xbf16>
    %cst_182 = arith.constant dense<0.000000e+00> : vector<16x64xf32>
    %428 = tpu.matmul %426, %427, %cst_182 {dimension_numbers = #tpu.dot_dimension_numbers<[1], [0], [0], [1], [0, 0, 1, 1], [], []>} : vector<16x32xbf16>, vector<32x64xbf16>, vector<16x64xf32> -> vector<16x64xf32>
    %429 = arith.addf %422, %428 : vector<16x64xf32>
    %c2 = arith.constant 2 : index
    %c0_183 = arith.constant 0 : index
    %c0_184 = arith.constant 0 : index
    %430 = vector.load %arg33[%c2, %c0_183, %c0_184] : memref<4x16x64xf32, #tpu.memory_space<vmem>>, vector<1x16x64xf32>
    %431 = vector.shape_cast %430 : vector<1x16x64xf32> to vector<16x64xf32>
    %cst_185 = arith.constant dense<0.000000e+00> : vector<16x32xf32>
    %432 = tpu.matmul %431, %411, %cst_185 {dimension_numbers = #tpu.dot_dimension_numbers<[1], [0], [0], [1], [0, 0, 1, 1], [], []>} : vector<16x64xf32>, vector<64x32xf32>, vector<16x32xf32> -> vector<16x32xf32>
    %433 = arith.truncf %432 : vector<16x32xf32> to vector<16x32xbf16>
    %434 = vector.extract_strided_slice %412 {offsets = [64, 0], sizes = [32, 64], strides = [1, 1]} : vector<128x64xbf16> to vector<32x64xbf16>
    %cst_186 = arith.constant dense<0.000000e+00> : vector<16x64xf32>
    %435 = tpu.matmul %433, %434, %cst_186 {dimension_numbers = #tpu.dot_dimension_numbers<[1], [0], [0], [1], [0, 0, 1, 1], [], []>} : vector<16x32xbf16>, vector<32x64xbf16>, vector<16x64xf32> -> vector<16x64xf32>
    %436 = arith.addf %429, %435 : vector<16x64xf32>
    %c3 = arith.constant 3 : index
    %c0_187 = arith.constant 0 : index
    %c0_188 = arith.constant 0 : index
    %437 = vector.load %arg33[%c3, %c0_187, %c0_188] : memref<4x16x64xf32, #tpu.memory_space<vmem>>, vector<1x16x64xf32>
    %438 = vector.shape_cast %437 : vector<1x16x64xf32> to vector<16x64xf32>
    %cst_189 = arith.constant dense<0.000000e+00> : vector<16x32xf32>
    %439 = tpu.matmul %438, %411, %cst_189 {dimension_numbers = #tpu.dot_dimension_numbers<[1], [0], [0], [1], [0, 0, 1, 1], [], []>} : vector<16x64xf32>, vector<64x32xf32>, vector<16x32xf32> -> vector<16x32xf32>
    %440 = arith.truncf %439 : vector<16x32xf32> to vector<16x32xbf16>
    %441 = vector.extract_strided_slice %412 {offsets = [96, 0], sizes = [32, 64], strides = [1, 1]} : vector<128x64xbf16> to vector<32x64xbf16>
    %cst_190 = arith.constant dense<0.000000e+00> : vector<16x64xf32>
    %442 = tpu.matmul %440, %441, %cst_190 {dimension_numbers = #tpu.dot_dimension_numbers<[1], [0], [0], [1], [0, 0, 1, 1], [], []>} : vector<16x32xbf16>, vector<32x64xbf16>, vector<16x64xf32> -> vector<16x64xf32>
    %443 = arith.addf %436, %442 : vector<16x64xf32>
    %cst_191 = arith.constant dense<0.000000e+00> : vector<16xf32>
    %444 = vector.multi_reduction <add>, %443, %cst_191 [1] : vector<16x64xf32> to vector<16xf32>
    %445 = vector.shape_cast %444 : vector<16xf32> to vector<16x1xf32>
    %cst_192 = arith.constant 6.400000e+01 : f32
    %446 = vector.broadcast %cst_192 : f32 to vector<16x1xf32>
    %447 = arith.divf %445, %446 : vector<16x1xf32>
    %448 = vector.broadcast %447 : vector<16x1xf32> to vector<16x64xf32>
    %449 = arith.subf %443, %448 : vector<16x64xf32>
    %450 = arith.mulf %449, %449 : vector<16x64xf32>
    %cst_193 = arith.constant dense<0.000000e+00> : vector<16xf32>
    %451 = vector.multi_reduction <add>, %450, %cst_193 [1] : vector<16x64xf32> to vector<16xf32>
    %452 = vector.shape_cast %451 : vector<16xf32> to vector<16x1xf32>
    %cst_194 = arith.constant 6.400000e+01 : f32
    %453 = vector.broadcast %cst_194 : f32 to vector<16x1xf32>
    %454 = arith.divf %452, %453 : vector<16x1xf32>
    %cst_195 = arith.constant 9.99999974E-6 : f32
    %455 = vector.broadcast %cst_195 : f32 to vector<16x1xf32>
    %456 = arith.addf %454, %455 : vector<16x1xf32>
    %457 = math.rsqrt %456 : vector<16x1xf32>
    %458 = vector.broadcast %457 : vector<16x1xf32> to vector<16x64xf32>
    %459 = arith.mulf %449, %458 : vector<16x64xf32>
    %460 = vector.broadcast %413 : vector<1x64xf32> to vector<16x64xf32>
    %461 = arith.mulf %459, %460 : vector<16x64xf32>
    %462 = vector.broadcast %414 : vector<1x64xf32> to vector<16x64xf32>
    %463 = arith.addf %461, %462 : vector<16x64xf32>
    %c0_196 = arith.constant 0 : index
    %c0_197 = arith.constant 0 : index
    %464 = vector.load %arg38[%c0_196, %c0_197] : memref<64x192xbf16, #tpu.memory_space<vmem>>, vector<64x192xbf16>
    %c0_198 = arith.constant 0 : index
    %c0_199 = arith.constant 0 : index
    %465 = vector.load %arg39[%c0_198, %c0_199] : memref<1x192xf32, #tpu.memory_space<vmem>>, vector<1x192xf32>
    %c0_200 = arith.constant 0 : index
    %c0_201 = arith.constant 0 : index
    %466 = vector.load %arg40[%c0_200, %c0_201] : memref<64x64xbf16, #tpu.memory_space<vmem>>, vector<64x64xbf16>
    %c0_202 = arith.constant 0 : index
    %c0_203 = arith.constant 0 : index
    %467 = vector.load %arg41[%c0_202, %c0_203] : memref<1x64xf32, #tpu.memory_space<vmem>>, vector<1x64xf32>
    %c0_204 = arith.constant 0 : index
    %c0_205 = arith.constant 0 : index
    %468 = vector.load %arg42[%c0_204, %c0_205] : memref<1x64xf32, #tpu.memory_space<vmem>>, vector<1x64xf32>
    %c0_206 = arith.constant 0 : index
    %c0_207 = arith.constant 0 : index
    %469 = vector.load %arg43[%c0_206, %c0_207] : memref<1x64xf32, #tpu.memory_space<vmem>>, vector<1x64xf32>
    %c0_208 = arith.constant 0 : index
    %c0_209 = arith.constant 0 : index
    %470 = vector.load %arg44[%c0_208, %c0_209] : memref<64x256xbf16, #tpu.memory_space<vmem>>, vector<64x256xbf16>
    %c0_210 = arith.constant 0 : index
    %c0_211 = arith.constant 0 : index
    %471 = vector.load %arg45[%c0_210, %c0_211] : memref<1x256xf32, #tpu.memory_space<vmem>>, vector<1x256xf32>
    %c0_212 = arith.constant 0 : index
    %c0_213 = arith.constant 0 : index
    %472 = vector.load %arg46[%c0_212, %c0_213] : memref<256x64xbf16, #tpu.memory_space<vmem>>, vector<256x64xbf16>
    %c0_214 = arith.constant 0 : index
    %c0_215 = arith.constant 0 : index
    %473 = vector.load %arg47[%c0_214, %c0_215] : memref<1x64xf32, #tpu.memory_space<vmem>>, vector<1x64xf32>
    %c0_216 = arith.constant 0 : index
    %c0_217 = arith.constant 0 : index
    %474 = vector.load %arg48[%c0_216, %c0_217] : memref<1x64xf32, #tpu.memory_space<vmem>>, vector<1x64xf32>
    %c0_218 = arith.constant 0 : index
    %c0_219 = arith.constant 0 : index
    %475 = vector.load %arg49[%c0_218, %c0_219] : memref<1x64xf32, #tpu.memory_space<vmem>>, vector<1x64xf32>
    %476 = arith.truncf %463 : vector<16x64xf32> to vector<16x64xbf16>
    %cst_220 = arith.constant dense<0.000000e+00> : vector<16x192xf32>
    %477 = tpu.matmul %476, %464, %cst_220 {dimension_numbers = #tpu.dot_dimension_numbers<[1], [0], [0], [1], [0, 0, 1, 1], [], []>} : vector<16x64xbf16>, vector<64x192xbf16>, vector<16x192xf32> -> vector<16x192xf32>
    %478 = vector.broadcast %465 : vector<1x192xf32> to vector<16x192xf32>
    %479 = arith.addf %477, %478 : vector<16x192xf32>
    %480 = vector.extract_strided_slice %479 {offsets = [0, 0], sizes = [16, 16], strides = [1, 1]} : vector<16x192xf32> to vector<16x16xf32>
    %481 = vector.extract_strided_slice %479 {offsets = [0, 64], sizes = [16, 16], strides = [1, 1]} : vector<16x192xf32> to vector<16x16xf32>
    %482 = vector.extract_strided_slice %479 {offsets = [0, 128], sizes = [16, 16], strides = [1, 1]} : vector<16x192xf32> to vector<16x16xf32>
    %483 = arith.mulf %480, %480 : vector<16x16xf32>
    %cst_221 = arith.constant dense<0.000000e+00> : vector<16xf32>
    %484 = vector.multi_reduction <add>, %483, %cst_221 [1] : vector<16x16xf32> to vector<16xf32>
    %485 = vector.shape_cast %484 : vector<16xf32> to vector<16x1xf32>
    %cst_222 = arith.constant 1.000000e-24 : f32
    %486 = vector.broadcast %cst_222 : f32 to vector<16x1xf32>
    %487 = arith.maximumf %485, %486 : vector<16x1xf32>
    %488 = math.rsqrt %487 : vector<16x1xf32>
    %489 = vector.broadcast %488 : vector<16x1xf32> to vector<16x16xf32>
    %490 = arith.mulf %480, %489 : vector<16x16xf32>
    %491 = arith.mulf %481, %481 : vector<16x16xf32>
    %cst_223 = arith.constant dense<0.000000e+00> : vector<16xf32>
    %492 = vector.multi_reduction <add>, %491, %cst_223 [1] : vector<16x16xf32> to vector<16xf32>
    %493 = vector.shape_cast %492 : vector<16xf32> to vector<16x1xf32>
    %cst_224 = arith.constant 1.000000e-24 : f32
    %494 = vector.broadcast %cst_224 : f32 to vector<16x1xf32>
    %495 = arith.maximumf %493, %494 : vector<16x1xf32>
    %496 = math.rsqrt %495 : vector<16x1xf32>
    %497 = vector.broadcast %496 : vector<16x1xf32> to vector<16x16xf32>
    %498 = arith.mulf %481, %497 : vector<16x16xf32>
    %c8 = arith.constant 8 : index
    %499 = memref.load %arg1[%c8] : memref<16xf32, #tpu.memory_space<smem>>
    %500 = vector.broadcast %499 : f32 to vector<16x16xf32>
    %501 = arith.mulf %490, %500 : vector<16x16xf32>
    %502 = arith.truncf %501 : vector<16x16xf32> to vector<16x16xbf16>
    %503 = arith.truncf %498 : vector<16x16xf32> to vector<16x16xbf16>
    %cst_225 = arith.constant dense<0.000000e+00> : vector<16x16xf32>
    %504 = tpu.matmul %502, %503, %cst_225 {dimension_numbers = #tpu.dot_dimension_numbers<[1], [1], [0], [0], [0, 0, 1, 0], [], []>} : vector<16x16xbf16>, vector<16x16xbf16>, vector<16x16xf32> -> vector<16x16xf32>
    %c0_226 = arith.constant 0 : index
    %c0_227 = arith.constant 0 : index
    %c0_228 = arith.constant 0 : index
    %505 = vector.load %arg37[%c0_226, %c0_227, %c0_228] : memref<4x16x16xf32, #tpu.memory_space<vmem>>, vector<1x16x16xf32>
    %506 = vector.shape_cast %505 : vector<1x16x16xf32> to vector<16x16xf32>
    %507 = arith.addf %504, %506 : vector<16x16xf32>
    %cst_229 = arith.constant dense<0xFF800000> : vector<16xf32>
    %508 = vector.multi_reduction <maximumf>, %507, %cst_229 [1] : vector<16x16xf32> to vector<16xf32>
    %509 = vector.shape_cast %508 : vector<16xf32> to vector<16x1xf32>
    %510 = vector.broadcast %509 : vector<16x1xf32> to vector<16x16xf32>
    %511 = arith.subf %507, %510 : vector<16x16xf32>
    %512 = math.exp %511 : vector<16x16xf32>
    %cst_230 = arith.constant dense<0.000000e+00> : vector<16xf32>
    %513 = vector.multi_reduction <add>, %512, %cst_230 [1] : vector<16x16xf32> to vector<16xf32>
    %514 = vector.shape_cast %513 : vector<16xf32> to vector<16x1xf32>
    %515 = vector.broadcast %514 : vector<16x1xf32> to vector<16x16xf32>
    %516 = arith.divf %512, %515 : vector<16x16xf32>
    %517 = arith.truncf %516 : vector<16x16xf32> to vector<16x16xbf16>
    %518 = arith.truncf %482 : vector<16x16xf32> to vector<16x16xbf16>
    %cst_231 = arith.constant dense<0.000000e+00> : vector<16x16xf32>
    %519 = tpu.matmul %517, %518, %cst_231 {dimension_numbers = #tpu.dot_dimension_numbers<[1], [0], [0], [1], [0, 0, 1, 1], [], []>} : vector<16x16xbf16>, vector<16x16xbf16>, vector<16x16xf32> -> vector<16x16xf32>
    %520 = vector.extract_strided_slice %479 {offsets = [0, 16], sizes = [16, 16], strides = [1, 1]} : vector<16x192xf32> to vector<16x16xf32>
    %521 = vector.extract_strided_slice %479 {offsets = [0, 80], sizes = [16, 16], strides = [1, 1]} : vector<16x192xf32> to vector<16x16xf32>
    %522 = vector.extract_strided_slice %479 {offsets = [0, 144], sizes = [16, 16], strides = [1, 1]} : vector<16x192xf32> to vector<16x16xf32>
    %523 = arith.mulf %520, %520 : vector<16x16xf32>
    %cst_232 = arith.constant dense<0.000000e+00> : vector<16xf32>
    %524 = vector.multi_reduction <add>, %523, %cst_232 [1] : vector<16x16xf32> to vector<16xf32>
    %525 = vector.shape_cast %524 : vector<16xf32> to vector<16x1xf32>
    %cst_233 = arith.constant 1.000000e-24 : f32
    %526 = vector.broadcast %cst_233 : f32 to vector<16x1xf32>
    %527 = arith.maximumf %525, %526 : vector<16x1xf32>
    %528 = math.rsqrt %527 : vector<16x1xf32>
    %529 = vector.broadcast %528 : vector<16x1xf32> to vector<16x16xf32>
    %530 = arith.mulf %520, %529 : vector<16x16xf32>
    %531 = arith.mulf %521, %521 : vector<16x16xf32>
    %cst_234 = arith.constant dense<0.000000e+00> : vector<16xf32>
    %532 = vector.multi_reduction <add>, %531, %cst_234 [1] : vector<16x16xf32> to vector<16xf32>
    %533 = vector.shape_cast %532 : vector<16xf32> to vector<16x1xf32>
    %cst_235 = arith.constant 1.000000e-24 : f32
    %534 = vector.broadcast %cst_235 : f32 to vector<16x1xf32>
    %535 = arith.maximumf %533, %534 : vector<16x1xf32>
    %536 = math.rsqrt %535 : vector<16x1xf32>
    %537 = vector.broadcast %536 : vector<16x1xf32> to vector<16x16xf32>
    %538 = arith.mulf %521, %537 : vector<16x16xf32>
    %c9 = arith.constant 9 : index
    %539 = memref.load %arg1[%c9] : memref<16xf32, #tpu.memory_space<smem>>
    %540 = vector.broadcast %539 : f32 to vector<16x16xf32>
    %541 = arith.mulf %530, %540 : vector<16x16xf32>
    %542 = arith.truncf %541 : vector<16x16xf32> to vector<16x16xbf16>
    %543 = arith.truncf %538 : vector<16x16xf32> to vector<16x16xbf16>
    %cst_236 = arith.constant dense<0.000000e+00> : vector<16x16xf32>
    %544 = tpu.matmul %542, %543, %cst_236 {dimension_numbers = #tpu.dot_dimension_numbers<[1], [1], [0], [0], [0, 0, 1, 0], [], []>} : vector<16x16xbf16>, vector<16x16xbf16>, vector<16x16xf32> -> vector<16x16xf32>
    %c1_237 = arith.constant 1 : index
    %c0_238 = arith.constant 0 : index
    %c0_239 = arith.constant 0 : index
    %545 = vector.load %arg37[%c1_237, %c0_238, %c0_239] : memref<4x16x16xf32, #tpu.memory_space<vmem>>, vector<1x16x16xf32>
    %546 = vector.shape_cast %545 : vector<1x16x16xf32> to vector<16x16xf32>
    %547 = arith.addf %544, %546 : vector<16x16xf32>
    %cst_240 = arith.constant dense<0xFF800000> : vector<16xf32>
    %548 = vector.multi_reduction <maximumf>, %547, %cst_240 [1] : vector<16x16xf32> to vector<16xf32>
    %549 = vector.shape_cast %548 : vector<16xf32> to vector<16x1xf32>
    %550 = vector.broadcast %549 : vector<16x1xf32> to vector<16x16xf32>
    %551 = arith.subf %547, %550 : vector<16x16xf32>
    %552 = math.exp %551 : vector<16x16xf32>
    %cst_241 = arith.constant dense<0.000000e+00> : vector<16xf32>
    %553 = vector.multi_reduction <add>, %552, %cst_241 [1] : vector<16x16xf32> to vector<16xf32>
    %554 = vector.shape_cast %553 : vector<16xf32> to vector<16x1xf32>
    %555 = vector.broadcast %554 : vector<16x1xf32> to vector<16x16xf32>
    %556 = arith.divf %552, %555 : vector<16x16xf32>
    %557 = arith.truncf %556 : vector<16x16xf32> to vector<16x16xbf16>
    %558 = arith.truncf %522 : vector<16x16xf32> to vector<16x16xbf16>
    %cst_242 = arith.constant dense<0.000000e+00> : vector<16x16xf32>
    %559 = tpu.matmul %557, %558, %cst_242 {dimension_numbers = #tpu.dot_dimension_numbers<[1], [0], [0], [1], [0, 0, 1, 1], [], []>} : vector<16x16xbf16>, vector<16x16xbf16>, vector<16x16xf32> -> vector<16x16xf32>
    %560 = vector.extract_strided_slice %479 {offsets = [0, 32], sizes = [16, 16], strides = [1, 1]} : vector<16x192xf32> to vector<16x16xf32>
    %561 = vector.extract_strided_slice %479 {offsets = [0, 96], sizes = [16, 16], strides = [1, 1]} : vector<16x192xf32> to vector<16x16xf32>
    %562 = vector.extract_strided_slice %479 {offsets = [0, 160], sizes = [16, 16], strides = [1, 1]} : vector<16x192xf32> to vector<16x16xf32>
    %563 = arith.mulf %560, %560 : vector<16x16xf32>
    %cst_243 = arith.constant dense<0.000000e+00> : vector<16xf32>
    %564 = vector.multi_reduction <add>, %563, %cst_243 [1] : vector<16x16xf32> to vector<16xf32>
    %565 = vector.shape_cast %564 : vector<16xf32> to vector<16x1xf32>
    %cst_244 = arith.constant 1.000000e-24 : f32
    %566 = vector.broadcast %cst_244 : f32 to vector<16x1xf32>
    %567 = arith.maximumf %565, %566 : vector<16x1xf32>
    %568 = math.rsqrt %567 : vector<16x1xf32>
    %569 = vector.broadcast %568 : vector<16x1xf32> to vector<16x16xf32>
    %570 = arith.mulf %560, %569 : vector<16x16xf32>
    %571 = arith.mulf %561, %561 : vector<16x16xf32>
    %cst_245 = arith.constant dense<0.000000e+00> : vector<16xf32>
    %572 = vector.multi_reduction <add>, %571, %cst_245 [1] : vector<16x16xf32> to vector<16xf32>
    %573 = vector.shape_cast %572 : vector<16xf32> to vector<16x1xf32>
    %cst_246 = arith.constant 1.000000e-24 : f32
    %574 = vector.broadcast %cst_246 : f32 to vector<16x1xf32>
    %575 = arith.maximumf %573, %574 : vector<16x1xf32>
    %576 = math.rsqrt %575 : vector<16x1xf32>
    %577 = vector.broadcast %576 : vector<16x1xf32> to vector<16x16xf32>
    %578 = arith.mulf %561, %577 : vector<16x16xf32>
    %c10 = arith.constant 10 : index
    %579 = memref.load %arg1[%c10] : memref<16xf32, #tpu.memory_space<smem>>
    %580 = vector.broadcast %579 : f32 to vector<16x16xf32>
    %581 = arith.mulf %570, %580 : vector<16x16xf32>
    %582 = arith.truncf %581 : vector<16x16xf32> to vector<16x16xbf16>
    %583 = arith.truncf %578 : vector<16x16xf32> to vector<16x16xbf16>
    %cst_247 = arith.constant dense<0.000000e+00> : vector<16x16xf32>
    %584 = tpu.matmul %582, %583, %cst_247 {dimension_numbers = #tpu.dot_dimension_numbers<[1], [1], [0], [0], [0, 0, 1, 0], [], []>} : vector<16x16xbf16>, vector<16x16xbf16>, vector<16x16xf32> -> vector<16x16xf32>
    %c2_248 = arith.constant 2 : index
    %c0_249 = arith.constant 0 : index
    %c0_250 = arith.constant 0 : index
    %585 = vector.load %arg37[%c2_248, %c0_249, %c0_250] : memref<4x16x16xf32, #tpu.memory_space<vmem>>, vector<1x16x16xf32>
    %586 = vector.shape_cast %585 : vector<1x16x16xf32> to vector<16x16xf32>
    %587 = arith.addf %584, %586 : vector<16x16xf32>
    %cst_251 = arith.constant dense<0xFF800000> : vector<16xf32>
    %588 = vector.multi_reduction <maximumf>, %587, %cst_251 [1] : vector<16x16xf32> to vector<16xf32>
    %589 = vector.shape_cast %588 : vector<16xf32> to vector<16x1xf32>
    %590 = vector.broadcast %589 : vector<16x1xf32> to vector<16x16xf32>
    %591 = arith.subf %587, %590 : vector<16x16xf32>
    %592 = math.exp %591 : vector<16x16xf32>
    %cst_252 = arith.constant dense<0.000000e+00> : vector<16xf32>
    %593 = vector.multi_reduction <add>, %592, %cst_252 [1] : vector<16x16xf32> to vector<16xf32>
    %594 = vector.shape_cast %593 : vector<16xf32> to vector<16x1xf32>
    %595 = vector.broadcast %594 : vector<16x1xf32> to vector<16x16xf32>
    %596 = arith.divf %592, %595 : vector<16x16xf32>
    %597 = arith.truncf %596 : vector<16x16xf32> to vector<16x16xbf16>
    %598 = arith.truncf %562 : vector<16x16xf32> to vector<16x16xbf16>
    %cst_253 = arith.constant dense<0.000000e+00> : vector<16x16xf32>
    %599 = tpu.matmul %597, %598, %cst_253 {dimension_numbers = #tpu.dot_dimension_numbers<[1], [0], [0], [1], [0, 0, 1, 1], [], []>} : vector<16x16xbf16>, vector<16x16xbf16>, vector<16x16xf32> -> vector<16x16xf32>
    %600 = vector.extract_strided_slice %479 {offsets = [0, 48], sizes = [16, 16], strides = [1, 1]} : vector<16x192xf32> to vector<16x16xf32>
    %601 = vector.extract_strided_slice %479 {offsets = [0, 112], sizes = [16, 16], strides = [1, 1]} : vector<16x192xf32> to vector<16x16xf32>
    %602 = vector.extract_strided_slice %479 {offsets = [0, 176], sizes = [16, 16], strides = [1, 1]} : vector<16x192xf32> to vector<16x16xf32>
    %603 = arith.mulf %600, %600 : vector<16x16xf32>
    %cst_254 = arith.constant dense<0.000000e+00> : vector<16xf32>
    %604 = vector.multi_reduction <add>, %603, %cst_254 [1] : vector<16x16xf32> to vector<16xf32>
    %605 = vector.shape_cast %604 : vector<16xf32> to vector<16x1xf32>
    %cst_255 = arith.constant 1.000000e-24 : f32
    %606 = vector.broadcast %cst_255 : f32 to vector<16x1xf32>
    %607 = arith.maximumf %605, %606 : vector<16x1xf32>
    %608 = math.rsqrt %607 : vector<16x1xf32>
    %609 = vector.broadcast %608 : vector<16x1xf32> to vector<16x16xf32>
    %610 = arith.mulf %600, %609 : vector<16x16xf32>
    %611 = arith.mulf %601, %601 : vector<16x16xf32>
    %cst_256 = arith.constant dense<0.000000e+00> : vector<16xf32>
    %612 = vector.multi_reduction <add>, %611, %cst_256 [1] : vector<16x16xf32> to vector<16xf32>
    %613 = vector.shape_cast %612 : vector<16xf32> to vector<16x1xf32>
    %cst_257 = arith.constant 1.000000e-24 : f32
    %614 = vector.broadcast %cst_257 : f32 to vector<16x1xf32>
    %615 = arith.maximumf %613, %614 : vector<16x1xf32>
    %616 = math.rsqrt %615 : vector<16x1xf32>
    %617 = vector.broadcast %616 : vector<16x1xf32> to vector<16x16xf32>
    %618 = arith.mulf %601, %617 : vector<16x16xf32>
    %c11 = arith.constant 11 : index
    %619 = memref.load %arg1[%c11] : memref<16xf32, #tpu.memory_space<smem>>
    %620 = vector.broadcast %619 : f32 to vector<16x16xf32>
    %621 = arith.mulf %610, %620 : vector<16x16xf32>
    %622 = arith.truncf %621 : vector<16x16xf32> to vector<16x16xbf16>
    %623 = arith.truncf %618 : vector<16x16xf32> to vector<16x16xbf16>
    %cst_258 = arith.constant dense<0.000000e+00> : vector<16x16xf32>
    %624 = tpu.matmul %622, %623, %cst_258 {dimension_numbers = #tpu.dot_dimension_numbers<[1], [1], [0], [0], [0, 0, 1, 0], [], []>} : vector<16x16xbf16>, vector<16x16xbf16>, vector<16x16xf32> -> vector<16x16xf32>
    %c3_259 = arith.constant 3 : index
    %c0_260 = arith.constant 0 : index
    %c0_261 = arith.constant 0 : index
    %625 = vector.load %arg37[%c3_259, %c0_260, %c0_261] : memref<4x16x16xf32, #tpu.memory_space<vmem>>, vector<1x16x16xf32>
    %626 = vector.shape_cast %625 : vector<1x16x16xf32> to vector<16x16xf32>
    %627 = arith.addf %624, %626 : vector<16x16xf32>
    %cst_262 = arith.constant dense<0xFF800000> : vector<16xf32>
    %628 = vector.multi_reduction <maximumf>, %627, %cst_262 [1] : vector<16x16xf32> to vector<16xf32>
    %629 = vector.shape_cast %628 : vector<16xf32> to vector<16x1xf32>
    %630 = vector.broadcast %629 : vector<16x1xf32> to vector<16x16xf32>
    %631 = arith.subf %627, %630 : vector<16x16xf32>
    %632 = math.exp %631 : vector<16x16xf32>
    %cst_263 = arith.constant dense<0.000000e+00> : vector<16xf32>
    %633 = vector.multi_reduction <add>, %632, %cst_263 [1] : vector<16x16xf32> to vector<16xf32>
    %634 = vector.shape_cast %633 : vector<16xf32> to vector<16x1xf32>
    %635 = vector.broadcast %634 : vector<16x1xf32> to vector<16x16xf32>
    %636 = arith.divf %632, %635 : vector<16x16xf32>
    %637 = arith.truncf %636 : vector<16x16xf32> to vector<16x16xbf16>
    %638 = arith.truncf %602 : vector<16x16xf32> to vector<16x16xbf16>
    %cst_264 = arith.constant dense<0.000000e+00> : vector<16x16xf32>
    %639 = tpu.matmul %637, %638, %cst_264 {dimension_numbers = #tpu.dot_dimension_numbers<[1], [0], [0], [1], [0, 0, 1, 1], [], []>} : vector<16x16xbf16>, vector<16x16xbf16>, vector<16x16xf32> -> vector<16x16xf32>
    %640 = tpu.concatenate %519, %559, %599, %639 in 1 : vector<16x16xf32>, vector<16x16xf32>, vector<16x16xf32>, vector<16x16xf32> -> vector<16x64xf32>
    %641 = arith.truncf %640 : vector<16x64xf32> to vector<16x64xbf16>
    %cst_265 = arith.constant dense<0.000000e+00> : vector<16x64xf32>
    %642 = tpu.matmul %641, %466, %cst_265 {dimension_numbers = #tpu.dot_dimension_numbers<[1], [0], [0], [1], [0, 0, 1, 1], [], []>} : vector<16x64xbf16>, vector<64x64xbf16>, vector<16x64xf32> -> vector<16x64xf32>
    %643 = vector.broadcast %467 : vector<1x64xf32> to vector<16x64xf32>
    %644 = arith.addf %642, %643 : vector<16x64xf32>
    %cst_266 = arith.constant dense<0.000000e+00> : vector<16xf32>
    %645 = vector.multi_reduction <add>, %644, %cst_266 [1] : vector<16x64xf32> to vector<16xf32>
    %646 = vector.shape_cast %645 : vector<16xf32> to vector<16x1xf32>
    %cst_267 = arith.constant 6.400000e+01 : f32
    %647 = vector.broadcast %cst_267 : f32 to vector<16x1xf32>
    %648 = arith.divf %646, %647 : vector<16x1xf32>
    %649 = vector.broadcast %648 : vector<16x1xf32> to vector<16x64xf32>
    %650 = arith.subf %644, %649 : vector<16x64xf32>
    %651 = arith.mulf %650, %650 : vector<16x64xf32>
    %cst_268 = arith.constant dense<0.000000e+00> : vector<16xf32>
    %652 = vector.multi_reduction <add>, %651, %cst_268 [1] : vector<16x64xf32> to vector<16xf32>
    %653 = vector.shape_cast %652 : vector<16xf32> to vector<16x1xf32>
    %cst_269 = arith.constant 6.400000e+01 : f32
    %654 = vector.broadcast %cst_269 : f32 to vector<16x1xf32>
    %655 = arith.divf %653, %654 : vector<16x1xf32>
    %cst_270 = arith.constant 9.99999974E-6 : f32
    %656 = vector.broadcast %cst_270 : f32 to vector<16x1xf32>
    %657 = arith.addf %655, %656 : vector<16x1xf32>
    %658 = math.rsqrt %657 : vector<16x1xf32>
    %659 = vector.broadcast %658 : vector<16x1xf32> to vector<16x64xf32>
    %660 = arith.mulf %650, %659 : vector<16x64xf32>
    %661 = vector.broadcast %468 : vector<1x64xf32> to vector<16x64xf32>
    %662 = arith.mulf %660, %661 : vector<16x64xf32>
    %663 = vector.broadcast %469 : vector<1x64xf32> to vector<16x64xf32>
    %664 = arith.addf %662, %663 : vector<16x64xf32>
    %665 = arith.addf %463, %664 : vector<16x64xf32>
    %666 = arith.truncf %665 : vector<16x64xf32> to vector<16x64xbf16>
    %cst_271 = arith.constant dense<0.000000e+00> : vector<16x256xf32>
    %667 = tpu.matmul %666, %470, %cst_271 {dimension_numbers = #tpu.dot_dimension_numbers<[1], [0], [0], [1], [0, 0, 1, 1], [], []>} : vector<16x64xbf16>, vector<64x256xbf16>, vector<16x256xf32> -> vector<16x256xf32>
    %668 = vector.broadcast %471 : vector<1x256xf32> to vector<16x256xf32>
    %669 = arith.addf %667, %668 : vector<16x256xf32>
    %cst_272 = arith.constant 5.000000e-01 : f32
    %670 = vector.broadcast %cst_272 : f32 to vector<16x256xf32>
    %671 = arith.mulf %670, %669 : vector<16x256xf32>
    %cst_273 = arith.constant 0.707106769 : f32
    %672 = vector.broadcast %cst_273 : f32 to vector<16x256xf32>
    %673 = arith.mulf %669, %672 : vector<16x256xf32>
    %674 = math.absf %673 : vector<16x256xf32>
    %cst_274 = arith.constant 0.327591091 : f32
    %675 = vector.broadcast %cst_274 : f32 to vector<16x256xf32>
    %676 = arith.mulf %675, %674 : vector<16x256xf32>
    %cst_275 = arith.constant 1.000000e+00 : f32
    %677 = vector.broadcast %cst_275 : f32 to vector<16x256xf32>
    %678 = arith.addf %677, %676 : vector<16x256xf32>
    %cst_276 = arith.constant 1.000000e+00 : f32
    %679 = vector.broadcast %cst_276 : f32 to vector<16x256xf32>
    %680 = arith.divf %679, %678 : vector<16x256xf32>
    %cst_277 = arith.constant 1.06140542 : f32
    %681 = vector.broadcast %cst_277 : f32 to vector<16x256xf32>
    %682 = arith.mulf %681, %680 : vector<16x256xf32>
    %cst_278 = arith.constant -1.45315206 : f32
    %683 = vector.broadcast %cst_278 : f32 to vector<16x256xf32>
    %684 = arith.addf %682, %683 : vector<16x256xf32>
    %685 = arith.mulf %684, %680 : vector<16x256xf32>
    %cst_279 = arith.constant 1.42141378 : f32
    %686 = vector.broadcast %cst_279 : f32 to vector<16x256xf32>
    %687 = arith.addf %685, %686 : vector<16x256xf32>
    %688 = arith.mulf %687, %680 : vector<16x256xf32>
    %cst_280 = arith.constant -0.284496725 : f32
    %689 = vector.broadcast %cst_280 : f32 to vector<16x256xf32>
    %690 = arith.addf %688, %689 : vector<16x256xf32>
    %691 = arith.mulf %690, %680 : vector<16x256xf32>
    %cst_281 = arith.constant 0.254829586 : f32
    %692 = vector.broadcast %cst_281 : f32 to vector<16x256xf32>
    %693 = arith.addf %691, %692 : vector<16x256xf32>
    %694 = arith.mulf %693, %680 : vector<16x256xf32>
    %cst_282 = arith.constant 0.000000e+00 : f32
    %695 = vector.broadcast %cst_282 : f32 to vector<16x256xf32>
    %696 = arith.subf %695, %674 : vector<16x256xf32>
    %697 = arith.mulf %696, %674 : vector<16x256xf32>
    %698 = math.exp %697 : vector<16x256xf32>
    %699 = arith.mulf %694, %698 : vector<16x256xf32>
    %cst_283 = arith.constant 1.000000e+00 : f32
    %700 = vector.broadcast %cst_283 : f32 to vector<16x256xf32>
    %701 = arith.subf %700, %699 : vector<16x256xf32>
    %cst_284 = arith.constant 0.000000e+00 : f32
    %702 = vector.broadcast %cst_284 : f32 to vector<16x256xf32>
    %703 = arith.cmpf oge, %673, %702 : vector<16x256xf32>
    %cst_285 = arith.constant 0.000000e+00 : f32
    %704 = vector.broadcast %cst_285 : f32 to vector<16x256xf32>
    %705 = arith.subf %704, %701 : vector<16x256xf32>
    %706 = arith.select %703, %701, %705 : vector<16x256xi1>, vector<16x256xf32>
    %cst_286 = arith.constant 1.000000e+00 : f32
    %707 = vector.broadcast %cst_286 : f32 to vector<16x256xf32>
    %708 = arith.addf %707, %706 : vector<16x256xf32>
    %709 = arith.mulf %671, %708 : vector<16x256xf32>
    %710 = arith.truncf %709 : vector<16x256xf32> to vector<16x256xbf16>
    %cst_287 = arith.constant dense<0.000000e+00> : vector<16x64xf32>
    %711 = tpu.matmul %710, %472, %cst_287 {dimension_numbers = #tpu.dot_dimension_numbers<[1], [0], [0], [1], [0, 0, 1, 1], [], []>} : vector<16x256xbf16>, vector<256x64xbf16>, vector<16x64xf32> -> vector<16x64xf32>
    %712 = vector.broadcast %473 : vector<1x64xf32> to vector<16x64xf32>
    %713 = arith.addf %711, %712 : vector<16x64xf32>
    %cst_288 = arith.constant dense<0.000000e+00> : vector<16xf32>
    %714 = vector.multi_reduction <add>, %713, %cst_288 [1] : vector<16x64xf32> to vector<16xf32>
    %715 = vector.shape_cast %714 : vector<16xf32> to vector<16x1xf32>
    %cst_289 = arith.constant 6.400000e+01 : f32
    %716 = vector.broadcast %cst_289 : f32 to vector<16x1xf32>
    %717 = arith.divf %715, %716 : vector<16x1xf32>
    %718 = vector.broadcast %717 : vector<16x1xf32> to vector<16x64xf32>
    %719 = arith.subf %713, %718 : vector<16x64xf32>
    %720 = arith.mulf %719, %719 : vector<16x64xf32>
    %cst_290 = arith.constant dense<0.000000e+00> : vector<16xf32>
    %721 = vector.multi_reduction <add>, %720, %cst_290 [1] : vector<16x64xf32> to vector<16xf32>
    %722 = vector.shape_cast %721 : vector<16xf32> to vector<16x1xf32>
    %cst_291 = arith.constant 6.400000e+01 : f32
    %723 = vector.broadcast %cst_291 : f32 to vector<16x1xf32>
    %724 = arith.divf %722, %723 : vector<16x1xf32>
    %cst_292 = arith.constant 9.99999974E-6 : f32
    %725 = vector.broadcast %cst_292 : f32 to vector<16x1xf32>
    %726 = arith.addf %724, %725 : vector<16x1xf32>
    %727 = math.rsqrt %726 : vector<16x1xf32>
    %728 = vector.broadcast %727 : vector<16x1xf32> to vector<16x64xf32>
    %729 = arith.mulf %719, %728 : vector<16x64xf32>
    %730 = vector.broadcast %474 : vector<1x64xf32> to vector<16x64xf32>
    %731 = arith.mulf %729, %730 : vector<16x64xf32>
    %732 = vector.broadcast %475 : vector<1x64xf32> to vector<16x64xf32>
    %733 = arith.addf %731, %732 : vector<16x64xf32>
    %734 = arith.addf %665, %733 : vector<16x64xf32>
    %c0_293 = arith.constant 0 : index
    %c0_294 = arith.constant 0 : index
    %735 = vector.load %arg51[%c0_293, %c0_294] : memref<64x192xbf16, #tpu.memory_space<vmem>>, vector<64x192xbf16>
    %c0_295 = arith.constant 0 : index
    %c0_296 = arith.constant 0 : index
    %736 = vector.load %arg52[%c0_295, %c0_296] : memref<1x192xf32, #tpu.memory_space<vmem>>, vector<1x192xf32>
    %c0_297 = arith.constant 0 : index
    %c0_298 = arith.constant 0 : index
    %737 = vector.load %arg53[%c0_297, %c0_298] : memref<64x64xbf16, #tpu.memory_space<vmem>>, vector<64x64xbf16>
    %c0_299 = arith.constant 0 : index
    %c0_300 = arith.constant 0 : index
    %738 = vector.load %arg54[%c0_299, %c0_300] : memref<1x64xf32, #tpu.memory_space<vmem>>, vector<1x64xf32>
    %c0_301 = arith.constant 0 : index
    %c0_302 = arith.constant 0 : index
    %739 = vector.load %arg55[%c0_301, %c0_302] : memref<1x64xf32, #tpu.memory_space<vmem>>, vector<1x64xf32>
    %c0_303 = arith.constant 0 : index
    %c0_304 = arith.constant 0 : index
    %740 = vector.load %arg56[%c0_303, %c0_304] : memref<1x64xf32, #tpu.memory_space<vmem>>, vector<1x64xf32>
    %c0_305 = arith.constant 0 : index
    %c0_306 = arith.constant 0 : index
    %741 = vector.load %arg57[%c0_305, %c0_306] : memref<64x256xbf16, #tpu.memory_space<vmem>>, vector<64x256xbf16>
    %c0_307 = arith.constant 0 : index
    %c0_308 = arith.constant 0 : index
    %742 = vector.load %arg58[%c0_307, %c0_308] : memref<1x256xf32, #tpu.memory_space<vmem>>, vector<1x256xf32>
    %c0_309 = arith.constant 0 : index
    %c0_310 = arith.constant 0 : index
    %743 = vector.load %arg59[%c0_309, %c0_310] : memref<256x64xbf16, #tpu.memory_space<vmem>>, vector<256x64xbf16>
    %c0_311 = arith.constant 0 : index
    %c0_312 = arith.constant 0 : index
    %744 = vector.load %arg60[%c0_311, %c0_312] : memref<1x64xf32, #tpu.memory_space<vmem>>, vector<1x64xf32>
    %c0_313 = arith.constant 0 : index
    %c0_314 = arith.constant 0 : index
    %745 = vector.load %arg61[%c0_313, %c0_314] : memref<1x64xf32, #tpu.memory_space<vmem>>, vector<1x64xf32>
    %c0_315 = arith.constant 0 : index
    %c0_316 = arith.constant 0 : index
    %746 = vector.load %arg62[%c0_315, %c0_316] : memref<1x64xf32, #tpu.memory_space<vmem>>, vector<1x64xf32>
    %747 = arith.truncf %734 : vector<16x64xf32> to vector<16x64xbf16>
    %cst_317 = arith.constant dense<0.000000e+00> : vector<16x192xf32>
    %748 = tpu.matmul %747, %735, %cst_317 {dimension_numbers = #tpu.dot_dimension_numbers<[1], [0], [0], [1], [0, 0, 1, 1], [], []>} : vector<16x64xbf16>, vector<64x192xbf16>, vector<16x192xf32> -> vector<16x192xf32>
    %749 = vector.broadcast %736 : vector<1x192xf32> to vector<16x192xf32>
    %750 = arith.addf %748, %749 : vector<16x192xf32>
    %751 = vector.extract_strided_slice %750 {offsets = [0, 0], sizes = [16, 16], strides = [1, 1]} : vector<16x192xf32> to vector<16x16xf32>
    %752 = vector.extract_strided_slice %750 {offsets = [0, 64], sizes = [16, 16], strides = [1, 1]} : vector<16x192xf32> to vector<16x16xf32>
    %753 = vector.extract_strided_slice %750 {offsets = [0, 128], sizes = [16, 16], strides = [1, 1]} : vector<16x192xf32> to vector<16x16xf32>
    %754 = arith.mulf %751, %751 : vector<16x16xf32>
    %cst_318 = arith.constant dense<0.000000e+00> : vector<16xf32>
    %755 = vector.multi_reduction <add>, %754, %cst_318 [1] : vector<16x16xf32> to vector<16xf32>
    %756 = vector.shape_cast %755 : vector<16xf32> to vector<16x1xf32>
    %cst_319 = arith.constant 1.000000e-24 : f32
    %757 = vector.broadcast %cst_319 : f32 to vector<16x1xf32>
    %758 = arith.maximumf %756, %757 : vector<16x1xf32>
    %759 = math.rsqrt %758 : vector<16x1xf32>
    %760 = vector.broadcast %759 : vector<16x1xf32> to vector<16x16xf32>
    %761 = arith.mulf %751, %760 : vector<16x16xf32>
    %762 = arith.mulf %752, %752 : vector<16x16xf32>
    %cst_320 = arith.constant dense<0.000000e+00> : vector<16xf32>
    %763 = vector.multi_reduction <add>, %762, %cst_320 [1] : vector<16x16xf32> to vector<16xf32>
    %764 = vector.shape_cast %763 : vector<16xf32> to vector<16x1xf32>
    %cst_321 = arith.constant 1.000000e-24 : f32
    %765 = vector.broadcast %cst_321 : f32 to vector<16x1xf32>
    %766 = arith.maximumf %764, %765 : vector<16x1xf32>
    %767 = math.rsqrt %766 : vector<16x1xf32>
    %768 = vector.broadcast %767 : vector<16x1xf32> to vector<16x16xf32>
    %769 = arith.mulf %752, %768 : vector<16x16xf32>
    %c12 = arith.constant 12 : index
    %770 = memref.load %arg1[%c12] : memref<16xf32, #tpu.memory_space<smem>>
    %771 = vector.broadcast %770 : f32 to vector<16x16xf32>
    %772 = arith.mulf %761, %771 : vector<16x16xf32>
    %773 = arith.truncf %772 : vector<16x16xf32> to vector<16x16xbf16>
    %774 = arith.truncf %769 : vector<16x16xf32> to vector<16x16xbf16>
    %cst_322 = arith.constant dense<0.000000e+00> : vector<16x16xf32>
    %775 = tpu.matmul %773, %774, %cst_322 {dimension_numbers = #tpu.dot_dimension_numbers<[1], [1], [0], [0], [0, 0, 1, 0], [], []>} : vector<16x16xbf16>, vector<16x16xbf16>, vector<16x16xf32> -> vector<16x16xf32>
    %c0_323 = arith.constant 0 : index
    %c0_324 = arith.constant 0 : index
    %c0_325 = arith.constant 0 : index
    %776 = vector.load %arg50[%c0_323, %c0_324, %c0_325] : memref<4x16x16xf32, #tpu.memory_space<vmem>>, vector<1x16x16xf32>
    %777 = vector.shape_cast %776 : vector<1x16x16xf32> to vector<16x16xf32>
    %778 = arith.addf %775, %777 : vector<16x16xf32>
    %cst_326 = arith.constant dense<0xFF800000> : vector<16xf32>
    %779 = vector.multi_reduction <maximumf>, %778, %cst_326 [1] : vector<16x16xf32> to vector<16xf32>
    %780 = vector.shape_cast %779 : vector<16xf32> to vector<16x1xf32>
    %781 = vector.broadcast %780 : vector<16x1xf32> to vector<16x16xf32>
    %782 = arith.subf %778, %781 : vector<16x16xf32>
    %783 = math.exp %782 : vector<16x16xf32>
    %cst_327 = arith.constant dense<0.000000e+00> : vector<16xf32>
    %784 = vector.multi_reduction <add>, %783, %cst_327 [1] : vector<16x16xf32> to vector<16xf32>
    %785 = vector.shape_cast %784 : vector<16xf32> to vector<16x1xf32>
    %786 = vector.broadcast %785 : vector<16x1xf32> to vector<16x16xf32>
    %787 = arith.divf %783, %786 : vector<16x16xf32>
    %788 = arith.truncf %787 : vector<16x16xf32> to vector<16x16xbf16>
    %789 = arith.truncf %753 : vector<16x16xf32> to vector<16x16xbf16>
    %cst_328 = arith.constant dense<0.000000e+00> : vector<16x16xf32>
    %790 = tpu.matmul %788, %789, %cst_328 {dimension_numbers = #tpu.dot_dimension_numbers<[1], [0], [0], [1], [0, 0, 1, 1], [], []>} : vector<16x16xbf16>, vector<16x16xbf16>, vector<16x16xf32> -> vector<16x16xf32>
    %791 = vector.extract_strided_slice %750 {offsets = [0, 16], sizes = [16, 16], strides = [1, 1]} : vector<16x192xf32> to vector<16x16xf32>
    %792 = vector.extract_strided_slice %750 {offsets = [0, 80], sizes = [16, 16], strides = [1, 1]} : vector<16x192xf32> to vector<16x16xf32>
    %793 = vector.extract_strided_slice %750 {offsets = [0, 144], sizes = [16, 16], strides = [1, 1]} : vector<16x192xf32> to vector<16x16xf32>
    %794 = arith.mulf %791, %791 : vector<16x16xf32>
    %cst_329 = arith.constant dense<0.000000e+00> : vector<16xf32>
    %795 = vector.multi_reduction <add>, %794, %cst_329 [1] : vector<16x16xf32> to vector<16xf32>
    %796 = vector.shape_cast %795 : vector<16xf32> to vector<16x1xf32>
    %cst_330 = arith.constant 1.000000e-24 : f32
    %797 = vector.broadcast %cst_330 : f32 to vector<16x1xf32>
    %798 = arith.maximumf %796, %797 : vector<16x1xf32>
    %799 = math.rsqrt %798 : vector<16x1xf32>
    %800 = vector.broadcast %799 : vector<16x1xf32> to vector<16x16xf32>
    %801 = arith.mulf %791, %800 : vector<16x16xf32>
    %802 = arith.mulf %792, %792 : vector<16x16xf32>
    %cst_331 = arith.constant dense<0.000000e+00> : vector<16xf32>
    %803 = vector.multi_reduction <add>, %802, %cst_331 [1] : vector<16x16xf32> to vector<16xf32>
    %804 = vector.shape_cast %803 : vector<16xf32> to vector<16x1xf32>
    %cst_332 = arith.constant 1.000000e-24 : f32
    %805 = vector.broadcast %cst_332 : f32 to vector<16x1xf32>
    %806 = arith.maximumf %804, %805 : vector<16x1xf32>
    %807 = math.rsqrt %806 : vector<16x1xf32>
    %808 = vector.broadcast %807 : vector<16x1xf32> to vector<16x16xf32>
    %809 = arith.mulf %792, %808 : vector<16x16xf32>
    %c13 = arith.constant 13 : index
    %810 = memref.load %arg1[%c13] : memref<16xf32, #tpu.memory_space<smem>>
    %811 = vector.broadcast %810 : f32 to vector<16x16xf32>
    %812 = arith.mulf %801, %811 : vector<16x16xf32>
    %813 = arith.truncf %812 : vector<16x16xf32> to vector<16x16xbf16>
    %814 = arith.truncf %809 : vector<16x16xf32> to vector<16x16xbf16>
    %cst_333 = arith.constant dense<0.000000e+00> : vector<16x16xf32>
    %815 = tpu.matmul %813, %814, %cst_333 {dimension_numbers = #tpu.dot_dimension_numbers<[1], [1], [0], [0], [0, 0, 1, 0], [], []>} : vector<16x16xbf16>, vector<16x16xbf16>, vector<16x16xf32> -> vector<16x16xf32>
    %c1_334 = arith.constant 1 : index
    %c0_335 = arith.constant 0 : index
    %c0_336 = arith.constant 0 : index
    %816 = vector.load %arg50[%c1_334, %c0_335, %c0_336] : memref<4x16x16xf32, #tpu.memory_space<vmem>>, vector<1x16x16xf32>
    %817 = vector.shape_cast %816 : vector<1x16x16xf32> to vector<16x16xf32>
    %818 = arith.addf %815, %817 : vector<16x16xf32>
    %cst_337 = arith.constant dense<0xFF800000> : vector<16xf32>
    %819 = vector.multi_reduction <maximumf>, %818, %cst_337 [1] : vector<16x16xf32> to vector<16xf32>
    %820 = vector.shape_cast %819 : vector<16xf32> to vector<16x1xf32>
    %821 = vector.broadcast %820 : vector<16x1xf32> to vector<16x16xf32>
    %822 = arith.subf %818, %821 : vector<16x16xf32>
    %823 = math.exp %822 : vector<16x16xf32>
    %cst_338 = arith.constant dense<0.000000e+00> : vector<16xf32>
    %824 = vector.multi_reduction <add>, %823, %cst_338 [1] : vector<16x16xf32> to vector<16xf32>
    %825 = vector.shape_cast %824 : vector<16xf32> to vector<16x1xf32>
    %826 = vector.broadcast %825 : vector<16x1xf32> to vector<16x16xf32>
    %827 = arith.divf %823, %826 : vector<16x16xf32>
    %828 = arith.truncf %827 : vector<16x16xf32> to vector<16x16xbf16>
    %829 = arith.truncf %793 : vector<16x16xf32> to vector<16x16xbf16>
    %cst_339 = arith.constant dense<0.000000e+00> : vector<16x16xf32>
    %830 = tpu.matmul %828, %829, %cst_339 {dimension_numbers = #tpu.dot_dimension_numbers<[1], [0], [0], [1], [0, 0, 1, 1], [], []>} : vector<16x16xbf16>, vector<16x16xbf16>, vector<16x16xf32> -> vector<16x16xf32>
    %831 = vector.extract_strided_slice %750 {offsets = [0, 32], sizes = [16, 16], strides = [1, 1]} : vector<16x192xf32> to vector<16x16xf32>
    %832 = vector.extract_strided_slice %750 {offsets = [0, 96], sizes = [16, 16], strides = [1, 1]} : vector<16x192xf32> to vector<16x16xf32>
    %833 = vector.extract_strided_slice %750 {offsets = [0, 160], sizes = [16, 16], strides = [1, 1]} : vector<16x192xf32> to vector<16x16xf32>
    %834 = arith.mulf %831, %831 : vector<16x16xf32>
    %cst_340 = arith.constant dense<0.000000e+00> : vector<16xf32>
    %835 = vector.multi_reduction <add>, %834, %cst_340 [1] : vector<16x16xf32> to vector<16xf32>
    %836 = vector.shape_cast %835 : vector<16xf32> to vector<16x1xf32>
    %cst_341 = arith.constant 1.000000e-24 : f32
    %837 = vector.broadcast %cst_341 : f32 to vector<16x1xf32>
    %838 = arith.maximumf %836, %837 : vector<16x1xf32>
    %839 = math.rsqrt %838 : vector<16x1xf32>
    %840 = vector.broadcast %839 : vector<16x1xf32> to vector<16x16xf32>
    %841 = arith.mulf %831, %840 : vector<16x16xf32>
    %842 = arith.mulf %832, %832 : vector<16x16xf32>
    %cst_342 = arith.constant dense<0.000000e+00> : vector<16xf32>
    %843 = vector.multi_reduction <add>, %842, %cst_342 [1] : vector<16x16xf32> to vector<16xf32>
    %844 = vector.shape_cast %843 : vector<16xf32> to vector<16x1xf32>
    %cst_343 = arith.constant 1.000000e-24 : f32
    %845 = vector.broadcast %cst_343 : f32 to vector<16x1xf32>
    %846 = arith.maximumf %844, %845 : vector<16x1xf32>
    %847 = math.rsqrt %846 : vector<16x1xf32>
    %848 = vector.broadcast %847 : vector<16x1xf32> to vector<16x16xf32>
    %849 = arith.mulf %832, %848 : vector<16x16xf32>
    %c14 = arith.constant 14 : index
    %850 = memref.load %arg1[%c14] : memref<16xf32, #tpu.memory_space<smem>>
    %851 = vector.broadcast %850 : f32 to vector<16x16xf32>
    %852 = arith.mulf %841, %851 : vector<16x16xf32>
    %853 = arith.truncf %852 : vector<16x16xf32> to vector<16x16xbf16>
    %854 = arith.truncf %849 : vector<16x16xf32> to vector<16x16xbf16>
    %cst_344 = arith.constant dense<0.000000e+00> : vector<16x16xf32>
    %855 = tpu.matmul %853, %854, %cst_344 {dimension_numbers = #tpu.dot_dimension_numbers<[1], [1], [0], [0], [0, 0, 1, 0], [], []>} : vector<16x16xbf16>, vector<16x16xbf16>, vector<16x16xf32> -> vector<16x16xf32>
    %c2_345 = arith.constant 2 : index
    %c0_346 = arith.constant 0 : index
    %c0_347 = arith.constant 0 : index
    %856 = vector.load %arg50[%c2_345, %c0_346, %c0_347] : memref<4x16x16xf32, #tpu.memory_space<vmem>>, vector<1x16x16xf32>
    %857 = vector.shape_cast %856 : vector<1x16x16xf32> to vector<16x16xf32>
    %858 = arith.addf %855, %857 : vector<16x16xf32>
    %cst_348 = arith.constant dense<0xFF800000> : vector<16xf32>
    %859 = vector.multi_reduction <maximumf>, %858, %cst_348 [1] : vector<16x16xf32> to vector<16xf32>
    %860 = vector.shape_cast %859 : vector<16xf32> to vector<16x1xf32>
    %861 = vector.broadcast %860 : vector<16x1xf32> to vector<16x16xf32>
    %862 = arith.subf %858, %861 : vector<16x16xf32>
    %863 = math.exp %862 : vector<16x16xf32>
    %cst_349 = arith.constant dense<0.000000e+00> : vector<16xf32>
    %864 = vector.multi_reduction <add>, %863, %cst_349 [1] : vector<16x16xf32> to vector<16xf32>
    %865 = vector.shape_cast %864 : vector<16xf32> to vector<16x1xf32>
    %866 = vector.broadcast %865 : vector<16x1xf32> to vector<16x16xf32>
    %867 = arith.divf %863, %866 : vector<16x16xf32>
    %868 = arith.truncf %867 : vector<16x16xf32> to vector<16x16xbf16>
    %869 = arith.truncf %833 : vector<16x16xf32> to vector<16x16xbf16>
    %cst_350 = arith.constant dense<0.000000e+00> : vector<16x16xf32>
    %870 = tpu.matmul %868, %869, %cst_350 {dimension_numbers = #tpu.dot_dimension_numbers<[1], [0], [0], [1], [0, 0, 1, 1], [], []>} : vector<16x16xbf16>, vector<16x16xbf16>, vector<16x16xf32> -> vector<16x16xf32>
    %871 = vector.extract_strided_slice %750 {offsets = [0, 48], sizes = [16, 16], strides = [1, 1]} : vector<16x192xf32> to vector<16x16xf32>
    %872 = vector.extract_strided_slice %750 {offsets = [0, 112], sizes = [16, 16], strides = [1, 1]} : vector<16x192xf32> to vector<16x16xf32>
    %873 = vector.extract_strided_slice %750 {offsets = [0, 176], sizes = [16, 16], strides = [1, 1]} : vector<16x192xf32> to vector<16x16xf32>
    %874 = arith.mulf %871, %871 : vector<16x16xf32>
    %cst_351 = arith.constant dense<0.000000e+00> : vector<16xf32>
    %875 = vector.multi_reduction <add>, %874, %cst_351 [1] : vector<16x16xf32> to vector<16xf32>
    %876 = vector.shape_cast %875 : vector<16xf32> to vector<16x1xf32>
    %cst_352 = arith.constant 1.000000e-24 : f32
    %877 = vector.broadcast %cst_352 : f32 to vector<16x1xf32>
    %878 = arith.maximumf %876, %877 : vector<16x1xf32>
    %879 = math.rsqrt %878 : vector<16x1xf32>
    %880 = vector.broadcast %879 : vector<16x1xf32> to vector<16x16xf32>
    %881 = arith.mulf %871, %880 : vector<16x16xf32>
    %882 = arith.mulf %872, %872 : vector<16x16xf32>
    %cst_353 = arith.constant dense<0.000000e+00> : vector<16xf32>
    %883 = vector.multi_reduction <add>, %882, %cst_353 [1] : vector<16x16xf32> to vector<16xf32>
    %884 = vector.shape_cast %883 : vector<16xf32> to vector<16x1xf32>
    %cst_354 = arith.constant 1.000000e-24 : f32
    %885 = vector.broadcast %cst_354 : f32 to vector<16x1xf32>
    %886 = arith.maximumf %884, %885 : vector<16x1xf32>
    %887 = math.rsqrt %886 : vector<16x1xf32>
    %888 = vector.broadcast %887 : vector<16x1xf32> to vector<16x16xf32>
    %889 = arith.mulf %872, %888 : vector<16x16xf32>
    %c15 = arith.constant 15 : index
    %890 = memref.load %arg1[%c15] : memref<16xf32, #tpu.memory_space<smem>>
    %891 = vector.broadcast %890 : f32 to vector<16x16xf32>
    %892 = arith.mulf %881, %891 : vector<16x16xf32>
    %893 = arith.truncf %892 : vector<16x16xf32> to vector<16x16xbf16>
    %894 = arith.truncf %889 : vector<16x16xf32> to vector<16x16xbf16>
    %cst_355 = arith.constant dense<0.000000e+00> : vector<16x16xf32>
    %895 = tpu.matmul %893, %894, %cst_355 {dimension_numbers = #tpu.dot_dimension_numbers<[1], [1], [0], [0], [0, 0, 1, 0], [], []>} : vector<16x16xbf16>, vector<16x16xbf16>, vector<16x16xf32> -> vector<16x16xf32>
    %c3_356 = arith.constant 3 : index
    %c0_357 = arith.constant 0 : index
    %c0_358 = arith.constant 0 : index
    %896 = vector.load %arg50[%c3_356, %c0_357, %c0_358] : memref<4x16x16xf32, #tpu.memory_space<vmem>>, vector<1x16x16xf32>
    %897 = vector.shape_cast %896 : vector<1x16x16xf32> to vector<16x16xf32>
    %898 = arith.addf %895, %897 : vector<16x16xf32>
    %cst_359 = arith.constant dense<0xFF800000> : vector<16xf32>
    %899 = vector.multi_reduction <maximumf>, %898, %cst_359 [1] : vector<16x16xf32> to vector<16xf32>
    %900 = vector.shape_cast %899 : vector<16xf32> to vector<16x1xf32>
    %901 = vector.broadcast %900 : vector<16x1xf32> to vector<16x16xf32>
    %902 = arith.subf %898, %901 : vector<16x16xf32>
    %903 = math.exp %902 : vector<16x16xf32>
    %cst_360 = arith.constant dense<0.000000e+00> : vector<16xf32>
    %904 = vector.multi_reduction <add>, %903, %cst_360 [1] : vector<16x16xf32> to vector<16xf32>
    %905 = vector.shape_cast %904 : vector<16xf32> to vector<16x1xf32>
    %906 = vector.broadcast %905 : vector<16x1xf32> to vector<16x16xf32>
    %907 = arith.divf %903, %906 : vector<16x16xf32>
    %908 = arith.truncf %907 : vector<16x16xf32> to vector<16x16xbf16>
    %909 = arith.truncf %873 : vector<16x16xf32> to vector<16x16xbf16>
    %cst_361 = arith.constant dense<0.000000e+00> : vector<16x16xf32>
    %910 = tpu.matmul %908, %909, %cst_361 {dimension_numbers = #tpu.dot_dimension_numbers<[1], [0], [0], [1], [0, 0, 1, 1], [], []>} : vector<16x16xbf16>, vector<16x16xbf16>, vector<16x16xf32> -> vector<16x16xf32>
    %911 = tpu.concatenate %790, %830, %870, %910 in 1 : vector<16x16xf32>, vector<16x16xf32>, vector<16x16xf32>, vector<16x16xf32> -> vector<16x64xf32>
    %912 = arith.truncf %911 : vector<16x64xf32> to vector<16x64xbf16>
    %cst_362 = arith.constant dense<0.000000e+00> : vector<16x64xf32>
    %913 = tpu.matmul %912, %737, %cst_362 {dimension_numbers = #tpu.dot_dimension_numbers<[1], [0], [0], [1], [0, 0, 1, 1], [], []>} : vector<16x64xbf16>, vector<64x64xbf16>, vector<16x64xf32> -> vector<16x64xf32>
    %914 = vector.broadcast %738 : vector<1x64xf32> to vector<16x64xf32>
    %915 = arith.addf %913, %914 : vector<16x64xf32>
    %cst_363 = arith.constant dense<0.000000e+00> : vector<16xf32>
    %916 = vector.multi_reduction <add>, %915, %cst_363 [1] : vector<16x64xf32> to vector<16xf32>
    %917 = vector.shape_cast %916 : vector<16xf32> to vector<16x1xf32>
    %cst_364 = arith.constant 6.400000e+01 : f32
    %918 = vector.broadcast %cst_364 : f32 to vector<16x1xf32>
    %919 = arith.divf %917, %918 : vector<16x1xf32>
    %920 = vector.broadcast %919 : vector<16x1xf32> to vector<16x64xf32>
    %921 = arith.subf %915, %920 : vector<16x64xf32>
    %922 = arith.mulf %921, %921 : vector<16x64xf32>
    %cst_365 = arith.constant dense<0.000000e+00> : vector<16xf32>
    %923 = vector.multi_reduction <add>, %922, %cst_365 [1] : vector<16x64xf32> to vector<16xf32>
    %924 = vector.shape_cast %923 : vector<16xf32> to vector<16x1xf32>
    %cst_366 = arith.constant 6.400000e+01 : f32
    %925 = vector.broadcast %cst_366 : f32 to vector<16x1xf32>
    %926 = arith.divf %924, %925 : vector<16x1xf32>
    %cst_367 = arith.constant 9.99999974E-6 : f32
    %927 = vector.broadcast %cst_367 : f32 to vector<16x1xf32>
    %928 = arith.addf %926, %927 : vector<16x1xf32>
    %929 = math.rsqrt %928 : vector<16x1xf32>
    %930 = vector.broadcast %929 : vector<16x1xf32> to vector<16x64xf32>
    %931 = arith.mulf %921, %930 : vector<16x64xf32>
    %932 = vector.broadcast %739 : vector<1x64xf32> to vector<16x64xf32>
    %933 = arith.mulf %931, %932 : vector<16x64xf32>
    %934 = vector.broadcast %740 : vector<1x64xf32> to vector<16x64xf32>
    %935 = arith.addf %933, %934 : vector<16x64xf32>
    %936 = arith.addf %734, %935 : vector<16x64xf32>
    %937 = arith.truncf %936 : vector<16x64xf32> to vector<16x64xbf16>
    %cst_368 = arith.constant dense<0.000000e+00> : vector<16x256xf32>
    %938 = tpu.matmul %937, %741, %cst_368 {dimension_numbers = #tpu.dot_dimension_numbers<[1], [0], [0], [1], [0, 0, 1, 1], [], []>} : vector<16x64xbf16>, vector<64x256xbf16>, vector<16x256xf32> -> vector<16x256xf32>
    %939 = vector.broadcast %742 : vector<1x256xf32> to vector<16x256xf32>
    %940 = arith.addf %938, %939 : vector<16x256xf32>
    %cst_369 = arith.constant 5.000000e-01 : f32
    %941 = vector.broadcast %cst_369 : f32 to vector<16x256xf32>
    %942 = arith.mulf %941, %940 : vector<16x256xf32>
    %cst_370 = arith.constant 0.707106769 : f32
    %943 = vector.broadcast %cst_370 : f32 to vector<16x256xf32>
    %944 = arith.mulf %940, %943 : vector<16x256xf32>
    %945 = math.absf %944 : vector<16x256xf32>
    %cst_371 = arith.constant 0.327591091 : f32
    %946 = vector.broadcast %cst_371 : f32 to vector<16x256xf32>
    %947 = arith.mulf %946, %945 : vector<16x256xf32>
    %cst_372 = arith.constant 1.000000e+00 : f32
    %948 = vector.broadcast %cst_372 : f32 to vector<16x256xf32>
    %949 = arith.addf %948, %947 : vector<16x256xf32>
    %cst_373 = arith.constant 1.000000e+00 : f32
    %950 = vector.broadcast %cst_373 : f32 to vector<16x256xf32>
    %951 = arith.divf %950, %949 : vector<16x256xf32>
    %cst_374 = arith.constant 1.06140542 : f32
    %952 = vector.broadcast %cst_374 : f32 to vector<16x256xf32>
    %953 = arith.mulf %952, %951 : vector<16x256xf32>
    %cst_375 = arith.constant -1.45315206 : f32
    %954 = vector.broadcast %cst_375 : f32 to vector<16x256xf32>
    %955 = arith.addf %953, %954 : vector<16x256xf32>
    %956 = arith.mulf %955, %951 : vector<16x256xf32>
    %cst_376 = arith.constant 1.42141378 : f32
    %957 = vector.broadcast %cst_376 : f32 to vector<16x256xf32>
    %958 = arith.addf %956, %957 : vector<16x256xf32>
    %959 = arith.mulf %958, %951 : vector<16x256xf32>
    %cst_377 = arith.constant -0.284496725 : f32
    %960 = vector.broadcast %cst_377 : f32 to vector<16x256xf32>
    %961 = arith.addf %959, %960 : vector<16x256xf32>
    %962 = arith.mulf %961, %951 : vector<16x256xf32>
    %cst_378 = arith.constant 0.254829586 : f32
    %963 = vector.broadcast %cst_378 : f32 to vector<16x256xf32>
    %964 = arith.addf %962, %963 : vector<16x256xf32>
    %965 = arith.mulf %964, %951 : vector<16x256xf32>
    %cst_379 = arith.constant 0.000000e+00 : f32
    %966 = vector.broadcast %cst_379 : f32 to vector<16x256xf32>
    %967 = arith.subf %966, %945 : vector<16x256xf32>
    %968 = arith.mulf %967, %945 : vector<16x256xf32>
    %969 = math.exp %968 : vector<16x256xf32>
    %970 = arith.mulf %965, %969 : vector<16x256xf32>
    %cst_380 = arith.constant 1.000000e+00 : f32
    %971 = vector.broadcast %cst_380 : f32 to vector<16x256xf32>
    %972 = arith.subf %971, %970 : vector<16x256xf32>
    %cst_381 = arith.constant 0.000000e+00 : f32
    %973 = vector.broadcast %cst_381 : f32 to vector<16x256xf32>
    %974 = arith.cmpf oge, %944, %973 : vector<16x256xf32>
    %cst_382 = arith.constant 0.000000e+00 : f32
    %975 = vector.broadcast %cst_382 : f32 to vector<16x256xf32>
    %976 = arith.subf %975, %972 : vector<16x256xf32>
    %977 = arith.select %974, %972, %976 : vector<16x256xi1>, vector<16x256xf32>
    %cst_383 = arith.constant 1.000000e+00 : f32
    %978 = vector.broadcast %cst_383 : f32 to vector<16x256xf32>
    %979 = arith.addf %978, %977 : vector<16x256xf32>
    %980 = arith.mulf %942, %979 : vector<16x256xf32>
    %981 = arith.truncf %980 : vector<16x256xf32> to vector<16x256xbf16>
    %cst_384 = arith.constant dense<0.000000e+00> : vector<16x64xf32>
    %982 = tpu.matmul %981, %743, %cst_384 {dimension_numbers = #tpu.dot_dimension_numbers<[1], [0], [0], [1], [0, 0, 1, 1], [], []>} : vector<16x256xbf16>, vector<256x64xbf16>, vector<16x64xf32> -> vector<16x64xf32>
    %983 = vector.broadcast %744 : vector<1x64xf32> to vector<16x64xf32>
    %984 = arith.addf %982, %983 : vector<16x64xf32>
    %cst_385 = arith.constant dense<0.000000e+00> : vector<16xf32>
    %985 = vector.multi_reduction <add>, %984, %cst_385 [1] : vector<16x64xf32> to vector<16xf32>
    %986 = vector.shape_cast %985 : vector<16xf32> to vector<16x1xf32>
    %cst_386 = arith.constant 6.400000e+01 : f32
    %987 = vector.broadcast %cst_386 : f32 to vector<16x1xf32>
    %988 = arith.divf %986, %987 : vector<16x1xf32>
    %989 = vector.broadcast %988 : vector<16x1xf32> to vector<16x64xf32>
    %990 = arith.subf %984, %989 : vector<16x64xf32>
    %991 = arith.mulf %990, %990 : vector<16x64xf32>
    %cst_387 = arith.constant dense<0.000000e+00> : vector<16xf32>
    %992 = vector.multi_reduction <add>, %991, %cst_387 [1] : vector<16x64xf32> to vector<16xf32>
    %993 = vector.shape_cast %992 : vector<16xf32> to vector<16x1xf32>
    %cst_388 = arith.constant 6.400000e+01 : f32
    %994 = vector.broadcast %cst_388 : f32 to vector<16x1xf32>
    %995 = arith.divf %993, %994 : vector<16x1xf32>
    %cst_389 = arith.constant 9.99999974E-6 : f32
    %996 = vector.broadcast %cst_389 : f32 to vector<16x1xf32>
    %997 = arith.addf %995, %996 : vector<16x1xf32>
    %998 = math.rsqrt %997 : vector<16x1xf32>
    %999 = vector.broadcast %998 : vector<16x1xf32> to vector<16x64xf32>
    %1000 = arith.mulf %990, %999 : vector<16x64xf32>
    %1001 = vector.broadcast %745 : vector<1x64xf32> to vector<16x64xf32>
    %1002 = arith.mulf %1000, %1001 : vector<16x64xf32>
    %1003 = vector.broadcast %746 : vector<1x64xf32> to vector<16x64xf32>
    %1004 = arith.addf %1002, %1003 : vector<16x64xf32>
    %1005 = arith.addf %936, %1004 : vector<16x64xf32>
    %c0_390 = arith.constant 0 : index
    %c0_391 = arith.constant 0 : index
    %1006 = vector.load %arg63[%c0_390, %c0_391] : memref<1x64xf32, #tpu.memory_space<vmem>>, vector<1x64xf32>
    %c0_392 = arith.constant 0 : index
    %c0_393 = arith.constant 0 : index
    %1007 = vector.load %arg64[%c0_392, %c0_393] : memref<1x64xf32, #tpu.memory_space<vmem>>, vector<1x64xf32>
    %cst_394 = arith.constant dense<0.000000e+00> : vector<16xf32>
    %1008 = vector.multi_reduction <add>, %1005, %cst_394 [1] : vector<16x64xf32> to vector<16xf32>
    %1009 = vector.shape_cast %1008 : vector<16xf32> to vector<16x1xf32>
    %cst_395 = arith.constant 6.400000e+01 : f32
    %1010 = vector.broadcast %cst_395 : f32 to vector<16x1xf32>
    %1011 = arith.divf %1009, %1010 : vector<16x1xf32>
    %1012 = vector.broadcast %1011 : vector<16x1xf32> to vector<16x64xf32>
    %1013 = arith.subf %1005, %1012 : vector<16x64xf32>
    %1014 = arith.mulf %1013, %1013 : vector<16x64xf32>
    %cst_396 = arith.constant dense<0.000000e+00> : vector<16xf32>
    %1015 = vector.multi_reduction <add>, %1014, %cst_396 [1] : vector<16x64xf32> to vector<16xf32>
    %1016 = vector.shape_cast %1015 : vector<16xf32> to vector<16x1xf32>
    %cst_397 = arith.constant 6.400000e+01 : f32
    %1017 = vector.broadcast %cst_397 : f32 to vector<16x1xf32>
    %1018 = arith.divf %1016, %1017 : vector<16x1xf32>
    %cst_398 = arith.constant 9.99999974E-6 : f32
    %1019 = vector.broadcast %cst_398 : f32 to vector<16x1xf32>
    %1020 = arith.addf %1018, %1019 : vector<16x1xf32>
    %1021 = math.rsqrt %1020 : vector<16x1xf32>
    %1022 = vector.broadcast %1021 : vector<16x1xf32> to vector<16x64xf32>
    %1023 = arith.mulf %1013, %1022 : vector<16x64xf32>
    %1024 = vector.broadcast %1006 : vector<1x64xf32> to vector<16x64xf32>
    %1025 = arith.mulf %1023, %1024 : vector<16x64xf32>
    %1026 = vector.broadcast %1007 : vector<1x64xf32> to vector<16x64xf32>
    %1027 = arith.addf %1025, %1026 : vector<16x64xf32>
    %c0_399 = arith.constant 0 : index
    %c0_400 = arith.constant 0 : index
    %1028 = vector.load %arg66[%c0_399, %c0_400] : memref<1x128xf32, #tpu.memory_space<vmem>>, vector<1x128xf32>
    %1029 = arith.truncf %1027 : vector<16x64xf32> to vector<16x64xbf16>
    %1030 = vector.extract_strided_slice %1029 {offsets = [0, 0], sizes = [1, 64], strides = [1, 1]} : vector<16x64xbf16> to vector<1x64xbf16>
    %c0_401 = arith.constant 0 : index
    %c0_402 = arith.constant 0 : index
    %1031 = vector.load %arg65[%c0_401, %c0_402] : memref<1024x128xbf16, #tpu.memory_space<vmem>>, vector<64x128xbf16>
    %cst_403 = arith.constant dense<0.000000e+00> : vector<1x128xf32>
    %1032 = tpu.matmul %1030, %1031, %cst_403 {dimension_numbers = #tpu.dot_dimension_numbers<[1], [0], [0], [1], [0, 0, 1, 1], [], []>} : vector<1x64xbf16>, vector<64x128xbf16>, vector<1x128xf32> -> vector<1x128xf32>
    %1033 = arith.addf %1028, %1032 : vector<1x128xf32>
    %1034 = vector.extract_strided_slice %1029 {offsets = [1, 0], sizes = [1, 64], strides = [1, 1]} : vector<16x64xbf16> to vector<1x64xbf16>
    %c64 = arith.constant 64 : index
    %c0_404 = arith.constant 0 : index
    %1035 = vector.load %arg65[%c64, %c0_404] : memref<1024x128xbf16, #tpu.memory_space<vmem>>, vector<64x128xbf16>
    %cst_405 = arith.constant dense<0.000000e+00> : vector<1x128xf32>
    %1036 = tpu.matmul %1034, %1035, %cst_405 {dimension_numbers = #tpu.dot_dimension_numbers<[1], [0], [0], [1], [0, 0, 1, 1], [], []>} : vector<1x64xbf16>, vector<64x128xbf16>, vector<1x128xf32> -> vector<1x128xf32>
    %1037 = arith.addf %1033, %1036 : vector<1x128xf32>
    %1038 = vector.extract_strided_slice %1029 {offsets = [2, 0], sizes = [1, 64], strides = [1, 1]} : vector<16x64xbf16> to vector<1x64xbf16>
    %c128 = arith.constant 128 : index
    %c0_406 = arith.constant 0 : index
    %1039 = vector.load %arg65[%c128, %c0_406] : memref<1024x128xbf16, #tpu.memory_space<vmem>>, vector<64x128xbf16>
    %cst_407 = arith.constant dense<0.000000e+00> : vector<1x128xf32>
    %1040 = tpu.matmul %1038, %1039, %cst_407 {dimension_numbers = #tpu.dot_dimension_numbers<[1], [0], [0], [1], [0, 0, 1, 1], [], []>} : vector<1x64xbf16>, vector<64x128xbf16>, vector<1x128xf32> -> vector<1x128xf32>
    %1041 = arith.addf %1037, %1040 : vector<1x128xf32>
    %1042 = vector.extract_strided_slice %1029 {offsets = [3, 0], sizes = [1, 64], strides = [1, 1]} : vector<16x64xbf16> to vector<1x64xbf16>
    %c192 = arith.constant 192 : index
    %c0_408 = arith.constant 0 : index
    %1043 = vector.load %arg65[%c192, %c0_408] : memref<1024x128xbf16, #tpu.memory_space<vmem>>, vector<64x128xbf16>
    %cst_409 = arith.constant dense<0.000000e+00> : vector<1x128xf32>
    %1044 = tpu.matmul %1042, %1043, %cst_409 {dimension_numbers = #tpu.dot_dimension_numbers<[1], [0], [0], [1], [0, 0, 1, 1], [], []>} : vector<1x64xbf16>, vector<64x128xbf16>, vector<1x128xf32> -> vector<1x128xf32>
    %1045 = arith.addf %1041, %1044 : vector<1x128xf32>
    %1046 = vector.extract_strided_slice %1029 {offsets = [4, 0], sizes = [1, 64], strides = [1, 1]} : vector<16x64xbf16> to vector<1x64xbf16>
    %c256 = arith.constant 256 : index
    %c0_410 = arith.constant 0 : index
    %1047 = vector.load %arg65[%c256, %c0_410] : memref<1024x128xbf16, #tpu.memory_space<vmem>>, vector<64x128xbf16>
    %cst_411 = arith.constant dense<0.000000e+00> : vector<1x128xf32>
    %1048 = tpu.matmul %1046, %1047, %cst_411 {dimension_numbers = #tpu.dot_dimension_numbers<[1], [0], [0], [1], [0, 0, 1, 1], [], []>} : vector<1x64xbf16>, vector<64x128xbf16>, vector<1x128xf32> -> vector<1x128xf32>
    %1049 = arith.addf %1045, %1048 : vector<1x128xf32>
    %1050 = vector.extract_strided_slice %1029 {offsets = [5, 0], sizes = [1, 64], strides = [1, 1]} : vector<16x64xbf16> to vector<1x64xbf16>
    %c320 = arith.constant 320 : index
    %c0_412 = arith.constant 0 : index
    %1051 = vector.load %arg65[%c320, %c0_412] : memref<1024x128xbf16, #tpu.memory_space<vmem>>, vector<64x128xbf16>
    %cst_413 = arith.constant dense<0.000000e+00> : vector<1x128xf32>
    %1052 = tpu.matmul %1050, %1051, %cst_413 {dimension_numbers = #tpu.dot_dimension_numbers<[1], [0], [0], [1], [0, 0, 1, 1], [], []>} : vector<1x64xbf16>, vector<64x128xbf16>, vector<1x128xf32> -> vector<1x128xf32>
    %1053 = arith.addf %1049, %1052 : vector<1x128xf32>
    %1054 = vector.extract_strided_slice %1029 {offsets = [6, 0], sizes = [1, 64], strides = [1, 1]} : vector<16x64xbf16> to vector<1x64xbf16>
    %c384 = arith.constant 384 : index
    %c0_414 = arith.constant 0 : index
    %1055 = vector.load %arg65[%c384, %c0_414] : memref<1024x128xbf16, #tpu.memory_space<vmem>>, vector<64x128xbf16>
    %cst_415 = arith.constant dense<0.000000e+00> : vector<1x128xf32>
    %1056 = tpu.matmul %1054, %1055, %cst_415 {dimension_numbers = #tpu.dot_dimension_numbers<[1], [0], [0], [1], [0, 0, 1, 1], [], []>} : vector<1x64xbf16>, vector<64x128xbf16>, vector<1x128xf32> -> vector<1x128xf32>
    %1057 = arith.addf %1053, %1056 : vector<1x128xf32>
    %1058 = vector.extract_strided_slice %1029 {offsets = [7, 0], sizes = [1, 64], strides = [1, 1]} : vector<16x64xbf16> to vector<1x64xbf16>
    %c448 = arith.constant 448 : index
    %c0_416 = arith.constant 0 : index
    %1059 = vector.load %arg65[%c448, %c0_416] : memref<1024x128xbf16, #tpu.memory_space<vmem>>, vector<64x128xbf16>
    %cst_417 = arith.constant dense<0.000000e+00> : vector<1x128xf32>
    %1060 = tpu.matmul %1058, %1059, %cst_417 {dimension_numbers = #tpu.dot_dimension_numbers<[1], [0], [0], [1], [0, 0, 1, 1], [], []>} : vector<1x64xbf16>, vector<64x128xbf16>, vector<1x128xf32> -> vector<1x128xf32>
    %1061 = arith.addf %1057, %1060 : vector<1x128xf32>
    %1062 = vector.extract_strided_slice %1029 {offsets = [8, 0], sizes = [1, 64], strides = [1, 1]} : vector<16x64xbf16> to vector<1x64xbf16>
    %c512 = arith.constant 512 : index
    %c0_418 = arith.constant 0 : index
    %1063 = vector.load %arg65[%c512, %c0_418] : memref<1024x128xbf16, #tpu.memory_space<vmem>>, vector<64x128xbf16>
    %cst_419 = arith.constant dense<0.000000e+00> : vector<1x128xf32>
    %1064 = tpu.matmul %1062, %1063, %cst_419 {dimension_numbers = #tpu.dot_dimension_numbers<[1], [0], [0], [1], [0, 0, 1, 1], [], []>} : vector<1x64xbf16>, vector<64x128xbf16>, vector<1x128xf32> -> vector<1x128xf32>
    %1065 = arith.addf %1061, %1064 : vector<1x128xf32>
    %1066 = vector.extract_strided_slice %1029 {offsets = [9, 0], sizes = [1, 64], strides = [1, 1]} : vector<16x64xbf16> to vector<1x64xbf16>
    %c576 = arith.constant 576 : index
    %c0_420 = arith.constant 0 : index
    %1067 = vector.load %arg65[%c576, %c0_420] : memref<1024x128xbf16, #tpu.memory_space<vmem>>, vector<64x128xbf16>
    %cst_421 = arith.constant dense<0.000000e+00> : vector<1x128xf32>
    %1068 = tpu.matmul %1066, %1067, %cst_421 {dimension_numbers = #tpu.dot_dimension_numbers<[1], [0], [0], [1], [0, 0, 1, 1], [], []>} : vector<1x64xbf16>, vector<64x128xbf16>, vector<1x128xf32> -> vector<1x128xf32>
    %1069 = arith.addf %1065, %1068 : vector<1x128xf32>
    %1070 = vector.extract_strided_slice %1029 {offsets = [10, 0], sizes = [1, 64], strides = [1, 1]} : vector<16x64xbf16> to vector<1x64xbf16>
    %c640 = arith.constant 640 : index
    %c0_422 = arith.constant 0 : index
    %1071 = vector.load %arg65[%c640, %c0_422] : memref<1024x128xbf16, #tpu.memory_space<vmem>>, vector<64x128xbf16>
    %cst_423 = arith.constant dense<0.000000e+00> : vector<1x128xf32>
    %1072 = tpu.matmul %1070, %1071, %cst_423 {dimension_numbers = #tpu.dot_dimension_numbers<[1], [0], [0], [1], [0, 0, 1, 1], [], []>} : vector<1x64xbf16>, vector<64x128xbf16>, vector<1x128xf32> -> vector<1x128xf32>
    %1073 = arith.addf %1069, %1072 : vector<1x128xf32>
    %1074 = vector.extract_strided_slice %1029 {offsets = [11, 0], sizes = [1, 64], strides = [1, 1]} : vector<16x64xbf16> to vector<1x64xbf16>
    %c704 = arith.constant 704 : index
    %c0_424 = arith.constant 0 : index
    %1075 = vector.load %arg65[%c704, %c0_424] : memref<1024x128xbf16, #tpu.memory_space<vmem>>, vector<64x128xbf16>
    %cst_425 = arith.constant dense<0.000000e+00> : vector<1x128xf32>
    %1076 = tpu.matmul %1074, %1075, %cst_425 {dimension_numbers = #tpu.dot_dimension_numbers<[1], [0], [0], [1], [0, 0, 1, 1], [], []>} : vector<1x64xbf16>, vector<64x128xbf16>, vector<1x128xf32> -> vector<1x128xf32>
    %1077 = arith.addf %1073, %1076 : vector<1x128xf32>
    %1078 = vector.extract_strided_slice %1029 {offsets = [12, 0], sizes = [1, 64], strides = [1, 1]} : vector<16x64xbf16> to vector<1x64xbf16>
    %c768 = arith.constant 768 : index
    %c0_426 = arith.constant 0 : index
    %1079 = vector.load %arg65[%c768, %c0_426] : memref<1024x128xbf16, #tpu.memory_space<vmem>>, vector<64x128xbf16>
    %cst_427 = arith.constant dense<0.000000e+00> : vector<1x128xf32>
    %1080 = tpu.matmul %1078, %1079, %cst_427 {dimension_numbers = #tpu.dot_dimension_numbers<[1], [0], [0], [1], [0, 0, 1, 1], [], []>} : vector<1x64xbf16>, vector<64x128xbf16>, vector<1x128xf32> -> vector<1x128xf32>
    %1081 = arith.addf %1077, %1080 : vector<1x128xf32>
    %1082 = vector.extract_strided_slice %1029 {offsets = [13, 0], sizes = [1, 64], strides = [1, 1]} : vector<16x64xbf16> to vector<1x64xbf16>
    %c832 = arith.constant 832 : index
    %c0_428 = arith.constant 0 : index
    %1083 = vector.load %arg65[%c832, %c0_428] : memref<1024x128xbf16, #tpu.memory_space<vmem>>, vector<64x128xbf16>
    %cst_429 = arith.constant dense<0.000000e+00> : vector<1x128xf32>
    %1084 = tpu.matmul %1082, %1083, %cst_429 {dimension_numbers = #tpu.dot_dimension_numbers<[1], [0], [0], [1], [0, 0, 1, 1], [], []>} : vector<1x64xbf16>, vector<64x128xbf16>, vector<1x128xf32> -> vector<1x128xf32>
    %1085 = arith.addf %1081, %1084 : vector<1x128xf32>
    %1086 = vector.extract_strided_slice %1029 {offsets = [14, 0], sizes = [1, 64], strides = [1, 1]} : vector<16x64xbf16> to vector<1x64xbf16>
    %c896 = arith.constant 896 : index
    %c0_430 = arith.constant 0 : index
    %1087 = vector.load %arg65[%c896, %c0_430] : memref<1024x128xbf16, #tpu.memory_space<vmem>>, vector<64x128xbf16>
    %cst_431 = arith.constant dense<0.000000e+00> : vector<1x128xf32>
    %1088 = tpu.matmul %1086, %1087, %cst_431 {dimension_numbers = #tpu.dot_dimension_numbers<[1], [0], [0], [1], [0, 0, 1, 1], [], []>} : vector<1x64xbf16>, vector<64x128xbf16>, vector<1x128xf32> -> vector<1x128xf32>
    %1089 = arith.addf %1085, %1088 : vector<1x128xf32>
    %1090 = vector.extract_strided_slice %1029 {offsets = [15, 0], sizes = [1, 64], strides = [1, 1]} : vector<16x64xbf16> to vector<1x64xbf16>
    %c960 = arith.constant 960 : index
    %c0_432 = arith.constant 0 : index
    %1091 = vector.load %arg65[%c960, %c0_432] : memref<1024x128xbf16, #tpu.memory_space<vmem>>, vector<64x128xbf16>
    %cst_433 = arith.constant dense<0.000000e+00> : vector<1x128xf32>
    %1092 = tpu.matmul %1090, %1091, %cst_433 {dimension_numbers = #tpu.dot_dimension_numbers<[1], [0], [0], [1], [0, 0, 1, 1], [], []>} : vector<1x64xbf16>, vector<64x128xbf16>, vector<1x128xf32> -> vector<1x128xf32>
    %1093 = arith.addf %1089, %1092 : vector<1x128xf32>
    %c0_434 = arith.constant 0 : index
    %c0_435 = arith.constant 0 : index
    %c0_436 = arith.constant 0 : index
    %1094 = vector.load %arg67[%c0_434, %c0_435, %c0_436] : memref<1x1x128xf32, #tpu.memory_space<vmem>>, vector<1x1x128xf32>
    %1095 = vector.shape_cast %1094 : vector<1x1x128xf32> to vector<1x128xf32>
    %1096 = vector.shape_cast %1093 : vector<1x128xf32> to vector<1x1x128xf32>
    tpu.vector_store %arg67[%c0_434, %c0_435, %c0_436], %1096 {strides = array<i32>} : memref<1x1x128xf32, #tpu.memory_space<vmem>>, vector<1x1x128xf32>,
    return
  }
  func.func @transform_0(%arg0: i32) -> i32 {
    %c0_i32 = arith.constant 0 : i32
    %c0_i32_0 = arith.constant 0 : i32
    return %c0_i32 : i32
  }
  func.func @transform_1(%arg0: i32) -> (i32, i32, i32) {
    %c0_i32 = arith.constant 0 : i32
    %c0_i32_0 = arith.constant 0 : i32
    %c0_i32_1 = arith.constant 0 : i32
    return %arg0, %c0_i32, %c0_i32_0 : i32, i32, i32
  }
  func.func @transform_2(%arg0: i32) -> (i32, i32) {
    %c0_i32 = arith.constant 0 : i32
    %c0_i32_0 = arith.constant 0 : i32
    %c0_i32_1 = arith.constant 0 : i32
    return %c0_i32, %c0_i32_0 : i32, i32
  }
  func.func @transform_3(%arg0: i32) -> (i32, i32) {
    %c0_i32 = arith.constant 0 : i32
    %c0_i32_0 = arith.constant 0 : i32
    %c0_i32_1 = arith.constant 0 : i32
    return %c0_i32, %c0_i32_0 : i32, i32
  }
  func.func @transform_4(%arg0: i32) -> (i32, i32) {
    %c0_i32 = arith.constant 0 : i32
    %c0_i32_0 = arith.constant 0 : i32
    %c0_i32_1 = arith.constant 0 : i32
    return %c0_i32, %c0_i32_0 : i32, i32
  }
  func.func @transform_5(%arg0: i32) -> (i32, i32) {
    %c0_i32 = arith.constant 0 : i32
    %c0_i32_0 = arith.constant 0 : i32
    %c0_i32_1 = arith.constant 0 : i32
    return %c0_i32, %c0_i32_0 : i32, i32
  }
  func.func @transform_6(%arg0: i32) -> (i32, i32, i32) {
    %c0_i32 = arith.constant 0 : i32
    %c0_i32_0 = arith.constant 0 : i32
    %c0_i32_1 = arith.constant 0 : i32
    %c0_i32_2 = arith.constant 0 : i32
    return %c0_i32, %c0_i32_0, %c0_i32_1 : i32, i32, i32
  }
  func.func @transform_7(%arg0: i32) -> (i32, i32) {
    %c0_i32 = arith.constant 0 : i32
    %c0_i32_0 = arith.constant 0 : i32
    %c0_i32_1 = arith.constant 0 : i32
    return %c0_i32, %c0_i32_0 : i32, i32
  }
  func.func @transform_8(%arg0: i32) -> (i32, i32) {
    %c0_i32 = arith.constant 0 : i32
    %c0_i32_0 = arith.constant 0 : i32
    %c0_i32_1 = arith.constant 0 : i32
    return %c0_i32, %c0_i32_0 : i32, i32
  }
  func.func @transform_9(%arg0: i32) -> (i32, i32) {
    %c0_i32 = arith.constant 0 : i32
    %c0_i32_0 = arith.constant 0 : i32
    %c0_i32_1 = arith.constant 0 : i32
    return %c0_i32, %c0_i32_0 : i32, i32
  }
  func.func @transform_10(%arg0: i32) -> (i32, i32) {
    %c0_i32 = arith.constant 0 : i32
    %c0_i32_0 = arith.constant 0 : i32
    %c0_i32_1 = arith.constant 0 : i32
    return %c0_i32, %c0_i32_0 : i32, i32
  }
  func.func @transform_11(%arg0: i32) -> (i32, i32) {
    %c0_i32 = arith.constant 0 : i32
    %c0_i32_0 = arith.constant 0 : i32
    %c0_i32_1 = arith.constant 0 : i32
    return %c0_i32, %c0_i32_0 : i32, i32
  }
  func.func @transform_12(%arg0: i32) -> (i32, i32) {
    %c0_i32 = arith.constant 0 : i32
    %c0_i32_0 = arith.constant 0 : i32
    %c0_i32_1 = arith.constant 0 : i32
    return %c0_i32, %c0_i32_0 : i32, i32
  }
  func.func @transform_13(%arg0: i32) -> (i32, i32) {
    %c0_i32 = arith.constant 0 : i32
    %c0_i32_0 = arith.constant 0 : i32
    %c0_i32_1 = arith.constant 0 : i32
    return %c0_i32, %c0_i32_0 : i32, i32
  }
  func.func @transform_14(%arg0: i32) -> (i32, i32) {
    %c0_i32 = arith.constant 0 : i32
    %c0_i32_0 = arith.constant 0 : i32
    %c0_i32_1 = arith.constant 0 : i32
    return %c0_i32, %c0_i32_0 : i32, i32
  }
  func.func @transform_15(%arg0: i32) -> (i32, i32) {
    %c0_i32 = arith.constant 0 : i32
    %c0_i32_0 = arith.constant 0 : i32
    %c0_i32_1 = arith.constant 0 : i32
    return %c0_i32, %c0_i32_0 : i32, i32
  }
  func.func @transform_16(%arg0: i32) -> (i32, i32) {
    %c0_i32 = arith.constant 0 : i32
    %c0_i32_0 = arith.constant 0 : i32
    %c0_i32_1 = arith.constant 0 : i32
    return %c0_i32, %c0_i32_0 : i32, i32
  }
  func.func @transform_17(%arg0: i32) -> (i32, i32) {
    %c0_i32 = arith.constant 0 : i32
    %c0_i32_0 = arith.constant 0 : i32
    %c0_i32_1 = arith.constant 0 : i32
    return %c0_i32, %c0_i32_0 : i32, i32
  }
  func.func @transform_18(%arg0: i32) -> (i32, i32) {
    %c0_i32 = arith.constant 0 : i32
    %c0_i32_0 = arith.constant 0 : i32
    %c0_i32_1 = arith.constant 0 : i32
    return %c0_i32, %c0_i32_0 : i32, i32
  }
  func.func @transform_19(%arg0: i32) -> (i32, i32, i32) {
    %c0_i32 = arith.constant 0 : i32
    %c0_i32_0 = arith.constant 0 : i32
    %c0_i32_1 = arith.constant 0 : i32
    %c0_i32_2 = arith.constant 0 : i32
    return %c0_i32, %c0_i32_0, %c0_i32_1 : i32, i32, i32
  }
  func.func @transform_20(%arg0: i32) -> (i32, i32) {
    %c0_i32 = arith.constant 0 : i32
    %c0_i32_0 = arith.constant 0 : i32
    %c0_i32_1 = arith.constant 0 : i32
    return %c0_i32, %c0_i32_0 : i32, i32
  }
  func.func @transform_21(%arg0: i32) -> (i32, i32) {
    %c0_i32 = arith.constant 0 : i32
    %c0_i32_0 = arith.constant 0 : i32
    %c0_i32_1 = arith.constant 0 : i32
    return %c0_i32, %c0_i32_0 : i32, i32
  }
  func.func @transform_22(%arg0: i32) -> (i32, i32) {
    %c0_i32 = arith.constant 0 : i32
    %c0_i32_0 = arith.constant 0 : i32
    %c0_i32_1 = arith.constant 0 : i32
    return %c0_i32, %c0_i32_0 : i32, i32
  }
  func.func @transform_23(%arg0: i32) -> (i32, i32) {
    %c0_i32 = arith.constant 0 : i32
    %c0_i32_0 = arith.constant 0 : i32
    %c0_i32_1 = arith.constant 0 : i32
    return %c0_i32, %c0_i32_0 : i32, i32
  }
  func.func @transform_24(%arg0: i32) -> (i32, i32) {
    %c0_i32 = arith.constant 0 : i32
    %c0_i32_0 = arith.constant 0 : i32
    %c0_i32_1 = arith.constant 0 : i32
    return %c0_i32, %c0_i32_0 : i32, i32
  }
  func.func @transform_25(%arg0: i32) -> (i32, i32) {
    %c0_i32 = arith.constant 0 : i32
    %c0_i32_0 = arith.constant 0 : i32
    %c0_i32_1 = arith.constant 0 : i32
    return %c0_i32, %c0_i32_0 : i32, i32
  }
  func.func @transform_26(%arg0: i32) -> (i32, i32) {
    %c0_i32 = arith.constant 0 : i32
    %c0_i32_0 = arith.constant 0 : i32
    %c0_i32_1 = arith.constant 0 : i32
    return %c0_i32, %c0_i32_0 : i32, i32
  }
  func.func @transform_27(%arg0: i32) -> (i32, i32) {
    %c0_i32 = arith.constant 0 : i32
    %c0_i32_0 = arith.constant 0 : i32
    %c0_i32_1 = arith.constant 0 : i32
    return %c0_i32, %c0_i32_0 : i32, i32
  }
  func.func @transform_28(%arg0: i32) -> (i32, i32) {
    %c0_i32 = arith.constant 0 : i32
    %c0_i32_0 = arith.constant 0 : i32
    %c0_i32_1 = arith.constant 0 : i32
    return %c0_i32, %c0_i32_0 : i32, i32
  }
  func.func @transform_29(%arg0: i32) -> (i32, i32) {
    %c0_i32 = arith.constant 0 : i32
    %c0_i32_0 = arith.constant 0 : i32
    %c0_i32_1 = arith.constant 0 : i32
    return %c0_i32, %c0_i32_0 : i32, i32
  }
  func.func @transform_30(%arg0: i32) -> (i32, i32) {
    %c0_i32 = arith.constant 0 : i32
    %c0_i32_0 = arith.constant 0 : i32
    %c0_i32_1 = arith.constant 0 : i32
    return %c0_i32, %c0_i32_0 : i32, i32
  }
  func.func @transform_31(%arg0: i32) -> (i32, i32) {
    %c0_i32 = arith.constant 0 : i32
    %c0_i32_0 = arith.constant 0 : i32
    %c0_i32_1 = arith.constant 0 : i32
    return %c0_i32, %c0_i32_0 : i32, i32
  }
  func.func @transform_32(%arg0: i32) -> (i32, i32, i32) {
    %c0_i32 = arith.constant 0 : i32
    %c0_i32_0 = arith.constant 0 : i32
    %c0_i32_1 = arith.constant 0 : i32
    %c0_i32_2 = arith.constant 0 : i32
    return %c0_i32, %c0_i32_0, %c0_i32_1 : i32, i32, i32
  }
  func.func @transform_33(%arg0: i32) -> (i32, i32) {
    %c0_i32 = arith.constant 0 : i32
    %c0_i32_0 = arith.constant 0 : i32
    %c0_i32_1 = arith.constant 0 : i32
    return %c0_i32, %c0_i32_0 : i32, i32
  }
  func.func @transform_34(%arg0: i32) -> (i32, i32) {
    %c0_i32 = arith.constant 0 : i32
    %c0_i32_0 = arith.constant 0 : i32
    %c0_i32_1 = arith.constant 0 : i32
    return %c0_i32, %c0_i32_0 : i32, i32
  }
  func.func @transform_35(%arg0: i32) -> (i32, i32) {
    %c0_i32 = arith.constant 0 : i32
    %c0_i32_0 = arith.constant 0 : i32
    %c0_i32_1 = arith.constant 0 : i32
    return %c0_i32, %c0_i32_0 : i32, i32
  }
  func.func @transform_36(%arg0: i32) -> (i32, i32, i32) {
    %c0_i32 = arith.constant 0 : i32
    %c0_i32_0 = arith.constant 0 : i32
    %c0_i32_1 = arith.constant 0 : i32
    %c0_i32_2 = arith.constant 0 : i32
    return %c0_i32, %c0_i32_0, %c0_i32_1 : i32, i32, i32
  }
  func.func @transform_37(%arg0: i32) -> (i32, i32) {
    %c0_i32 = arith.constant 0 : i32
    %c0_i32_0 = arith.constant 0 : i32
    %c0_i32_1 = arith.constant 0 : i32
    return %c0_i32, %c0_i32_0 : i32, i32
  }
  func.func @transform_38(%arg0: i32) -> (i32, i32) {
    %c0_i32 = arith.constant 0 : i32
    %c0_i32_0 = arith.constant 0 : i32
    %c0_i32_1 = arith.constant 0 : i32
    return %c0_i32, %c0_i32_0 : i32, i32
  }
  func.func @transform_39(%arg0: i32) -> (i32, i32) {
    %c0_i32 = arith.constant 0 : i32
    %c0_i32_0 = arith.constant 0 : i32
    %c0_i32_1 = arith.constant 0 : i32
    return %c0_i32, %c0_i32_0 : i32, i32
  }
  func.func @transform_40(%arg0: i32) -> (i32, i32) {
    %c0_i32 = arith.constant 0 : i32
    %c0_i32_0 = arith.constant 0 : i32
    %c0_i32_1 = arith.constant 0 : i32
    return %c0_i32, %c0_i32_0 : i32, i32
  }
  func.func @transform_41(%arg0: i32) -> (i32, i32) {
    %c0_i32 = arith.constant 0 : i32
    %c0_i32_0 = arith.constant 0 : i32
    %c0_i32_1 = arith.constant 0 : i32
    return %c0_i32, %c0_i32_0 : i32, i32
  }
  func.func @transform_42(%arg0: i32) -> (i32, i32) {
    %c0_i32 = arith.constant 0 : i32
    %c0_i32_0 = arith.constant 0 : i32
    %c0_i32_1 = arith.constant 0 : i32
    return %c0_i32, %c0_i32_0 : i32, i32
  }
  func.func @transform_43(%arg0: i32) -> (i32, i32) {
    %c0_i32 = arith.constant 0 : i32
    %c0_i32_0 = arith.constant 0 : i32
    %c0_i32_1 = arith.constant 0 : i32
    return %c0_i32, %c0_i32_0 : i32, i32
  }
  func.func @transform_44(%arg0: i32) -> (i32, i32) {
    %c0_i32 = arith.constant 0 : i32
    %c0_i32_0 = arith.constant 0 : i32
    %c0_i32_1 = arith.constant 0 : i32
    return %c0_i32, %c0_i32_0 : i32, i32
  }
  func.func @transform_45(%arg0: i32) -> (i32, i32) {
    %c0_i32 = arith.constant 0 : i32
    %c0_i32_0 = arith.constant 0 : i32
    %c0_i32_1 = arith.constant 0 : i32
    return %c0_i32, %c0_i32_0 : i32, i32
  }
  func.func @transform_46(%arg0: i32) -> (i32, i32) {
    %c0_i32 = arith.constant 0 : i32
    %c0_i32_0 = arith.constant 0 : i32
    %c0_i32_1 = arith.constant 0 : i32
    return %c0_i32, %c0_i32_0 : i32, i32
  }
  func.func @transform_47(%arg0: i32) -> (i32, i32) {
    %c0_i32 = arith.constant 0 : i32
    %c0_i32_0 = arith.constant 0 : i32
    %c0_i32_1 = arith.constant 0 : i32
    return %c0_i32, %c0_i32_0 : i32, i32
  }
  func.func @transform_48(%arg0: i32) -> (i32, i32) {
    %c0_i32 = arith.constant 0 : i32
    %c0_i32_0 = arith.constant 0 : i32
    %c0_i32_1 = arith.constant 0 : i32
    return %c0_i32, %c0_i32_0 : i32, i32
  }
  func.func @transform_49(%arg0: i32) -> (i32, i32, i32) {
    %c0_i32 = arith.constant 0 : i32
    %c0_i32_0 = arith.constant 0 : i32
    %c0_i32_1 = arith.constant 0 : i32
    %c0_i32_2 = arith.constant 0 : i32
    return %c0_i32, %c0_i32_0, %c0_i32_1 : i32, i32, i32
  }
  func.func @transform_50(%arg0: i32) -> (i32, i32) {
    %c0_i32 = arith.constant 0 : i32
    %c0_i32_0 = arith.constant 0 : i32
    %c0_i32_1 = arith.constant 0 : i32
    return %c0_i32, %c0_i32_0 : i32, i32
  }
  func.func @transform_51(%arg0: i32) -> (i32, i32) {
    %c0_i32 = arith.constant 0 : i32
    %c0_i32_0 = arith.constant 0 : i32
    %c0_i32_1 = arith.constant 0 : i32
    return %c0_i32, %c0_i32_0 : i32, i32
  }
  func.func @transform_52(%arg0: i32) -> (i32, i32) {
    %c0_i32 = arith.constant 0 : i32
    %c0_i32_0 = arith.constant 0 : i32
    %c0_i32_1 = arith.constant 0 : i32
    return %c0_i32, %c0_i32_0 : i32, i32
  }
  func.func @transform_53(%arg0: i32) -> (i32, i32) {
    %c0_i32 = arith.constant 0 : i32
    %c0_i32_0 = arith.constant 0 : i32
    %c0_i32_1 = arith.constant 0 : i32
    return %c0_i32, %c0_i32_0 : i32, i32
  }
  func.func @transform_54(%arg0: i32) -> (i32, i32) {
    %c0_i32 = arith.constant 0 : i32
    %c0_i32_0 = arith.constant 0 : i32
    %c0_i32_1 = arith.constant 0 : i32
    return %c0_i32, %c0_i32_0 : i32, i32
  }
  func.func @transform_55(%arg0: i32) -> (i32, i32) {
    %c0_i32 = arith.constant 0 : i32
    %c0_i32_0 = arith.constant 0 : i32
    %c0_i32_1 = arith.constant 0 : i32
    return %c0_i32, %c0_i32_0 : i32, i32
  }
  func.func @transform_56(%arg0: i32) -> (i32, i32) {
    %c0_i32 = arith.constant 0 : i32
    %c0_i32_0 = arith.constant 0 : i32
    %c0_i32_1 = arith.constant 0 : i32
    return %c0_i32, %c0_i32_0 : i32, i32
  }
  func.func @transform_57(%arg0: i32) -> (i32, i32) {
    %c0_i32 = arith.constant 0 : i32
    %c0_i32_0 = arith.constant 0 : i32
    %c0_i32_1 = arith.constant 0 : i32
    return %c0_i32, %c0_i32_0 : i32, i32
  }
  func.func @transform_58(%arg0: i32) -> (i32, i32) {
    %c0_i32 = arith.constant 0 : i32
    %c0_i32_0 = arith.constant 0 : i32
    %c0_i32_1 = arith.constant 0 : i32
    return %c0_i32, %c0_i32_0 : i32, i32
  }
  func.func @transform_59(%arg0: i32) -> (i32, i32) {
    %c0_i32 = arith.constant 0 : i32
    %c0_i32_0 = arith.constant 0 : i32
    %c0_i32_1 = arith.constant 0 : i32
    return %c0_i32, %c0_i32_0 : i32, i32
  }
  func.func @transform_60(%arg0: i32) -> (i32, i32) {
    %c0_i32 = arith.constant 0 : i32
    %c0_i32_0 = arith.constant 0 : i32
    %c0_i32_1 = arith.constant 0 : i32
    return %c0_i32, %c0_i32_0 : i32, i32
  }
  func.func @transform_61(%arg0: i32) -> (i32, i32) {
    %c0_i32 = arith.constant 0 : i32
    %c0_i32_0 = arith.constant 0 : i32
    %c0_i32_1 = arith.constant 0 : i32
    return %c0_i32, %c0_i32_0 : i32, i32
  }
  func.func @transform_62(%arg0: i32) -> (i32, i32) {
    %c0_i32 = arith.constant 0 : i32
    %c0_i32_0 = arith.constant 0 : i32
    %c0_i32_1 = arith.constant 0 : i32
    return %c0_i32, %c0_i32_0 : i32, i32
  }
  func.func @transform_63(%arg0: i32) -> (i32, i32) {
    %c0_i32 = arith.constant 0 : i32
    %c0_i32_0 = arith.constant 0 : i32
    %c0_i32_1 = arith.constant 0 : i32
    return %c0_i32, %c0_i32_0 : i32, i32
  }
  func.func @transform_64(%arg0: i32) -> (i32, i32) {
    %c0_i32 = arith.constant 0 : i32
    %c0_i32_0 = arith.constant 0 : i32
    %c0_i32_1 = arith.constant 0 : i32
    return %c0_i32, %c0_i32_0 : i32, i32
  }
  func.func @transform_65(%arg0: i32) -> (i32, i32) {
    %c0_i32 = arith.constant 0 : i32
    %c0_i32_0 = arith.constant 0 : i32
    %c0_i32_1 = arith.constant 0 : i32
    return %c0_i32, %c0_i32_0 : i32, i32
  }
  func.func @transform_66(%arg0: i32) -> (i32, i32, i32) {
    %c0_i32 = arith.constant 0 : i32
    %c0_i32_0 = arith.constant 0 : i32
    %c0_i32_1 = arith.constant 0 : i32
    return %arg0, %c0_i32, %c0_i32_0 : i32, i32, i32
  }
}

</mosaic_0001>

<bundles_post_ra>
// kernel: forward.1
= control target key start
LH: loop header
LB: loop body
LE: loop exit
PB: predicated region body
PF: predicated region fallthrough
CT: control target
= control target key end

     0   :  { %s13439_s6 = smov 1   ;;  %s13440_s10 = smov 2   ;;  %s16461_s0 = inlined_call_operand.smem [shape: u32[67], index: -1, kind: input, shape index: {}] }
   0x1   :  { %s13525_s5 = sld [smem:[%s16461_s0]]   ;;  %s13441_s14 = smov 3  }
   0x2   :  { %s13530_s9 = sld [smem:[%s16461_s0 + %s13439_s6]]   ;;  %s13442_s18 = smov 4  }
   0x3   :  { %s13535_s13 = sld [smem:[%s16461_s0 + %s13440_s10]]   ;;  %s13443_s22 = smov 5  }
   0x4   :  { %s13540_s17 = sld [smem:[%s16461_s0 + %s13441_s14]]   ;;  %s13444_s26 = smov 6  }
   0x5   :  { %s13545_s21 = sld [smem:[%s16461_s0 + %s13442_s18]]   ;;  %s13445_s30 = smov 7  }
   0x6   :  { %s13550_s25 = sld [smem:[%s16461_s0 + %s13443_s22]]   ;;  %s13446_s4 = smov 8  }
   0x7   :  { %16514 = sst [smem:[#allocation8_spill]] %s13525_s5  ;;  %s13447_s10 = smov 9  }
   0x8   :  { %16515 = sst [smem:[#allocation9_spill]] %s13530_s9  ;;  %s13448_s15 = smov 10  }
   0x9   :  { %16516 = sst [smem:[#allocation10_spill]] %s13535_s13  ;;  %s13449_s20 = smov 11  }
   0xa   :  { %s13555_s29 = sld [smem:[%s16461_s0 + %s13444_s26]]   ;;  %s13450_s26 = smov 12  }
   0xb   :  { %s13560_s3 = sld [smem:[%s16461_s0 + %s13445_s30]]   ;;  %s13451_s1 = smov 13  }
   0xc   :  { %s13565_s8 = sld [smem:[%s16461_s0 + %s13446_s4]]   ;;  %s13452_s7 = smov 14  }
   0xd   :  { %s13570_s14 = sld [smem:[%s16461_s0 + %s13447_s10]]   ;;  %s13454_s22 = smov 16  }
   0xe   :  { %s13575_s19 = sld [smem:[%s16461_s0 + %s13448_s15]]   ;;  %s13453_s15 = smov 15  }
   0xf   :  { %s13580_s24 = sld [smem:[%s16461_s0 + %s13449_s20]]   ;;  %s13455_s28 = smov 17  }
  0x10   :  { %s13585_s30 = sld [smem:[%s16461_s0 + %s13450_s26]]  }
  0x11   :  { %16517 = sst [smem:[#allocation11_spill]] %s13560_s3 }
  0x12   :  { %16518 = sst [smem:[#allocation12_spill]] %s13565_s8 }
  0x13   :  { %16519 = sst [smem:[#allocation13_spill]] %s13570_s14 }
  0x14   :  { %s13590_s6 = sld [smem:[%s16461_s0 + %s13451_s1]]  }
  0x15   :  { %s13595_s12 = sld [smem:[%s16461_s0 + %s13452_s7]]   ;;  %s13456_s7 = smov 18  }
  0x16   :  { %s13600_s20 = sld [smem:[%s16461_s0 + %s13453_s15]]   ;;  %s13457_s15 = smov 19  }
  0x17   :  { %s13605_s27 = sld [smem:[%s16461_s0 + %s13454_s22]]   ;;  %s13458_s22 = smov 20  }
  0x18   :  { %s13610_s4 = sld [smem:[%s16461_s0 + %s13455_s28]]   ;;  %s13459_s28 = smov 21  }
  0x1a   :  { %16520 = sst [smem:[#allocation14_spill]] %s13590_s6 }
  0x1b   :  { %16521 = sst [smem:[#allocation15_spill]] %s13595_s12 }
  0x1c   :  { %16522 = sst [smem:[#allocation16_spill]] %s13600_s20 }
  0x1d   :  { %16523 = sst [smem:[#allocation17_spill]] %s13605_s27 }
  0x1e   :  { %16524 = sst [smem:[#allocation18_spill]] %s13610_s4 }
  0x1f   :  { %s13615_s12 = sld [smem:[%s16461_s0 + %s13456_s7]]   ;;  %s13460_s7 = smov 22  }
  0x20   :  { %s13620_s20 = sld [smem:[%s16461_s0 + %s13457_s15]]   ;;  %s13461_s15 = smov 23  }
  0x21   :  { %s13625_s27 = sld [smem:[%s16461_s0 + %s13458_s22]]   ;;  %s13462_s22 = smov 24  }
  0x22   :  { %s13630_s4 = sld [smem:[%s16461_s0 + %s13459_s28]]   ;;  %s13463_s28 = smov 25  }
  0x25   :  { %16525 = sst [smem:[#allocation19_spill]] %s13615_s12 }
  0x26   :  { %16526 = sst [smem:[#allocation20_spill]] %s13620_s20 }
  0x27   :  { %16527 = sst [smem:[#allocation21_spill]] %s13625_s27 }
  0x28   :  { %16528 = sst [smem:[#allocation22_spill]] %s13630_s4 }
  0x29   :  { %s13635_s12 = sld [smem:[%s16461_s0 + %s13460_s7]]   ;;  %s13464_s7 = smov 26  }
  0x2a   :  { %s13640_s20 = sld [smem:[%s16461_s0 + %s13461_s15]]   ;;  %s13465_s15 = smov 27  }
  0x2b   :  { %s13645_s27 = sld [smem:[%s16461_s0 + %s13462_s22]]   ;;  %s13466_s22 = smov 28  }
  0x2c   :  { %s13650_s4 = sld [smem:[%s16461_s0 + %s13463_s28]]   ;;  %s13467_s28 = smov 29  }
  0x2f   :  { %16529 = sst [smem:[#allocation23_spill]] %s13635_s12 }
  0x30   :  { %16530 = sst [smem:[#allocation24_spill]] %s13640_s20 }
  0x31   :  { %16531 = sst [smem:[#allocation25_spill]] %s13645_s27 }
  0x32   :  { %16532 = sst [smem:[#allocation26_spill]] %s13650_s4 }
  0x33   :  { %s13655_s12 = sld [smem:[%s16461_s0 + %s13464_s7]]   ;;  %s13468_s7 = smov 30  }
  0x34   :  { %s13660_s20 = sld [smem:[%s16461_s0 + %s13465_s15]]   ;;  %s13469_s15 = smov 31  }
  0x35   :  { %s13665_s27 = sld [smem:[%s16461_s0 + %s13466_s22]]   ;;  %s13470_s22 = smov 32  }
  0x36   :  { %s13670_s4 = sld [smem:[%s16461_s0 + %s13467_s28]]   ;;  %s13471_s28 = smov 33  }
  0x39   :  { %16533 = sst [smem:[#allocation27_spill]] %s13655_s12 }
  0x3a   :  { %16534 = sst [smem:[#allocation28_spill]] %s13660_s20 }
  0x3b   :  { %16535 = sst [smem:[#allocation29_spill]] %s13665_s27 }
  0x3c   :  { %16536 = sst [smem:[#allocation30_spill]] %s13670_s4 }
  0x3d   :  { %s13675_s12 = sld [smem:[%s16461_s0 + %s13468_s7]]   ;;  %s13472_s7 = smov 34  }
  0x3e   :  { %s13680_s20 = sld [smem:[%s16461_s0 + %s13469_s15]]   ;;  %s13473_s15 = smov 35  }
  0x3f   :  { %s13685_s27 = sld [smem:[%s16461_s0 + %s13470_s22]]   ;;  %s13474_s22 = smov 36  }
  0x40   :  { %s13690_s4 = sld [smem:[%s16461_s0 + %s13471_s28]]   ;;  %s13475_s28 = smov 37  }
  0x43   :  { %16537 = sst [smem:[#allocation31_spill]] %s13675_s12 }
  0x44   :  { %16538 = sst [smem:[#allocation32_spill]] %s13680_s20 }
  0x45   :  { %16539 = sst [smem:[#allocation33_spill]] %s13685_s27 }
  0x46   :  { %16540 = sst [smem:[#allocation34_spill]] %s13690_s4 }
  0x47   :  { %s13695_s12 = sld [smem:[%s16461_s0 + %s13472_s7]]   ;;  %s13476_s7 = smov 38  }
  0x48   :  { %s13700_s20 = sld [smem:[%s16461_s0 + %s13473_s15]]   ;;  %s13477_s15 = smov 39  }
  0x49   :  { %s13705_s27 = sld [smem:[%s16461_s0 + %s13474_s22]]   ;;  %s13478_s22 = smov 40  }
  0x4a   :  { %s13710_s4 = sld [smem:[%s16461_s0 + %s13475_s28]]   ;;  %s13479_s28 = smov 41  }
  0x4d   :  { %16541 = sst [smem:[#allocation35_spill]] %s13695_s12 }
  0x4e   :  { %16542 = sst [smem:[#allocation36_spill]] %s13700_s20 }
  0x4f   :  { %16543 = sst [smem:[#allocation37_spill]] %s13705_s27 }
  0x50   :  { %16544 = sst [smem:[#allocation38_spill]] %s13710_s4 }
  0x51   :  { %s13715_s12 = sld [smem:[%s16461_s0 + %s13476_s7]]   ;;  %s13480_s7 = smov 42  }
  0x52   :  { %s13720_s20 = sld [smem:[%s16461_s0 + %s13477_s15]]   ;;  %s13481_s15 = smov 43  }
  0x53   :  { %s13725_s27 = sld [smem:[%s16461_s0 + %s13478_s22]]   ;;  %s13482_s22 = smov 44  }
  0x54   :  { %s13730_s4 = sld [smem:[%s16461_s0 + %s13479_s28]]   ;;  %s13483_s28 = smov 45  }
  0x57   :  { %16545 = sst [smem:[#allocation39_spill]] %s13715_s12 }
  0x58   :  { %16546 = sst [smem:[#allocation40_spill]] %s13720_s20 }
  0x59   :  { %16547 = sst [smem:[#allocation41_spill]] %s13725_s27 }
  0x5a   :  { %16548 = sst [smem:[#allocation42_spill]] %s13730_s4 }
  0x5b   :  { %s13735_s12 = sld [smem:[%s16461_s0 + %s13480_s7]]   ;;  %s13484_s7 = smov 46  }
  0x5c   :  { %s13740_s20 = sld [smem:[%s16461_s0 + %s13481_s15]]   ;;  %s13485_s15 = smov 47  }
  0x5d   :  { %s13745_s27 = sld [smem:[%s16461_s0 + %s13482_s22]]   ;;  %s13486_s22 = smov 48  }
  0x5e   :  { %s13750_s4 = sld [smem:[%s16461_s0 + %s13483_s28]]   ;;  %s13487_s28 = smov 49  }
  0x61   :  { %16549 = sst [smem:[#allocation43_spill]] %s13735_s12 }
  0x62   :  { %16550 = sst [smem:[#allocation44_spill]] %s13740_s20 }
  0x63   :  { %16551 = sst [smem:[#allocation45_spill]] %s13745_s27 }
  0x64   :  { %16552 = sst [smem:[#allocation46_spill]] %s13750_s4 }
  0x65   :  { %s13755_s12 = sld [smem:[%s16461_s0 + %s13484_s7]]   ;;  %s13488_s7 = smov 50  }
  0x66   :  { %s13760_s20 = sld [smem:[%s16461_s0 + %s13485_s15]]   ;;  %s13489_s15 = smov 51  }
  0x67   :  { %s13765_s27 = sld [smem:[%s16461_s0 + %s13486_s22]]   ;;  %s13490_s22 = smov 52  }
  0x68   :  { %s13770_s4 = sld [smem:[%s16461_s0 + %s13487_s28]]   ;;  %s13491_s28 = smov 53  }
  0x6b   :  { %16553 = sst [smem:[#allocation47_spill]] %s13755_s12 }
  0x6c   :  { %16554 = sst [smem:[#allocation48_spill]] %s13760_s20 }
  0x6d   :  { %16555 = sst [smem:[#allocation49_spill]] %s13765_s27 }
  0x6e   :  { %16556 = sst [smem:[#allocation50_spill]] %s13770_s4 }
  0x6f   :  { %s13775_s12 = sld [smem:[%s16461_s0 + %s13488_s7]]   ;;  %s13492_s7 = smov 54  }
  0x70   :  { %s13780_s20 = sld [smem:[%s16461_s0 + %s13489_s15]]   ;;  %s13493_s15 = smov 55  }
  0x71   :  { %s13785_s27 = sld [smem:[%s16461_s0 + %s13490_s22]]   ;;  %s13494_s22 = smov 56  }
  0x72   :  { %s13790_s4 = sld [smem:[%s16461_s0 + %s13491_s28]]   ;;  %s13495_s28 = smov 57  }
  0x75   :  { %16557 = sst [smem:[#allocation51_spill]] %s13775_s12 }
  0x76   :  { %16558 = sst [smem:[#allocation52_spill]] %s13780_s20 }
  0x77   :  { %16559 = sst [smem:[#allocation53_spill]] %s13785_s27 }
  0x78   :  { %16560 = sst [smem:[#allocation54_spill]] %s13790_s4 }
  0x79   :  { %s13795_s12 = sld [smem:[%s16461_s0 + %s13492_s7]]   ;;  %s13496_s7 = smov 58  }
  0x7a   :  { %s13800_s20 = sld [smem:[%s16461_s0 + %s13493_s15]]   ;;  %s13497_s15 = smov 59  }
  0x7b   :  { %s13805_s27 = sld [smem:[%s16461_s0 + %s13494_s22]]   ;;  %s13498_s22 = smov 60  }
  0x7c   :  { %s13810_s4 = sld [smem:[%s16461_s0 + %s13495_s28]]   ;;  %s13499_s28 = smov 61  }
  0x7f   :  { %16561 = sst [smem:[#allocation55_spill]] %s13795_s12 }
  0x80   :  { %16562 = sst [smem:[#allocation56_spill]] %s13800_s20 }
  0x81   :  { %16563 = sst [smem:[#allocation57_spill]] %s13805_s27 }
  0x82   :  { %16564 = sst [smem:[#allocation58_spill]] %s13810_s4 }
  0x83   :  { %s13815_s12 = sld [smem:[%s16461_s0 + %s13496_s7]]   ;;  %s13500_s7 = smov 62  }
  0x84   :  { %s13820_s20 = sld [smem:[%s16461_s0 + %s13497_s15]]   ;;  %s13501_s15 = smov 63  }
  0x85   :  { %s13825_s27 = sld [smem:[%s16461_s0 + %s13498_s22]]   ;;  %s13502_s22 = smov 64  }
  0x86   :  { %s13830_s4 = sld [smem:[%s16461_s0 + %s13499_s28]]   ;;  %s13503_s28 = smov 65  }
  0x89   :  { %16565 = sst [smem:[#allocation59_spill]] %s13815_s12 }
  0x8a   :  { %16566 = sst [smem:[#allocation60_spill]] %s13820_s20 }
  0x8b   :  { %16567 = sst [smem:[#allocation61_spill]] %s13825_s27 }
  0x8c   :  { %16568 = sst [smem:[#allocation62_spill]] %s13830_s4 }
  0x8d   :  { %s13835_s12 = sld [smem:[%s16461_s0 + %s13500_s7]]   ;;  %s13504_s7 = smov 66  }
  0x8e   :  { %s13840_s20 = sld [smem:[%s16461_s0 + %s13501_s15]]  }
  0x8f   :  { %s13845_s27 = sld [smem:[%s16461_s0 + %s13502_s22]]  }
  0x90   :  { %s13850_s4 = sld [smem:[%s16461_s0 + %s13503_s28]]  }
  0x93   :  { %16569 = sst [smem:[#allocation63_spill]] %s13835_s12 }
  0x94   :  { %s13855_s12 = sld [smem:[%s16461_s0 + %s13504_s7]]  }
  0x96   :  { %16570 = sst [smem:[#allocation64_spill]] %s13850_s4 }
  0x97   :  { %138 = vsyncpa [#allocation4], 0 }
  0x98   :  { %139 = vsyncpa [#allocation3], 0 }
  0x99   :  { %141 = vsyncpa [#allocation3 + $0x1], 0  ;;  %s13857_s15 = smov 0   ;;  %s13859_s16 = smov 0  }
  0x9a   :  { %s13861_s18 = smov 0   ;;  %s13863_s22 = smov 0  }
  0x9b LB: > { %s16571_s14 = sld [smem:[#allocation13_spill]]  ;;  %s16572_s13 = sld [smem:[#allocation10_spill]]  ;;  %s13437_s22 = sphi %s13863_s22, %s16643_s22   ;;  %s13433_s18 = sphi %s13861_s18, %s16642_s18   ;;  %s13429_s16 = sphi %s13859_s16, %s16641_s16   ;;  %s13425_s15 = sphi %s13857_s15, %s16640_s15  }
  0x9c   : > { %s16573_s6 = sld [smem:[#allocation14_spill]]  ;;  %s16574_s3 = sld [smem:[#allocation11_spill]] }
  0x9d   : > { %s13878_s0 = sadd.s32 4294967295, %s13437_s22   ;;  %s10824_s23 = sadd.s32 4294967294, %s13437_s22  }
  0x9e   : > { %s16575_s5 = sld [smem:[#allocation8_spill]]  ;;  %s13882_s26 = sadd.s32 1, %s13437_s22  }
  0x9f   : > { %s1545_s28 = sadd.s32 1, %s13433_s18  ;;  %s1542_s1 = ssub.s32 %s13437_s22, %s13882_s26 }
  0xa0   : > { %p1555_p0 = scmp.ne.s32.totalorder %s13433_s18, %s13429_s16  ;;  %p1543_p1 = scmp.eq.s32.totalorder %s1542_s1, 0 }
  0xa1   : > { %p1556_p2 = scmp.eq.s32.totalorder %s13878_s0, 1  ;;  %p1561_p3 = scmp.ne.s32.totalorder %s13429_s16, %s13425_s15 }
  0xa2   : > { %p1562_p4 = scmp.eq.s32.totalorder %s10824_s23, 1  ;;  %p10825_p7 = scmp.ge.s32.totalorder %s13437_s22, 1 }
  0xa3   : > { %s13893_s2 = scalar_select %p1543_p1, %s13433_s18, %s1545_s28  }
  0xa4   : > { %p13895_p5 = por %p1556_p2, %p1555_p0  ;;  %p13899_p6 = por %p1562_p4, %p1561_p3 }
  0xa5   : > { %p1569_p8 = scmp.lt.s32.totalorder %s13437_s22, 3  ;;  %p12399_p9 = scmp.eq.s32.totalorder %s13878_s0, 0 }
  0xa6   : > { %s16576_s7 = scalar_select %p13895_p5, 1, 0 }
  0xa7   : > { %s16577_s10 = scalar_select %p13899_p6, 1, 0 }
  0xa8   : > { %p13906_p10 = pnand %p10825_p7, %p1569_p8  ;;  %s1582_s1 = sshll.u32 %s16575_s5, 4  ;;  %s1583_s1 = int_to_ptr.vmem [resolvable:$true] %s1582_s1 }
  0xa9   : > { %s13356_s23 = scalar_lea.vmem %s1583_s1, 16  ;;  %p13364_p3 = scmp.lt.s32.totalorder %s1583_s1, %s1583_s1 }
  0xaa   : > { %p12391_p11 = pneg %p13906_p10  ;;  %p13357_p13 = scmp.ne.s32.totalorder %s1583_s1, %s13356_s23 }
  0xab   : > { %p13365_p4 = scmp.lt.s32.totalorder %s13356_s23, %s13356_s23 }
  0xac   : > { %p12392_p12 = pnand %p12399_p9, %p12391_p11 }
  0xad   : > { %p13366_p6 = por %p13365_p4, %p13364_p3 }
  0xae   : > { %p13358_p0 = pneg %p12392_p12 }
  0xb0   : > { %p13359_p1 = pnand %p13358_p0, %p13357_p13 }
  0xb2   : > { %p13360_p2 = pneg %p13359_p1 }
  0xb4   : > { %p13367_p5 = pnand %p13366_p6, %p13360_p2 }
  0xb6   : > { %13370 = shalt.err (!%p13367_p5)
}
  0xb7   : > { %s13505_s28 = smov [#allocation2]   ;;  %1795 = sbr.rel (%p13906_p10) target bundleno = 14718 (0x397e), region = 284 }
  0xb8   : > { %12394 = dma.vmem_to_smem (!%p12392_p12), %s1583_s1, 16, %s13505_s28, [#allocation4]  }
  0xbe   : > { %13416 = dma.done.wait (%p12399_p9), [#allocation4], 16  }
  0xbf   : > { %13418 = vsyncadd (%p12399_p9), [#allocation4], 4294967280 }
  0xc0   : > { %1801 = sfence }
  0xc1   : > { %s16579_s9 = sld [smem:[#allocation9_spill]]  ;;  %v12581_v0 = vld [vmem:[%s16572_s13] sm:$0xff]   ;;  %p1945_p5 = scmp.lt.s32.totalorder %s13878_s0, 1  ;;  %v12582_v1 = vld [vmem:[%s16572_s13 + $0x8] sm:$0xff]   ;;  %v12583_v2 = vld [vmem:[%s16572_s13 + $0x10] sm:$0xff]   ;;  %vm1996_vm0 = vcmask 392192  }
  0xc2   : > { %11550 = vmatprep.subr.bf16.mxu0 %v12581_v0  ;;  %v10832_v15 = vld [vmem:[%s13540_s17] ss:$0 sm:$0xff]  ;;  %vm2074_vm1 = vcmask 261120   ;;  %s16580_s8 = sld [smem:[#allocation12_spill]]  ;;  %s16489_s28 = smov 96   ;;  %vm2351_vm2 = vcmask 130048  }
  0xc3   : > { %s1946_s11 = scalar_select %p1945_p5, %s13878_s0, 1  ;;  %11551 = vmatpush3.bf16.msra.mxu0 %v12581_v0  ;;  %vm2607_vm3 = vcmask 523264  }
  0xc4   : > { %11552 = vmatprep.subr.bf16.mxu0 %v12582_v1  ;;  %s10908_s5 = sld [smem:[#allocation2 + $0x4]]  ;;  %s16599_s13 = sld [smem:[#allocation26_spill]] }
  0xc5   : > { %s11200_s1 = sshll.u32 %s1946_s11, 6  ;;  %s2480_s11 = sld [smem:[#allocation2]] }
  0xc6   : > { %s16637_s4 = sld [smem:[#allocation64_spill]]  ;;  %p16638_p7 = scmp.ne.s32.totalorder %s16576_s7, 0 }
  0xc7   : > { %s1949_s23 = scalar_lea.vmem %s16579_s9, %s11200_s1  ;;  %11553 = vmatpush3.bf16.msra.mxu0 %v12582_v1  ;;  %s16491_s1 = smov 80  }
  0xc8   : > { %v1960_v3 = vld [vmem:[%s1949_s23] sm:$0xff]  ;;  %v1961_v4 = vld [vmem:[%s1949_s23 + $0x8] sm:$0xff]  ;;  %v1962_v6 = vld [vmem:[%s1949_s23 + $0x10] sm:$0xff]  ;;  %11554 = vmatprep.subr.bf16.mxu0 %v12583_v2  ;;  %s16595_s9 = smov 16  }
  0xc9   : > { %v1968_v5 = vpack.c.bf16 %v1961_v4, %v1960_v3  ;;  %v1963_v7 = vld [vmem:[%s1949_s23 + $0x18] sm:$0xff]  ;;  %v1964_v8 = vld [vmem:[%s1949_s23 + $0x20] sm:$0xff]  ;;  %v1965_v9 = vld [vmem:[%s1949_s23 + $0x28] sm:$0xff] }
  0xca   : > { %v1969_v10 = vpack.c.bf16 %v1963_v7, %v1962_v6  ;;  %v1970_v11 = vpack.c.bf16 %v1965_v9, %v1964_v8  ;;  %v1966_v12 = vld [vmem:[%s1949_s23 + $0x30] sm:$0xff]  ;;  %v1967_v13 = vld [vmem:[%s1949_s23 + $0x38] sm:$0xff]  ;;  %s16487_s23 = smov 112  }
  0xcb   : > { %11556 = vmatprep.mubr.msk.bf16.mxu0 %vm1996_vm0, %v1968_v5  ;;  %11555 = vmatpush3.bf16.msra.mxu0 %v12583_v2  ;;  %v1971_v14 = vpack.c.bf16 %v1967_v13, %v1966_v12 }
  0xce   : > { %11557 = vmatmul.mubr.msk.bf16.vlgmr.msra.gmra.mrb[0].mxu0 %vm1996_vm0, %v1969_v10 }
  0xcf   : > { %11560 = vmatprep.mubr.msk.bf16.mxu0 %vm1996_vm0, %v1970_v11 }
  0xd6   : > { %11561 = vmatmul.mubr.msk.bf16.gmra.mrb[4].mxu0 %vm1996_vm0, %v1971_v14 }
 0x1a1   : > { %v11558_v16 = vpop.f32.mrb[0].mxu0 }
 0x1a2   : > { %v2052_v17 = vadd.f32 %v11558_v16, %v10832_v15  ;;  %v2043_v18 = vpop.f32.mrb[1].mxu0  ;;  %v12584_v16 = vld [vmem:[%s16574_s3] sm:$0xff]  }
 0x1a3   : > { %v2044_v19 = vadd.f32 %v10832_v15, %v2043_v18  ;;  %v11559_v20 = vpop.f32.mrb[2].mxu0  ;;  %11564 = vmatprep.subr.bf16.mxu1 %v12584_v16 }
 0x1a4   : > { %v2055_v21 = vadd.f32 %v11559_v20, %v10832_v15  ;;  %v2046_v22 = vpop.f32.mrb[3].mxu0  ;;  %v2081_v23 = vsel %vm2074_vm1, %v2052_v17, 0.0  ;;  %11565 = vmatpush3.bf16.msra.mxu1 %v12584_v16 }
 0x1a5   : > { %v2047_v24 = vadd.f32 %v10832_v15, %v2046_v22  ;;  %2082 = vadd.xlane.f32.xlu1 %v2081_v23  ;;  %v2075_v25 = vsel %vm2074_vm1, %v2044_v19, 0.0 }
 0x1a6   : > { %2076 = vadd.xlane.f32.xlu0 %v2075_v25  ;;  %v2084_v26 = vsel %vm2074_vm1, %v2055_v21, 0.0 }
 0x1a7   : > { %v2078_v28 = vsel %vm2074_vm1, %v2047_v24, 0.0 }
 0x1a9   : > { %2085 = vadd.xlane.f32.xlu1 %v2084_v26  ;;  %v11562_v27 = vpop.f32.mrb[4].mxu0 }
 0x1aa   : > { %v2059_v29 = vpop.f32.mrb[5].mxu0  ;;  %2079 = vadd.xlane.f32.xlu0 %v2078_v28  ;;  %v2068_v30 = vadd.f32 %v11562_v27, %v10832_v15 }
 0x1ab   : > { %v2060_v31 = vadd.f32 %v10832_v15, %v2059_v29  ;;  %v11563_v32 = vpop.f32.mrb[6].mxu0 }
 0x1ac   : > { %v2062_v33 = vpop.f32.mrb[7].mxu0  ;;  %v2071_v34 = vadd.f32 %v11563_v32, %v10832_v15  ;;  %v2093_v38 = vsel %vm2074_vm1, %v2068_v30, 0.0 }
 0x1ad   : > { %v2063_v35 = vadd.f32 %v10832_v15, %v2062_v33  ;;  %v2087_v36 = vsel %vm2074_vm1, %v2060_v31, 0.0 }
 0x1ae   : > { %2088 = vadd.xlane.f32.xlu0 %v2087_v36  ;;  %v2096_v39 = vsel %vm2074_vm1, %v2071_v34, 0.0 }
 0x1af   : > { %v2090_v37 = vsel %vm2074_vm1, %v2063_v35, 0.0 }
 0x1b0   : > { %2091 = vadd.xlane.f32.xlu1 %v2090_v37 }
 0x1b2   : > { %2094 = vadd.xlane.f32.xlu0 %v2093_v38 }
 0x1b4   : > { %2097 = vadd.xlane.f32.xlu1 %v2096_v39 }
 0x232   : > { %v2083_v40 = vpop.xlane.xlu1 %2082 }
 0x233   : > { %v2102_v41 = vmul.f32 0.03125, %v2083_v40  ;;  %v2077_v42 = vpop.xlane.xlu0 %2076 }
 0x234   : > { %v2100_v43 = vmul.f32 0.03125, %v2077_v42 }
 0x235   : > { %v13940_v44 = vsub.f32 %v2052_v17, %v2102_v41  ;;  %v12585_v17 = vld [vmem:[%s16574_s3 + $0x8] sm:$0xff]   ;;  %s16589_s3 = smov 96  }
 0x236   : > { %v13942_v45 = vsub.f32 %v2044_v19, %v2100_v43  ;;  %v2086_v46 = vpop.xlane.xlu1 %2085  ;;  %11566 = vmatprep.subr.bf16.mxu1 %v12585_v17  ;;  %v10840_v43 = vld [vmem:[%s13545_s21] ss:$0 sm:$0xff] }
 0x237   : > { %v2103_v47 = vmul.f32 0.03125, %v2086_v46  ;;  %v2080_v48 = vpop.xlane.xlu0 %2079  ;;  %v2118_v54 = vmul.f32 %v13940_v44, %v13940_v44  ;;  %11567 = vmatpush3.bf16.msra.mxu1 %v12585_v17  ;;  %v10842_v17 = vld [vmem:[%s16580_s8] ss:$0 sm:$0xff]  ;;  %s16594_s8 = sld [smem:[#allocation23_spill]] }
 0x238   : > { %v2101_v49 = vmul.f32 0.03125, %v2080_v48  ;;  %v2116_v50 = vmul.f32 %v13942_v45, %v13942_v45 }
 0x239   : > { %v13946_v51 = vsub.f32 %v2055_v21, %v2103_v47  ;;  %v2130_v62 = vsel %vm2074_vm1, %v2118_v54, 0.0 }
 0x23a   : > { %v13948_v52 = vsub.f32 %v2047_v24, %v2101_v49  ;;  %v2124_v53 = vsel %vm2074_vm1, %v2116_v50, 0.0 }
 0x23b   : > { %2125 = vadd.xlane.f32.xlu0 %v2124_v53  ;;  %v2089_v55 = vpop.xlane.xlu0 %2088  ;;  %v2119_v59 = vmul.f32 %v13946_v51, %v13946_v51  ;;  %v10841_v53 = vld [vmem:[%s13550_s25] ss:$0 sm:$0xff] }
 0x23c   : > { %v2104_v56 = vmul.f32 0.03125, %v2089_v55  ;;  %v2117_v57 = vmul.f32 %v13948_v52, %v13948_v52 }
 0x23d   : > { %v2092_v58 = vpop.xlane.xlu1 %2091  ;;  %v2133_v5 = vsel %vm2074_vm1, %v2119_v59, 0.0 }
 0x23e   : > { %v13957_v60 = vsub.f32 %v2060_v31, %v2104_v56  ;;  %v2105_v61 = vmul.f32 0.03125, %v2092_v58  ;;  %v2127_v63 = vsel %vm2074_vm1, %v2117_v57, 0.0 }
 0x23f   : > { %2131 = vadd.xlane.f32.xlu0 %v2130_v62  ;;  %2128 = vadd.xlane.f32.xlu1 %v2127_v63  ;;  %v2095_v0 = vpop.xlane.xlu0 %2094 }
 0x240   : > { %v13961_v1 = vsub.f32 %v2063_v35, %v2105_v61  ;;  %v2106_v2 = vmul.f32 0.03125, %v2095_v0  ;;  %v2120_v3 = vmul.f32 %v13957_v60, %v13957_v60 }
 0x241   : > { %v2098_v4 = vpop.xlane.xlu1 %2097 }
 0x242   : > { %v13966_v6 = vsub.f32 %v2068_v30, %v2106_v2  ;;  %v2107_v7 = vmul.f32 0.03125, %v2098_v4  ;;  %v2136_v8 = vsel %vm2074_vm1, %v2120_v3, 0.0  ;;  %v2121_v9 = vmul.f32 %v13961_v1, %v13961_v1 }
 0x243   : > { %2134 = vadd.xlane.f32.xlu1 %v2133_v5  ;;  %2137 = vadd.xlane.f32.xlu0 %v2136_v8 }
 0x244   : > { %v13971_v10 = vsub.f32 %v2071_v34, %v2107_v7  ;;  %v2122_v11 = vmul.f32 %v13966_v6, %v13966_v6  ;;  %v2139_v12 = vsel %vm2074_vm1, %v2121_v9, 0.0 }
 0x246   : > { %v2142_v13 = vsel %vm2074_vm1, %v2122_v11, 0.0  ;;  %v2123_v14 = vmul.f32 %v13971_v10, %v13971_v10 }
 0x247   : > { %2140 = vadd.xlane.f32.xlu1 %v2139_v12  ;;  %2143 = vadd.xlane.f32.xlu0 %v2142_v13 }
 0x248   : > { %v2145_v15 = vsel %vm2074_vm1, %v2123_v14, 0.0 }
 0x24b   : > { %2146 = vadd.xlane.f32.xlu1 %v2145_v15 }
 0x2c8   : > { %v2126_v18 = vpop.xlane.xlu0 %2125 }
 0x2c9   : > { %v2148_v19 = vmul.f32 0.03125, %v2126_v18 }
 0x2cb   : > { %v2156_v20 = vadd.f32 1e-05, %v2148_v19 }
 0x2cc   : > { %v2129_v21 = vpop.xlane.xlu1 %2128  ;;  %v2132_v22 = vpop.xlane.xlu0 %2131 }
 0x2cd   : > { %12772 = vrsqrt.f32 %v2156_v20  ;;  %v2149_v23 = vmul.f32 0.03125, %v2129_v21  ;;  %v2150_v24 = vmul.f32 0.03125, %v2132_v22 }
 0x2cf   : > { %v2157_v25 = vadd.f32 1e-05, %v2149_v23  ;;  %v2158_v26 = vadd.f32 1e-05, %v2150_v24 }
 0x2d0   : > { %v2135_v27 = vpop.xlane.xlu1 %2134  ;;  %v2138_v28 = vpop.xlane.xlu0 %2137 }
 0x2d1   : > { %12774 = vrsqrt.f32 %v2157_v25  ;;  %v2151_v29 = vmul.f32 0.03125, %v2135_v27  ;;  %v2152_v30 = vmul.f32 0.03125, %v2138_v28 }
 0x2d2   : > { %12776 = vrsqrt.f32 %v2158_v26 }
 0x2d3   : > { %v2159_v31 = vadd.f32 1e-05, %v2151_v29  ;;  %v2160_v32 = vadd.f32 1e-05, %v2152_v30 }
 0x2d4   : > { %v2141_v33 = vpop.xlane.xlu1 %2140  ;;  %v2144_v34 = vpop.xlane.xlu0 %2143 }
 0x2d5   : > { %12778 = vrsqrt.f32 %v2159_v31  ;;  %v2153_v35 = vmul.f32 0.03125, %v2141_v33  ;;  %v2154_v36 = vmul.f32 0.03125, %v2144_v34 }
 0x2d6   : > { %12780 = vrsqrt.f32 %v2160_v32 }
 0x2d7   : > { %v12773_v37 = vpop.eup %12772  ;;  %v2161_v38 = vadd.f32 1e-05, %v2153_v35  ;;  %v2162_v39 = vadd.f32 1e-05, %v2154_v36 }
 0x2d8   : > { %v2147_v40 = vpop.xlane.xlu1 %2146  ;;  %v2172_v41 = vmul.f32 %v12773_v37, %v13942_v45 }
 0x2d9   : > { %12782 = vrsqrt.f32 %v2161_v38  ;;  %v2155_v42 = vmul.f32 0.03125, %v2147_v40 }
 0x2da   : > { %12784 = vrsqrt.f32 %v2162_v39  ;;  %v2186_v50 = vmul.f32 %v10840_v43, %v2172_v41 }
 0x2db   : > { %v12775_v46 = vpop.eup %12774  ;;  %v2163_v47 = vadd.f32 1e-05, %v2155_v42 }
 0x2dc   : > { %v12777_v48 = vpop.eup %12776  ;;  %v2173_v49 = vmul.f32 %v12775_v46, %v13948_v52  ;;  %v13987_v58 = vadd.f32 %v10841_v53, %v2186_v50 }
 0x2dd   : > { %12786 = vrsqrt.f32 %v2163_v47  ;;  %v2174_v54 = vmul.f32 %v12777_v48, %v13940_v44 }
 0x2de   : > { %v2187_v55 = vmul.f32 %v10840_v43, %v2173_v49 }
 0x2df   : > { %v12779_v56 = vpop.eup %12778  ;;  %v2188_v61 = vmul.f32 %v10840_v43, %v2174_v54 }
 0x2e0   : > { %v12781_v57 = vpop.eup %12780  ;;  %v13989_v45 = vadd.f32 %v10841_v53, %v2187_v55  ;;  %v2175_v59 = vmul.f32 %v12779_v56, %v13946_v51 }
 0x2e1   : > { %v2176_v62 = vmul.f32 %v12781_v57, %v13957_v60  ;;  %v13996_v44 = vadd.f32 %v10841_v53, %v2188_v61 }
 0x2e2   : > { %v2244_v52 = vpack.c.bf16 %v13989_v45, %v13987_v58  ;;  %v2189_v63 = vmul.f32 %v10840_v43, %v2175_v59 }
 0x2e3   : > { %v12783_v0 = vpop.eup %12782  ;;  %v2190_v5 = vmul.f32 %v10840_v43, %v2176_v62 }
 0x2e4   : > { %v12785_v2 = vpop.eup %12784  ;;  %11568 = vmatprep.mubr.msk.bf16.mxu1 %vm2074_vm1, %v2244_v52  ;;  %v13998_v3 = vadd.f32 %v10841_v53, %v2189_v63  ;;  %v2177_v4 = vmul.f32 %v12783_v0, %v13961_v1 }
 0x2e5   : > { %v2178_v51 = vmul.f32 %v12785_v2, %v13966_v6  ;;  %v14005_v9 = vadd.f32 %v10841_v53, %v2190_v5 }
 0x2e6   : > { %v2245_v60 = vpack.c.bf16 %v13998_v3, %v13996_v44  ;;  %v2191_v7 = vmul.f32 %v10840_v43, %v2177_v4 }
 0x2e7   : > { %v12787_v8 = vpop.eup %12786  ;;  %v2192_v13 = vmul.f32 %v10840_v43, %v2178_v51 }
 0x2e8   : > { %11569 = vmatmul.mubr.msk.bf16.vlgmr.msra.gmra.mrb[0].mxu1 %vm2074_vm1, %v2245_v60  ;;  %v14007_v11 = vadd.f32 %v10841_v53, %v2191_v7  ;;  %v2179_v12 = vmul.f32 %v12787_v8, %v13971_v10 }
 0x2e9   : > { %v14013_v6 = vadd.f32 %v10841_v53, %v2192_v13 }
 0x2ea   : > { %v2246_v1 = vpack.c.bf16 %v14007_v11, %v14005_v9  ;;  %v2193_v14 = vmul.f32 %v10840_v43, %v2179_v12 }
 0x2ec   : > { %11572 = vmatprep.mubr.msk.bf16.mxu1 %vm2074_vm1, %v2246_v1  ;;  %v14015_v15 = vadd.f32 %v10841_v53, %v2193_v14 }
 0x2ee   : > { %v2247_v16 = vpack.c.bf16 %v14015_v15, %v14013_v6 }
 0x2f0   : > { %11573 = vmatmul.mubr.msk.bf16.gmra.mrb[4].mxu1 %vm2074_vm1, %v2247_v16 }
 0x3bb   : > { %v11570_v18 = vpop.f32.mrb[0].mxu1 }
 0x3bc   : > { %v2312_v19 = vpop.f32.mrb[1].mxu1  ;;  %v14029_v24 = vadd.f32 %v11570_v18, %v10842_v17 }
 0x3bd   : > { %v14021_v10 = vadd.f32 %v10842_v17, %v2312_v19  ;;  %v11571_v20 = vpop.f32.mrb[2].mxu1 }
 0x3be   : > { %v2315_v21 = vpop.f32.mrb[3].mxu1  ;;  %v14039_v28 = vadd.f32 %v11571_v20, %v10842_v17  ;;  %v14045_v31 = vmul.f32 %v14029_v24, %v14029_v24 }
 0x3bf   : > { %v14023_v22 = vadd.f32 %v10842_v17, %v2315_v21  ;;  %v14027_v23 = vmul.f32 %v14021_v10, %v14021_v10 }
 0x3c0   : > { %v14061_v36 = vmul.f32 %v14039_v28, %v14039_v28  ;;  %v2358_v2 = vsel %vm2351_vm2, %v14045_v31, 0.0 }
 0x3c1   : > { %2408 = vrot.lane.b32.xlu0 %v14027_v23, %s16489_s28  ;;  %v14035_v25 = vmul.f32 %v14023_v22, %v14023_v22  ;;  %v2352_v63 = vsel %vm2351_vm2, %v14027_v23, 0.0 }
 0x3c2   : > { %v2361_v0 = vsel %vm2351_vm2, %v14061_v36, 0.0 }
 0x3c3   : > { %2410 = vrot.lane.b32.xlu1 %v14035_v25, %s16489_s28  ;;  %v11574_v26 = vpop.f32.mrb[4].mxu1  ;;  %v2355_v48 = vsel %vm2351_vm2, %v14035_v25, 0.0 }
 0x3c4   : > { %v2328_v27 = vpop.f32.mrb[5].mxu1  ;;  %v14047_v33 = vadd.f32 %v11574_v26, %v10842_v17 }
 0x3c5   : > { %v14041_v29 = vadd.f32 %v10842_v17, %v2328_v27  ;;  %v11575_v30 = vpop.f32.mrb[6].mxu1 }
 0x3c6   : > { %v2331_v32 = vpop.f32.mrb[7].mxu1  ;;  %v14067_v37 = vmul.f32 %v14047_v33, %v14047_v33  ;;  %v14069_v38 = vadd.f32 %v11575_v30, %v10842_v17 }
 0x3c7   : > { %2412 = vrot.lane.b32.xlu1 %v14045_v31, %s16489_s28  ;;  %v14053_v34 = vmul.f32 %v14041_v29, %v14041_v29  ;;  %v14055_v35 = vadd.f32 %v10842_v17, %v2331_v32 }
 0x3c8   : > { %v14081_v40 = vmul.f32 %v14069_v38, %v14069_v38 }
 0x3c9   : > { %2416 = vrot.lane.b32.xlu0 %v14053_v34, %s16489_s28  ;;  %v14075_v39 = vmul.f32 %v14055_v35, %v14055_v35 }
 0x3cb   : > { %2414 = vrot.lane.b32.xlu1 %v14061_v36, %s16489_s28 }
 0x3cd   : > { %2420 = vrot.lane.b32.xlu0 %v14067_v37, %s16489_s28 }
 0x3cf   : > { %2418 = vrot.lane.b32.xlu1 %v14075_v39, %s16489_s28 }
 0x3d3   : > { %2422 = vrot.lane.b32.xlu1 %v14081_v40, %s16489_s28 }
 0x433   : > { %v2409_v41 = vpop.permute.xlu0 %2408 }
 0x434   : > { %v2432_v42 = vsel %vm2351_vm2, %v2409_v41, 0.0 }
 0x435   : > { %v2411_v43 = vpop.permute.xlu1 %2410  ;;  %2433 = vadd.xlane.f32.xlu0 %v2432_v42 }
 0x436   : > { %v2435_v46 = vsel %vm2351_vm2, %v2411_v43, 0.0 }
 0x437   : > { %2436 = vadd.xlane.f32.xlu1 %v2435_v46 }
 0x439   : > { %v2413_v47 = vpop.permute.xlu1 %2412 }
 0x43a   : > { %v2438_v49 = vsel %vm2351_vm2, %v2413_v47, 0.0 }
 0x43b   : > { %2356 = vadd.xlane.f32.xlu1 %v2355_v48  ;;  %2439 = vadd.xlane.f32.xlu0 %v2438_v49  ;;  %v2417_v50 = vpop.permute.xlu0 %2416 }
 0x43c   : > { %v2444_v56 = vsel %vm2351_vm2, %v2417_v50, 0.0 }
 0x43d   : > { %v2415_v53 = vpop.permute.xlu1 %2414 }
 0x43e   : > { %v2441_v54 = vsel %vm2351_vm2, %v2415_v53, 0.0 }
 0x43f   : > { %2442 = vadd.xlane.f32.xlu0 %v2441_v54  ;;  %v2421_v57 = vpop.permute.xlu0 %2420 }
 0x440   : > { %v2450_v62 = vsel %vm2351_vm2, %v2421_v57, 0.0 }
 0x441   : > { %v2419_v55 = vpop.permute.xlu1 %2418 }
 0x442   : > { %v2447_v52 = vsel %vm2351_vm2, %v2419_v55, 0.0 }
 0x443   : > { %2445 = vadd.xlane.f32.xlu0 %v2444_v56 }
 0x445   : > { %v2423_v59 = vpop.permute.xlu1 %2422 }
 0x446   : > { %v2453_v61 = vsel %vm2351_vm2, %v2423_v59, 0.0  ;;  %v14108_v59 = vstv %s2480_s11  ;;  %s16481_s11 = smov 64  }
 0x447   : > { %2454 = vadd.xlane.f32.xlu1 %v2453_v61  ;;  %2451 = vadd.xlane.f32.xlu0 %v2450_v62 }
 0x44b   : > { %2448 = vadd.xlane.f32.xlu1 %v2447_v52  ;;  %2353 = vadd.xlane.f32.xlu0 %v2352_v63 }
 0x44f   : > { %2362 = vadd.xlane.f32.xlu1 %v2361_v0  ;;  %2359 = vadd.xlane.f32.xlu0 %v2358_v2 }
 0x4c2   : > { %v2434_v4 = vpop.xlane.xlu0 %2433 }
 0x4c3   : > { %v2456_v5 = vmax.f32 %v2434_v4, 1e-24 }
 0x4c4   : > { %v2437_v51 = vpop.xlane.xlu1 %2436 }
 0x4c5   : > { %12788 = vrsqrt.f32 %v2456_v5  ;;  %v2457_v60 = vmax.f32 %v2437_v51, 1e-24  ;;  %v2367_v5 = vsel %vm2351_vm2, %v14075_v39, 0.0  ;;  %v2370_v51 = vsel %vm2351_vm2, %v14067_v37, 0.0 }
 0x4c7   : > { %12790 = vrsqrt.f32 %v2457_v60  ;;  %v2373_v60 = vsel %vm2351_vm2, %v14081_v40, 0.0 }
 0x4c8   : > { %v2440_v7 = vpop.xlane.xlu0 %2439  ;;  %v2357_v14 = vpop.xlane.xlu1 %2356 }
 0x4c9   : > { %v2458_v8 = vmax.f32 %v2440_v7, 1e-24  ;;  %v2377_v20 = vmax.f32 %v2357_v14, 1e-24 }
 0x4cb   : > { %12792 = vrsqrt.f32 %v2458_v8 }
 0x4cc   : > { %v2443_v12 = vpop.xlane.xlu0 %2442 }
 0x4cd   : > { %v2459_v13 = vmax.f32 %v2443_v12, 1e-24  ;;  %v2364_v12 = vsel %vm2351_vm2, %v14053_v34, 0.0 }
 0x4cf   : > { %v12789_v1 = vpop.eup %12788  ;;  %12794 = vrsqrt.f32 %v2459_v13 }
 0x4d0   : > { %v2446_v16 = vpop.xlane.xlu0 %2445  ;;  %v2472_v18 = vmul.f32 %v12789_v1, %v14021_v10  ;;  %12796 = vrsqrt.f32 %v2377_v20 }
 0x4d1   : > { %v12791_v17 = vpop.eup %12790  ;;  %v2460_v30 = vmax.f32 %v2446_v16, 1e-24 }
 0x4d2   : > { %v2473_v19 = vmul.f32 %v12791_v17, %v14023_v22 }
 0x4d3   : > { %12798 = vrsqrt.f32 %v2460_v30 }
 0x4d4   : > { %v2455_v21 = vpop.xlane.xlu1 %2454  ;;  %v2452_v26 = vpop.xlane.xlu0 %2451  ;;  %v2494_v27 = vpack.c.bf16 %v2473_v19, %v2472_v18 }
 0x4d5   : > { %v12793_v32 = vpop.eup %12792  ;;  %v2463_v7 = vmax.f32 %v2455_v21, 1e-24  ;;  %v2462_v8 = vmax.f32 %v2452_v26, 1e-24 }
 0x4d6   : > { %2510 = vrot.lane.b32.xlu0 %v2494_v27, %s16489_s28  ;;  %v2474_v48 = vmul.f32 %v12793_v32, %v14029_v24 }
 0x4d8   : > { %v2449_v41 = vpop.xlane.xlu1 %2448  ;;  %v2354_v42 = vpop.xlane.xlu0 %2353 }
 0x4d9   : > { %v12795_v43 = vpop.eup %12794  ;;  %v2461_v46 = vmax.f32 %v2449_v41, 1e-24  ;;  %v2376_v47 = vmax.f32 %v2354_v42, 1e-24 }
 0x4da   : > { %v2475_v49 = vmul.f32 %v12795_v43, %v14039_v28  ;;  %v12797_v53 = vpop.eup %12796 }
 0x4db   : > { %12800 = vrsqrt.f32 %v2461_v46  ;;  %v2393_v56 = vmul.f32 %v12797_v53, %v14023_v22 }
 0x4dc   : > { %12802 = vrsqrt.f32 %v2376_v47  ;;  %v2495_v50 = vpack.c.bf16 %v2475_v49, %v2474_v48 }
 0x4dd   : > { %v12799_v54 = vpop.eup %12798  ;;  %v2483_v2 = vmul.f32 %v14108_v59, %v2393_v56  ;;  %12804 = vrsqrt.f32 %v2463_v7 }
 0x4de   : > { %2512 = vrot.lane.b32.xlu1 %v2495_v50, %s16489_s28  ;;  %v2476_v61 = vmul.f32 %v12799_v54, %v14041_v29  ;;  %12806 = vrsqrt.f32 %v2462_v8 }
 0x4e5   : > { %v12801_v55 = vpop.eup %12800 }
 0x4e6   : > { %v12803_v57 = vpop.eup %12802  ;;  %v2477_v62 = vmul.f32 %v12801_v55, %v14055_v35 }
 0x4e7   : > { %v2392_v52 = vmul.f32 %v12803_v57, %v14021_v10  ;;  %v12805_v13 = vpop.eup %12804 }
 0x4e8   : > { %v2496_v63 = vpack.c.bf16 %v2477_v62, %v2476_v61  ;;  %v12807_v1 = vpop.eup %12806  ;;  %v2479_v16 = vmul.f32 %v12805_v13, %v14069_v38 }
 0x4e9   : > { %v2482_v0 = vmul.f32 %v14108_v59, %v2392_v52  ;;  %v2478_v14 = vmul.f32 %v12807_v1, %v14047_v33 }
 0x4ea   : > { %2514 = vrot.lane.b32.xlu1 %v2496_v63, %s16489_s28 }
 0x4eb   : > { %v2490_v4 = vpack.c.bf16 %v2483_v2, %v2482_v0  ;;  %v2497_v17 = vpack.c.bf16 %v2479_v16, %v2478_v14 }
 0x4ed   : > { %11584 = vmatprep.mubr.msk.bf16.mxu0 %vm2351_vm2, %v2490_v4 }
 0x4f5   : > { %2368 = vadd.xlane.f32.xlu0 %v2367_v5 }
 0x4f9   : > { %2371 = vadd.xlane.f32.xlu0 %v2370_v51 }
 0x4fd   : > { %2374 = vadd.xlane.f32.xlu0 %v2373_v60 }
 0x50e   : > { %2365 = vadd.xlane.f32.xlu1 %v2364_v12 }
 0x513   : > { %2869 = vrot.lane.b32.xlu0 %v14027_v23, %s16491_s1 }
 0x517   : > { %2877 = vrot.lane.b32.xlu0 %v14053_v34, %s16491_s1 }
 0x51b   : > { %2881 = vrot.lane.b32.xlu0 %v14067_v37, %s16491_s1 }
 0x51f   : > { %2797 = vrot.lane.b32.xlu0 %v14027_v23, %s16487_s23  ;;  %2516 = vrot.lane.b32.xlu1 %v2497_v17, %s16489_s28  ;;  %v2360_v23 = vpop.xlane.xlu0 %2359  ;;  %s16585_s28 = sld [smem:[#allocation18_spill]] }
 0x520   : > { %v2378_v26 = vmax.f32 %v2360_v23, 1e-24 }
 0x523   : > { %2801 = vrot.lane.b32.xlu0 %v14045_v31, %s16487_s23  ;;  %2871 = vrot.lane.b32.xlu1 %v14035_v25, %s16491_s1 }
 0x527   : > { %2805 = vrot.lane.b32.xlu0 %v14053_v34, %s16487_s23  ;;  %2873 = vrot.lane.b32.xlu1 %v14045_v31, %s16491_s1 }
 0x52b   : > { %2875 = vrot.lane.b32.xlu1 %v14061_v36, %s16491_s1 }
 0x52f   : > { %2879 = vrot.lane.b32.xlu1 %v14075_v39, %s16491_s1 }
 0x533   : > { %2883 = vrot.lane.b32.xlu1 %v14081_v40, %s16491_s1 }
 0x537   : > { %2799 = vrot.lane.b32.xlu1 %v14035_v25, %s16487_s23  ;;  %v2363_v25 = vpop.xlane.xlu1 %2362 }
 0x538   : > { %v2379_v21 = vmax.f32 %v2363_v25, 1e-24 }
 0x53a   : > { %12808 = vrsqrt.f32 %v2379_v21 }
 0x53b   : > { %2803 = vrot.lane.b32.xlu1 %v14061_v36, %s16487_s23  ;;  %12810 = vrsqrt.f32 %v2378_v26 }
 0x53f   : > { %2807 = vrot.lane.b32.xlu1 %v14075_v39, %s16487_s23 }
 0x543   : > { %2809 = vrot.lane.b32.xlu1 %v14067_v37, %s16487_s23 }
 0x544   : > { %v12809_v43 = vpop.eup %12808 }
 0x545   : > { %v12811_v46 = vpop.eup %12810  ;;  %v2395_v49 = vmul.f32 %v12809_v43, %v14039_v28 }
 0x546   : > { %v2394_v50 = vmul.f32 %v12811_v46, %v14029_v24 }
 0x547   : > { %2811 = vrot.lane.b32.xlu1 %v14081_v40, %s16487_s23  ;;  %v2485_v56 = vmul.f32 %v14108_v59, %v2395_v49 }
 0x548   : > { %v2511_v31 = vpop.permute.xlu0 %2510  ;;  %v2484_v57 = vmul.f32 %v14108_v59, %v2394_v50 }
 0x549   : > { %12369 = vmatprep.subr.msk.bf16.mxu0 %vm2351_vm2, %v2511_v31  ;;  %v2531_v34 = vsel %vm2351_vm2, %v2511_v31, 0 }
 0x54a   : > { %11577 = vmatpush3.bf16.xpose.msra.mxu0 %v2531_v34  ;;  %v2491_v2 = vpack.c.bf16 %v2485_v56, %v2484_v57 }
 0x550   : > { %v2513_v18 = vpop.permute.xlu1 %2512 }
 0x551   : > { %12370 = vmatprep.subr.msk.bf16.mxu0 %vm2351_vm2, %v2513_v18  ;;  %v2534_v36 = vsel %vm2351_vm2, %v2513_v18, 0 }
 0x552   : > { %11579 = vmatpush3.bf16.xpose.msra.mxu0 %v2534_v36 }
 0x55c   : > { %v2515_v39 = vpop.permute.xlu1 %2514 }
 0x55d   : > { %12371 = vmatprep.subr.msk.bf16.mxu0 %vm2351_vm2, %v2515_v39  ;;  %v2537_v37 = vsel %vm2351_vm2, %v2515_v39, 0 }
 0x55e   : > { %11581 = vmatpush3.bf16.xpose.msra.mxu0 %v2537_v37 }
 0x582   : > { %v2369_v40 = vpop.xlane.xlu0 %2368 }
 0x583   : > { %v2381_v41 = vmax.f32 %v2369_v40, 1e-24 }
 0x586   : > { %v2372_v19 = vpop.xlane.xlu0 %2371 }
 0x587   : > { %v2382_v42 = vmax.f32 %v2372_v19, 1e-24 }
 0x58a   : > { %v2375_v20 = vpop.xlane.xlu0 %2374 }
 0x58b   : > { %v2383_v32 = vmax.f32 %v2375_v20, 1e-24 }
 0x58d   : > { %12812 = vrsqrt.f32 %v2383_v32 }
 0x58e   : > { %v2870_v27 = vpop.permute.xlu0 %2869  ;;  %12814 = vrsqrt.f32 %v2381_v41 }
 0x58f   : > { %v2893_v30 = vsel %vm2351_vm2, %v2870_v27, 0.0  ;;  %12816 = vrsqrt.f32 %v2382_v42 }
 0x590   : > { %2894 = vadd.xlane.f32.xlu0 %v2893_v30 }
 0x592   : > { %v2878_v55 = vpop.permute.xlu0 %2877 }
 0x593   : > { %v2905_v31 = vsel %vm2351_vm2, %v2878_v55, 0.0  ;;  %v2498_v55 = vld [vmem:[%s13555_s29] sm:$0xff] }
 0x596   : > { %v2882_v5 = vpop.permute.xlu0 %2881 }
 0x597   : > { %v12813_v61 = vpop.eup %12812  ;;  %v2911_v40 = vsel %vm2351_vm2, %v2882_v5, 0.0 }
 0x598   : > { %v12815_v52 = vpop.eup %12814  ;;  %v2399_v4 = vmul.f32 %v12813_v61, %v14069_v38  ;;  %v2499_v61 = vld [vmem:[%s13555_s29 + $0x8] sm:$0xff] }
 0x599   : > { %v12817_v0 = vpop.eup %12816  ;;  %v2397_v60 = vmul.f32 %v12815_v52, %v14055_v35 }
 0x59a   : > { %v2398_v12 = vmul.f32 %v12817_v0, %v14047_v33  ;;  %v2489_v1 = vmul.f32 %v14108_v59, %v2399_v4  ;;  %v2798_v25 = vpop.permute.xlu0 %2797 }
 0x59b   : > { %v2366_v47 = vpop.xlane.xlu1 %2365  ;;  %v2487_v17 = vmul.f32 %v14108_v59, %v2397_v60  ;;  %v2821_v21 = vsel %vm2351_vm2, %v2798_v25, 0.0  ;;  %v2505_v25 = vld [vmem:[%s13555_s29 + $0x38] sm:$0xff] }
 0x59c   : > { %v2380_v48 = vmax.f32 %v2366_v47, 1e-24  ;;  %v2488_v34 = vmul.f32 %v14108_v59, %v2398_v12 }
 0x59e   : > { %12818 = vrsqrt.f32 %v2380_v48  ;;  %v2493_v36 = vpack.c.bf16 %v2489_v1, %v2488_v34  ;;  %v2802_v19 = vpop.permute.xlu0 %2801 }
 0x59f   : > { %v2517_v53 = vpop.permute.xlu1 %2516  ;;  %v2827_v30 = vsel %vm2351_vm2, %v2802_v19, 0.0  ;;  %v14248_v19 = vpack.c.bf16 %v14023_v22, %v14021_v10 }
 0x5a0   : > { %12372 = vmatprep.subr.msk.bf16.mxu0 %vm2351_vm2, %v2517_v53  ;;  %v2540_v54 = vsel %vm2351_vm2, %v2517_v53, 0  ;;  %v2500_v53 = vld [vmem:[%s13555_s29 + $0x10] sm:$0xff] }
 0x5a1   : > { %11583 = vmatpush3.bf16.xpose.msra.mxu0 %v2540_v54 }
 0x5a2   : > { %v2806_v32 = vpop.permute.xlu0 %2805 }
 0x5a3   : > { %v2872_v62 = vpop.permute.xlu1 %2871  ;;  %v2833_v43 = vsel %vm2351_vm2, %v2806_v32, 0.0 }
 0x5a4   : > { %v2896_v63 = vsel %vm2351_vm2, %v2872_v62, 0.0 }
 0x5a5   : > { %2897 = vadd.xlane.f32.xlu1 %v2896_v63 }
 0x5a7   : > { %v2874_v51 = vpop.permute.xlu1 %2873 }
 0x5a8   : > { %v12819_v7 = vpop.eup %12818  ;;  %11585 = vmatmul.mubr.msk.bf16.vlgmr.msra.gmra.mrb[8].mxu0 %vm2351_vm2, %v2491_v2  ;;  %v2899_v8 = vsel %vm2351_vm2, %v2874_v51, 0.0  ;;  %v2501_v2 = vld [vmem:[%s13555_s29 + $0x18] sm:$0xff] }
 0x5a9   : > { %2900 = vadd.xlane.f32.xlu0 %v2899_v8  ;;  %v2396_v13 = vmul.f32 %v12819_v7, %v14041_v29 }
 0x5ab   : > { %v2876_v14 = vpop.permute.xlu1 %2875  ;;  %v2486_v16 = vmul.f32 %v14108_v59, %v2396_v13 }
 0x5ac   : > { %v2902_v23 = vsel %vm2351_vm2, %v2876_v14, 0.0  ;;  %v2504_v14 = vld [vmem:[%s13555_s29 + $0x30] sm:$0xff] }
 0x5ad   : > { %2903 = vadd.xlane.f32.xlu1 %v2902_v23  ;;  %2906 = vadd.xlane.f32.xlu0 %v2905_v31  ;;  %v2492_v18 = vpack.c.bf16 %v2487_v17, %v2486_v16  ;;  %v2502_v23 = vld [vmem:[%s13555_s29 + $0x20] sm:$0xff] }
 0x5af   : > { %v2880_v39 = vpop.permute.xlu1 %2879  ;;  %11588 = vmatprep.mubr.msk.bf16.mxu0 %vm2351_vm2, %v2492_v18  ;;  %v14230_v18 = vpack.c.bf16 %v14039_v28, %v14029_v24 }
 0x5b0   : > { %11589 = vmatmul.mubr.msk.bf16.gmra.mrb[12].mxu0 %vm2351_vm2, %v2493_v36  ;;  %v2908_v37 = vsel %vm2351_vm2, %v2880_v39, 0.0 }
 0x5b1   : > { %2909 = vadd.xlane.f32.xlu1 %v2908_v37  ;;  %2912 = vadd.xlane.f32.xlu0 %v2911_v40  ;;  %v14240_v37 = vpack.c.bf16 %v14055_v35, %v14041_v29 }
 0x5b3   : > { %v2884_v20 = vpop.permute.xlu1 %2883 }
 0x5b4   : > { %v2914_v59 = vsel %vm2351_vm2, %v2884_v20, 0.0  ;;  %v2503_v20 = vld [vmem:[%s13555_s29 + $0x28] sm:$0xff] }
 0x5b5   : > { %2915 = vadd.xlane.f32.xlu1 %v2914_v59  ;;  %2822 = vadd.xlane.f32.xlu0 %v2821_v21 }
 0x5b7   : > { %v2800_v26 = vpop.permute.xlu1 %2799 }
 0x5b8   : > { %v2824_v27 = vsel %vm2351_vm2, %v2800_v26, 0.0  ;;  %v14259_v26 = vpack.c.bf16 %v14069_v38, %v14047_v33 }
 0x5b9   : > { %2825 = vadd.xlane.f32.xlu1 %v2824_v27  ;;  %2828 = vadd.xlane.f32.xlu0 %v2827_v30 }
 0x5bb   : > { %v2804_v41 = vpop.permute.xlu1 %2803 }
 0x5bc   : > { %v2830_v42 = vsel %vm2351_vm2, %v2804_v41, 0.0 }
 0x5bd   : > { %2831 = vadd.xlane.f32.xlu1 %v2830_v42  ;;  %2834 = vadd.xlane.f32.xlu0 %v2833_v43 }
 0x5bf   : > { %v2808_v46 = vpop.permute.xlu1 %2807 }
 0x5c0   : > { %v2836_v47 = vsel %vm2351_vm2, %v2808_v46, 0.0 }
 0x5c1   : > { %2837 = vadd.xlane.f32.xlu1 %v2836_v47 }
 0x5c3   : > { %v2810_v48 = vpop.permute.xlu1 %2809 }
 0x5c4   : > { %v2839_v17 = vsel %vm2351_vm2, %v2810_v48, 0.0 }
 0x5c7   : > { %v2812_v49 = vpop.permute.xlu1 %2811 }
 0x5c8   : > { %v2842_v50 = vsel %vm2351_vm2, %v2812_v49, 0.0 }
 0x5c9   : > { %2843 = vadd.xlane.f32.xlu1 %v2842_v50 }
 0x61d   : > { %v14263_v27 = vpop.xlane.xlu0 %2894 }
 0x632   : > { %v14265_v30 = vpop.xlane.xlu1 %2897 }
 0x636   : > { %v2901_v32 = vpop.xlane.xlu0 %2900 }
 0x63a   : > { %v2904_v41 = vpop.xlane.xlu1 %2903  ;;  %v14267_v42 = vpop.xlane.xlu0 %2906 }
 0x63e   : > { %v2910_v43 = vpop.xlane.xlu1 %2909  ;;  %v14269_v46 = vpop.xlane.xlu0 %2912 }
 0x642   : > { %v14271_v47 = vpop.xlane.xlu1 %2915  ;;  %v14273_v48 = vpop.xlane.xlu0 %2822 }
 0x646   : > { %v14275_v49 = vpop.xlane.xlu1 %2825  ;;  %v14277_v50 = vpop.xlane.xlu0 %2828 }
 0x67b   : > { %v11586_v54 = vpop.f32.mrb[8].mxu0 }
 0x67c   : > { %v14200_v56 = vadd.f32 %v11586_v54, %v2500_v53  ;;  %v2576_v57 = vpop.f32.mrb[9].mxu0  ;;  %v14279_v53 = vpop.xlane.xlu1 %2831 }
 0x67d   : > { %v11587_v62 = vpop.f32.mrb[10].mxu0  ;;  %v14203_v52 = vadd.f32 %v2576_v57, %v2498_v55  ;;  %v14281_v54 = vpop.xlane.xlu0 %2834 }
 0x67e   : > { %v2579_v63 = vpop.f32.mrb[11].mxu0  ;;  %v2614_v0 = vsel %vm2607_vm3, %v14200_v56, -inf  ;;  %v14212_v51 = vadd.f32 %v11587_v62, %v2501_v2 }
 0x67f   : > { %v14208_v4 = vadd.f32 %v2579_v63, %v2499_v61  ;;  %2615 = vmax.xlane.f32.xlu0 %v2614_v0  ;;  %v2608_v60 = vsel %vm2607_vm3, %v14203_v52, -inf }
 0x680   : > { %v2617_v1 = vsel %vm2607_vm3, %v14212_v51, -inf  ;;  %v14283_v55 = vpop.xlane.xlu1 %2837 }
 0x681   : > { %v2611_v5 = vsel %vm2607_vm3, %v14208_v4, -inf }
 0x682   : > { %2612 = vmax.xlane.f32.xlu1 %v2611_v5 }
 0x683   : > { %v11590_v7 = vpop.f32.mrb[12].mxu0  ;;  %2609 = vmax.xlane.f32.xlu0 %v2608_v60 }
 0x684   : > { %v2592_v8 = vpop.f32.mrb[13].mxu0  ;;  %v14219_v16 = vadd.f32 %v11590_v7, %v2504_v14  ;;  %v14285_v57 = vpop.xlane.xlu1 %2843 }
 0x685   : > { %v11591_v12 = vpop.f32.mrb[14].mxu0  ;;  %v14223_v31 = vadd.f32 %v2592_v8, %v2502_v23 }
 0x686   : > { %v2595_v13 = vpop.f32.mrb[15].mxu0  ;;  %v2626_v34 = vsel %vm2607_vm3, %v14219_v16, -inf  ;;  %v14232_v36 = vadd.f32 %v11591_v12, %v2505_v25 }
 0x687   : > { %2618 = vmax.xlane.f32.xlu0 %v2617_v1  ;;  %v2620_v39 = vsel %vm2607_vm3, %v14223_v31, -inf  ;;  %v14253_v59 = vadd.f32 %v2595_v13, %v2503_v20  ;;  %v2920_v20 = vmax.f32 %v2904_v41, 1e-24 }
 0x688   : > { %v2629_v40 = vsel %vm2607_vm3, %v14232_v36, -inf }
 0x689   : > { %v2623_v21 = vsel %vm2607_vm3, %v14253_v59, -inf }
 0x68b   : > { %2840 = vadd.xlane.f32.xlu0 %v2839_v17 }
 0x68f   : > { %2627 = vmax.xlane.f32.xlu0 %v2626_v34 }
 0x693   : > { %2710 = vrot.lane.b32.xlu1 %v14230_v18, %s16481_s11  ;;  %2621 = vmax.xlane.f32.xlu0 %v2620_v39 }
 0x697   : > { %2712 = vrot.lane.b32.xlu1 %v14240_v37, %s16481_s11  ;;  %2630 = vmax.xlane.f32.xlu0 %v2629_v40 }
 0x6ad   : > { %2708 = vrot.lane.b32.xlu0 %v14248_v19, %s16481_s11 }
 0x6bb   : > { %2624 = vmax.xlane.f32.xlu1 %v2623_v21 }
 0x6cc   : > { %2714 = vrot.lane.b32.xlu1 %v14259_v26, %s16481_s11  ;;  %s10857_s11 = sld [smem:[#allocation2 + $0x1]] }
 0x70c   : > { %v2616_v61 = vpop.xlane.xlu0 %2615 }
 0x70d   : > { %v2634_v62 = vsub.f32 %v14200_v56, %v2616_v61  ;;  %v2919_v61 = vmax.f32 %v2901_v32, 1e-24  ;;  %v2921_v32 = vmax.f32 %v14267_v42, 1e-24 }
 0x70f   : > { %v2644_v63 = vmul.f32 1.442695, %v2634_v62  ;;  %v2613_v0 = vpop.xlane.xlu1 %2612 }
 0x710   : > { %v2610_v2 = vpop.xlane.xlu0 %2609  ;;  %v2633_v60 = vsub.f32 %v14208_v4, %v2613_v0 }
 0x711   : > { %12820 = vpow2.f32 %v2644_v63  ;;  %v2632_v5 = vsub.f32 %v14203_v52, %v2610_v2  ;;  %v2922_v2 = vmax.f32 %v2910_v43, 1e-24 }
 0x712   : > { %v2642_v13 = vmul.f32 1.442695, %v2633_v60 }
 0x713   : > { %v2640_v7 = vmul.f32 1.442695, %v2632_v5 }
 0x714   : > { %v2619_v8 = vpop.xlane.xlu0 %2618 }
 0x715   : > { %12822 = vpow2.f32 %v2640_v7  ;;  %v2635_v12 = vsub.f32 %v14212_v51, %v2619_v8 }
 0x717   : > { %v2646_v1 = vmul.f32 1.442695, %v2635_v12 }
 0x718   : > { %v14291_v14 = vpop.xlane.xlu0 %2840 }
 0x719   : > { %12824 = vpow2.f32 %v2646_v1 }
 0x71a   : > { %12826 = vpow2.f32 %v2642_v13 }
 0x71b   : > { %v14293_v17 = vpop.eup %12820 }
 0x71c   : > { %v2628_v56 = vpop.xlane.xlu0 %2627  ;;  %v2662_v23 = vsel %vm2607_vm3, %v14293_v17, 0.0 }
 0x71d   : > { %v2638_v52 = vsub.f32 %v14219_v16, %v2628_v56  ;;  %2663 = vadd.xlane.f32.xlu0 %v2662_v23  ;;  %v2918_v56 = vmax.f32 %v14265_v30, 1e-24  ;;  %v2846_v23 = vmax.f32 %v14275_v49, 1e-24  ;;  %v2850_v30 = vmax.f32 %v14283_v55, 1e-24 }
 0x71f   : > { %v14298_v4 = vpop.eup %12822  ;;  %v2652_v34 = vmul.f32 1.442695, %v2638_v52 }
 0x720   : > { %v2622_v25 = vpop.xlane.xlu0 %2621  ;;  %v2656_v51 = vsel %vm2607_vm3, %v14298_v4, 0.0 }
 0x721   : > { %12828 = vpow2.f32 %v2652_v34  ;;  %v2636_v39 = vsub.f32 %v14223_v31, %v2622_v25  ;;  %2657 = vadd.xlane.f32.xlu0 %v2656_v51  ;;  %v2711_v31 = vpop.permute.xlu1 %2710  ;;  %v2917_v51 = vmax.f32 %v14263_v27, 1e-24 }
 0x723   : > { %v14303_v40 = vpop.eup %12824  ;;  %v2648_v21 = vmul.f32 1.442695, %v2636_v39  ;;  %v2845_v39 = vmax.f32 %v14273_v48, 1e-24 }
 0x724   : > { %v2631_v62 = vpop.xlane.xlu0 %2630  ;;  %v2665_v16 = vsel %vm2607_vm3, %v14303_v40, 0.0  ;;  %v14307_v63 = vpop.eup %12826 }
 0x725   : > { %12830 = vpow2.f32 %v2648_v21  ;;  %v2639_v0 = vsub.f32 %v14232_v36, %v2631_v62  ;;  %2666 = vadd.xlane.f32.xlu1 %v2665_v16  ;;  %v2659_v41 = vsel %vm2607_vm3, %v14307_v63, 0.0  ;;  %v2713_v43 = vpop.permute.xlu1 %2712  ;;  %v2849_v62 = vmax.f32 %v14281_v54, 1e-24 }
 0x726   : > { %12832 = vrsqrt.f32 %v2920_v20 }
 0x727   : > { %v2654_v5 = vmul.f32 1.442695, %v2639_v0  ;;  %12834 = vrsqrt.f32 %v2919_v61 }
 0x728   : > { %v2709_v60 = vpop.permute.xlu0 %2708 }
 0x729   : > { %12836 = vpow2.f32 %v2654_v5  ;;  %2660 = vadd.xlane.f32.xlu1 %v2659_v41  ;;  %11592 = vmatprep.subr.bf16.mxu0 %v2709_v60 }
 0x72a   : > { %11593 = vmatpush3.bf16.msra.mxu0 %v2709_v60  ;;  %12838 = vrsqrt.f32 %v2922_v2 }
 0x72b   : > { %v14313_v7 = vpop.eup %12828  ;;  %11594 = vmatprep.subr.bf16.mxu0 %v2711_v31  ;;  %12840 = vrsqrt.f32 %v2921_v32 }
 0x72c   : > { %v2674_v36 = vsel %vm2607_vm3, %v14313_v7, 0.0  ;;  %12842 = vrsqrt.f32 %v2918_v56 }
 0x72d   : > { %2675 = vadd.xlane.f32.xlu0 %v2674_v36  ;;  %12844 = vrsqrt.f32 %v2846_v23 }
 0x72e   : > { %11595 = vmatpush3.bf16.msra.mxu0 %v2711_v31  ;;  %12846 = vrsqrt.f32 %v2917_v51 }
 0x72f   : > { %v14317_v8 = vpop.eup %12830  ;;  %11596 = vmatprep.subr.bf16.mxu0 %v2713_v43  ;;  %12848 = vrsqrt.f32 %v2845_v39 }
 0x730   : > { %v2668_v42 = vsel %vm2607_vm3, %v14317_v8, 0.0  ;;  %v12833_v12 = vpop.eup %12832  ;;  %12850 = vrsqrt.f32 %v2850_v30  ;;  %v2851_v30 = vmax.f32 %v14291_v14, 1e-24 }
 0x731   : > { %2669 = vadd.xlane.f32.xlu0 %v2668_v42  ;;  %v12835_v13 = vpop.eup %12834  ;;  %v2936_v34 = vmul.f32 %v12833_v12, %v14039_v28  ;;  %12852 = vrsqrt.f32 %v2849_v62 }
 0x732   : > { %11597 = vmatpush3.bf16.msra.mxu0 %v2713_v43  ;;  %v2935_v20 = vmul.f32 %v12835_v13, %v14029_v24  ;;  %v2942_v43 = vstv %s10857_s11  ;;  %s16483_s11 = smov 48  }
 0x733   : > { %v14321_v1 = vpop.eup %12836 }
 0x734   : > { %v2677_v52 = vsel %vm2607_vm3, %v14321_v1, 0.0  ;;  %v12839_v25 = vpop.eup %12838  ;;  %v2956_v61 = vpack.c.bf16 %v2936_v34, %v2935_v20  ;;  %v2848_v20 = vmax.f32 %v14279_v53, 1e-24 }
 0x735   : > { %2678 = vadd.xlane.f32.xlu0 %v2677_v52  ;;  %v12841_v21 = vpop.eup %12840  ;;  %v2938_v49 = vmul.f32 %v12839_v25, %v14055_v35 }
 0x736   : > { %v2937_v27 = vmul.f32 %v12841_v21, %v14041_v29  ;;  %v12843_v16 = vpop.eup %12842  ;;  %v2847_v21 = vmax.f32 %v14277_v50, 1e-24 }
 0x737   : > { %v12845_v0 = vpop.eup %12844  ;;  %v2934_v5 = vmul.f32 %v12843_v16, %v14023_v22 }
 0x738   : > { %v2957_v48 = vpack.c.bf16 %v2938_v49, %v2937_v27  ;;  %v12847_v55 = vpop.eup %12846  ;;  %v2862_v31 = vmul.f32 %v12845_v0, %v14023_v22  ;;  %v2852_v49 = vmax.f32 %v14285_v57, 1e-24 }
 0x739   : > { %v12849_v2 = vpop.eup %12848  ;;  %v2933_v54 = vmul.f32 %v12847_v55, %v14021_v10 }
 0x73a   : > { %2986 = vrot.lane.b32.xlu1 %v2956_v61, %s16491_s1  ;;  %v12851_v60 = vpop.eup %12850  ;;  %v2861_v41 = vmul.f32 %v12849_v2, %v14021_v10  ;;  %v2944_v12 = vmul.f32 %v2942_v43, %v2862_v31 }
 0x73b   : > { %v12853_v32 = vpop.eup %12852  ;;  %v2955_v42 = vpack.c.bf16 %v2934_v5, %v2933_v54  ;;  %v2866_v13 = vmul.f32 %v12851_v60, %v14055_v35  ;;  %v2924_v35 = vmax.f32 %v14271_v47, 1e-24 }
 0x73c   : > { %v2943_v56 = vmul.f32 %v2942_v43, %v2861_v41  ;;  %v2865_v23 = vmul.f32 %v12853_v32, %v14041_v29  ;;  %v2923_v29 = vmax.f32 %v14269_v46, 1e-24 }
 0x73d   : > { %v2948_v25 = vmul.f32 %v2942_v43, %v2866_v13 }
 0x73e   : > { %2988 = vrot.lane.b32.xlu1 %v2957_v48, %s16491_s1  ;;  %v2951_v34 = vpack.c.bf16 %v2944_v12, %v2943_v56  ;;  %v2947_v10 = vmul.f32 %v2942_v43, %v2865_v23 }
 0x740   : > { %v2953_v39 = vpack.c.bf16 %v2948_v25, %v2947_v10 }
 0x748   : > { %v2625_v36 = vpop.xlane.xlu1 %2624 }
 0x749   : > { %v2637_v52 = vsub.f32 %v14253_v59, %v2625_v36 }
 0x74b   : > { %2984 = vrot.lane.b32.xlu0 %v2955_v42, %s16491_s1  ;;  %v2650_v51 = vmul.f32 1.442695, %v2637_v52 }
 0x74c   : > { %v2715_v22 = vpop.permute.xlu1 %2714 }
 0x74d   : > { %11598 = vmatprep.subr.bf16.mxu0 %v2715_v22  ;;  %12854 = vpow2.f32 %v2650_v51 }
 0x74e   : > { %11599 = vmatpush3.bf16.msra.mxu0 %v2715_v22  ;;  %12856 = vrsqrt.f32 %v2924_v35 }
 0x74f   : > { %2972 = vrot.lane.b32.xlu0 %v2951_v34, %s16487_s23  ;;  %12858 = vrsqrt.f32 %v2848_v20 }
 0x750   : > { %12860 = vrsqrt.f32 %v2923_v29 }
 0x751   : > { %12862 = vrsqrt.f32 %v2847_v21 }
 0x752   : > { %12864 = vrsqrt.f32 %v2851_v30 }
 0x753   : > { %2976 = vrot.lane.b32.xlu0 %v2953_v39, %s16487_s23  ;;  %12866 = vrsqrt.f32 %v2852_v49 }
 0x757   : > { %v14350_v59 = vpop.eup %12854 }
 0x758   : > { %v2671_v61 = vsel %vm2607_vm3, %v14350_v59, 0.0  ;;  %v12857_v47 = vpop.eup %12856 }
 0x759   : > { %v12859_v46 = vpop.eup %12858  ;;  %v2940_v50 = vmul.f32 %v12857_v47, %v14069_v38 }
 0x75a   : > { %v12861_v53 = vpop.eup %12860  ;;  %v2864_v27 = vmul.f32 %v12859_v46, %v14039_v28 }
 0x75b   : > { %v12863_v62 = vpop.eup %12862  ;;  %v2939_v14 = vmul.f32 %v12861_v53, %v14047_v33 }
 0x75c   : > { %v12865_v48 = vpop.eup %12864  ;;  %v2863_v16 = vmul.f32 %v12863_v62, %v14029_v24  ;;  %v2946_v2 = vmul.f32 %v2942_v43, %v2864_v27 }
 0x75d   : > { %v12867_v0 = vpop.eup %12866  ;;  %v2958_v55 = vpack.c.bf16 %v2940_v50, %v2939_v14  ;;  %v2867_v57 = vmul.f32 %v12865_v48, %v14047_v33 }
 0x75e   : > { %v2945_v5 = vmul.f32 %v2942_v43, %v2863_v16  ;;  %v2868_v31 = vmul.f32 %v12867_v0, %v14069_v38 }
 0x75f   : > { %v2949_v54 = vmul.f32 %v2942_v43, %v2867_v57 }
 0x760   : > { %v2952_v60 = vpack.c.bf16 %v2946_v2, %v2945_v5  ;;  %v2950_v28 = vmul.f32 %v2942_v43, %v2868_v31 }
 0x762   : > { %2672 = vadd.xlane.f32.xlu1 %v2671_v61  ;;  %v2954_v41 = vpack.c.bf16 %v2950_v28, %v2949_v54  ;;  %v10860_v28 = vld [vmem:[%s13555_s29 + $0x50] sm:$0xff] }
 0x773   : > { %2990 = vrot.lane.b32.xlu1 %v2958_v55, %s16491_s1  ;;  %s16586_s1 = sld [smem:[#allocation19_spill]] }
 0x777   : > { %2974 = vrot.lane.b32.xlu1 %v2952_v60, %s16487_s23  ;;  %v10858_v60 = vld [vmem:[%s13555_s29 + $0x40] sm:$0xff] }
 0x77b   : > { %2978 = vrot.lane.b32.xlu1 %v2954_v41, %s16487_s23  ;;  %s16582_s23 = sld [smem:[#allocation15_spill]] }
 0x7aa   : > { %v2664_v32 = vpop.xlane.xlu0 %2663 }
 0x7ae   : > { %v2658_v24 = vpop.xlane.xlu0 %2657 }
 0x7b2   : > { %v2667_v36 = vpop.xlane.xlu1 %2666 }
 0x7b3   : > { %12868 = vrcp.f32 %v2667_v36 }
 0x7b4   : > { %12870 = vrcp.f32 %v2658_v24 }
 0x7b5   : > { %12872 = vrcp.f32 %v2664_v32  ;;  %v10859_v32 = vld [vmem:[%s13555_s29 + $0x48] sm:$0xff] }
 0x7b6   : > { %v2661_v33 = vpop.xlane.xlu1 %2660 }
 0x7b7   : > { %12874 = vrcp.f32 %v2661_v33 }
 0x7ba   : > { %v2676_v42 = vpop.xlane.xlu0 %2675  ;;  %v2987_v20 = vpop.permute.xlu1 %2986 }
 0x7bd   : > { %v12869_v12 = vpop.eup %12868 }
 0x7be   : > { %v2670_v13 = vpop.xlane.xlu0 %2669  ;;  %v12871_v38 = vpop.eup %12870  ;;  %v2687_v52 = vmul.f32 %v12869_v12, %v14303_v40 }
 0x7bf   : > { %v12873_v56 = vpop.eup %12872  ;;  %v2681_v22 = vmul.f32 %v12871_v38, %v14298_v4  ;;  %v3008_v4 = vsel %vm2351_vm2, %v2987_v20, 0  ;;  %v2989_v40 = vpop.permute.xlu1 %2988  ;;  %v10861_v38 = vld [vmem:[%s13555_s29 + $0x58] sm:$0xff] }
 0x7c0   : > { %v2685_v25 = vmul.f32 %v12873_v56, %v14293_v17  ;;  %v3011_v17 = vsel %vm2351_vm2, %v2989_v40, 0 }
 0x7c1   : > { %v12875_v23 = vpop.eup %12874 }
 0x7c2   : > { %v2679_v43 = vpop.xlane.xlu0 %2678  ;;  %v2683_v34 = vmul.f32 %v12875_v23, %v14307_v63  ;;  %v2697_v51 = vpack.c.bf16 %v2687_v52, %v2685_v25  ;;  %v10863_v25 = vld [vmem:[%s13555_s29 + $0x68] sm:$0xff] }
 0x7c3   : > { %12876 = vrcp.f32 %v2679_v43 }
 0x7c4   : > { %v2696_v10 = vpack.c.bf16 %v2683_v34, %v2681_v22  ;;  %12878 = vrcp.f32 %v2670_v13  ;;  %v10862_v34 = vld [vmem:[%s13555_s29 + $0x60] sm:$0xff] }
 0x7c5   : > { %12880 = vrcp.f32 %v2676_v42 }
 0x7c6   : > { %11600 = vmatprep.mubr.msk.bf16.mxu0 %vm2607_vm3, %v2696_v10  ;;  %v2985_v39 = vpop.permute.xlu0 %2984 }
 0x7c7   : > { %11601 = vmatmul.mubr.msk.bf16.vlgmr.msra.gmra.mrb[16].mxu0 %vm2607_vm3, %v2697_v51  ;;  %12373 = vmatprep.subr.msk.bf16.mxu0 %vm2351_vm2, %v2985_v39  ;;  %v3005_v35 = vsel %vm2351_vm2, %v2985_v39, 0  ;;  %v10865_v51 = vld [vmem:[%s13555_s29 + $0x78] sm:$0xff] }
 0x7c8   : > { %11609 = vmatpush3.bf16.xpose.msra.mxu0 %v3005_v35 }
 0x7c9   : > { %12374 = vmatprep.subr.msk.bf16.mxu0 %vm2351_vm2, %v2987_v20 }
 0x7ca   : > { %v2973_v14 = vpop.permute.xlu0 %2972 }
 0x7cd   : > { %v12877_v30 = vpop.eup %12876 }
 0x7ce   : > { %v12879_v61 = vpop.eup %12878  ;;  %v2695_v46 = vmul.f32 %v12877_v30, %v14321_v1  ;;  %v2977_v0 = vpop.permute.xlu0 %2976 }
 0x7cf   : > { %v12881_v49 = vpop.eup %12880  ;;  %v2689_v53 = vmul.f32 %v12879_v61, %v14317_v8 }
 0x7d0   : > { %11611 = vmatpush3.bf16.xpose.msra.mxu0 %v3008_v4  ;;  %v2693_v50 = vmul.f32 %v12881_v49, %v14313_v7 }
 0x7d1   : > { %12375 = vmatprep.subr.msk.bf16.mxu0 %vm2351_vm2, %v2989_v40  ;;  %v10864_v40 = vld [vmem:[%s13555_s29 + $0x70] sm:$0xff] }
 0x7d2   : > { %v2699_v48 = vpack.c.bf16 %v2695_v46, %v2693_v50 }
 0x7d8   : > { %11613 = vmatpush3.bf16.xpose.msra.mxu0 %v3011_v17 }
 0x7ef   : > { %v2673_v63 = vpop.xlane.xlu1 %2672 }
 0x7f0   : > { %12882 = vrcp.f32 %v2673_v63 }
 0x7f3   : > { %v2991_v29 = vpop.permute.xlu1 %2990 }
 0x7f4   : > { %12376 = vmatprep.subr.msk.bf16.mxu0 %vm2351_vm2, %v2991_v29  ;;  %v3014_v21 = vsel %vm2351_vm2, %v2991_v29, 0 }
 0x7f5   : > { %11615 = vmatpush3.bf16.xpose.msra.mxu0 %v3014_v21 }
 0x7f7   : > { %v2975_v16 = vpop.permute.xlu1 %2974 }
 0x7fa   : > { %v12883_v47 = vpop.eup %12882 }
 0x7fb   : > { %v2691_v62 = vmul.f32 %v12883_v47, %v14350_v59  ;;  %v2979_v8 = vpop.permute.xlu1 %2978 }
 0x7fd   : > { %v2698_v27 = vpack.c.bf16 %v2691_v62, %v2689_v53 }
 0x7ff   : > { %11604 = vmatprep.mubr.msk.bf16.mxu0 %vm2607_vm3, %v2698_v27 }
 0x800   : > { %11605 = vmatmul.mubr.msk.bf16.gmra.mrb[20].mxu0 %vm2607_vm3, %v2699_v48 }
 0x801   : > { %11616 = vmatprep.mubr.msk.bf16.mxu0 %vm2351_vm2, %v2973_v14 }
 0x808   : > { %11617 = vmatmul.mubr.msk.bf16.vlgmr.msra.gmra.mrb[24].mxu0 %vm2351_vm2, %v2975_v16 }
 0x809   : > { %11620 = vmatprep.mubr.msk.bf16.mxu0 %vm2351_vm2, %v2977_v0 }
 0x810   : > { %11621 = vmatmul.mubr.msk.bf16.gmra.mrb[28].mxu0 %vm2351_vm2, %v2979_v8 }
 0x89a   : > { %v14390_v7 = vpop.f32.mrb[16].mxu0 }
 0x89b   : > { %v14392_v1 = vpop.f32.mrb[17].mxu0 }
 0x89c   : > { %v14394_v59 = vpop.f32.mrb[18].mxu0 }
 0x89d   : > { %v14396_v55 = vpop.f32.mrb[19].mxu0 }
 0x8d3   : > { %v14398_v2 = vpop.f32.mrb[20].mxu0 }
 0x8d4   : > { %v14400_v57 = vpop.f32.mrb[21].mxu0 }
 0x8d5   : > { %v14402_v5 = vpop.f32.mrb[22].mxu0 }
 0x8d6   : > { %v14404_v31 = vpop.f32.mrb[23].mxu0 }
 0x8db   : > { %v11618_v54 = vpop.f32.mrb[24].mxu0 }
 0x8dc   : > { %v3050_v41 = vpop.f32.mrb[25].mxu0  ;;  %v3059_v42 = vadd.f32 %v11618_v54, %v10860_v28 }
 0x8dd   : > { %v3051_v24 = vadd.f32 %v10858_v60, %v3050_v41  ;;  %v11619_v36 = vpop.f32.mrb[26].mxu0 }
 0x8de   : > { %v3053_v33 = vpop.f32.mrb[27].mxu0  ;;  %v3062_v23 = vadd.f32 %v11619_v36, %v10861_v38  ;;  %v3087_v43 = vsel %vm2607_vm3, %v3059_v42, -inf }
 0x8df   : > { %v3054_v12 = vadd.f32 %v10859_v32, %v3053_v33  ;;  %v3081_v13 = vsel %vm2607_vm3, %v3051_v24, -inf }
 0x8e0   : > { %3082 = vmax.xlane.f32.xlu0 %v3081_v13  ;;  %v3090_v4 = vsel %vm2607_vm3, %v3062_v23, -inf }
 0x8e1   : > { %v3084_v56 = vsel %vm2607_vm3, %v3054_v12, -inf }
 0x8e2   : > { %3085 = vmax.xlane.f32.xlu1 %v3084_v56 }
 0x8e3   : > { %v11622_v52 = vpop.f32.mrb[28].mxu0 }
 0x8e4   : > { %3088 = vmax.xlane.f32.xlu0 %v3087_v43  ;;  %v3066_v22 = vpop.f32.mrb[29].mxu0  ;;  %v3075_v29 = vadd.f32 %v11622_v52, %v10864_v40 }
 0x8e5   : > { %v11623_v10 = vpop.f32.mrb[30].mxu0  ;;  %v3067_v35 = vadd.f32 %v10862_v34, %v3066_v22 }
 0x8e6   : > { %v3069_v39 = vpop.f32.mrb[31].mxu0  ;;  %v3078_v17 = vadd.f32 %v11623_v10, %v10865_v51  ;;  %v3099_v61 = vsel %vm2607_vm3, %v3075_v29, -inf }
 0x8e7   : > { %v3070_v20 = vadd.f32 %v10863_v25, %v3069_v39  ;;  %v3093_v21 = vsel %vm2607_vm3, %v3067_v35, -inf }
 0x8e8   : > { %3091 = vmax.xlane.f32.xlu0 %v3090_v4  ;;  %v3102_v30 = vsel %vm2607_vm3, %v3078_v17, -inf }
 0x8e9   : > { %v3096_v63 = vsel %vm2607_vm3, %v3070_v20, -inf }
 0x8ea   : > { %3097 = vmax.xlane.f32.xlu1 %v3096_v63 }
 0x8ec   : > { %3094 = vmax.xlane.f32.xlu0 %v3093_v21 }
 0x8ee   : > { %3103 = vmax.xlane.f32.xlu1 %v3102_v30 }
 0x8f0   : > { %3100 = vmax.xlane.f32.xlu0 %v3099_v61 }
 0x906   : > { %3173 = vrot.lane.b32.xlu0 %v14248_v19, %s16483_s11 }
 0x96d   : > { %v3083_v49 = vpop.xlane.xlu0 %3082 }
 0x96e   : > { %v3105_v47 = vsub.f32 %v3051_v24, %v3083_v49 }
 0x96f   : > { %v3086_v46 = vpop.xlane.xlu1 %3085 }
 0x970   : > { %v3113_v50 = vmul.f32 1.442695, %v3105_v47  ;;  %v3106_v27 = vsub.f32 %v3054_v12, %v3086_v46 }
 0x971   : > { %v3089_v53 = vpop.xlane.xlu0 %3088 }
 0x972   : > { %v3107_v62 = vsub.f32 %v3059_v42, %v3089_v53  ;;  %v3115_v8 = vmul.f32 1.442695, %v3106_v27 }
 0x974   : > { %v3117_v48 = vmul.f32 1.442695, %v3107_v62 }
 0x975   : > { %v3092_v14 = vpop.xlane.xlu0 %3091 }
 0x976   : > { %12884 = vpow2.f32 %v3117_v48  ;;  %v3108_v16 = vsub.f32 %v3062_v23, %v3092_v14 }
 0x977   : > { %v3098_v0 = vpop.xlane.xlu1 %3097  ;;  %12886 = vpow2.f32 %v3113_v50 }
 0x978   : > { %v3119_v60 = vmul.f32 1.442695, %v3108_v16  ;;  %v3110_v23 = vsub.f32 %v3070_v20, %v3098_v0 }
 0x979   : > { %v3095_v54 = vpop.xlane.xlu0 %3094 }
 0x97a   : > { %12888 = vpow2.f32 %v3119_v60  ;;  %v3109_v28 = vsub.f32 %v3067_v35, %v3095_v54  ;;  %v3123_v25 = vmul.f32 1.442695, %v3110_v23  ;;  %v12587_v23 = vld [vmem:[%s16571_s14 + $0x8] sm:$0xff]  }
 0x97b   : > { %12890 = vpow2.f32 %v3115_v8  ;;  %v3104_v19 = vpop.xlane.xlu1 %3103 }
 0x97c   : > { %v3121_v36 = vmul.f32 1.442695, %v3109_v28  ;;  %v3112_v33 = vsub.f32 %v3078_v17, %v3104_v19 }
 0x97d   : > { %v3101_v41 = vpop.xlane.xlu0 %3100 }
 0x97e   : > { %v3111_v32 = vsub.f32 %v3075_v29, %v3101_v41  ;;  %v3127_v52 = vmul.f32 1.442695, %v3112_v33 }
 0x980   : > { %v14424_v24 = vpop.eup %12884  ;;  %v3125_v42 = vmul.f32 1.442695, %v3111_v32 }
 0x981   : > { %v3174_v12 = vpop.permute.xlu0 %3173  ;;  %v3135_v13 = vsel %vm2607_vm3, %v14424_v24, 0.0  ;;  %v12887_v38 = vpop.eup %12886 }
 0x982   : > { %12892 = vpow2.f32 %v3125_v42  ;;  %3136 = vadd.xlane.f32.xlu0 %v3135_v13  ;;  %11624 = vmatprep.subr.bf16.mxu0 %v3174_v12  ;;  %v3129_v43 = vsel %vm2607_vm3, %v12887_v38, 0.0 }
 0x983   : > { %11625 = vmatpush3.bf16.msra.mxu0 %v3174_v12  ;;  %12894 = vpow2.f32 %v3121_v36 }
 0x984   : > { %v12889_v56 = vpop.eup %12888  ;;  %12896 = vpow2.f32 %v3127_v52 }
 0x985   : > { %v3138_v22 = vsel %vm2607_vm3, %v12889_v56, 0.0  ;;  %v12891_v34 = vpop.eup %12890  ;;  %12898 = vpow2.f32 %v3123_v25 }
 0x986   : > { %3130 = vadd.xlane.f32.xlu0 %v3129_v43  ;;  %3139 = vadd.xlane.f32.xlu1 %v3138_v22  ;;  %v3132_v10 = vsel %vm2607_vm3, %v12891_v34, 0.0 }
 0x98a   : > { %3133 = vadd.xlane.f32.xlu1 %v3132_v10 }
 0x98c   : > { %v12893_v51 = vpop.eup %12892 }
 0x98d   : > { %v3147_v39 = vsel %vm2607_vm3, %v12893_v51, 0.0  ;;  %v12895_v35 = vpop.eup %12894 }
 0x98e   : > { %3148 = vadd.xlane.f32.xlu1 %v3147_v39  ;;  %v3141_v20 = vsel %vm2607_vm3, %v12895_v35, 0.0  ;;  %v12897_v4 = vpop.eup %12896 }
 0x98f   : > { %v3150_v40 = vsel %vm2607_vm3, %v12897_v4, 0.0  ;;  %v12899_v17 = vpop.eup %12898 }
 0x990   : > { %v3144_v63 = vsel %vm2607_vm3, %v12899_v17, 0.0 }
 0x992   : > { %3142 = vadd.xlane.f32.xlu1 %v3141_v20 }
 0x996   : > { %3151 = vadd.xlane.f32.xlu1 %v3150_v40 }
 0x99a   : > { %3145 = vadd.xlane.f32.xlu1 %v3144_v63 }
 0x99c   : > { %3177 = vrot.lane.b32.xlu0 %v14240_v37, %s16483_s11 }
 0x9a0   : > { %3179 = vrot.lane.b32.xlu0 %v14259_v26, %s16483_s11 }
 0x9ab   : > { %3175 = vrot.lane.b32.xlu1 %v14230_v18, %s16483_s11  ;;  %s16485_s11 = smov 16  }
 0xa0f   : > { %v3137_v29 = vpop.xlane.xlu0 %3136 }
 0xa13   : > { %v3140_v21 = vpop.xlane.xlu1 %3139  ;;  %v3131_v30 = vpop.xlane.xlu0 %3130 }
 0xa14   : > { %12900 = vrcp.f32 %v3131_v30 }
 0xa17   : > { %v3134_v61 = vpop.xlane.xlu1 %3133  ;;  %v3178_v18 = vpop.permute.xlu0 %3177 }
 0xa18   : > { %12902 = vrcp.f32 %v3134_v61 }
 0xa19   : > { %12904 = vrcp.f32 %v3140_v21 }
 0xa1a   : > { %12906 = vrcp.f32 %v3137_v29 }
 0xa1b   : > { %v3149_v49 = vpop.xlane.xlu1 %3148  ;;  %v3180_v8 = vpop.permute.xlu0 %3179 }
 0xa1e   : > { %v12901_v46 = vpop.eup %12900 }
 0xa1f   : > { %v3143_v47 = vpop.xlane.xlu1 %3142  ;;  %v3154_v50 = vmul.f32 %v12901_v46, %v12887_v38 }
 0xa20   : > { %12908 = vrcp.f32 %v3143_v47 }
 0xa22   : > { %v12903_v53 = vpop.eup %12902 }
 0xa23   : > { %v3152_v62 = vpop.xlane.xlu1 %3151  ;;  %v3156_v27 = vmul.f32 %v12903_v53, %v12891_v34  ;;  %v12905_v14 = vpop.eup %12904 }
 0xa24   : > { %v12907_v16 = vpop.eup %12906  ;;  %v3160_v54 = vmul.f32 %v12905_v14, %v12889_v56  ;;  %v12586_v56 = vld [vmem:[%s16571_s14] sm:$0xff]   ;;  %s16610_s14 = sld [smem:[#allocation39_spill]] }
 0xa25   : > { %v3169_v37 = vpack.c.bf16 %v3156_v27, %v3154_v50  ;;  %v3158_v19 = vmul.f32 %v12907_v16, %v14424_v24  ;;  %11640 = vmatprep.subr.bf16.mxu1 %v12586_v56 }
 0xa26   : > { %11641 = vmatpush3.bf16.msra.mxu1 %v12586_v56 }
 0xa27   : > { %v3146_v26 = vpop.xlane.xlu1 %3145  ;;  %11632 = vmatprep.mubr.msk.bf16.mxu0 %vm2607_vm3, %v3169_v37  ;;  %v3170_v32 = vpack.c.bf16 %v3160_v54, %v3158_v19  ;;  %11642 = vmatprep.subr.bf16.mxu1 %v12587_v23 }
 0xa28   : > { %12910 = vrcp.f32 %v3146_v26 }
 0xa29   : > { %12912 = vrcp.f32 %v3152_v62 }
 0xa2a   : > { %12914 = vrcp.f32 %v3149_v49  ;;  %v12909_v0 = vpop.eup %12908  ;;  %11643 = vmatpush3.bf16.msra.mxu1 %v12587_v23 }
 0xa2b   : > { %v3176_v48 = vpop.permute.xlu1 %3175  ;;  %v3162_v41 = vmul.f32 %v12909_v0, %v12895_v35  ;;  %v10874_v0 = vld [vmem:[%s13575_s19] ss:$0 sm:$0xff] }
 0xa2c   : > { %11626 = vmatprep.subr.bf16.mxu0 %v3176_v48 }
 0xa2d   : > { %11627 = vmatpush3.bf16.msra.mxu0 %v3176_v48 }
 0xa2e   : > { %11628 = vmatprep.subr.bf16.mxu0 %v3178_v18 }
 0xa31   : > { %11629 = vmatpush3.bf16.msra.mxu0 %v3178_v18 }
 0xa32   : > { %v12911_v60 = vpop.eup %12910  ;;  %11630 = vmatprep.subr.bf16.mxu0 %v3180_v8 }
 0xa33   : > { %v3164_v28 = vmul.f32 %v12911_v60, %v12899_v17  ;;  %v12913_v36 = vpop.eup %12912 }
 0xa34   : > { %v12915_v42 = vpop.eup %12914  ;;  %v3168_v12 = vmul.f32 %v12913_v36, %v12897_v4 }
 0xa35   : > { %11631 = vmatpush3.bf16.msra.mxu0 %v3180_v8  ;;  %v3171_v33 = vpack.c.bf16 %v3164_v28, %v3162_v41  ;;  %v3166_v13 = vmul.f32 %v12915_v42, %v12893_v51 }
 0xa37   : > { %v3172_v38 = vpack.c.bf16 %v3168_v12, %v3166_v13 }
 0xa38   : > { %11633 = vmatmul.mubr.msk.bf16.vlgmr.msra.gmra.mrb[32].mxu0 %vm2607_vm3, %v3170_v32 }
 0xa39   : > { %11636 = vmatprep.mubr.msk.bf16.mxu0 %vm2607_vm3, %v3171_v33 }
 0xa40   : > { %11637 = vmatmul.mubr.msk.bf16.gmra.mrb[36].mxu0 %vm2607_vm3, %v3172_v38 }
 0xb0b   : > { %v11634_v24 = vpop.f32.mrb[32].mxu0 }
 0xb0c   : > { %v3231_v52 = vpop.f32.mrb[33].mxu0 }
 0xb0d   : > { %v11635_v43 = vpop.f32.mrb[34].mxu0 }
 0xb0e   : > { %v12516_v22 = vpack.i.bf16 %v11635_v43, %v11634_v24  ;;  %v3234_v34 = vpop.f32.mrb[35].mxu0 }
 0xb0f   : > { %v12511_v25 = vpack.i.bf16 %v3234_v34, %v3231_v52 }
 0xb10   : > { %12517 = vrot.lane.b32.xlu1 %v12516_v22, %s16485_s11 }
 0xb11   : > { %12512 = vrot.lane.b32.xlu0 %v12511_v25, %s16485_s11 }
 0xb13   : > { %v11638_v10 = vpop.f32.mrb[36].mxu0 }
 0xb14   : > { %v3247_v51 = vpop.f32.mrb[37].mxu0 }
 0xb15   : > { %v11639_v39 = vpop.f32.mrb[38].mxu0 }
 0xb16   : > { %v12526_v35 = vpack.i.bf16 %v11639_v39, %v11638_v10  ;;  %v3250_v20 = vpop.f32.mrb[39].mxu0 }
 0xb17   : > { %v12521_v4 = vpack.i.bf16 %v3250_v20, %v3247_v51 }
 0xb18   : > { %12527 = vrot.lane.b32.xlu1 %v12526_v35, %s16485_s11 }
 0xb19   : > { %12522 = vrot.lane.b32.xlu0 %v12521_v4, %s16485_s11  ;;  %s16581_s11 = sld [smem:[#allocation16_spill]] }
 0xb82   : > { %v12518_v40 = vpop.permute.xlu1 %12517 }
 0xb83   : > { %v12520_v17 = vunpack.i.h.bf16 %v12518_v40  ;;  %v12519_v63 = vunpack.i.l.bf16 %v12518_v40  ;;  %v12513_v29 = vpop.permute.xlu0 %12512 }
 0xb84   : > { %v12515_v21 = vunpack.i.h.bf16 %v12513_v29  ;;  %v12514_v30 = vunpack.i.l.bf16 %v12513_v29 }
 0xb85   : > { %v3297_v61 = vsel %vm2351_vm2, %v14394_v59, %v12520_v17  ;;  %v3296_v49 = vsel %vm2351_vm2, %v14390_v7, %v12519_v63 }
 0xb86   : > { %v3303_v47 = vpack.c.bf16 %v3297_v61, %v3296_v49  ;;  %v3295_v46 = vsel %vm2351_vm2, %v14396_v55, %v12515_v21  ;;  %v3294_v53 = vsel %vm2351_vm2, %v14392_v1, %v12514_v30 }
 0xb87   : > { %v3302_v62 = vpack.c.bf16 %v3295_v46, %v3294_v53 }
 0xb89   : > { %11644 = vmatprep.mubr.msk.bf16.mxu1 %vm2074_vm1, %v3302_v62 }
 0xb8a   : > { %11645 = vmatmul.mubr.msk.bf16.vlgmr.msra.gmra.mrb[8].mxu1 %vm2074_vm1, %v3303_v47  ;;  %v12528_v50 = vpop.permute.xlu1 %12527 }
 0xb8b   : > { %v12530_v27 = vunpack.i.h.bf16 %v12528_v50  ;;  %v12529_v37 = vunpack.i.l.bf16 %v12528_v50  ;;  %v12523_v59 = vpop.permute.xlu0 %12522 }
 0xb8c   : > { %v12525_v26 = vunpack.i.h.bf16 %v12523_v59  ;;  %v12524_v18 = vunpack.i.l.bf16 %v12523_v59 }
 0xb8d   : > { %v3301_v7 = vsel %vm2351_vm2, %v14402_v5, %v12530_v27  ;;  %v3300_v55 = vsel %vm2351_vm2, %v14398_v2, %v12529_v37 }
 0xb8e   : > { %v3299_v1 = vsel %vm2351_vm2, %v14404_v31, %v12525_v26  ;;  %v3298_v48 = vsel %vm2351_vm2, %v14400_v57, %v12524_v18  ;;  %v3305_v14 = vpack.c.bf16 %v3301_v7, %v3300_v55 }
 0xb8f   : > { %v3304_v16 = vpack.c.bf16 %v3299_v1, %v3298_v48 }
 0xb91   : > { %11648 = vmatprep.mubr.msk.bf16.mxu1 %vm2074_vm1, %v3304_v16 }
 0xb92   : > { %11649 = vmatmul.mubr.msk.bf16.gmra.mrb[12].mxu1 %vm2074_vm1, %v3305_v14 }
 0xc5d   : > { %v11646_v8 = vpop.f32.mrb[8].mxu1 }
 0xc5e   : > { %v3370_v60 = vpop.f32.mrb[9].mxu1  ;;  %v3379_v19 = vadd.f32 %v11646_v8, %v10874_v0 }
 0xc5f   : > { %v3371_v54 = vadd.f32 %v10874_v0, %v3370_v60  ;;  %v11647_v5 = vpop.f32.mrb[10].mxu1 }
 0xc60   : > { %v3373_v28 = vpop.f32.mrb[11].mxu1  ;;  %v3382_v57 = vadd.f32 %v11647_v5, %v10874_v0  ;;  %v3407_v36 = vsel %vm2074_vm1, %v3379_v19, 0.0 }
 0xc61   : > { %v3374_v2 = vadd.f32 %v10874_v0, %v3373_v28  ;;  %v3401_v41 = vsel %vm2074_vm1, %v3371_v54, 0.0 }
 0xc62   : > { %3402 = vadd.xlane.f32.xlu0 %v3401_v41  ;;  %v3410_v56 = vsel %vm2074_vm1, %v3382_v57, 0.0 }
 0xc63   : > { %v3404_v31 = vsel %vm2074_vm1, %v3374_v2, 0.0 }
 0xc64   : > { %3405 = vadd.xlane.f32.xlu1 %v3404_v31  ;;  %v12588_v31 = vld [vmem:[%s16573_s6] sm:$0xff]  }
 0xc65   : > { %v11650_v32 = vpop.f32.mrb[12].mxu1  ;;  %11652 = vmatprep.subr.bf16.mxu0 %v12588_v31 }
 0xc66   : > { %3408 = vadd.xlane.f32.xlu0 %v3407_v36  ;;  %v3386_v33 = vpop.f32.mrb[13].mxu1  ;;  %v3395_v52 = vadd.f32 %v11650_v32, %v10874_v0  ;;  %11653 = vmatpush3.bf16.msra.mxu0 %v12588_v31 }
 0xc67   : > { %v11651_v42 = vpop.f32.mrb[14].mxu1  ;;  %v3387_v13 = vadd.f32 %v10874_v0, %v3386_v33 }
 0xc68   : > { %v3389_v12 = vpop.f32.mrb[15].mxu1  ;;  %v3398_v23 = vadd.f32 %v11651_v42, %v10874_v0  ;;  %v3419_v34 = vsel %vm2074_vm1, %v3395_v52, 0.0 }
 0xc69   : > { %v3390_v38 = vadd.f32 %v10874_v0, %v3389_v12  ;;  %v3413_v43 = vsel %vm2074_vm1, %v3387_v13, 0.0 }
 0xc6a   : > { %3411 = vadd.xlane.f32.xlu0 %v3410_v56  ;;  %v3422_v22 = vsel %vm2074_vm1, %v3398_v23, 0.0 }
 0xc6b   : > { %v3416_v24 = vsel %vm2074_vm1, %v3390_v38, 0.0 }
 0xc6c   : > { %3417 = vadd.xlane.f32.xlu1 %v3416_v24 }
 0xc6e   : > { %3414 = vadd.xlane.f32.xlu0 %v3413_v43 }
 0xc70   : > { %3423 = vadd.xlane.f32.xlu1 %v3422_v22 }
 0xc72   : > { %3420 = vadd.xlane.f32.xlu0 %v3419_v34 }
 0xcef   : > { %v3403_v25 = vpop.xlane.xlu0 %3402 }
 0xcf0   : > { %v3425_v10 = vmul.f32 0.03125, %v3403_v25 }
 0xcf1   : > { %v3406_v51 = vpop.xlane.xlu1 %3405 }
 0xcf2   : > { %v14481_v39 = vsub.f32 %v3371_v54, %v3425_v10  ;;  %v3426_v35 = vmul.f32 0.03125, %v3406_v51 }
 0xcf3   : > { %v3409_v20 = vpop.xlane.xlu0 %3408 }
 0xcf4   : > { %v14483_v4 = vsub.f32 %v3374_v2, %v3426_v35  ;;  %v3427_v40 = vmul.f32 0.03125, %v3409_v20  ;;  %v3441_v17 = vmul.f32 %v14481_v39, %v14481_v39  ;;  %v10881_v35 = vld [vmem:[%s13580_s24] ss:$0 sm:$0xff] }
 0xcf6   : > { %v14487_v63 = vsub.f32 %v3379_v19, %v3427_v40  ;;  %v3449_v29 = vsel %vm2074_vm1, %v3441_v17, 0.0  ;;  %v3442_v21 = vmul.f32 %v14483_v4, %v14483_v4 }
 0xcf7   : > { %v3412_v30 = vpop.xlane.xlu0 %3411  ;;  %3450 = vadd.xlane.f32.xlu0 %v3449_v29 }
 0xcf8   : > { %v3428_v61 = vmul.f32 0.03125, %v3412_v30  ;;  %v3452_v49 = vsel %vm2074_vm1, %v3442_v21, 0.0  ;;  %v3443_v47 = vmul.f32 %v14487_v63, %v14487_v63 }
 0xcf9   : > { %3453 = vadd.xlane.f32.xlu1 %v3452_v49  ;;  %v3418_v46 = vpop.xlane.xlu1 %3417 }
 0xcfa   : > { %v14495_v53 = vsub.f32 %v3382_v57, %v3428_v61  ;;  %v3430_v62 = vmul.f32 0.03125, %v3418_v46  ;;  %v3455_v50 = vsel %vm2074_vm1, %v3443_v47, 0.0  ;;  %v12589_v57 = vld [vmem:[%s16573_s6 + $0x8] sm:$0xff]   ;;  %v10882_v61 = vld [vmem:[%s13585_s30] ss:$0 sm:$0xff]  ;;  %s16593_s6 = smov 64  }
 0xcfb   : > { %3456 = vadd.xlane.f32.xlu0 %v3455_v50  ;;  %v3415_v27 = vpop.xlane.xlu0 %3414  ;;  %11654 = vmatprep.subr.bf16.mxu0 %v12589_v57 }
 0xcfc   : > { %v14498_v37 = vsub.f32 %v3390_v38, %v3430_v62  ;;  %v3429_v59 = vmul.f32 0.03125, %v3415_v27  ;;  %v3444_v26 = vmul.f32 %v14495_v53, %v14495_v53  ;;  %11655 = vmatpush3.bf16.msra.mxu0 %v12589_v57 }
 0xcfd   : > { %v3424_v18 = vpop.xlane.xlu1 %3423 }
 0xcfe   : > { %v14502_v7 = vsub.f32 %v3387_v13, %v3429_v59  ;;  %v3432_v55 = vmul.f32 0.03125, %v3424_v18  ;;  %v3458_v1 = vsel %vm2074_vm1, %v3444_v26, 0.0  ;;  %v3446_v48 = vmul.f32 %v14498_v37, %v14498_v37 }
 0xcff   : > { %3459 = vadd.xlane.f32.xlu1 %v3458_v1  ;;  %v3421_v14 = vpop.xlane.xlu0 %3420 }
 0xd00   : > { %v14507_v16 = vsub.f32 %v3398_v23, %v3432_v55  ;;  %v3431_v0 = vmul.f32 0.03125, %v3421_v14  ;;  %v3445_v8 = vmul.f32 %v14502_v7, %v14502_v7  ;;  %v3464_v54 = vsel %vm2074_vm1, %v3446_v48, 0.0 }
 0xd02   : > { %v14511_v60 = vsub.f32 %v3395_v52, %v3431_v0  ;;  %v3461_v5 = vsel %vm2074_vm1, %v3445_v8, 0.0  ;;  %v3448_v28 = vmul.f32 %v14507_v16, %v14507_v16 }
 0xd03   : > { %3465 = vadd.xlane.f32.xlu1 %v3464_v54  ;;  %3462 = vadd.xlane.f32.xlu0 %v3461_v5 }
 0xd04   : > { %v3447_v19 = vmul.f32 %v14511_v60, %v14511_v60  ;;  %v3470_v2 = vsel %vm2074_vm1, %v3448_v28, 0.0 }
 0xd06   : > { %v3467_v41 = vsel %vm2074_vm1, %v3447_v19, 0.0 }
 0xd07   : > { %3471 = vadd.xlane.f32.xlu1 %v3470_v2  ;;  %3468 = vadd.xlane.f32.xlu0 %v3467_v41 }
 0xd84   : > { %v3451_v32 = vpop.xlane.xlu0 %3450 }
 0xd85   : > { %v3473_v36 = vmul.f32 0.03125, %v3451_v32 }
 0xd86   : > { %v3454_v33 = vpop.xlane.xlu1 %3453 }
 0xd87   : > { %v3481_v42 = vadd.f32 1e-05, %v3473_v36  ;;  %v3474_v12 = vmul.f32 0.03125, %v3454_v33 }
 0xd88   : > { %v3457_v13 = vpop.xlane.xlu0 %3456 }
 0xd89   : > { %12916 = vrsqrt.f32 %v3481_v42  ;;  %v3482_v38 = vadd.f32 1e-05, %v3474_v12  ;;  %v3475_v56 = vmul.f32 0.03125, %v3457_v13 }
 0xd8b   : > { %12918 = vrsqrt.f32 %v3482_v38  ;;  %v3483_v23 = vadd.f32 1e-05, %v3475_v56 }
 0xd8c   : > { %v3460_v24 = vpop.xlane.xlu1 %3459 }
 0xd8d   : > { %12920 = vrsqrt.f32 %v3483_v23  ;;  %v3476_v52 = vmul.f32 0.03125, %v3460_v24  ;;  %v12590_v23 = vld [vmem:[%s16581_s11] sm:$0xff]   ;;  %v12591_v24 = vld [vmem:[%s16581_s11 + $0x8] sm:$0xff]  }
 0xd8e   : > { %11664 = vmatprep.subr.bf16.mxu0 %v12590_v23 }
 0xd8f   : > { %v3484_v43 = vadd.f32 1e-05, %v3476_v52  ;;  %v12594_v52 = vld [vmem:[%s16581_s11 + $0x20] sm:$0xff]  }
 0xd90   : > { %v3466_v22 = vpop.xlane.xlu1 %3465  ;;  %v3463_v34 = vpop.xlane.xlu0 %3462 }
 0xd91   : > { %12922 = vrsqrt.f32 %v3484_v43  ;;  %v3478_v25 = vmul.f32 0.03125, %v3466_v22  ;;  %v3477_v10 = vmul.f32 0.03125, %v3463_v34  ;;  %v12595_v43 = vld [vmem:[%s16581_s11 + $0x28] sm:$0xff]   ;;  %v12596_v22 = vld [vmem:[%s16581_s11 + $0x30] sm:$0xff]   ;;  %v12597_v34 = vld [vmem:[%s16581_s11 + $0x38] sm:$0xff]  }
 0xd93   : > { %v12917_v51 = vpop.eup %12916  ;;  %v3486_v20 = vadd.f32 1e-05, %v3478_v25  ;;  %v3485_v40 = vadd.f32 1e-05, %v3477_v10  ;;  %v10883_v25 = vld [vmem:[%s16582_s23] ss:$0 sm:$0xff] }
 0xd94   : > { %v3497_v17 = vmul.f32 %v12917_v51, %v14481_v39  ;;  %v3472_v29 = vpop.xlane.xlu1 %3471  ;;  %v3469_v21 = vpop.xlane.xlu0 %3468  ;;  %s16583_s23 = sld [smem:[#allocation17_spill]] }
 0xd95   : > { %v12919_v30 = vpop.eup %12918  ;;  %12924 = vrsqrt.f32 %v3486_v20  ;;  %v3480_v49 = vmul.f32 0.03125, %v3472_v29  ;;  %v3479_v47 = vmul.f32 0.03125, %v3469_v21 }
 0xd96   : > { %v3498_v46 = vmul.f32 %v12919_v30, %v14483_v4  ;;  %12926 = vrsqrt.f32 %v3485_v40  ;;  %v3511_v62 = vmul.f32 %v10881_v35, %v3497_v17 }
 0xd97   : > { %v12921_v50 = vpop.eup %12920  ;;  %v3488_v27 = vadd.f32 1e-05, %v3480_v49  ;;  %v3487_v59 = vadd.f32 1e-05, %v3479_v47 }
 0xd98   : > { %v3499_v26 = vmul.f32 %v12921_v50, %v14487_v63  ;;  %v3512_v18 = vmul.f32 %v10881_v35, %v3498_v46  ;;  %v3525_v55 = vadd.f32 %v10882_v61, %v3511_v62 }
 0xd99   : > { %12928 = vrsqrt.f32 %v3488_v27 }
 0xd9a   : > { %v3513_v39 = vmul.f32 %v10881_v35, %v3499_v26  ;;  %12930 = vrsqrt.f32 %v3487_v59  ;;  %v3526_v1 = vadd.f32 %v10882_v61, %v3512_v18  ;;  %v14530_v0 = vadd.f32 %v3525_v55, %v13987_v58 }
 0xd9b   : > { %v12923_v48 = vpop.eup %12922 }
 0xd9c   : > { %v3500_v14 = vmul.f32 %v12923_v48, %v14495_v53  ;;  %v14533_v4 = vadd.f32 %v3526_v1, %v13989_v45  ;;  %v3527_v8 = vadd.f32 %v10882_v61, %v3513_v39 }
 0xd9e   : > { %v3514_v54 = vmul.f32 %v10881_v35, %v3500_v14  ;;  %v3541_v63 = vpack.c.bf16 %v14533_v4, %v14530_v0  ;;  %v14541_v58 = vadd.f32 %v3527_v8, %v13996_v44 }
 0xd9f   : > { %v12925_v5 = vpop.eup %12924 }
 0xda0   : > { %v12927_v28 = vpop.eup %12926  ;;  %v3528_v19 = vadd.f32 %v10882_v61, %v3514_v54  ;;  %v3502_v2 = vmul.f32 %v12925_v5, %v14498_v37  ;;  %11656 = vmatprep.mubr.msk.bf16.mxu0 %vm2074_vm1, %v3541_v63 }
 0xda1   : > { %v3501_v53 = vmul.f32 %v12927_v28, %v14502_v7 }
 0xda2   : > { %v14544_v45 = vadd.f32 %v3528_v19, %v13998_v3  ;;  %v3516_v41 = vmul.f32 %v10881_v35, %v3502_v2 }
 0xda3   : > { %v12929_v31 = vpop.eup %12928  ;;  %v3515_v57 = vmul.f32 %v10881_v35, %v3501_v53 }
 0xda4   : > { %v12931_v32 = vpop.eup %12930  ;;  %v3504_v36 = vmul.f32 %v12929_v31, %v14507_v16  ;;  %v3542_v33 = vpack.c.bf16 %v14544_v45, %v14541_v58  ;;  %v3530_v37 = vadd.f32 %v10882_v61, %v3516_v41 }
 0xda5   : > { %v3503_v42 = vmul.f32 %v12931_v32, %v14511_v60  ;;  %v3529_v7 = vadd.f32 %v10882_v61, %v3515_v57 }
 0xda6   : > { %11657 = vmatmul.mubr.msk.bf16.vlgmr.msra.gmra.mrb[40].mxu0 %vm2074_vm1, %v3542_v33  ;;  %v14552_v44 = vadd.f32 %v3530_v37, %v14007_v11  ;;  %v3518_v3 = vmul.f32 %v10881_v35, %v3504_v36 }
 0xda7   : > { %v14555_v12 = vadd.f32 %v3529_v7, %v14005_v9  ;;  %v3517_v16 = vmul.f32 %v10881_v35, %v3503_v42  ;;  %11665 = vmatpush3.bf16.msra.mxu0 %v12590_v23 }
 0xda8   : > { %v3532_v13 = vadd.f32 %v10882_v61, %v3518_v3  ;;  %11666 = vmatprep.subr.bf16.mxu0 %v12591_v24 }
 0xda9   : > { %v3543_v38 = vpack.c.bf16 %v14552_v44, %v14555_v12  ;;  %v3531_v56 = vadd.f32 %v10882_v61, %v3517_v16 }
 0xdaa   : > { %v14560_v60 = vadd.f32 %v3532_v13, %v14015_v15  ;;  %v12592_v15 = vld [vmem:[%s16581_s11 + $0x10] sm:$0xff]  }
 0xdab   : > { %11660 = vmatprep.mubr.msk.bf16.mxu0 %vm2074_vm1, %v3543_v38  ;;  %v14564_v11 = vadd.f32 %v3531_v56, %v14013_v6  ;;  %11667 = vmatpush3.bf16.msra.mxu0 %v12591_v24  ;;  %v12593_v6 = vld [vmem:[%s16581_s11 + $0x18] sm:$0xff]   ;;  %s16598_s11 = sld [smem:[#allocation25_spill]] }
 0xdac   : > { %11668 = vmatprep.subr.bf16.mxu0 %v12592_v15 }
 0xdad   : > { %v3544_v9 = vpack.c.bf16 %v14560_v60, %v14564_v11 }
 0xdaf   : > { %11661 = vmatmul.mubr.msk.bf16.gmra.mrb[44].mxu0 %vm2074_vm1, %v3544_v9 }
 0xdb0   : > { %11669 = vmatpush3.bf16.msra.mxu0 %v12592_v15 }
 0xdb1   : > { %11670 = vmatprep.subr.bf16.mxu0 %v12593_v6 }
 0xdb4   : > { %11671 = vmatpush3.bf16.msra.mxu0 %v12593_v6 }
 0xdb5   : > { %11672 = vmatprep.subr.bf16.mxu0 %v12594_v52 }
 0xdb8   : > { %11673 = vmatpush3.bf16.msra.mxu0 %v12594_v52 }
 0xdb9   : > { %11674 = vmatprep.subr.bf16.mxu0 %v12595_v43 }
 0xdbc   : > { %11675 = vmatpush3.bf16.msra.mxu0 %v12595_v43 }
 0xdbd   : > { %11676 = vmatprep.subr.bf16.mxu0 %v12596_v22 }
 0xdc0   : > { %11677 = vmatpush3.bf16.msra.mxu0 %v12596_v22 }
 0xdc1   : > { %11678 = vmatprep.subr.bf16.mxu0 %v12597_v34 }
 0xdc4   : > { %11679 = vmatpush3.bf16.msra.mxu0 %v12597_v34 }
 0xe79   : > { %v11658_v10 = vpop.f32.mrb[40].mxu0 }
 0xe7a   : > { %v3618_v51 = vadd.f32 %v11658_v10, %v10883_v25  ;;  %v3609_v35 = vpop.f32.mrb[41].mxu0 }
 0xe7b   : > { %v14578_v20 = vadd.f32 %v10883_v25, %v3609_v35  ;;  %v11659_v40 = vpop.f32.mrb[42].mxu0 }
 0xe7c   : > { %v14580_v17 = vmul.f32 0.70710677, %v3618_v51  ;;  %v14582_v29 = vadd.f32 %v11659_v40, %v10883_v25  ;;  %v3612_v21 = vpop.f32.mrb[43].mxu0  ;;  %v14622_v38 = vmul.f32 0.5, %v3618_v51 }
 0xe7d   : > { %v14585_v30 = vmul.f32 0.70710677, %v14578_v20  ;;  %v14587_v61 = vadd.f32 %v10883_v25, %v3612_v21 }
 0xe7e   : > { %v3658_v49 = vand.u32 2147483647, %v14580_v17  ;;  %v14591_v47 = vmul.f32 0.70710677, %v14582_v29  ;;  %vm3818_vm4 = vcmp.ge.f32.partialorder %v14580_v17, 0.0 }
 0xe7f   : > { %v3656_v46 = vand.u32 2147483647, %v14585_v30  ;;  %v14595_v62 = vmul.f32 0.70710677, %v14587_v61  ;;  %vm3816_vm5 = vcmp.ge.f32.partialorder %v14585_v30, 0.0 }
 0xe80   : > { %v3666_v50 = vmul.f32 0.3275911, %v3658_v49  ;;  %v3659_v27 = vand.u32 2147483647, %v14591_v47  ;;  %v3770_v31 = vsub.f32 0.0, %v3658_v49  ;;  %vm3819_vm6 = vcmp.ge.f32.partialorder %v14591_v47, 0.0 }
 0xe81   : > { %v3664_v59 = vmul.f32 0.3275911, %v3656_v46  ;;  %v3657_v26 = vand.u32 2147483647, %v14595_v62  ;;  %v3768_v36 = vsub.f32 0.0, %v3656_v46  ;;  %vm3817_vm7 = vcmp.ge.f32.partialorder %v14595_v62, 0.0 }
 0xe82   : > { %v3674_v18 = vadd.f32 1.0, %v3666_v50  ;;  %v3667_v55 = vmul.f32 0.3275911, %v3659_v27  ;;  %v11662_v39 = vpop.f32.mrb[44].mxu0  ;;  %v3771_v37 = vsub.f32 0.0, %v3659_v27  ;;  %v3778_v56 = vmul.f32 %v3770_v31, %v3658_v49 }
 0xe83   : > { %v3672_v1 = vadd.f32 1.0, %v3664_v59  ;;  %v3665_v48 = vmul.f32 0.3275911, %v3657_v26  ;;  %v3625_v14 = vpop.f32.mrb[45].mxu0  ;;  %v14599_v28 = vadd.f32 %v11662_v39, %v10883_v25  ;;  %v3769_v42 = vsub.f32 0.0, %v3657_v26 }
 0xe84   : > { %12932 = vrcp.f32 %v3674_v18  ;;  %v3675_v8 = vadd.f32 1.0, %v3667_v55  ;;  %v11663_v54 = vpop.f32.mrb[46].mxu0  ;;  %v14601_v19 = vadd.f32 %v10883_v25, %v3625_v14  ;;  %v3776_v15 = vmul.f32 %v3768_v36, %v3656_v46 }
 0xe85   : > { %12934 = vrcp.f32 %v3672_v1  ;;  %v3628_v63 = vpop.f32.mrb[47].mxu0  ;;  %v3673_v5 = vadd.f32 1.0, %v3665_v48  ;;  %v14603_v2 = vadd.f32 %v11663_v54, %v10883_v25  ;;  %v14606_v53 = vmul.f32 0.70710677, %v14599_v28 }
 0xe86   : > { %12936 = vrcp.f32 %v3675_v8  ;;  %v14608_v41 = vadd.f32 %v10883_v25, %v3628_v63  ;;  %v14611_v57 = vmul.f32 0.70710677, %v14601_v19  ;;  %v3779_v25 = vmul.f32 %v3771_v37, %v3659_v27 }
 0xe87   : > { %v14614_v32 = vmul.f32 0.70710677, %v14603_v2  ;;  %12938 = vrcp.f32 %v3673_v5  ;;  %v3662_v33 = vand.u32 2147483647, %v14606_v53  ;;  %v3777_v10 = vmul.f32 %v3769_v42, %v3657_v26 }
 0xe88   : > { %v3660_v7 = vand.u32 2147483647, %v14611_v57  ;;  %v14620_v13 = vmul.f32 0.70710677, %v14608_v41  ;;  %v3788_v50 = vmul.f32 1.442695, %v3778_v56 }
 0xe89   : > { %v3663_v3 = vand.u32 2147483647, %v14614_v32  ;;  %v3670_v16 = vmul.f32 0.3275911, %v3662_v33  ;;  %v3774_v52 = vsub.f32 0.0, %v3662_v33  ;;  %vm3822_vm8 = vcmp.ge.f32.partialorder %v14606_v53, 0.0 }
 0xe8a   : > { %v3668_v9 = vmul.f32 0.3275911, %v3660_v7  ;;  %v3661_v43 = vand.u32 2147483647, %v14620_v13  ;;  %v3772_v40 = vsub.f32 0.0, %v3660_v7  ;;  %vm3823_vm9 = vcmp.ge.f32.partialorder %v14614_v32, 0.0 }
 0xe8b   : > { %v3671_v23 = vmul.f32 0.3275911, %v3663_v3  ;;  %v3678_v6 = vadd.f32 1.0, %v3670_v16  ;;  %v3784_v55 = vmul.f32 1.442695, %v3776_v15  ;;  %v3782_v39 = vmul.f32 %v3774_v52, %v3662_v33 }
 0xe8c   : > { %v3676_v35 = vadd.f32 1.0, %v3668_v9  ;;  %v3669_v46 = vmul.f32 0.3275911, %v3661_v43  ;;  %v3775_v1 = vsub.f32 0.0, %v3663_v3  ;;  %v3790_v26 = vmul.f32 1.442695, %v3779_v25 }
 0xe8d   : > { %12940 = vrcp.f32 %v3678_v6  ;;  %v3679_v21 = vadd.f32 1.0, %v3671_v23  ;;  %v3786_v63 = vmul.f32 1.442695, %v3777_v10  ;;  %v3780_v5 = vmul.f32 %v3772_v40, %v3660_v7 }
 0xe8e   : > { %v14624_v24 = vpop.eup %12932  ;;  %12942 = vrcp.f32 %v3676_v35  ;;  %v3677_v14 = vadd.f32 1.0, %v3669_v46  ;;  %v3796_v42 = vmul.f32 1.442695, %v3782_v39  ;;  %v3783_v16 = vmul.f32 %v3775_v1, %v3663_v3 }
 0xe8f   : > { %v14627_v22 = vpop.eup %12934  ;;  %v3698_v34 = vmul.f32 1.0614054, %v14624_v24  ;;  %12944 = vrcp.f32 %v3679_v21  ;;  %v3792_v7 = vmul.f32 1.442695, %v3780_v5  ;;  %v3773_v6 = vsub.f32 0.0, %v3661_v43 }
 0xe90   : > { %v3696_v51 = vmul.f32 1.0614054, %v14627_v22  ;;  %v14631_v59 = vpop.eup %12936  ;;  %12946 = vpow2.f32 %v3788_v50  ;;  %v14646_v3 = vmul.f32 0.5, %v14578_v20  ;;  %vm3820_vm10 = vcmp.ge.f32.partialorder %v14611_v57, 0.0 }
 0xe91   : > { %v3706_v49 = vadd.f32 -1.4531521, %v3698_v34  ;;  %v3699_v27 = vmul.f32 1.0614054, %v14631_v59  ;;  %v14635_v8 = vpop.eup %12938  ;;  %12948 = vrcp.f32 %v3677_v14  ;;  %v3781_v39 = vmul.f32 %v3773_v6, %v3661_v43 }
 0xe92   : > { %v3704_v18 = vadd.f32 -1.4531521, %v3696_v51  ;;  %v3697_v37 = vmul.f32 1.0614054, %v14635_v8  ;;  %12950 = vpow2.f32 %v3784_v55  ;;  %v3798_v51 = vmul.f32 1.442695, %v3783_v16 }
 0xe93   : > { %v3714_v48 = vmul.f32 %v14624_v24, %v3706_v49  ;;  %v3707_v36 = vadd.f32 -1.4531521, %v3699_v27  ;;  %12952 = vpow2.f32 %v3790_v26  ;;  %vm3821_vm11 = vcmp.ge.f32.partialorder %v14620_v13, 0.0 }
 0xe94   : > { %v3712_v54 = vmul.f32 %v14627_v22, %v3704_v18  ;;  %v3705_v23 = vadd.f32 -1.4531521, %v3697_v37  ;;  %12954 = vpow2.f32 %v3786_v63 }
 0xe95   : > { %v3722_v31 = vadd.f32 1.4214138, %v3714_v48  ;;  %v3715_v9 = vmul.f32 %v14631_v59, %v3707_v36  ;;  %12956 = vpow2.f32 %v3796_v42 }
 0xe96   : > { %v3720_v33 = vadd.f32 1.4214138, %v3712_v54  ;;  %v3713_v25 = vmul.f32 %v14635_v8, %v3705_v23  ;;  %12958 = vpow2.f32 %v3792_v7  ;;  %v14660_v54 = vmul.f32 0.5, %v14582_v29 }
 0xe97   : > { %v3730_v56 = vmul.f32 %v14624_v24, %v3722_v31  ;;  %v3723_v34 = vadd.f32 1.4214138, %v3715_v9  ;;  %v14643_v10 = vpop.eup %12940  ;;  %12960 = vpow2.f32 %v3798_v51 }
 0xe98   : > { %v3728_v15 = vmul.f32 %v14627_v22, %v3720_v33  ;;  %v14648_v40 = vpop.eup %12942  ;;  %v3721_v50 = vadd.f32 1.4214138, %v3713_v25  ;;  %v3702_v46 = vmul.f32 1.0614054, %v14643_v10 }
 0xe99   : > { %v3738_v52 = vadd.f32 -0.28449672, %v3730_v56  ;;  %v3731_v49 = vmul.f32 %v14631_v59, %v3723_v34  ;;  %v3700_v55 = vmul.f32 1.0614054, %v14648_v40  ;;  %v14656_v26 = vpop.eup %12944  ;;  %v3794_v56 = vmul.f32 1.442695, %v3781_v39 }
 0xe9a   : > { %v3736_v35 = vadd.f32 -0.28449672, %v3728_v15  ;;  %v3729_v48 = vmul.f32 %v14635_v8, %v3721_v50  ;;  %v3710_v27 = vadd.f32 -1.4531521, %v3702_v46  ;;  %v12947_v5 = vpop.eup %12946  ;;  %v3703_v29 = vmul.f32 1.0614054, %v14656_v26 }
 0xe9b   : > { %v3746_v21 = vmul.f32 %v14624_v24, %v3738_v52  ;;  %v3739_v1 = vadd.f32 -0.28449672, %v3731_v49  ;;  %v3708_v63 = vadd.f32 -1.4531521, %v3700_v55  ;;  %v14666_v33 = vpop.eup %12948  ;;  %12962 = vpow2.f32 %v3794_v56 }
 0xe9c   : > { %v3744_v18 = vmul.f32 %v14627_v22, %v3736_v35  ;;  %v3737_v36 = vadd.f32 -0.28449672, %v3729_v48  ;;  %v3718_v37 = vmul.f32 %v14643_v10, %v3710_v27  ;;  %v12951_v9 = vpop.eup %12950  ;;  %v3711_v25 = vadd.f32 -1.4531521, %v3703_v29 }
 0xe9d   : > { %v3754_v20 = vadd.f32 0.2548296, %v3746_v21  ;;  %v3747_v43 = vmul.f32 %v14631_v59, %v3739_v1  ;;  %v3716_v16 = vmul.f32 %v14648_v40, %v3708_v63  ;;  %v12953_v6 = vpop.eup %12952  ;;  %v3701_v35 = vmul.f32 1.0614054, %v14666_v33 }
 0xe9e   : > { %v3752_v14 = vadd.f32 0.2548296, %v3744_v18  ;;  %v3726_v7 = vadd.f32 1.4214138, %v3718_v37  ;;  %v3719_v39 = vmul.f32 %v14656_v26, %v3711_v25 }
 0xe9f   : > { %v3762_v31 = vmul.f32 %v14624_v24, %v3754_v20  ;;  %v3755_v15 = vadd.f32 0.2548296, %v3747_v43  ;;  %v3745_v24 = vmul.f32 %v14635_v8, %v3737_v36  ;;  %v3724_v34 = vadd.f32 1.4214138, %v3716_v16 }
 0xea0   : > { %v3760_v42 = vmul.f32 %v14627_v22, %v3752_v14  ;;  %v12955_v22 = vpop.eup %12954  ;;  %v3734_v50 = vmul.f32 %v14643_v10, %v3726_v7  ;;  %v3709_v20 = vadd.f32 -1.4531521, %v3701_v35  ;;  %v3727_v43 = vadd.f32 1.4214138, %v3719_v39 }
 0xea1   : > { %v3802_v23 = vmul.f32 %v12947_v5, %v3762_v31  ;;  %v3763_v21 = vmul.f32 %v14631_v59, %v3755_v15  ;;  %v3753_v49 = vadd.f32 0.2548296, %v3745_v24  ;;  %v12957_v46 = vpop.eup %12956  ;;  %v3732_v55 = vmul.f32 %v14648_v40, %v3724_v34 }
 0xea2   : > { %v3800_v52 = vmul.f32 %v12951_v9, %v3760_v42  ;;  %v3742_v14 = vadd.f32 -0.28449672, %v3734_v50  ;;  %v12959_v63 = vpop.eup %12958  ;;  %v3717_v59 = vmul.f32 %v14666_v33, %v3709_v20 }
 0xea3   : > { %v3810_v51 = vsub.f32 1.0, %v3802_v23  ;;  %v3803_v48 = vmul.f32 %v12953_v6, %v3763_v21  ;;  %v3761_v27 = vmul.f32 %v14635_v8, %v3753_v49  ;;  %v3740_v31 = vadd.f32 -0.28449672, %v3732_v55  ;;  %v12961_v29 = vpop.eup %12960 }
 0xea4   : > { %v3808_v18 = vsub.f32 1.0, %v3800_v52  ;;  %v3750_v16 = vmul.f32 %v14643_v10, %v3742_v14  ;;  %v3735_v23 = vmul.f32 %v14656_v26, %v3727_v43  ;;  %v3725_v34 = vadd.f32 1.4214138, %v3717_v59 }
 0xea5   : > { %v3826_v1 = vsub.f32 0.0, %v3810_v51  ;;  %v3811_v37 = vsub.f32 1.0, %v3803_v48  ;;  %v3801_v42 = vmul.f32 %v12955_v22, %v3761_v27  ;;  %v3748_v8 = vmul.f32 %v14648_v40, %v3740_v31 }
 0xea6   : > { %v3824_v5 = vsub.f32 0.0, %v3808_v18  ;;  %v3758_v6 = vadd.f32 0.2548296, %v3750_v16  ;;  %v3743_v52 = vadd.f32 -0.28449672, %v3735_v23  ;;  %v3733_v50 = vmul.f32 %v14666_v33, %v3725_v34 }
 0xea7   : > { %v3834_v36 = vsel %vm3818_vm4, %v3810_v51, %v3826_v1  ;;  %v3827_v24 = vsub.f32 0.0, %v3811_v37  ;;  %v3809_v7 = vsub.f32 1.0, %v3801_v42  ;;  %v3756_v17 = vadd.f32 0.2548296, %v3748_v8 }
 0xea8   : > { %v3832_v9 = vsel %vm3816_vm5, %v3808_v18, %v3824_v5  ;;  %v3842_v15 = vadd.f32 1.0, %v3834_v36  ;;  %v3766_v22 = vmul.f32 %v14643_v10, %v3758_v6  ;;  %v3751_v49 = vmul.f32 %v14656_v26, %v3743_v52 }
 0xea9   : > { %v3840_v25 = vadd.f32 1.0, %v3832_v9  ;;  %v3835_v35 = vsel %vm3819_vm6, %v3811_v37, %v3827_v24  ;;  %v3825_v30 = vsub.f32 0.0, %v3809_v7  ;;  %v3764_v21 = vmul.f32 %v14648_v40, %v3756_v17 }
 0xeaa   : > { %v3843_v51 = vadd.f32 1.0, %v3835_v35  ;;  %v3850_v18 = vmul.f32 %v3842_v15, %v14622_v38  ;;  %v3641_v55 = vmul.f32 0.5, %v14587_v61  ;;  %v3806_v39 = vmul.f32 %v12957_v46, %v3766_v22  ;;  %v12963_v46 = vpop.eup %12962 }
 0xeab   : > { %v3833_v56 = vsel %vm3817_vm7, %v3809_v7, %v3825_v30  ;;  %v3804_v1 = vmul.f32 %v12959_v63, %v3764_v21  ;;  %v3759_v10 = vadd.f32 0.2548296, %v3751_v49  ;;  %v3741_v27 = vadd.f32 -0.28449672, %v3733_v50 }
 0xeac   : > { %v3851_v47 = vmul.f32 %v3843_v51, %v14660_v54  ;;  %v3841_v20 = vadd.f32 1.0, %v3833_v56  ;;  %v3814_v48 = vsub.f32 1.0, %v3806_v39  ;;  %v3848_v40 = vmul.f32 %v3840_v25, %v14646_v3 }
 0xead   : > { %v3767_v31 = vmul.f32 %v14656_v26, %v3759_v10  ;;  %v3812_v43 = vsub.f32 1.0, %v3804_v1  ;;  %v3749_v61 = vmul.f32 %v14666_v33, %v3741_v27  ;;  %v3646_v9 = vmul.f32 0.5, %v14599_v28 }
 0xeae   : > { %v3857_v14 = vpack.c.bf16 %v3851_v47, %v3850_v18  ;;  %v3849_v5 = vmul.f32 %v3841_v20, %v3641_v55  ;;  %v3830_v38 = vsub.f32 0.0, %v3814_v48  ;;  %v3647_v8 = vmul.f32 0.5, %v14603_v2  ;;  %v10890_v2 = vld [vmem:[%s16583_s23] ss:$0 sm:$0xff]  ;;  %s16584_s23 = sld [smem:[#allocation21_spill]] }
 0xeaf   : > { %v3807_v62 = vmul.f32 %v12961_v29, %v3767_v31  ;;  %v3757_v54 = vadd.f32 0.2548296, %v3749_v61  ;;  %v3828_v37 = vsub.f32 0.0, %v3812_v43  ;;  %v3644_v52 = vmul.f32 0.5, %v14601_v19 }
 0xeb0   : > { %v3856_v59 = vpack.c.bf16 %v3849_v5, %v3848_v40  ;;  %v3838_v63 = vsel %vm3822_vm8, %v3814_v48, %v3830_v38  ;;  %v3645_v28 = vmul.f32 0.5, %v14608_v41  ;;  %vm13513_vm8 = vmmov 0  }
 0xeb1   : > { %v3815_v36 = vsub.f32 1.0, %v3807_v62  ;;  %v3765_v3 = vmul.f32 %v14666_v33, %v3757_v54  ;;  %v3846_v16 = vadd.f32 1.0, %v3838_v63  ;;  %v3836_v53 = vsel %vm3820_vm10, %v3812_v43, %v3828_v37 }
 0xeb2   : > { %11680 = vmatprep.mubr.bf16.mxu0 %v3856_v59  ;;  %v3844_v6 = vadd.f32 1.0, %v3836_v53 }
 0xeb3   : > { %11681 = vmatmul.mubr.bf16.vlgmr.msra.gmra.mrb[48].mxu0 %v3857_v14  ;;  %v3831_v42 = vsub.f32 0.0, %v3815_v36  ;;  %v3805_v26 = vmul.f32 %v12963_v46, %v3765_v3  ;;  %v3854_v24 = vmul.f32 %v3846_v16, %v3646_v9 }
 0xeb4   : > { %v3852_v34 = vmul.f32 %v3844_v6, %v3644_v52 }
 0xeb5   : > { %v3839_v29 = vsel %vm3823_vm9, %v3815_v36, %v3831_v42  ;;  %v3813_v15 = vsub.f32 1.0, %v3805_v26 }
 0xeb6   : > { %v3847_v23 = vadd.f32 1.0, %v3839_v29 }
 0xeb7   : > { %v3829_v33 = vsub.f32 0.0, %v3813_v15 }
 0xeb8   : > { %v3855_v7 = vmul.f32 %v3847_v23, %v3647_v8 }
 0xeb9   : > { %v3837_v17 = vsel %vm3821_vm11, %v3813_v15, %v3829_v33 }
 0xeba   : > { %v3859_v32 = vpack.c.bf16 %v3855_v7, %v3854_v24  ;;  %v3845_v57 = vadd.f32 1.0, %v3837_v17 }
 0xebc   : > { %v3853_v25 = vmul.f32 %v3845_v57, %v3645_v28 }
 0xebe   : > { %v3858_v35 = vpack.c.bf16 %v3853_v25, %v3852_v34 }
 0xec0   : > { %11684 = vmatprep.mubr.bf16.mxu0 %v3858_v35 }
 0xec1   : > { %11685 = vmatmul.mubr.bf16.gmra.mrb[52].mxu0 %v3859_v32 }
 0xf86   : > { %v11682_v30 = vpop.f32.mrb[48].mxu0 }
 0xf87   : > { %v3948_v22 = vpop.f32.mrb[49].mxu0  ;;  %v3957_v50 = vadd.f32 %v11682_v30, %v10890_v2 }
 0xf88   : > { %v3949_v51 = vadd.f32 %v10890_v2, %v3948_v22  ;;  %v11683_v21 = vpop.f32.mrb[50].mxu0 }
 0xf89   : > { %v3951_v49 = vpop.f32.mrb[51].mxu0  ;;  %v3960_v19 = vadd.f32 %v11683_v21, %v10890_v2  ;;  %v3985_v55 = vsel %vm2074_vm1, %v3957_v50, 0.0 }
 0xf8a   : > { %v3952_v13 = vadd.f32 %v10890_v2, %v3951_v49  ;;  %v3979_v18 = vsel %vm2074_vm1, %v3949_v51, 0.0 }
 0xf8b   : > { %3980 = vadd.xlane.f32.xlu0 %v3979_v18  ;;  %v3988_v56 = vsel %vm2074_vm1, %v3960_v19, 0.0 }
 0xf8c   : > { %v3982_v41 = vsel %vm2074_vm1, %v3952_v13, 0.0 }
 0xf8d   : > { %3983 = vadd.xlane.f32.xlu1 %v3982_v41  ;;  %v12599_v41 = vld [vmem:[%s16584_s23 + $0x8] sm:$0xff]  }
 0xf8f   : > { %3986 = vadd.xlane.f32.xlu0 %v3985_v55 }
 0xf91   : > { %3989 = vadd.xlane.f32.xlu1 %v3988_v56 }
 0xf94   : > { %v11686_v39 = vpop.f32.mrb[52].mxu0 }
 0xf95   : > { %v3964_v47 = vpop.f32.mrb[53].mxu0  ;;  %v3973_v48 = vadd.f32 %v11686_v39, %v10890_v2 }
 0xf96   : > { %v3965_v20 = vadd.f32 %v10890_v2, %v3964_v47  ;;  %v11687_v1 = vpop.f32.mrb[54].mxu0 }
 0xf97   : > { %v3967_v10 = vpop.f32.mrb[55].mxu0  ;;  %v3976_v14 = vadd.f32 %v11687_v1, %v10890_v2  ;;  %v3997_v31 = vsel %vm2074_vm1, %v3973_v48, 0.0 }
 0xf98   : > { %v3968_v27 = vadd.f32 %v10890_v2, %v3967_v10  ;;  %v3991_v40 = vsel %vm2074_vm1, %v3965_v20, 0.0 }
 0xf99   : > { %3992 = vadd.xlane.f32.xlu0 %v3991_v40  ;;  %v4000_v38 = vsel %vm2074_vm1, %v3976_v14, 0.0 }
 0xf9a   : > { %v3994_v5 = vsel %vm2074_vm1, %v3968_v27, 0.0 }
 0xf9b   : > { %3995 = vadd.xlane.f32.xlu1 %v3994_v5 }
 0xf9d   : > { %3998 = vadd.xlane.f32.xlu0 %v3997_v31 }
 0xf9f   : > { %4001 = vadd.xlane.f32.xlu1 %v4000_v38  ;;  %v10899_v38 = vld [vmem:[%s16585_s28] ss:$0 sm:$0xff]  ;;  %s16587_s28 = sld [smem:[#allocation22_spill]] }
0x1018   : > { %v3981_v43 = vpop.xlane.xlu0 %3980 }
0x1019   : > { %v4003_v61 = vmul.f32 0.03125, %v3981_v43 }
0x101a   : > { %v3984_v62 = vpop.xlane.xlu1 %3983 }
0x101b   : > { %v14720_v59 = vsub.f32 %v3949_v51, %v4003_v61  ;;  %v4004_v54 = vmul.f32 0.03125, %v3984_v62 }
0x101c   : > { %v3987_v46 = vpop.xlane.xlu0 %3986 }
0x101d   : > { %v14722_v63 = vsub.f32 %v3952_v13, %v4004_v54  ;;  %v4005_v36 = vmul.f32 0.03125, %v3987_v46  ;;  %v4019_v37 = vmul.f32 %v14720_v59, %v14720_v59  ;;  %v10900_v54 = vld [vmem:[%s16586_s1] ss:$0 sm:$0xff]  ;;  %s16588_s1 = smov 80  }
0x101e   : > { %v3990_v3 = vpop.xlane.xlu1 %3989 }
0x101f   : > { %v14726_v42 = vsub.f32 %v3957_v50, %v4005_v36  ;;  %v4006_v16 = vmul.f32 0.03125, %v3990_v3  ;;  %v4027_v26 = vsel %vm2074_vm1, %v4019_v37, 0.0  ;;  %v4020_v9 = vmul.f32 %v14722_v63, %v14722_v63 }
0x1020   : > { %4028 = vadd.xlane.f32.xlu0 %v4027_v26 }
0x1021   : > { %v14731_v29 = vsub.f32 %v3960_v19, %v4006_v16  ;;  %v4030_v53 = vsel %vm2074_vm1, %v4020_v9, 0.0  ;;  %v4021_v8 = vmul.f32 %v14726_v42, %v14726_v42  ;;  %v12598_v19 = vld [vmem:[%s16584_s23] sm:$0xff]  }
0x1022   : > { %4031 = vadd.xlane.f32.xlu1 %v4030_v53  ;;  %11688 = vmatprep.subr.bf16.mxu0 %v12598_v19 }
0x1023   : > { %v4033_v23 = vsel %vm2074_vm1, %v4021_v8, 0.0  ;;  %v4022_v15 = vmul.f32 %v14731_v29, %v14731_v29  ;;  %11689 = vmatpush3.bf16.msra.mxu0 %v12598_v19 }
0x1024   : > { %4034 = vadd.xlane.f32.xlu0 %v4033_v23  ;;  %11690 = vmatprep.subr.bf16.mxu0 %v12599_v41 }
0x1025   : > { %v4036_v24 = vsel %vm2074_vm1, %v4022_v15, 0.0 }
0x1026   : > { %4037 = vadd.xlane.f32.xlu1 %v4036_v24  ;;  %v3993_v7 = vpop.xlane.xlu0 %3992 }
0x1027   : > { %v4007_v33 = vmul.f32 0.03125, %v3993_v7  ;;  %11691 = vmatpush3.bf16.msra.mxu0 %v12599_v41 }
0x1028   : > { %v3996_v6 = vpop.xlane.xlu1 %3995 }
0x1029   : > { %v14740_v17 = vsub.f32 %v3965_v20, %v4007_v33  ;;  %v4008_v32 = vmul.f32 0.03125, %v3996_v6 }
0x102a   : > { %v3999_v52 = vpop.xlane.xlu0 %3998 }
0x102b   : > { %v14742_v28 = vsub.f32 %v3968_v27, %v4008_v32  ;;  %v4009_v57 = vmul.f32 0.03125, %v3999_v52  ;;  %v4023_v34 = vmul.f32 %v14740_v17, %v14740_v17 }
0x102c   : > { %v4002_v25 = vpop.xlane.xlu1 %4001 }
0x102d   : > { %v14746_v35 = vsub.f32 %v3973_v48, %v4009_v57  ;;  %v4010_v2 = vmul.f32 0.03125, %v4002_v25  ;;  %v4039_v30 = vsel %vm2074_vm1, %v4023_v34, 0.0  ;;  %v4024_v22 = vmul.f32 %v14742_v28, %v14742_v28 }
0x102e   : > { %4040 = vadd.xlane.f32.xlu0 %v4039_v30 }
0x102f   : > { %v14751_v51 = vsub.f32 %v3976_v14, %v4010_v2  ;;  %v4042_v21 = vsel %vm2074_vm1, %v4024_v22, 0.0  ;;  %v4025_v49 = vmul.f32 %v14746_v35, %v14746_v35 }
0x1030   : > { %4043 = vadd.xlane.f32.xlu1 %v4042_v21 }
0x1031   : > { %v4045_v50 = vsel %vm2074_vm1, %v4025_v49, 0.0  ;;  %v4026_v13 = vmul.f32 %v14751_v51, %v14751_v51 }
0x1032   : > { %4046 = vadd.xlane.f32.xlu0 %v4045_v50 }
0x1033   : > { %v4048_v18 = vsel %vm2074_vm1, %v4026_v13, 0.0 }
0x1034   : > { %4049 = vadd.xlane.f32.xlu1 %v4048_v18 }
0x10ad   : > { %v4029_v55 = vpop.xlane.xlu0 %4028 }
0x10ae   : > { %v4051_v56 = vmul.f32 0.03125, %v4029_v55 }
0x10af   : > { %v4032_v39 = vpop.xlane.xlu1 %4031 }
0x10b0   : > { %v4059_v47 = vadd.f32 1e-05, %v4051_v56  ;;  %v4052_v20 = vmul.f32 0.03125, %v4032_v39 }
0x10b1   : > { %v4035_v1 = vpop.xlane.xlu0 %4034 }
0x10b2   : > { %12964 = vrsqrt.f32 %v4059_v47  ;;  %v4060_v10 = vadd.f32 1e-05, %v4052_v20  ;;  %v4053_v48 = vmul.f32 0.03125, %v4035_v1 }
0x10b3   : > { %v4038_v27 = vpop.xlane.xlu1 %4037 }
0x10b4   : > { %12966 = vrsqrt.f32 %v4060_v10  ;;  %v4061_v40 = vadd.f32 1e-05, %v4053_v48  ;;  %v4054_v14 = vmul.f32 0.03125, %v4038_v27 }
0x10b6   : > { %12968 = vrsqrt.f32 %v4061_v40  ;;  %v4062_v5 = vadd.f32 1e-05, %v4054_v14 }
0x10b8   : > { %12970 = vrsqrt.f32 %v4062_v5 }
0x10bb   : > { %v4041_v61 = vpop.xlane.xlu0 %4040 }
0x10bc   : > { %v12965_v31 = vpop.eup %12964  ;;  %v4055_v46 = vmul.f32 0.03125, %v4041_v61 }
0x10bd   : > { %v4075_v43 = vmul.f32 %v12965_v31, %v14720_v59  ;;  %v4044_v37 = vpop.xlane.xlu1 %4043 }
0x10be   : > { %v12967_v62 = vpop.eup %12966  ;;  %v4063_v26 = vadd.f32 1e-05, %v4055_v46  ;;  %v4056_v9 = vmul.f32 0.03125, %v4044_v37 }
0x10bf   : > { %v4076_v36 = vmul.f32 %v12967_v62, %v14722_v63  ;;  %v4089_v3 = vmul.f32 %v10899_v38, %v4075_v43  ;;  %v4047_v8 = vpop.xlane.xlu0 %4046 }
0x10c0   : > { %v12969_v16 = vpop.eup %12968  ;;  %12972 = vrsqrt.f32 %v4063_v26  ;;  %v4064_v7 = vadd.f32 1e-05, %v4056_v9  ;;  %v4057_v59 = vmul.f32 0.03125, %v4047_v8 }
0x10c1   : > { %v4077_v53 = vmul.f32 %v12969_v16, %v14726_v42  ;;  %v4090_v23 = vmul.f32 %v10899_v38, %v4076_v36  ;;  %v4103_v15 = vadd.f32 %v10900_v54, %v4089_v3  ;;  %v4050_v32 = vpop.xlane.xlu1 %4049 }
0x10c2   : > { %v12971_v24 = vpop.eup %12970  ;;  %12974 = vrsqrt.f32 %v4064_v7  ;;  %v4065_v63 = vadd.f32 1e-05, %v4057_v59  ;;  %v4058_v57 = vmul.f32 0.03125, %v4050_v32 }
0x10c3   : > { %v4091_v33 = vmul.f32 %v10899_v38, %v4077_v53  ;;  %v4078_v6 = vmul.f32 %v12971_v24, %v14731_v29  ;;  %v4104_v52 = vadd.f32 %v10900_v54, %v4090_v23  ;;  %v14769_v2 = vadd.f32 %v4103_v15, %v14530_v0 }
0x10c4   : > { %12976 = vrsqrt.f32 %v4065_v63  ;;  %v4066_v30 = vadd.f32 1e-05, %v4058_v57 }
0x10c5   : > { %v4105_v34 = vadd.f32 %v10900_v54, %v4091_v33  ;;  %v4092_v25 = vmul.f32 %v10899_v38, %v4078_v6  ;;  %v14772_v42 = vadd.f32 %v4104_v52, %v14533_v4 }
0x10c6   : > { %12978 = vrsqrt.f32 %v4066_v30 }
0x10c7   : > { %v4106_v22 = vadd.f32 %v10900_v54, %v4092_v25  ;;  %v4155_v21 = vpack.c.bf16 %v14772_v42, %v14769_v2  ;;  %v14778_v29 = vadd.f32 %v4105_v34, %v14541_v58 }
0x10c9   : > { %11692 = vmatprep.mubr.msk.bf16.mxu0 %vm2074_vm1, %v4155_v21  ;;  %v14781_v49 = vadd.f32 %v4106_v22, %v14544_v45 }
0x10ca   : > { %v12973_v4 = vpop.eup %12972 }
0x10cb   : > { %v4156_v0 = vpack.c.bf16 %v14781_v49, %v14778_v29  ;;  %v4079_v50 = vmul.f32 %v12973_v4, %v14740_v17 }
0x10cc   : > { %v12975_v13 = vpop.eup %12974 }
0x10cd   : > { %11693 = vmatmul.mubr.msk.bf16.vlgmr.msra.gmra.mrb[56].mxu0 %vm2074_vm1, %v4156_v0  ;;  %v4080_v18 = vmul.f32 %v12975_v13, %v14742_v28  ;;  %v4093_v19 = vmul.f32 %v10899_v38, %v4079_v50 }
0x10ce   : > { %v12977_v41 = vpop.eup %12976 }
0x10cf   : > { %v4081_v55 = vmul.f32 %v12977_v41, %v14746_v35  ;;  %v4094_v58 = vmul.f32 %v10899_v38, %v4080_v18  ;;  %v4107_v56 = vadd.f32 %v10900_v54, %v4093_v19 }
0x10d0   : > { %v12979_v45 = vpop.eup %12978 }
0x10d1   : > { %v4082_v39 = vmul.f32 %v12979_v45, %v14751_v51  ;;  %v4108_v47 = vadd.f32 %v10900_v54, %v4094_v58  ;;  %v4095_v20 = vmul.f32 %v10899_v38, %v4081_v55  ;;  %v14791_v1 = vadd.f32 %v4107_v56, %v14555_v12 }
0x10d3   : > { %v14794_v17 = vadd.f32 %v4108_v47, %v14552_v44  ;;  %v4096_v10 = vmul.f32 %v10899_v38, %v4082_v39  ;;  %v4109_v28 = vadd.f32 %v10900_v54, %v4095_v20  ;;  %v10901_v44 = vld [vmem:[%s16587_s28] ss:$0 sm:$0xff]  ;;  %s16590_s28 = smov 112  }
0x10d5   : > { %v4157_v48 = vpack.c.bf16 %v14794_v17, %v14791_v1  ;;  %v4110_v35 = vadd.f32 %v10900_v54, %v4096_v10  ;;  %v14800_v27 = vadd.f32 %v4109_v28, %v14564_v11 }
0x10d7   : > { %11696 = vmatprep.mubr.msk.bf16.mxu0 %vm2074_vm1, %v4157_v48  ;;  %v14803_v51 = vadd.f32 %v4110_v35, %v14560_v60 }
0x10d9   : > { %v4158_v12 = vpack.c.bf16 %v14803_v51, %v14800_v27 }
0x10db   : > { %11697 = vmatmul.mubr.msk.bf16.gmra.mrb[60].mxu0 %vm2074_vm1, %v4158_v12 }
0x11a0   : > { %v11694_v40 = vpop.f32.mrb[56].mxu0 }
0x11a1   : > { %v14809_v14 = vadd.f32 %v11694_v40, %v10901_v44  ;;  %v4223_v5 = vpop.f32.mrb[57].mxu0 }
0x11a2   : > { %v11695_v31 = vpop.f32.mrb[58].mxu0  ;;  %v14821_v60 = vadd.f32 %v10901_v44, %v4223_v5 }
0x11a3   : > { %v14811_v38 = vadd.f32 %v11695_v31, %v10901_v44  ;;  %v4226_v43 = vpop.f32.mrb[59].mxu0  ;;  %v14815_v11 = vmul.f32 %v14809_v14, %v14809_v14 }
0x11a4   : > { %v14833_v62 = vmul.f32 %v14821_v60, %v14821_v60  ;;  %v14839_v54 = vadd.f32 %v10901_v44, %v4226_v43 }
0x11a5   : > { %4782 = vrot.lane.b32.xlu0 %v14815_v11, %s16588_s1  ;;  %4322 = vrot.lane.b32.xlu1 %v14815_v11, %s16589_s3  ;;  %v14825_v61 = vmul.f32 %v14811_v38, %v14811_v38 }
0x11a6   : > { %v14849_v26 = vmul.f32 %v14839_v54, %v14839_v54 }
0x11a7   : > { %v4271_v5 = vsel %vm2351_vm2, %v14825_v61, 0.0 }
0x11a8   : > { %v4265_v35 = vsel %vm2351_vm2, %v14849_v26, 0.0 }
0x11a9   : > { %4710 = vrot.lane.b32.xlu0 %v14815_v11, %s16590_s28  ;;  %4324 = vrot.lane.b32.xlu1 %v14825_v61, %s16589_s3 }
0x11ad   : > { %4784 = vrot.lane.b32.xlu1 %v14825_v61, %s16588_s1  ;;  %4318 = vrot.lane.b32.xlu0 %v14833_v62, %s16589_s3 }
0x11ae   : > { %v11698_v46 = vpop.f32.mrb[60].mxu0 }
0x11af   : > { %v4239_v36 = vpop.f32.mrb[61].mxu0  ;;  %v14845_v3 = vadd.f32 %v11698_v46, %v10901_v44 }
0x11b0   : > { %v11699_v37 = vpop.f32.mrb[62].mxu0  ;;  %v14869_v8 = vadd.f32 %v10901_v44, %v4239_v36 }
0x11b1   : > { %4712 = vrot.lane.b32.xlu1 %v14825_v61, %s16590_s28  ;;  %4778 = vrot.lane.b32.xlu0 %v14833_v62, %s16588_s1  ;;  %v4242_v16 = vpop.f32.mrb[63].mxu0  ;;  %v14857_v9 = vmul.f32 %v14845_v3, %v14845_v3  ;;  %v14863_v53 = vadd.f32 %v11699_v37, %v10901_v44 }
0x11b2   : > { %v14881_v15 = vmul.f32 %v14869_v8, %v14869_v8  ;;  %v14887_v24 = vadd.f32 %v10901_v44, %v4242_v16 }
0x11b3   : > { %v14873_v23 = vmul.f32 %v14863_v53, %v14863_v53 }
0x11b4   : > { %v14895_v7 = vmul.f32 %v14887_v24, %v14887_v24 }
0x11b5   : > { %4320 = vrot.lane.b32.xlu1 %v14849_v26, %s16589_s3  ;;  %4706 = vrot.lane.b32.xlu0 %v14833_v62, %s16590_s28 }
0x11b9   : > { %4780 = vrot.lane.b32.xlu1 %v14849_v26, %s16588_s1  ;;  %4330 = vrot.lane.b32.xlu0 %v14857_v9, %s16589_s3 }
0x11bd   : > { %4708 = vrot.lane.b32.xlu1 %v14849_v26, %s16590_s28  ;;  %4790 = vrot.lane.b32.xlu0 %v14857_v9, %s16588_s1 }
0x11c1   : > { %4718 = vrot.lane.b32.xlu0 %v14857_v9, %s16590_s28  ;;  %4332 = vrot.lane.b32.xlu1 %v14873_v23, %s16589_s3 }
0x11c5   : > { %4792 = vrot.lane.b32.xlu1 %v14873_v23, %s16588_s1  ;;  %4326 = vrot.lane.b32.xlu0 %v14881_v15, %s16589_s3 }
0x11c9   : > { %4720 = vrot.lane.b32.xlu1 %v14873_v23, %s16590_s28  ;;  %4786 = vrot.lane.b32.xlu0 %v14881_v15, %s16588_s1 }
0x11cd   : > { %4328 = vrot.lane.b32.xlu1 %v14895_v7, %s16589_s3  ;;  %4714 = vrot.lane.b32.xlu0 %v14881_v15, %s16590_s28 }
0x11d1   : > { %4788 = vrot.lane.b32.xlu1 %v14895_v7, %s16588_s1 }
0x11d5   : > { %4716 = vrot.lane.b32.xlu1 %v14895_v7, %s16590_s28 }
0x1217   : > { %v4323_v59 = vpop.permute.xlu1 %4322  ;;  %v4783_v33 = vpop.permute.xlu0 %4782 }
0x1218   : > { %v4348_v6 = vsel %vm2351_vm2, %v4323_v59, 0.0  ;;  %v4808_v57 = vsel %vm2351_vm2, %v4783_v33, 0.0 }
0x1219   : > { %4349 = vadd.xlane.f32.xlu0 %v4348_v6 }
0x121b   : > { %v4325_v32 = vpop.permute.xlu1 %4324  ;;  %v4711_v52 = vpop.permute.xlu0 %4710 }
0x121c   : > { %v4351_v63 = vsel %vm2351_vm2, %v4325_v32, 0.0  ;;  %v4736_v22 = vsel %vm2351_vm2, %v4711_v52, 0.0 }
0x121d   : > { %4352 = vadd.xlane.f32.xlu1 %v4351_v63  ;;  %4809 = vadd.xlane.f32.xlu0 %v4808_v57 }
0x121f   : > { %v4785_v34 = vpop.permute.xlu1 %4784  ;;  %v4319_v25 = vpop.permute.xlu0 %4318 }
0x1220   : > { %v4811_v30 = vsel %vm2351_vm2, %v4785_v34, 0.0  ;;  %v4342_v50 = vsel %vm2351_vm2, %v4319_v25, 0.0  ;;  %v4262_v25 = vsel %vm2351_vm2, %v14833_v62, 0.0 }
0x1221   : > { %4812 = vadd.xlane.f32.xlu1 %v4811_v30  ;;  %4737 = vadd.xlane.f32.xlu0 %v4736_v22  ;;  %v4268_v30 = vsel %vm2351_vm2, %v14815_v11, 0.0 }
0x1223   : > { %v4713_v21 = vpop.permute.xlu1 %4712  ;;  %v4779_v0 = vpop.permute.xlu0 %4778 }
0x1224   : > { %v4739_v4 = vsel %vm2351_vm2, %v4713_v21, 0.0  ;;  %v4802_v41 = vsel %vm2351_vm2, %v4779_v0, 0.0 }
0x1225   : > { %4740 = vadd.xlane.f32.xlu1 %v4739_v4  ;;  %4343 = vadd.xlane.f32.xlu0 %v4342_v50 }
0x1227   : > { %v4321_v13 = vpop.permute.xlu1 %4320  ;;  %v4707_v18 = vpop.permute.xlu0 %4706 }
0x1228   : > { %v4345_v19 = vsel %vm2351_vm2, %v4321_v13, 0.0  ;;  %v4730_v45 = vsel %vm2351_vm2, %v4707_v18, 0.0 }
0x1229   : > { %4346 = vadd.xlane.f32.xlu1 %v4345_v19  ;;  %4803 = vadd.xlane.f32.xlu0 %v4802_v41 }
0x122b   : > { %v4781_v55 = vpop.permute.xlu1 %4780  ;;  %v4331_v58 = vpop.permute.xlu0 %4330 }
0x122c   : > { %v4805_v56 = vsel %vm2351_vm2, %v4781_v55, 0.0  ;;  %v4360_v10 = vsel %vm2351_vm2, %v4331_v58, 0.0 }
0x122d   : > { %4806 = vadd.xlane.f32.xlu1 %v4805_v56  ;;  %4731 = vadd.xlane.f32.xlu0 %v4730_v45 }
0x122f   : > { %v4709_v39 = vpop.permute.xlu1 %4708  ;;  %v4791_v47 = vpop.permute.xlu0 %4790 }
0x1230   : > { %v4733_v20 = vsel %vm2351_vm2, %v4709_v39, 0.0  ;;  %v4820_v12 = vsel %vm2351_vm2, %v4791_v47, 0.0 }
0x1231   : > { %4734 = vadd.xlane.f32.xlu1 %v4733_v20  ;;  %4361 = vadd.xlane.f32.xlu0 %v4360_v10 }
0x1233   : > { %v4333_v28 = vpop.permute.xlu1 %4332  ;;  %v4719_v48 = vpop.permute.xlu0 %4718 }
0x1234   : > { %v4748_v31 = vsel %vm2351_vm2, %v4719_v48, 0.0  ;;  %v4363_v63 = vsel %vm2351_vm2, %v4333_v28, 0.0 }
0x1235   : > { %4266 = vadd.xlane.f32.xlu1 %v4265_v35  ;;  %4821 = vadd.xlane.f32.xlu0 %v4820_v12 }
0x1237   : > { %v4793_v44 = vpop.permute.xlu1 %4792  ;;  %v4327_v40 = vpop.permute.xlu0 %4326 }
0x1238   : > { %v4823_v36 = vsel %vm2351_vm2, %v4793_v44, 0.0  ;;  %v4354_v37 = vsel %vm2351_vm2, %v4327_v40, 0.0 }
0x1239   : > { %4272 = vadd.xlane.f32.xlu1 %v4271_v5  ;;  %4749 = vadd.xlane.f32.xlu0 %v4748_v31 }
0x123b   : > { %v4721_v43 = vpop.permute.xlu1 %4720  ;;  %v4787_v46 = vpop.permute.xlu0 %4786 }
0x123c   : > { %v4751_v26 = vsel %vm2351_vm2, %v4721_v43, 0.0  ;;  %v4814_v59 = vsel %vm2351_vm2, %v4787_v46, 0.0 }
0x123d   : > { %4824 = vadd.xlane.f32.xlu1 %v4823_v36  ;;  %4355 = vadd.xlane.f32.xlu0 %v4354_v37 }
0x123f   : > { %v4329_v16 = vpop.permute.xlu1 %4328  ;;  %v4715_v33 = vpop.permute.xlu0 %4714 }
0x1240   : > { %v4357_v6 = vsel %vm2351_vm2, %v4329_v16, 0.0  ;;  %v4742_v32 = vsel %vm2351_vm2, %v4715_v33, 0.0 }
0x1241   : > { %4752 = vadd.xlane.f32.xlu1 %v4751_v26  ;;  %4815 = vadd.xlane.f32.xlu0 %v4814_v59 }
0x1243   : > { %v4789_v61 = vpop.permute.xlu1 %4788 }
0x1244   : > { %v4817_v52 = vsel %vm2351_vm2, %v4789_v61, 0.0 }
0x1245   : > { %4358 = vadd.xlane.f32.xlu1 %v4357_v6  ;;  %4743 = vadd.xlane.f32.xlu0 %v4742_v32 }
0x1247   : > { %v4717_v57 = vpop.permute.xlu1 %4716 }
0x1248   : > { %v4745_v34 = vsel %vm2351_vm2, %v4717_v57, 0.0 }
0x1249   : > { %4818 = vadd.xlane.f32.xlu1 %v4817_v52  ;;  %4364 = vadd.xlane.f32.xlu0 %v4363_v63 }
0x124d   : > { %4746 = vadd.xlane.f32.xlu1 %v4745_v34  ;;  %4263 = vadd.xlane.f32.xlu0 %v4262_v25 }
0x1251   : > { %4269 = vadd.xlane.f32.xlu0 %v4268_v30 }
0x12a6   : > { %v4350_v22 = vpop.xlane.xlu0 %4349 }
0x12a7   : > { %v4368_v21 = vmax.f32 %v4350_v22, 1e-24 }
0x12a9   : > { %12980 = vrsqrt.f32 %v4368_v21 }
0x12aa   : > { %v4353_v0 = vpop.xlane.xlu1 %4352  ;;  %v14937_v4 = vpop.xlane.xlu0 %4809 }
0x12ab   : > { %v4369_v50 = vmax.f32 %v4353_v0, 1e-24 }
0x12ad   : > { %12982 = vrsqrt.f32 %v4369_v50 }
0x12ae   : > { %v14939_v13 = vpop.xlane.xlu1 %4812  ;;  %v14941_v18 = vpop.xlane.xlu0 %4737 }
0x12b2   : > { %v14943_v19 = vpop.xlane.xlu1 %4740  ;;  %v4344_v62 = vpop.xlane.xlu0 %4343 }
0x12b3   : > { %v4366_v41 = vmax.f32 %v4344_v62, 1e-24  ;;  %v12981_v55 = vpop.eup %12980 }
0x12b4   : > { %v4384_v39 = vmul.f32 %v12981_v55, %v14809_v14 }
0x12b5   : > { %12984 = vrsqrt.f32 %v4366_v41  ;;  %v4277_v41 = vsel %vm2351_vm2, %v14895_v7, 0.0 }
0x12b6   : > { %v4347_v58 = vpop.xlane.xlu1 %4346  ;;  %v14945_v11 = vpop.xlane.xlu0 %4803 }
0x12b7   : > { %v12983_v56 = vpop.eup %12982  ;;  %v4367_v45 = vmax.f32 %v4347_v58, 1e-24 }
0x12b8   : > { %v4385_v47 = vmul.f32 %v12983_v56, %v14811_v38  ;;  %v14975_v56 = vstv %s10908_s5  ;;  %s10917_s5 = sld [smem:[#allocation2 + $0x5]] }
0x12b9   : > { %12986 = vrsqrt.f32 %v4367_v45 }
0x12ba   : > { %v4807_v20 = vpop.xlane.xlu1 %4806  ;;  %v14949_v10 = vpop.xlane.xlu0 %4731  ;;  %v4405_v28 = vpack.c.bf16 %v4385_v47, %v4384_v39  ;;  %v4280_v47 = vsel %vm2351_vm2, %v14857_v9, 0.0 }
0x12bc   : > { %4422 = vrot.lane.b32.xlu1 %v4405_v28, %s16589_s3 }
0x12be   : > { %v4735_v48 = vpop.xlane.xlu1 %4734  ;;  %v14952_v35 = vpop.xlane.xlu0 %4361 }
0x12bf   : > { %v12985_v12 = vpop.eup %12984  ;;  %v4755_v7 = vmax.f32 %v4735_v48, 1e-24 }
0x12c0   : > { %v4382_v31 = vmul.f32 %v12985_v12, %v14821_v60 }
0x12c2   : > { %v4267_v44 = vpop.xlane.xlu1 %4266  ;;  %v14954_v40 = vpop.xlane.xlu0 %4821 }
0x12c3   : > { %v12987_v5 = vpop.eup %12986  ;;  %v4287_v63 = vmax.f32 %v4267_v44, 1e-24  ;;  %v4827_v44 = vmax.f32 %v4807_v20, 1e-24 }
0x12c4   : > { %v4383_v43 = vmul.f32 %v12987_v5, %v14839_v54 }
0x12c6   : > { %v14958_v46 = vpop.xlane.xlu1 %4272  ;;  %v14960_v36 = vpop.xlane.xlu0 %4749  ;;  %v4404_v37 = vpack.c.bf16 %v4383_v43, %v4382_v31  ;;  %v4283_v31 = vsel %vm2351_vm2, %v14873_v23, 0.0  ;;  %v4826_v43 = vmax.f32 %v14945_v11, 1e-24 }
0x12c8   : > { %4420 = vrot.lane.b32.xlu0 %v4404_v37, %s16589_s3 }
0x12ca   : > { %v14963_v16 = vpop.xlane.xlu1 %4824  ;;  %v4356_v26 = vpop.xlane.xlu0 %4355 }
0x12cb   : > { %v4370_v61 = vmax.f32 %v4356_v26, 1e-24  ;;  %v4754_v26 = vmax.f32 %v14949_v10, 1e-24 }
0x12cd   : > { %12988 = vrsqrt.f32 %v4370_v61 }
0x12ce   : > { %v14965_v59 = vpop.xlane.xlu1 %4752  ;;  %v14967_v33 = vpop.xlane.xlu0 %4815 }
0x12d2   : > { %v4359_v6 = vpop.xlane.xlu1 %4358  ;;  %v4744_v32 = vpop.xlane.xlu0 %4743 }
0x12d3   : > { %v4371_v52 = vmax.f32 %v4359_v6, 1e-24  ;;  %v4758_v61 = vmax.f32 %v4744_v32, 1e-24 }
0x12d5   : > { %12990 = vrsqrt.f32 %v4371_v52 }
0x12d6   : > { %v4365_v57 = vpop.xlane.xlu0 %4364  ;;  %12992 = vrsqrt.f32 %v4287_v63  ;;  %v4819_v45 = vpop.xlane.xlu1 %4818 }
0x12d7   : > { %v12989_v30 = vpop.eup %12988 }
0x12d8   : > { %v4386_v21 = vmul.f32 %v12989_v30, %v14869_v8  ;;  %v4373_v30 = vmax.f32 %v4365_v57, 1e-24  ;;  %v4274_v57 = vsel %vm2351_vm2, %v14881_v15, 0.0  ;;  %v4833_v15 = vmax.f32 %v14963_v16, 1e-24 }
0x12da   : > { %v4264_v34 = vpop.xlane.xlu0 %4263  ;;  %v4747_v37 = vpop.xlane.xlu1 %4746 }
0x12db   : > { %v4286_v25 = vmax.f32 %v4264_v34, 1e-24  ;;  %v4759_v9 = vmax.f32 %v4747_v37, 1e-24 }
0x12dd   : > { %12994 = vrsqrt.f32 %v4286_v25 }
0x12de   : > { %12996 = vrsqrt.f32 %v4827_v44  ;;  %v4757_v44 = vmax.f32 %v14943_v19, 1e-24 }
0x12df   : > { %v12991_v22 = vpop.eup %12990  ;;  %12998 = vrsqrt.f32 %v4755_v7  ;;  %v4832_v7 = vmax.f32 %v14954_v40, 1e-24 }
0x12e0   : > { %v4387_v0 = vmul.f32 %v12991_v22, %v14887_v24  ;;  %v12993_v62 = vpop.eup %12992  ;;  %13000 = vrsqrt.f32 %v4826_v43  ;;  %v14991_v22 = vstv %s10917_s5  ;;  %v4760_v43 = vmax.f32 %v14960_v36, 1e-24  ;;  %s16591_s5 = sld [smem:[#allocation20_spill]] }
0x12e1   : > { %v4303_v55 = vmul.f32 %v12993_v62, %v14839_v54  ;;  %13002 = vrsqrt.f32 %v4754_v26 }
0x12e2   : > { %v4406_v50 = vpack.c.bf16 %v4387_v0, %v4386_v21  ;;  %13004 = vrsqrt.f32 %v4759_v9 }
0x12e3   : > { %v4393_v12 = vmul.f32 %v14975_v56, %v4303_v55  ;;  %13006 = vrsqrt.f32 %v4758_v61  ;;  %v4829_v55 = vmax.f32 %v14939_v13, 1e-24  ;;  %v4830_v13 = vmax.f32 %v14967_v33, 1e-24 }
0x12e4   : > { %4424 = vrot.lane.b32.xlu1 %v4406_v50, %s16589_s3  ;;  %v4372_v50 = vmax.f32 %v14952_v35, 1e-24  ;;  %13008 = vrsqrt.f32 %v4373_v30 }
0x12e6   : > { %13010 = vrsqrt.f32 %v4372_v50 }
0x12e7   : > { %4278 = vadd.xlane.f32.xlu0 %v4277_v41  ;;  %v12995_v58 = vpop.eup %12994  ;;  %13012 = vrsqrt.f32 %v4829_v55 }
0x12e8   : > { %v4302_v39 = vmul.f32 %v12995_v58, %v14821_v60  ;;  %v12997_v20 = vpop.eup %12996 }
0x12e9   : > { %v12999_v48 = vpop.eup %12998  ;;  %v4843_v11 = vmul.f32 %v12997_v20, %v14839_v54 }
0x12ea   : > { %v4392_v28 = vmul.f32 %v14975_v56, %v4302_v39  ;;  %v13001_v23 = vpop.eup %13000  ;;  %v4771_v52 = vmul.f32 %v12999_v48, %v14839_v54 }
0x12eb   : > { %4281 = vadd.xlane.f32.xlu0 %v4280_v47  ;;  %v13003_v6 = vpop.eup %13002  ;;  %v4842_v10 = vmul.f32 %v13001_v23, %v14821_v60  ;;  %v4828_v47 = vmax.f32 %v14937_v4, 1e-24  ;;  %v4756_v4 = vmax.f32 %v14941_v18, 1e-24 }
0x12ec   : > { %v4400_v5 = vpack.c.bf16 %v4393_v12, %v4392_v28  ;;  %v13005_v63 = vpop.eup %13004  ;;  %v4770_v34 = vmul.f32 %v13003_v6, %v14821_v60  ;;  %v4853_v21 = vmul.f32 %v14991_v22, %v4771_v52  ;;  %v4831_v28 = vmax.f32 %v4819_v45, 1e-24 }
0x12ed   : > { %v13007_v25 = vpop.eup %13006  ;;  %v4864_v32 = vpack.c.bf16 %v4843_v11, %v4842_v10  ;;  %v4775_v0 = vmul.f32 %v13005_v63, %v14887_v24  ;;  %13014 = vrsqrt.f32 %v4828_v47  ;;  %v4761_v45 = vmax.f32 %v14965_v59, 1e-24  ;;  %v4270_v47 = vpop.xlane.xlu0 %4269 }
0x12ee   : > { %11708 = vmatprep.mubr.msk.bf16.mxu0 %vm2351_vm2, %v4400_v5  ;;  %v4852_v62 = vmul.f32 %v14991_v22, %v4770_v34  ;;  %v4774_v41 = vmul.f32 %v13007_v25, %v14869_v8  ;;  %13016 = vrsqrt.f32 %v4831_v28  ;;  %v13009_v5 = vpop.eup %13008 }
0x12ef   : > { %4284 = vadd.xlane.f32.xlu0 %v4283_v31  ;;  %v4857_v39 = vmul.f32 %v14991_v22, %v4775_v0  ;;  %13018 = vrsqrt.f32 %v4830_v13  ;;  %v4389_v33 = vmul.f32 %v13009_v5, %v14863_v53  ;;  %v4288_v5 = vmax.f32 %v4270_v47, 1e-24 }
0x12f0   : > { %v4860_v58 = vpack.c.bf16 %v4853_v21, %v4852_v62  ;;  %v4856_v35 = vmul.f32 %v14991_v22, %v4774_v41  ;;  %13020 = vrsqrt.f32 %v4757_v44  ;;  %v13011_v31 = vpop.eup %13010 }
0x12f1   : > { %13022 = vrsqrt.f32 %v4833_v15  ;;  %v13013_v19 = vpop.eup %13012  ;;  %v4388_v16 = vmul.f32 %v13011_v31, %v14845_v3 }
0x12f2   : > { %v4862_v12 = vpack.c.bf16 %v4857_v39, %v4856_v35  ;;  %13024 = vrsqrt.f32 %v4756_v4  ;;  %v4845_v40 = vmul.f32 %v13013_v19, %v14811_v38 }
0x12f3   : > { %13026 = vrsqrt.f32 %v4832_v7  ;;  %v4407_v18 = vpack.c.bf16 %v4389_v33, %v4388_v16  ;;  %v4289_v7 = vmax.f32 %v14958_v46, 1e-24 }
0x12f4   : > { %13028 = vrsqrt.f32 %v4761_v45 }
0x12f5   : > { %13030 = vrsqrt.f32 %v4760_v43 }
0x12f6   : > { %13032 = vrsqrt.f32 %v4288_v5 }
0x12f7   : > { %v13015_v37 = vpop.eup %13014  ;;  %13034 = vrsqrt.f32 %v4289_v7 }
0x12f8   : > { %v13017_v26 = vpop.eup %13016  ;;  %v4844_v59 = vmul.f32 %v13015_v37, %v14809_v14 }
0x12f9   : > { %v13019_v9 = vpop.eup %13018  ;;  %v4847_v48 = vmul.f32 %v13017_v26, %v14887_v24 }
0x12fa   : > { %v13021_v61 = vpop.eup %13020  ;;  %v4865_v20 = vpack.c.bf16 %v4845_v40, %v4844_v59  ;;  %v4846_v6 = vmul.f32 %v13019_v9, %v14869_v8 }
0x12fb   : > { %v13023_v23 = vpop.eup %13022  ;;  %v4773_v10 = vmul.f32 %v13021_v61, %v14811_v38 }
0x12fc   : > { %v13025_v36 = vpop.eup %13024  ;;  %v4866_v52 = vpack.c.bf16 %v4847_v48, %v4846_v6  ;;  %v4849_v63 = vmul.f32 %v13023_v23, %v14863_v53 }
0x12fd   : > { %v13027_v11 = vpop.eup %13026  ;;  %v4772_v30 = vmul.f32 %v13025_v36, %v14809_v14  ;;  %v4855_v0 = vmul.f32 %v14991_v22, %v4773_v10 }
0x12fe   : > { %v13029_v34 = vpop.eup %13028  ;;  %v4848_v25 = vmul.f32 %v13027_v11, %v14845_v3 }
0x12ff   : > { %v4777_v50 = vmul.f32 %v13029_v34, %v14863_v53  ;;  %v4854_v62 = vmul.f32 %v14991_v22, %v4772_v30 }
0x1300   : > { %v4867_v21 = vpack.c.bf16 %v4849_v63, %v4848_v25 }
0x1301   : > { %v4861_v55 = vpack.c.bf16 %v4855_v0, %v4854_v62 }
0x1305   : > { %4893 = vrot.lane.b32.xlu0 %v4864_v32, %s16588_s1  ;;  %v13031_v32 = vpop.eup %13030 }
0x1306   : > { %v4776_v41 = vmul.f32 %v13031_v32, %v14845_v3  ;;  %v13033_v43 = vpop.eup %13032 }
0x1307   : > { %v4304_v40 = vmul.f32 %v13033_v43, %v14809_v14 }
0x1308   : > { %4275 = vadd.xlane.f32.xlu1 %v4274_v57  ;;  %v4859_v57 = vmul.f32 %v14991_v22, %v4777_v50 }
0x1309   : > { %4881 = vrot.lane.b32.xlu0 %v4860_v58, %s16590_s28  ;;  %v4858_v58 = vmul.f32 %v14991_v22, %v4776_v41  ;;  %v4394_v61 = vmul.f32 %v14975_v56, %v4304_v40  ;;  %v4409_v40 = vld [vmem:[%s16591_s5 + $0x8] sm:$0xff] }
0x130b   : > { %v4863_v39 = vpack.c.bf16 %v4859_v57, %v4858_v58 }
0x130d   : > { %4885 = vrot.lane.b32.xlu0 %v4862_v12, %s16590_s28 }
0x1319   : > { %4426 = vrot.lane.b32.xlu1 %v4407_v18, %s16589_s3  ;;  %v13035_v18 = vpop.eup %13034 }
0x131a   : > { %v4305_v59 = vmul.f32 %v13035_v18, %v14811_v38 }
0x131c   : > { %v4395_v23 = vmul.f32 %v14975_v56, %v4305_v59 }
0x131d   : > { %4895 = vrot.lane.b32.xlu1 %v4865_v20, %s16588_s1 }
0x131e   : > { %v4401_v6 = vpack.c.bf16 %v4395_v23, %v4394_v61  ;;  %v4411_v23 = vld [vmem:[%s16591_s5 + $0x18] sm:$0xff] }
0x1321   : > { %4897 = vrot.lane.b32.xlu1 %v4866_v52, %s16588_s1 }
0x1325   : > { %4899 = vrot.lane.b32.xlu1 %v4867_v21, %s16588_s1 }
0x1329   : > { %4883 = vrot.lane.b32.xlu1 %v4861_v55, %s16590_s28 }
0x132d   : > { %4887 = vrot.lane.b32.xlu1 %v4863_v39, %s16590_s28 }
0x132e   : > { %v4423_v12 = vpop.permute.xlu1 %4422 }
0x132f   : > { %v4444_v13 = vsel %vm2351_vm2, %v4423_v12, 0 }
0x133a   : > { %v4421_v35 = vpop.permute.xlu0 %4420 }
0x133b   : > { %12377 = vmatprep.subr.msk.bf16.mxu0 %vm2351_vm2, %v4421_v35  ;;  %v4441_v28 = vsel %vm2351_vm2, %v4421_v35, 0 }
0x133c   : > { %11701 = vmatpush3.bf16.xpose.msra.mxu0 %v4441_v28 }
0x133d   : > { %12378 = vmatprep.subr.msk.bf16.mxu0 %vm2351_vm2, %v4423_v12 }
0x1344   : > { %11703 = vmatpush3.bf16.xpose.msra.mxu0 %v4444_v13 }
0x1356   : > { %v4425_v44 = vpop.permute.xlu1 %4424 }
0x1357   : > { %12379 = vmatprep.subr.msk.bf16.mxu0 %vm2351_vm2, %v4425_v44  ;;  %v4447_v22 = vsel %vm2351_vm2, %v4425_v44, 0 }
0x1358   : > { %11705 = vmatpush3.bf16.xpose.msra.mxu0 %v4447_v22 }
0x1374   : > { %v4279_v15 = vpop.xlane.xlu0 %4278 }
0x1375   : > { %v4291_v33 = vmax.f32 %v4279_v15, 1e-24 }
0x1378   : > { %v4282_v4 = vpop.xlane.xlu0 %4281 }
0x1379   : > { %v4292_v19 = vmax.f32 %v4282_v4, 1e-24 }
0x137c   : > { %v4285_v31 = vpop.xlane.xlu0 %4284 }
0x137d   : > { %v4293_v45 = vmax.f32 %v4285_v31, 1e-24 }
0x137f   : > { %13036 = vrsqrt.f32 %v4293_v45  ;;  %v10920_v45 = vld [vmem:[%s16591_s5 + $0x50] sm:$0xff] }
0x1380   : > { %13038 = vrsqrt.f32 %v4291_v33  ;;  %v4894_v9 = vpop.permute.xlu0 %4893 }
0x1381   : > { %13040 = vrsqrt.f32 %v4292_v19  ;;  %v4914_v10 = vsel %vm2351_vm2, %v4894_v9, 0  ;;  %v10918_v19 = vld [vmem:[%s16591_s5 + $0x40] sm:$0xff] }
0x1384   : > { %v4882_v55 = vpop.permute.xlu0 %4881 }
0x1388   : > { %v4886_v28 = vpop.permute.xlu0 %4885 }
0x1389   : > { %v13037_v20 = vpop.eup %13036 }
0x138a   : > { %v13039_v48 = vpop.eup %13038  ;;  %v4309_v11 = vmul.f32 %v13037_v20, %v14863_v53 }
0x138b   : > { %v13041_v36 = vpop.eup %13040  ;;  %v4307_v52 = vmul.f32 %v13039_v48, %v14887_v24 }
0x138c   : > { %v4308_v34 = vmul.f32 %v13041_v36, %v14845_v3  ;;  %v4399_v32 = vmul.f32 %v14975_v56, %v4309_v11 }
0x138d   : > { %v4397_v0 = vmul.f32 %v14975_v56, %v4307_v52  ;;  %v10922_v52 = vld [vmem:[%s16591_s5 + $0x60] sm:$0xff] }
0x138e   : > { %v4398_v50 = vmul.f32 %v14975_v56, %v4308_v34 }
0x1390   : > { %v4403_v41 = vpack.c.bf16 %v4399_v32, %v4398_v50  ;;  %v10924_v50 = vld [vmem:[%s16591_s5 + $0x70] sm:$0xff] }
0x1395   : > { %v4276_v16 = vpop.xlane.xlu1 %4275 }
0x1396   : > { %v4290_v37 = vmax.f32 %v4276_v16, 1e-24 }
0x1398   : > { %13042 = vrsqrt.f32 %v4290_v37  ;;  %v10919_v37 = vld [vmem:[%s16591_s5 + $0x48] sm:$0xff] }
0x1399   : > { %v4427_v26 = vpop.permute.xlu1 %4426 }
0x139a   : > { %12380 = vmatprep.subr.msk.bf16.mxu0 %vm2351_vm2, %v4427_v26  ;;  %v4450_v46 = vsel %vm2351_vm2, %v4427_v26, 0 }
0x139b   : > { %11707 = vmatpush3.bf16.xpose.msra.mxu0 %v4450_v46 }
0x139c   : > { %12381 = vmatprep.subr.msk.bf16.mxu0 %vm2351_vm2, %v4894_v9  ;;  %v10921_v9 = vld [vmem:[%s16591_s5 + $0x58] sm:$0xff] }
0x139d   : > { %v4896_v25 = vpop.permute.xlu1 %4895 }
0x139e   : > { %v4917_v57 = vsel %vm2351_vm2, %v4896_v25, 0 }
0x13a1   : > { %v4898_v58 = vpop.permute.xlu1 %4897 }
0x13a2   : > { %v13043_v63 = vpop.eup %13042  ;;  %11709 = vmatmul.mubr.msk.bf16.vlgmr.msra.gmra.mrb[64].mxu0 %vm2351_vm2, %v4401_v6  ;;  %v4920_v39 = vsel %vm2351_vm2, %v4898_v58, 0 }
0x13a3   : > { %11733 = vmatpush3.bf16.xpose.msra.mxu0 %v4914_v10  ;;  %v4306_v30 = vmul.f32 %v13043_v63, %v14869_v8 }
0x13a4   : > { %12382 = vmatprep.subr.msk.bf16.mxu0 %vm2351_vm2, %v4896_v25 }
0x13a5   : > { %v4396_v21 = vmul.f32 %v14975_v56, %v4306_v30  ;;  %v4900_v47 = vpop.permute.xlu1 %4899  ;;  %v4413_v30 = vld [vmem:[%s16591_s5 + $0x28] sm:$0xff] }
0x13a6   : > { %v4923_v56 = vsel %vm2351_vm2, %v4900_v47, 0 }
0x13a7   : > { %v4402_v62 = vpack.c.bf16 %v4397_v0, %v4396_v21 }
0x13a9   : > { %11712 = vmatprep.mubr.msk.bf16.mxu0 %vm2351_vm2, %v4402_v62  ;;  %v4884_v35 = vpop.permute.xlu1 %4883 }
0x13aa   : > { %11713 = vmatmul.mubr.msk.bf16.gmra.mrb[68].mxu0 %vm2351_vm2, %v4403_v41 }
0x13ab   : > { %11735 = vmatpush3.bf16.xpose.msra.mxu0 %v4917_v57  ;;  %11740 = vmatprep.mubr.msk.bf16.mxu0 %vm2351_vm2, %v4882_v55  ;;  %v4415_v55 = vld [vmem:[%s16591_s5 + $0x38] sm:$0xff] }
0x13ac   : > { %12383 = vmatprep.subr.msk.bf16.mxu0 %vm2351_vm2, %v4898_v58 }
0x13ad   : > { %v4888_v12 = vpop.permute.xlu1 %4887 }
0x13b3   : > { %11737 = vmatpush3.bf16.xpose.msra.mxu0 %v4920_v39  ;;  %v4408_v39 = vld [vmem:[%s16591_s5] sm:$0xff] }
0x13b4   : > { %12384 = vmatprep.subr.msk.bf16.mxu0 %vm2351_vm2, %v4900_v47 }
0x13bb   : > { %11739 = vmatpush3.bf16.xpose.msra.mxu0 %v4923_v56 }
0x13c2   : > { %11741 = vmatmul.mubr.msk.bf16.vlgmr.msra.gmra.mrb[72].mxu0 %vm2351_vm2, %v4884_v35 }
0x13c3   : > { %11744 = vmatprep.mubr.msk.bf16.mxu0 %vm2351_vm2, %v4886_v28  ;;  %v10925_v28 = vld [vmem:[%s16591_s5 + $0x78] sm:$0xff] }
0x13ca   : > { %11745 = vmatmul.mubr.msk.bf16.gmra.mrb[76].mxu0 %vm2351_vm2, %v4888_v12 }
0x1475   : > { %v11710_v13 = vpop.f32.mrb[64].mxu0 }
0x1476   : > { %v4486_v44 = vpop.f32.mrb[65].mxu0 }
0x1477   : > { %v11711_v22 = vpop.f32.mrb[66].mxu0  ;;  %v15121_v35 = vadd.f32 %v4486_v44, %v4408_v39 }
0x1478   : > { %v4489_v15 = vpop.f32.mrb[67].mxu0  ;;  %v15099_v10 = vadd.f32 %v11711_v22, %v4411_v23  ;;  %v4410_v22 = vld [vmem:[%s16591_s5 + $0x10] sm:$0xff] }
0x1479   : > { %v15089_v20 = vadd.f32 %v4489_v15, %v4409_v40  ;;  %v4517_v44 = vsel %vm2607_vm3, %v15121_v35, -inf }
0x147a   : > { %v4526_v41 = vsel %vm2607_vm3, %v15099_v10, -inf }
0x147b   : > { %v4520_v25 = vsel %vm2607_vm3, %v15089_v20, -inf }
0x147d   : > { %v15072_v4 = vpop.f32.mrb[68].mxu0 }
0x147e   : > { %v15074_v5 = vpop.f32.mrb[69].mxu0 }
0x147f   : > { %v11715_v7 = vpop.f32.mrb[70].mxu0 }
0x1480   : > { %v4505_v31 = vpop.f32.mrb[71].mxu0  ;;  %v15117_v47 = vadd.f32 %v11715_v7, %v4415_v55  ;;  %v10923_v7 = vld [vmem:[%s16591_s5 + $0x68] sm:$0xff] }
0x1481   : > { %v15109_v62 = vadd.f32 %v4505_v31, %v4413_v30 }
0x1482   : > { %v4538_v31 = vsel %vm2607_vm3, %v15117_v47, -inf }
0x1483   : > { %v4532_v56 = vsel %vm2607_vm3, %v15109_v62, -inf }
0x1495   : > { %v11742_v33 = vpop.f32.mrb[72].mxu0 }
0x1496   : > { %v15078_v43 = vadd.f32 %v11742_v33, %v10920_v45  ;;  %v4959_v16 = vpop.f32.mrb[73].mxu0  ;;  %v15130_v45 = vadd.f32 %v11710_v13, %v4410_v22  ;;  %v4412_v33 = vld [vmem:[%s16591_s5 + $0x20] sm:$0xff] }
0x1497   : > { %v11743_v18 = vpop.f32.mrb[74].mxu0  ;;  %v15082_v26 = vadd.f32 %v10918_v19, %v4959_v16 }
0x1498   : > { %v4962_v59 = vpop.f32.mrb[75].mxu0  ;;  %v4996_v46 = vsel %vm2607_vm3, %v15078_v43, -inf  ;;  %v15094_v36 = vadd.f32 %v11743_v18, %v10921_v9  ;;  %v4523_v13 = vsel %vm2607_vm3, %v15130_v45, -inf  ;;  %v4414_v18 = vld [vmem:[%s16591_s5 + $0x30] sm:$0xff]  ;;  %s16592_s5 = smov 48  }
0x1499   : > { %v15087_v61 = vadd.f32 %v10919_v37, %v4962_v59  ;;  %4997 = vmax.xlane.f32.xlu0 %v4996_v46  ;;  %v4990_v6 = vsel %vm2607_vm3, %v15082_v26, -inf  ;;  %v15141_v37 = vadd.f32 %v15074_v5, %v4412_v33  ;;  %v15149_v59 = vadd.f32 %v15072_v4, %v4414_v18 }
0x149a   : > { %v4999_v0 = vsel %vm2607_vm3, %v15094_v36, -inf  ;;  %v15194_v18 = vpack.c.bf16 %v14887_v24, %v14869_v8 }
0x149b   : > { %v4993_v48 = vsel %vm2607_vm3, %v15087_v61, -inf  ;;  %v4529_v46 = vsel %vm2607_vm3, %v15141_v37, -inf  ;;  %v4535_v5 = vsel %vm2607_vm3, %v15149_v59, -inf }
0x149c   : > { %4994 = vmax.xlane.f32.xlu1 %v4993_v48 }
0x149d   : > { %4991 = vmax.xlane.f32.xlu0 %v4990_v6  ;;  %v11746_v11 = vpop.f32.mrb[76].mxu0 }
0x149e   : > { %v4975_v63 = vpop.f32.mrb[77].mxu0  ;;  %v4984_v57 = vadd.f32 %v11746_v11, %v10924_v50 }
0x149f   : > { %v11747_v34 = vpop.f32.mrb[78].mxu0  ;;  %v15104_v32 = vadd.f32 %v10922_v52, %v4975_v63 }
0x14a0   : > { %4521 = vmax.xlane.f32.xlu1 %v4520_v25  ;;  %v4978_v21 = vpop.f32.mrb[79].mxu0  ;;  %v5008_v12 = vsel %vm2607_vm3, %v4984_v57, -inf  ;;  %v15126_v15 = vadd.f32 %v11747_v34, %v10925_v28 }
0x14a1   : > { %5000 = vmax.xlane.f32.xlu0 %v4999_v0  ;;  %v5002_v58 = vsel %vm2607_vm3, %v15104_v32, -inf  ;;  %v15136_v19 = vadd.f32 %v10923_v7, %v4978_v21 }
0x14a2   : > { %v5011_v16 = vsel %vm2607_vm3, %v15126_v15, -inf }
0x14a3   : > { %v5005_v40 = vsel %vm2607_vm3, %v15136_v19, -inf }
0x14a4   : > { %4527 = vmax.xlane.f32.xlu1 %v4526_v41 }
0x14a5   : > { %5003 = vmax.xlane.f32.xlu0 %v5002_v58 }
0x14a8   : > { %4533 = vmax.xlane.f32.xlu1 %v4532_v56 }
0x14a9   : > { %5009 = vmax.xlane.f32.xlu0 %v5008_v12 }
0x14ac   : > { %4539 = vmax.xlane.f32.xlu1 %v4538_v31 }
0x14ad   : > { %4518 = vmax.xlane.f32.xlu0 %v4517_v44 }
0x14b0   : > { %5012 = vmax.xlane.f32.xlu1 %v5011_v16  ;;  %v15188_v16 = vpack.c.bf16 %v14811_v38, %v14809_v14 }
0x14b1   : > { %4524 = vmax.xlane.f32.xlu0 %v4523_v13 }
0x14b4   : > { %5006 = vmax.xlane.f32.xlu1 %v5005_v40 }
0x14b5   : > { %4530 = vmax.xlane.f32.xlu0 %v4529_v46  ;;  %v4609_v46 = vpack.c.bf16 %v14839_v54, %v14821_v60 }
0x14b9   : > { %4536 = vmax.xlane.f32.xlu0 %v4535_v5 }
0x1526   : > { %v4998_v9 = vpop.xlane.xlu0 %4997 }
0x1527   : > { %v5016_v48 = vsub.f32 %v15078_v43, %v4998_v9 }
0x1529   : > { %v5026_v23 = vmul.f32 1.442695, %v5016_v48  ;;  %v4995_v6 = vpop.xlane.xlu1 %4994 }
0x152a   : > { %v4992_v11 = vpop.xlane.xlu0 %4991  ;;  %v5015_v4 = vsub.f32 %v15087_v61, %v4995_v6 }
0x152b   : > { %13044 = vpow2.f32 %v5026_v23  ;;  %v5014_v52 = vsub.f32 %v15082_v26, %v4992_v11 }
0x152c   : > { %v5024_v30 = vmul.f32 1.442695, %v5015_v4 }
0x152d   : > { %v5022_v63 = vmul.f32 1.442695, %v5014_v52  ;;  %v15182_v7 = vpop.xlane.xlu1 %4521 }
0x152e   : > { %v5001_v34 = vpop.xlane.xlu0 %5000 }
0x152f   : > { %13046 = vpow2.f32 %v5022_v63  ;;  %v5017_v25 = vsub.f32 %v15094_v36, %v5001_v34 }
0x1531   : > { %v5028_v21 = vmul.f32 1.442695, %v5017_v25  ;;  %v4528_v33 = vpop.xlane.xlu1 %4527 }
0x1532   : > { %v5004_v0 = vpop.xlane.xlu0 %5003  ;;  %v4544_v54 = vsub.f32 %v15099_v10, %v4528_v33 }
0x1533   : > { %13048 = vpow2.f32 %v5028_v21  ;;  %v5018_v43 = vsub.f32 %v15104_v32, %v5004_v0 }
0x1534   : > { %13050 = vpow2.f32 %v5024_v30  ;;  %v4555_v63 = vmul.f32 1.442695, %v4544_v54 }
0x1535   : > { %v15159_v50 = vpop.eup %13044  ;;  %v5030_v58 = vmul.f32 1.442695, %v5018_v43  ;;  %v4534_v13 = vpop.xlane.xlu1 %4533 }
0x1536   : > { %v5010_v41 = vpop.xlane.xlu0 %5009  ;;  %v5044_v26 = vsel %vm2607_vm3, %v15159_v50, 0.0 }
0x1537   : > { %v5020_v55 = vsub.f32 %v4984_v57, %v5010_v41  ;;  %5045 = vadd.xlane.f32.xlu0 %v5044_v26 }
0x1539   : > { %v15164_v61 = vpop.eup %13046  ;;  %v5034_v39 = vmul.f32 1.442695, %v5020_v55  ;;  %v4540_v40 = vpop.xlane.xlu1 %4539 }
0x153a   : > { %v5038_v36 = vsel %vm2607_vm3, %v15164_v61, 0.0  ;;  %v4519_v14 = vpop.xlane.xlu0 %4518 }
0x153b   : > { %13052 = vpow2.f32 %v5034_v39  ;;  %5039 = vadd.xlane.f32.xlu0 %v5038_v36  ;;  %v4541_v48 = vsub.f32 %v15121_v35, %v4519_v14 }
0x153c   : > { %13054 = vpow2.f32 %v5030_v58 }
0x153d   : > { %v15168_v56 = vpop.eup %13048  ;;  %v5013_v5 = vpop.xlane.xlu1 %5012  ;;  %v4549_v6 = vmul.f32 1.442695, %v4541_v48 }
0x153e   : > { %v5047_v32 = vsel %vm2607_vm3, %v15168_v56, 0.0  ;;  %v15172_v28 = vpop.eup %13050  ;;  %v5021_v38 = vsub.f32 %v15126_v15, %v5013_v5  ;;  %v4525_v24 = vpop.xlane.xlu0 %4524  ;;  %v4548_v5 = vsub.f32 %v15117_v47, %v4540_v40 }
0x153f   : > { %5048 = vadd.xlane.f32.xlu1 %v5047_v32  ;;  %v5041_v57 = vsel %vm2607_vm3, %v15172_v28, 0.0  ;;  %v4543_v11 = vsub.f32 %v15130_v45, %v4525_v24  ;;  %v4612_v32 = vpack.c.bf16 %v14863_v53, %v14845_v3 }
0x1540   : > { %v5036_v23 = vmul.f32 1.442695, %v5021_v38  ;;  %v4563_v14 = vmul.f32 1.442695, %v4548_v5 }
0x1541   : > { %v5007_v9 = vpop.xlane.xlu1 %5006  ;;  %v4553_v4 = vmul.f32 1.442695, %v4543_v11 }
0x1542   : > { %v5019_v8 = vsub.f32 %v15136_v19, %v5007_v9  ;;  %13056 = vpow2.f32 %v5036_v23  ;;  %v4531_v60 = vpop.xlane.xlu0 %4530 }
0x1543   : > { %5042 = vadd.xlane.f32.xlu1 %v5041_v57  ;;  %13058 = vpow2.f32 %v4549_v6  ;;  %v4545_v15 = vsub.f32 %v15141_v37, %v4531_v60  ;;  %v4542_v57 = vsub.f32 %v15089_v20, %v15182_v7 }
0x1544   : > { %v5032_v52 = vmul.f32 1.442695, %v5019_v8 }
0x1545   : > { %v15176_v12 = vpop.eup %13052  ;;  %v4557_v19 = vmul.f32 1.442695, %v4545_v15 }
0x1546   : > { %v5056_v22 = vsel %vm2607_vm3, %v15176_v12, 0.0  ;;  %v15180_v31 = vpop.eup %13054  ;;  %13060 = vpow2.f32 %v5032_v52  ;;  %v4537_v35 = vpop.xlane.xlu0 %4536 }
0x1547   : > { %5057 = vadd.xlane.f32.xlu0 %v5056_v22  ;;  %v5050_v44 = vsel %vm2607_vm3, %v15180_v31, 0.0  ;;  %13062 = vpow2.f32 %v4553_v4  ;;  %v4547_v25 = vsub.f32 %v15149_v59, %v4537_v35  ;;  %v4551_v22 = vmul.f32 1.442695, %v4542_v57 }
0x1548   : > { %13064 = vpow2.f32 %v4555_v63 }
0x1549   : > { %13066 = vpow2.f32 %v4557_v19  ;;  %v4561_v10 = vmul.f32 1.442695, %v4547_v25 }
0x154b   : > { %5051 = vadd.xlane.f32.xlu0 %v5050_v44  ;;  %13068 = vpow2.f32 %v4561_v10  ;;  %v4546_v44 = vsub.f32 %v15109_v62, %v4534_v13 }
0x154c   : > { %v15207_v34 = vpop.eup %13056  ;;  %13070 = vpow2.f32 %v4551_v22 }
0x154d   : > { %v15210_v30 = vpop.eup %13058  ;;  %v5059_v45 = vsel %vm2607_vm3, %v15207_v34, 0.0  ;;  %v4559_v33 = vmul.f32 1.442695, %v4546_v44 }
0x154e   : > { %v4565_v0 = vsel %vm2607_vm3, %v15210_v30, 0.0 }
0x154f   : > { %13072 = vpow2.f32 %v4559_v33 }
0x1550   : > { %v15214_v21 = vpop.eup %13060  ;;  %13074 = vpow2.f32 %v4563_v14 }
0x1551   : > { %v5053_v37 = vsel %vm2607_vm3, %v15214_v21, 0.0  ;;  %v15220_v43 = vpop.eup %13062 }
0x1552   : > { %v4571_v59 = vsel %vm2607_vm3, %v15220_v43, 0.0  ;;  %v15224_v41 = vpop.eup %13064 }
0x1553   : > { %v4574_v26 = vsel %vm2607_vm3, %v15224_v41, 0.0  ;;  %v15228_v55 = vpop.eup %13066 }
0x1554   : > { %5084 = vrot.lane.b32.xlu1 %v15188_v16, %s16592_s5  ;;  %v4577_v58 = vsel %vm2607_vm3, %v15228_v55, 0.0 }
0x1555   : > { %v15232_v39 = vpop.eup %13068 }
0x1556   : > { %v4583_v36 = vsel %vm2607_vm3, %v15232_v39, 0.0  ;;  %v15244_v38 = vpop.eup %13070 }
0x1557   : > { %v4568_v3 = vsel %vm2607_vm3, %v15244_v38, 0.0 }
0x1558   : > { %5086 = vrot.lane.b32.xlu1 %v15194_v18, %s16592_s5 }
0x1559   : > { %v15248_v53 = vpop.eup %13072 }
0x155a   : > { %v4580_v20 = vsel %vm2607_vm3, %v15248_v53, 0.0  ;;  %v15252_v62 = vpop.eup %13074 }
0x155b   : > { %v4586_v47 = vsel %vm2607_vm3, %v15252_v62, 0.0 }
0x1561   : > { %5082 = vrot.lane.b32.xlu0 %v4609_v46, %s16592_s5 }
0x157c   : > { %5060 = vadd.xlane.f32.xlu1 %v5059_v45 }
0x1580   : > { %5054 = vadd.xlane.f32.xlu1 %v5053_v37  ;;  %4566 = vadd.xlane.f32.xlu0 %v4565_v0 }
0x1584   : > { %4572 = vadd.xlane.f32.xlu0 %v4571_v59 }
0x1588   : > { %4575 = vadd.xlane.f32.xlu0 %v4574_v26 }
0x158c   : > { %4578 = vadd.xlane.f32.xlu0 %v4577_v58 }
0x1590   : > { %4584 = vadd.xlane.f32.xlu0 %v4583_v36 }
0x1591   : > { %5088 = vrot.lane.b32.xlu1 %v4612_v32, %s16592_s5 }
0x15a6   : > { %4617 = vrot.lane.b32.xlu0 %v4609_v46, %s16593_s6 }
0x15b5   : > { %4569 = vadd.xlane.f32.xlu1 %v4568_v3 }
0x15b9   : > { %4581 = vadd.xlane.f32.xlu1 %v4580_v20 }
0x15bd   : > { %4587 = vadd.xlane.f32.xlu1 %v4586_v47 }
0x15c4   : > { %v5046_v7 = vpop.xlane.xlu0 %5045 }
0x15c8   : > { %v5040_v13 = vpop.xlane.xlu0 %5039 }
0x15c9   : > { %13076 = vrcp.f32 %v5040_v13 }
0x15cc   : > { %v5049_v40 = vpop.xlane.xlu1 %5048 }
0x15ce   : > { %4619 = vrot.lane.b32.xlu1 %v15188_v16, %s16593_s6 }
0x15d0   : > { %v5043_v46 = vpop.xlane.xlu1 %5042 }
0x15d1   : > { %13078 = vrcp.f32 %v5043_v46 }
0x15d2   : > { %4621 = vrot.lane.b32.xlu1 %v15194_v18, %s16593_s6  ;;  %13080 = vrcp.f32 %v5049_v40 }
0x15d3   : > { %v13077_v23 = vpop.eup %13076  ;;  %13082 = vrcp.f32 %v5046_v7 }
0x15d4   : > { %v5058_v9 = vpop.xlane.xlu0 %5057  ;;  %v5085_v24 = vpop.permute.xlu1 %5084  ;;  %v5063_v11 = vmul.f32 %v13077_v23, %v15164_v61 }
0x15d6   : > { %4623 = vrot.lane.b32.xlu1 %v4612_v32, %s16593_s6 }
0x15d8   : > { %v5052_v48 = vpop.xlane.xlu0 %5051  ;;  %v5087_v60 = vpop.permute.xlu1 %5086 }
0x15db   : > { %v13079_v8 = vpop.eup %13078 }
0x15dc   : > { %v5083_v6 = vpop.permute.xlu0 %5082  ;;  %v5065_v52 = vmul.f32 %v13079_v8, %v15172_v28  ;;  %v13081_v54 = vpop.eup %13080 }
0x15dd   : > { %11748 = vmatprep.subr.bf16.mxu0 %v5083_v6  ;;  %v13083_v28 = vpop.eup %13082  ;;  %v5069_v63 = vmul.f32 %v13081_v54, %v15168_v56 }
0x15de   : > { %11749 = vmatpush3.bf16.msra.mxu0 %v5083_v6  ;;  %v5078_v16 = vpack.c.bf16 %v5065_v52, %v5063_v11  ;;  %v5067_v19 = vmul.f32 %v13083_v28, %v15159_v50 }
0x15df   : > { %11750 = vmatprep.subr.bf16.mxu0 %v5085_v24 }
0x15e0   : > { %11756 = vmatprep.mubr.msk.bf16.mxu0 %vm2607_vm3, %v5078_v16  ;;  %v5079_v25 = vpack.c.bf16 %v5069_v63, %v5067_v19  ;;  %v12601_v16 = vld [vmem:[%s16594_s8 + $0x8] sm:$0xff]  }
0x15e2   : > { %11751 = vmatpush3.bf16.msra.mxu0 %v5085_v24 }
0x15e3   : > { %11752 = vmatprep.subr.bf16.mxu0 %v5087_v60 }
0x15e6   : > { %11753 = vmatpush3.bf16.msra.mxu0 %v5087_v60 }
0x1609   : > { %v5061_v18 = vpop.xlane.xlu1 %5060 }
0x160a   : > { %13084 = vrcp.f32 %v5061_v18 }
0x160b   : > { %13086 = vrcp.f32 %v5052_v48 }
0x160c   : > { %13088 = vrcp.f32 %v5058_v9 }
0x160d   : > { %v5055_v61 = vpop.xlane.xlu1 %5054  ;;  %v4567_v4 = vpop.xlane.xlu0 %4566 }
0x160e   : > { %13090 = vrcp.f32 %v5055_v61 }
0x160f   : > { %13092 = vrcp.f32 %v4567_v4 }
0x1611   : > { %v5089_v15 = vpop.permute.xlu1 %5088  ;;  %v4573_v35 = vpop.xlane.xlu0 %4572 }
0x1612   : > { %11754 = vmatprep.subr.bf16.mxu0 %v5089_v15 }
0x1613   : > { %11755 = vmatpush3.bf16.msra.mxu0 %v5089_v15 }
0x1614   : > { %v13085_v45 = vpop.eup %13084 }
0x1615   : > { %v4576_v10 = vpop.xlane.xlu0 %4575  ;;  %v13087_v37 = vpop.eup %13086  ;;  %v5077_v26 = vmul.f32 %v13085_v45, %v15207_v34 }
0x1616   : > { %11757 = vmatmul.mubr.msk.bf16.vlgmr.msra.gmra.mrb[80].mxu0 %vm2607_vm3, %v5079_v25  ;;  %v13089_v0 = vpop.eup %13088  ;;  %v5071_v36 = vmul.f32 %v13087_v37, %v15180_v31 }
0x1617   : > { %v5075_v32 = vmul.f32 %v13089_v0, %v15176_v12 }
0x1618   : > { %v13091_v59 = vpop.eup %13090 }
0x1619   : > { %v4579_v58 = vpop.xlane.xlu0 %4578  ;;  %v5073_v56 = vmul.f32 %v13091_v59, %v15214_v21  ;;  %v5081_v57 = vpack.c.bf16 %v5077_v26, %v5075_v32  ;;  %v13093_v21 = vpop.eup %13092 }
0x161a   : > { %v4590_v14 = vmul.f32 %v13093_v21, %v15210_v30 }
0x161b   : > { %v5080_v50 = vpack.c.bf16 %v5073_v56, %v5071_v36 }
0x161d   : > { %11760 = vmatprep.mubr.msk.bf16.mxu0 %vm2607_vm3, %v5080_v50  ;;  %v4585_v22 = vpop.xlane.xlu0 %4584 }
0x161e   : > { %11761 = vmatmul.mubr.msk.bf16.gmra.mrb[84].mxu0 %vm2607_vm3, %v5081_v57 }
0x1621   : > { %v4618_v44 = vpop.permute.xlu0 %4617 }
0x1622   : > { %11716 = vmatprep.subr.bf16.mxu1 %v4618_v44 }
0x1623   : > { %11717 = vmatpush3.bf16.msra.mxu1 %v4618_v44 }
0x1642   : > { %v4570_v33 = vpop.xlane.xlu1 %4569 }
0x1643   : > { %13094 = vrcp.f32 %v4570_v33 }
0x1644   : > { %13096 = vrcp.f32 %v4576_v10 }
0x1646   : > { %v4582_v34 = vpop.xlane.xlu1 %4581 }
0x1647   : > { %13098 = vrcp.f32 %v4582_v34 }
0x1648   : > { %13100 = vrcp.f32 %v4573_v35 }
0x1649   : > { %13102 = vrcp.f32 %v4579_v58 }
0x164a   : > { %v4588_v31 = vpop.xlane.xlu1 %4587 }
0x164b   : > { %13104 = vrcp.f32 %v4588_v31 }
0x164c   : > { %13106 = vrcp.f32 %v4585_v22 }
0x164d   : > { %v13095_v12 = vpop.eup %13094 }
0x164e   : > { %v4620_v5 = vpop.permute.xlu1 %4619  ;;  %v4592_v3 = vmul.f32 %v13095_v12, %v15244_v38  ;;  %v13097_v47 = vpop.eup %13096 }
0x164f   : > { %11718 = vmatprep.subr.bf16.mxu1 %v4620_v5  ;;  %v4596_v9 = vmul.f32 %v13097_v47, %v15224_v41 }
0x1650   : > { %11719 = vmatpush3.bf16.msra.mxu1 %v4620_v5  ;;  %v4605_v20 = vpack.c.bf16 %v4592_v3, %v4590_v14 }
0x1651   : > { %v13099_v13 = vpop.eup %13098 }
0x1652   : > { %v4622_v7 = vpop.permute.xlu1 %4621  ;;  %11724 = vmatprep.mubr.msk.bf16.mxu1 %vm2607_vm3, %v4605_v20  ;;  %v13101_v40 = vpop.eup %13100  ;;  %v4600_v30 = vmul.f32 %v13099_v13, %v15248_v53 }
0x1653   : > { %11720 = vmatprep.subr.bf16.mxu1 %v4622_v7  ;;  %v13103_v46 = vpop.eup %13102  ;;  %v4594_v38 = vmul.f32 %v13101_v40, %v15220_v43  ;;  %v12600_v43 = vld [vmem:[%s16594_s8] sm:$0xff]   ;;  %s16596_s8 = sld [smem:[#allocation24_spill]] }
0x1654   : > { %11721 = vmatpush3.bf16.msra.mxu1 %v4622_v7  ;;  %v4598_v23 = vmul.f32 %v13103_v46, %v15228_v55  ;;  %11764 = vmatprep.subr.bf16.mxu0 %v12600_v43 }
0x1655   : > { %v4606_v8 = vpack.c.bf16 %v4596_v9, %v4594_v38  ;;  %v13105_v24 = vpop.eup %13104  ;;  %11765 = vmatpush3.bf16.msra.mxu0 %v12600_v43 }
0x1656   : > { %v4624_v48 = vpop.permute.xlu1 %4623  ;;  %v4607_v6 = vpack.c.bf16 %v4600_v30, %v4598_v23  ;;  %v13107_v11 = vpop.eup %13106  ;;  %v4604_v41 = vmul.f32 %v13105_v24, %v15252_v62  ;;  %11766 = vmatprep.subr.bf16.mxu0 %v12601_v16 }
0x1657   : > { %11722 = vmatprep.subr.bf16.mxu1 %v4624_v48  ;;  %v4602_v52 = vmul.f32 %v13107_v11, %v15232_v39 }
0x1658   : > { %11723 = vmatpush3.bf16.msra.mxu1 %v4624_v48 }
0x1659   : > { %v4608_v53 = vpack.c.bf16 %v4604_v41, %v4602_v52  ;;  %11767 = vmatpush3.bf16.msra.mxu0 %v12601_v16  ;;  %v10934_v30 = vld [vmem:[%s16596_s8] ss:$0 sm:$0xff]  ;;  %s16597_s8 = sld [smem:[#allocation27_spill]] }
0x165b   : > { %11725 = vmatmul.mubr.msk.bf16.vlgmr.msra.gmra.mrb[16].mxu1 %vm2607_vm3, %v4606_v8 }
0x165c   : > { %11728 = vmatprep.mubr.msk.bf16.mxu1 %vm2607_vm3, %v4607_v6 }
0x1663   : > { %11729 = vmatmul.mubr.msk.bf16.gmra.mrb[20].mxu1 %vm2607_vm3, %v4608_v53 }
0x16e9   : > { %v11758_v55 = vpop.f32.mrb[80].mxu0 }
0x16ea   : > { %v5140_v60 = vpop.f32.mrb[81].mxu0 }
0x16eb   : > { %v11759_v18 = vpop.f32.mrb[82].mxu0 }
0x16ec   : > { %v12536_v54 = vpack.i.bf16 %v11759_v18, %v11758_v55  ;;  %v5143_v61 = vpop.f32.mrb[83].mxu0 }
0x16ed   : > { %v12531_v4 = vpack.i.bf16 %v5143_v61, %v5140_v60 }
0x16ee   : > { %12537 = vrot.lane.b32.xlu1 %v12536_v54, %s16595_s9 }
0x16ef   : > { %12532 = vrot.lane.b32.xlu0 %v12531_v4, %s16595_s9 }
0x16f1   : > { %v11762_v39 = vpop.f32.mrb[84].mxu0 }
0x16f2   : > { %v5156_v62 = vpop.f32.mrb[85].mxu0 }
0x16f3   : > { %v11763_v28 = vpop.f32.mrb[86].mxu0 }
0x16f4   : > { %v12546_v63 = vpack.i.bf16 %v11763_v28, %v11762_v39  ;;  %v5159_v15 = vpop.f32.mrb[87].mxu0 }
0x16f5   : > { %v12541_v35 = vpack.i.bf16 %v5159_v15, %v5156_v62 }
0x16f6   : > { %12547 = vrot.lane.b32.xlu1 %v12546_v63, %s16595_s9 }
0x16f7   : > { %12542 = vrot.lane.b32.xlu0 %v12541_v35, %s16595_s9 }
0x172e   : > { %v11726_v19 = vpop.f32.mrb[16].mxu1 }
0x172f   : > { %v4675_v25 = vpop.f32.mrb[17].mxu1 }
0x1730   : > { %v11727_v45 = vpop.f32.mrb[18].mxu1 }
0x1731   : > { %v4678_v10 = vpop.f32.mrb[19].mxu1 }
0x1736   : > { %v11730_v37 = vpop.f32.mrb[20].mxu1 }
0x1737   : > { %v4691_v0 = vpop.f32.mrb[21].mxu1 }
0x1738   : > { %v11731_v59 = vpop.f32.mrb[22].mxu1 }
0x1739   : > { %v4694_v26 = vpop.f32.mrb[23].mxu1 }
0x1760   : > { %v12538_v58 = vpop.permute.xlu1 %12537 }
0x1761   : > { %v12540_v36 = vunpack.i.h.bf16 %v12538_v58  ;;  %v12539_v56 = vunpack.i.l.bf16 %v12538_v58  ;;  %v12533_v32 = vpop.permute.xlu0 %12532 }
0x1762   : > { %v12535_v50 = vunpack.i.h.bf16 %v12533_v32  ;;  %v12534_v57 = vunpack.i.l.bf16 %v12533_v32 }
0x1763   : > { %v5205_v22 = vsel %vm2351_vm2, %v11726_v19, %v12539_v56  ;;  %v5206_v44 = vsel %vm2351_vm2, %v11727_v45, %v12540_v36 }
0x1764   : > { %v5212_v33 = vpack.c.bf16 %v5206_v44, %v5205_v22  ;;  %v5204_v34 = vsel %vm2351_vm2, %v4678_v10, %v12535_v50  ;;  %v5203_v31 = vsel %vm2351_vm2, %v4675_v25, %v12534_v57 }
0x1765   : > { %v5211_v21 = vpack.c.bf16 %v5204_v34, %v5203_v31 }
0x1767   : > { %11768 = vmatprep.mubr.msk.bf16.mxu0 %vm2074_vm1, %v5211_v21 }
0x1768   : > { %v12548_v12 = vpop.permute.xlu1 %12547  ;;  %11769 = vmatmul.mubr.msk.bf16.vlgmr.msra.gmra.mrb[88].mxu0 %vm2074_vm1, %v5212_v33 }
0x1769   : > { %v12550_v5 = vunpack.i.h.bf16 %v12548_v12  ;;  %v12549_v14 = vunpack.i.l.bf16 %v12548_v12  ;;  %v12543_v3 = vpop.permute.xlu0 %12542 }
0x176a   : > { %v12545_v20 = vunpack.i.h.bf16 %v12543_v3  ;;  %v12544_v47 = vunpack.i.l.bf16 %v12543_v3 }
0x176b   : > { %v5209_v7 = vsel %vm2351_vm2, %v11730_v37, %v12549_v14  ;;  %v5210_v13 = vsel %vm2351_vm2, %v11731_v59, %v12550_v5 }
0x176c   : > { %v5208_v40 = vsel %vm2351_vm2, %v4694_v26, %v12545_v20  ;;  %v5207_v46 = vsel %vm2351_vm2, %v4691_v0, %v12544_v47  ;;  %v5214_v9 = vpack.c.bf16 %v5210_v13, %v5209_v7 }
0x176d   : > { %v5213_v48 = vpack.c.bf16 %v5208_v40, %v5207_v46 }
0x176f   : > { %11772 = vmatprep.mubr.msk.bf16.mxu0 %vm2074_vm1, %v5213_v48 }
0x1770   : > { %11773 = vmatmul.mubr.msk.bf16.gmra.mrb[92].mxu0 %vm2074_vm1, %v5214_v9 }
0x183b   : > { %v11770_v38 = vpop.f32.mrb[88].mxu0 }
0x183c   : > { %v5279_v23 = vpop.f32.mrb[89].mxu0  ;;  %v5288_v11 = vadd.f32 %v11770_v38, %v10934_v30 }
0x183d   : > { %v5280_v8 = vadd.f32 %v10934_v30, %v5279_v23  ;;  %v11771_v24 = vpop.f32.mrb[90].mxu0 }
0x183e   : > { %v5282_v6 = vpop.f32.mrb[91].mxu0  ;;  %v5291_v43 = vadd.f32 %v11771_v24, %v10934_v30  ;;  %v5316_v55 = vsel %vm2074_vm1, %v5288_v11, 0.0 }
0x183f   : > { %v5283_v41 = vadd.f32 %v10934_v30, %v5282_v6  ;;  %v5310_v52 = vsel %vm2074_vm1, %v5280_v8, 0.0 }
0x1840   : > { %5311 = vadd.xlane.f32.xlu0 %v5310_v52  ;;  %v5319_v39 = vsel %vm2074_vm1, %v5291_v43, 0.0 }
0x1841   : > { %v5313_v53 = vsel %vm2074_vm1, %v5283_v41, 0.0 }
0x1842   : > { %5314 = vadd.xlane.f32.xlu1 %v5313_v53  ;;  %v12602_v53 = vld [vmem:[%s16597_s8] sm:$0xff]  }
0x1843   : > { %v11774_v16 = vpop.f32.mrb[92].mxu0  ;;  %11776 = vmatprep.subr.bf16.mxu1 %v12602_v53 }
0x1844   : > { %v5295_v60 = vpop.f32.mrb[93].mxu0  ;;  %5317 = vadd.xlane.f32.xlu0 %v5316_v55  ;;  %v5304_v63 = vadd.f32 %v11774_v16, %v10934_v30  ;;  %11777 = vmatpush3.bf16.msra.mxu1 %v12602_v53 }
0x1845   : > { %v11775_v18 = vpop.f32.mrb[94].mxu0  ;;  %v5296_v61 = vadd.f32 %v10934_v30, %v5295_v60 }
0x1846   : > { %v5298_v54 = vpop.f32.mrb[95].mxu0  ;;  %v5307_v62 = vadd.f32 %v11775_v18, %v10934_v30  ;;  %v5328_v19 = vsel %vm2074_vm1, %v5304_v63, 0.0 }
0x1847   : > { %v5299_v4 = vadd.f32 %v10934_v30, %v5298_v54  ;;  %v5322_v15 = vsel %vm2074_vm1, %v5296_v61, 0.0 }
0x1848   : > { %5320 = vadd.xlane.f32.xlu0 %v5319_v39  ;;  %v5331_v35 = vsel %vm2074_vm1, %v5307_v62, 0.0 }
0x1849   : > { %v5325_v28 = vsel %vm2074_vm1, %v5299_v4, 0.0 }
0x184a   : > { %5326 = vadd.xlane.f32.xlu1 %v5325_v28 }
0x184c   : > { %5323 = vadd.xlane.f32.xlu0 %v5322_v15 }
0x184e   : > { %5332 = vadd.xlane.f32.xlu1 %v5331_v35 }
0x1850   : > { %5329 = vadd.xlane.f32.xlu0 %v5328_v19 }
0x18cd   : > { %v5312_v25 = vpop.xlane.xlu0 %5311 }
0x18ce   : > { %v5334_v45 = vmul.f32 0.03125, %v5312_v25 }
0x18cf   : > { %v5315_v10 = vpop.xlane.xlu1 %5314 }
0x18d0   : > { %v15312_v37 = vsub.f32 %v5280_v8, %v5334_v45  ;;  %v5335_v0 = vmul.f32 0.03125, %v5315_v10 }
0x18d1   : > { %v5318_v59 = vpop.xlane.xlu0 %5317 }
0x18d2   : > { %v15314_v26 = vsub.f32 %v5283_v41, %v5335_v0  ;;  %v5336_v58 = vmul.f32 0.03125, %v5318_v59  ;;  %v5350_v36 = vmul.f32 %v15312_v37, %v15312_v37  ;;  %v10941_v0 = vld [vmem:[%s16598_s11] ss:$0 sm:$0xff]  ;;  %s16601_s11 = sld [smem:[#allocation28_spill]] }
0x18d4   : > { %v15318_v56 = vsub.f32 %v5288_v11, %v5336_v58  ;;  %v5358_v32 = vsel %vm2074_vm1, %v5350_v36, 0.0  ;;  %v5351_v50 = vmul.f32 %v15314_v26, %v15314_v26 }
0x18d5   : > { %5359 = vadd.xlane.f32.xlu0 %v5358_v32  ;;  %v5321_v57 = vpop.xlane.xlu0 %5320 }
0x18d6   : > { %v5337_v22 = vmul.f32 0.03125, %v5321_v57  ;;  %v5361_v44 = vsel %vm2074_vm1, %v5351_v50, 0.0  ;;  %v5352_v33 = vmul.f32 %v15318_v56, %v15318_v56 }
0x18d7   : > { %5362 = vadd.xlane.f32.xlu1 %v5361_v44  ;;  %v5327_v34 = vpop.xlane.xlu1 %5326 }
0x18d8   : > { %v15326_v31 = vsub.f32 %v5291_v43, %v5337_v22  ;;  %v5339_v21 = vmul.f32 0.03125, %v5327_v34  ;;  %v5364_v12 = vsel %vm2074_vm1, %v5352_v33, 0.0  ;;  %v12603_v43 = vld [vmem:[%s16597_s8 + $0x8] sm:$0xff]   ;;  %v10942_v22 = vld [vmem:[%s16599_s13] ss:$0 sm:$0xff]  ;;  %s16600_s13 = sld [smem:[#allocation29_spill]] }
0x18d9   : > { %5365 = vadd.xlane.f32.xlu0 %v5364_v12  ;;  %v5324_v5 = vpop.xlane.xlu0 %5323  ;;  %11778 = vmatprep.subr.bf16.mxu1 %v12603_v43  ;;  %s16604_s8 = sld [smem:[#allocation31_spill]] }
0x18da   : > { %v15329_v14 = vsub.f32 %v5299_v4, %v5339_v21  ;;  %v5338_v3 = vmul.f32 0.03125, %v5324_v5  ;;  %v5353_v20 = vmul.f32 %v15326_v31, %v15326_v31  ;;  %11779 = vmatpush3.bf16.msra.mxu1 %v12603_v43 }
0x18db   : > { %v5333_v47 = vpop.xlane.xlu1 %5332 }
0x18dc   : > { %v15333_v7 = vsub.f32 %v5296_v61, %v5338_v3  ;;  %v5341_v13 = vmul.f32 0.03125, %v5333_v47  ;;  %v5367_v40 = vsel %vm2074_vm1, %v5353_v20, 0.0  ;;  %v5355_v46 = vmul.f32 %v15329_v14, %v15329_v14 }
0x18dd   : > { %5368 = vadd.xlane.f32.xlu1 %v5367_v40  ;;  %v5330_v9 = vpop.xlane.xlu0 %5329 }
0x18de   : > { %v15338_v48 = vsub.f32 %v5307_v62, %v5341_v13  ;;  %v5340_v30 = vmul.f32 0.03125, %v5330_v9  ;;  %v5354_v38 = vmul.f32 %v15333_v7, %v15333_v7  ;;  %v5373_v8 = vsel %vm2074_vm1, %v5355_v46, 0.0 }
0x18e0   : > { %v15342_v23 = vsub.f32 %v5304_v63, %v5340_v30  ;;  %v5370_v24 = vsel %vm2074_vm1, %v5354_v38, 0.0  ;;  %v5357_v6 = vmul.f32 %v15338_v48, %v15338_v48 }
0x18e1   : > { %5374 = vadd.xlane.f32.xlu1 %v5373_v8  ;;  %5371 = vadd.xlane.f32.xlu0 %v5370_v24 }
0x18e2   : > { %v5356_v11 = vmul.f32 %v15342_v23, %v15342_v23  ;;  %v5379_v41 = vsel %vm2074_vm1, %v5357_v6, 0.0 }
0x18e4   : > { %v5376_v52 = vsel %vm2074_vm1, %v5356_v11, 0.0 }
0x18e5   : > { %5380 = vadd.xlane.f32.xlu1 %v5379_v41  ;;  %5377 = vadd.xlane.f32.xlu0 %v5376_v52 }
0x1962   : > { %v5360_v16 = vpop.xlane.xlu0 %5359 }
0x1963   : > { %v5382_v55 = vmul.f32 0.03125, %v5360_v16 }
0x1964   : > { %v5363_v60 = vpop.xlane.xlu1 %5362 }
0x1965   : > { %v5390_v18 = vadd.f32 1e-05, %v5382_v55  ;;  %v5383_v54 = vmul.f32 0.03125, %v5363_v60 }
0x1966   : > { %v5366_v61 = vpop.xlane.xlu0 %5365 }
0x1967   : > { %13108 = vrsqrt.f32 %v5390_v18  ;;  %v5391_v4 = vadd.f32 1e-05, %v5383_v54  ;;  %v5384_v39 = vmul.f32 0.03125, %v5366_v61 }
0x1969   : > { %13110 = vrsqrt.f32 %v5391_v4  ;;  %v5392_v62 = vadd.f32 1e-05, %v5384_v39 }
0x196a   : > { %v5369_v28 = vpop.xlane.xlu1 %5368 }
0x196b   : > { %13112 = vrsqrt.f32 %v5392_v62  ;;  %v5385_v63 = vmul.f32 0.03125, %v5369_v28  ;;  %v12604_v62 = vld [vmem:[%s16600_s13] sm:$0xff]   ;;  %v12605_v28 = vld [vmem:[%s16600_s13 + $0x8] sm:$0xff]  }
0x196c   : > { %11788 = vmatprep.subr.bf16.mxu0 %v12604_v62 }
0x196d   : > { %v5393_v15 = vadd.f32 1e-05, %v5385_v63  ;;  %11789 = vmatpush3.bf16.msra.mxu0 %v12604_v62  ;;  %v12608_v63 = vld [vmem:[%s16600_s13 + $0x20] sm:$0xff]  }
0x196e   : > { %v5375_v35 = vpop.xlane.xlu1 %5374  ;;  %v5372_v19 = vpop.xlane.xlu0 %5371  ;;  %11790 = vmatprep.subr.bf16.mxu0 %v12605_v28 }
0x196f   : > { %13114 = vrsqrt.f32 %v5393_v15  ;;  %v5387_v25 = vmul.f32 0.03125, %v5375_v35  ;;  %v5386_v45 = vmul.f32 0.03125, %v5372_v19  ;;  %v12609_v15 = vld [vmem:[%s16600_s13 + $0x28] sm:$0xff]   ;;  %v12610_v35 = vld [vmem:[%s16600_s13 + $0x30] sm:$0xff]   ;;  %v12611_v19 = vld [vmem:[%s16600_s13 + $0x38] sm:$0xff]  }
0x1971   : > { %v13109_v10 = vpop.eup %13108  ;;  %v5395_v59 = vadd.f32 1e-05, %v5387_v25  ;;  %v5394_v58 = vadd.f32 1e-05, %v5386_v45  ;;  %11791 = vmatpush3.bf16.msra.mxu0 %v12605_v28  ;;  %v10943_v25 = vld [vmem:[%s16601_s11] ss:$0 sm:$0xff] }
0x1972   : > { %v5406_v36 = vmul.f32 %v13109_v10, %v15312_v37  ;;  %v5381_v32 = vpop.xlane.xlu1 %5380  ;;  %v5378_v50 = vpop.xlane.xlu0 %5377  ;;  %s16602_s11 = sld [smem:[#allocation30_spill]] }
0x1973   : > { %v13111_v57 = vpop.eup %13110  ;;  %13116 = vrsqrt.f32 %v5395_v59  ;;  %v5389_v44 = vmul.f32 0.03125, %v5381_v32  ;;  %v5388_v33 = vmul.f32 0.03125, %v5378_v50 }
0x1974   : > { %v5407_v34 = vmul.f32 %v13111_v57, %v15314_v26  ;;  %13118 = vrsqrt.f32 %v5394_v58  ;;  %v5420_v21 = vmul.f32 %v10941_v0, %v5406_v36 }
0x1975   : > { %v13113_v12 = vpop.eup %13112  ;;  %v5397_v5 = vadd.f32 1e-05, %v5389_v44  ;;  %v5396_v3 = vadd.f32 1e-05, %v5388_v33 }
0x1976   : > { %v5408_v20 = vmul.f32 %v13113_v12, %v15318_v56  ;;  %v5421_v47 = vmul.f32 %v10941_v0, %v5407_v34  ;;  %v5434_v13 = vadd.f32 %v10942_v22, %v5420_v21 }
0x1977   : > { %13120 = vrsqrt.f32 %v5397_v5 }
0x1978   : > { %v5422_v37 = vmul.f32 %v10941_v0, %v5408_v20  ;;  %13122 = vrsqrt.f32 %v5396_v3  ;;  %v5435_v40 = vadd.f32 %v10942_v22, %v5421_v47  ;;  %v15361_v30 = vadd.f32 %v5434_v13, %v14769_v2 }
0x1979   : > { %v13115_v46 = vpop.eup %13114 }
0x197a   : > { %v5409_v9 = vmul.f32 %v13115_v46, %v15326_v31  ;;  %v15364_v26 = vadd.f32 %v5435_v40, %v14772_v42  ;;  %v5436_v38 = vadd.f32 %v10942_v22, %v5422_v37 }
0x197c   : > { %v5423_v8 = vmul.f32 %v10941_v0, %v5409_v9  ;;  %v5450_v56 = vpack.c.bf16 %v15364_v26, %v15361_v30  ;;  %v15372_v2 = vadd.f32 %v5436_v38, %v14778_v29 }
0x197d   : > { %v13117_v24 = vpop.eup %13116 }
0x197e   : > { %v13119_v6 = vpop.eup %13118  ;;  %v5437_v11 = vadd.f32 %v10942_v22, %v5423_v8  ;;  %v5411_v41 = vmul.f32 %v13117_v24, %v15329_v14  ;;  %11780 = vmatprep.mubr.msk.bf16.mxu1 %vm2074_vm1, %v5450_v56 }
0x197f   : > { %v5410_v31 = vmul.f32 %v13119_v6, %v15333_v7 }
0x1980   : > { %v15375_v42 = vadd.f32 %v5437_v11, %v14781_v49  ;;  %v5425_v52 = vmul.f32 %v10941_v0, %v5411_v41 }
0x1981   : > { %v13121_v53 = vpop.eup %13120  ;;  %v5424_v43 = vmul.f32 %v10941_v0, %v5410_v31 }
0x1982   : > { %v13123_v16 = vpop.eup %13122  ;;  %v5413_v55 = vmul.f32 %v13121_v53, %v15338_v48  ;;  %v5451_v60 = vpack.c.bf16 %v15375_v42, %v15372_v2  ;;  %v5439_v14 = vadd.f32 %v10942_v22, %v5425_v52 }
0x1983   : > { %v5412_v18 = vmul.f32 %v13123_v16, %v15342_v23  ;;  %v5438_v7 = vadd.f32 %v10942_v22, %v5424_v43 }
0x1984   : > { %11781 = vmatmul.mubr.msk.bf16.vlgmr.msra.gmra.mrb[24].mxu1 %vm2074_vm1, %v5451_v60  ;;  %v15383_v29 = vadd.f32 %v5439_v14, %v14794_v17  ;;  %v5427_v49 = vmul.f32 %v10941_v0, %v5413_v55 }
0x1985   : > { %v15386_v54 = vadd.f32 %v5438_v7, %v14791_v1  ;;  %v5426_v48 = vmul.f32 %v10941_v0, %v5412_v18 }
0x1986   : > { %v5441_v61 = vadd.f32 %v10942_v22, %v5427_v49 }
0x1987   : > { %v5452_v4 = vpack.c.bf16 %v15383_v29, %v15386_v54  ;;  %v5440_v39 = vadd.f32 %v10942_v22, %v5426_v48 }
0x1988   : > { %v15391_v23 = vadd.f32 %v5441_v61, %v14803_v51  ;;  %v12606_v51 = vld [vmem:[%s16600_s13 + $0x10] sm:$0xff]  }
0x1989   : > { %11784 = vmatprep.mubr.msk.bf16.mxu1 %vm2074_vm1, %v5452_v4  ;;  %v15395_v17 = vadd.f32 %v5440_v39, %v14800_v27  ;;  %11792 = vmatprep.subr.bf16.mxu0 %v12606_v51  ;;  %v12607_v27 = vld [vmem:[%s16600_s13 + $0x18] sm:$0xff]   ;;  %s16605_s13 = sld [smem:[#allocation32_spill]] }
0x198a   : > { %11793 = vmatpush3.bf16.msra.mxu0 %v12606_v51 }
0x198b   : > { %v5453_v1 = vpack.c.bf16 %v15391_v23, %v15395_v17  ;;  %11794 = vmatprep.subr.bf16.mxu0 %v12607_v27 }
0x198d   : > { %11785 = vmatmul.mubr.msk.bf16.gmra.mrb[28].mxu1 %vm2074_vm1, %v5453_v1 }
0x198e   : > { %11795 = vmatpush3.bf16.msra.mxu0 %v12607_v27 }
0x198f   : > { %11796 = vmatprep.subr.bf16.mxu0 %v12608_v63 }
0x1992   : > { %11797 = vmatpush3.bf16.msra.mxu0 %v12608_v63 }
0x1993   : > { %11798 = vmatprep.subr.bf16.mxu0 %v12609_v15 }
0x1996   : > { %11799 = vmatpush3.bf16.msra.mxu0 %v12609_v15 }
0x1997   : > { %11800 = vmatprep.subr.bf16.mxu0 %v12610_v35 }
0x199a   : > { %11801 = vmatpush3.bf16.msra.mxu0 %v12610_v35 }
0x199b   : > { %11802 = vmatprep.subr.bf16.mxu0 %v12611_v19 }
0x199e   : > { %11803 = vmatpush3.bf16.msra.mxu0 %v12611_v19 }
0x1a57   : > { %v11782_v45 = vpop.f32.mrb[24].mxu1 }
0x1a58   : > { %v5527_v10 = vadd.f32 %v11782_v45, %v10943_v25  ;;  %v5518_v0 = vpop.f32.mrb[25].mxu1 }
0x1a59   : > { %v15409_v59 = vadd.f32 %v10943_v25, %v5518_v0  ;;  %v11783_v58 = vpop.f32.mrb[26].mxu1 }
0x1a5a   : > { %v15411_v36 = vmul.f32 0.70710677, %v5527_v10  ;;  %v15413_v32 = vadd.f32 %v11783_v58, %v10943_v25  ;;  %v5521_v50 = vpop.f32.mrb[27].mxu1  ;;  %v15453_v4 = vmul.f32 0.5, %v5527_v10 }
0x1a5b   : > { %v15416_v57 = vmul.f32 0.70710677, %v15409_v59  ;;  %v15418_v22 = vadd.f32 %v10943_v25, %v5521_v50 }
0x1a5c   : > { %v5567_v44 = vand.u32 2147483647, %v15411_v36  ;;  %v15422_v33 = vmul.f32 0.70710677, %v15413_v32  ;;  %vm5727_vm12 = vcmp.ge.f32.partialorder %v15411_v36, 0.0 }
0x1a5d   : > { %v5565_v34 = vand.u32 2147483647, %v15416_v57  ;;  %v15426_v21 = vmul.f32 0.70710677, %v15418_v22  ;;  %vm5725_vm13 = vcmp.ge.f32.partialorder %v15416_v57, 0.0 }
0x1a5e   : > { %v5575_v12 = vmul.f32 0.3275911, %v5567_v44  ;;  %v5568_v5 = vand.u32 2147483647, %v15422_v33  ;;  %v5679_v53 = vsub.f32 0.0, %v5567_v44  ;;  %vm5728_vm14 = vcmp.ge.f32.partialorder %v15422_v33, 0.0 }
0x1a5f   : > { %v5573_v3 = vmul.f32 0.3275911, %v5565_v34  ;;  %v5566_v20 = vand.u32 2147483647, %v15426_v21  ;;  %v5677_v55 = vsub.f32 0.0, %v5565_v34  ;;  %vm5726_vm15 = vcmp.ge.f32.partialorder %v15426_v21, 0.0 }
0x1a60   : > { %v5583_v47 = vadd.f32 1.0, %v5575_v12  ;;  %v5576_v13 = vmul.f32 0.3275911, %v5568_v5  ;;  %v11786_v37 = vpop.f32.mrb[28].mxu1  ;;  %v5680_v14 = vsub.f32 0.0, %v5568_v5  ;;  %v5687_v39 = vmul.f32 %v5679_v53, %v5567_v44 }
0x1a61   : > { %v5581_v40 = vadd.f32 1.0, %v5573_v3  ;;  %v5574_v46 = vmul.f32 0.3275911, %v5566_v20  ;;  %v5534_v9 = vpop.f32.mrb[29].mxu1  ;;  %v15430_v6 = vadd.f32 %v11786_v37, %v10943_v25  ;;  %v5678_v18 = vsub.f32 0.0, %v5566_v20 }
0x1a62   : > { %13124 = vrcp.f32 %v5583_v47  ;;  %v5584_v38 = vadd.f32 1.0, %v5576_v13  ;;  %v11787_v8 = vpop.f32.mrb[30].mxu1  ;;  %v15432_v11 = vadd.f32 %v10943_v25, %v5534_v9  ;;  %v5685_v51 = vmul.f32 %v5677_v55, %v5565_v34 }
0x1a63   : > { %13126 = vrcp.f32 %v5581_v40  ;;  %v5537_v56 = vpop.f32.mrb[31].mxu1  ;;  %v5582_v24 = vadd.f32 1.0, %v5574_v46  ;;  %v15434_v41 = vadd.f32 %v11787_v8, %v10943_v25  ;;  %v15437_v31 = vmul.f32 0.70710677, %v15430_v6 }
0x1a64   : > { %13128 = vrcp.f32 %v5584_v38  ;;  %v15439_v52 = vadd.f32 %v10943_v25, %v5537_v56  ;;  %v15442_v43 = vmul.f32 0.70710677, %v15432_v11  ;;  %v5688_v25 = vmul.f32 %v5680_v14, %v5568_v5 }
0x1a65   : > { %v15445_v16 = vmul.f32 0.70710677, %v15434_v41  ;;  %13130 = vrcp.f32 %v5582_v24  ;;  %v5571_v60 = vand.u32 2147483647, %v15437_v31  ;;  %v5686_v45 = vmul.f32 %v5678_v18, %v5566_v20 }
0x1a66   : > { %v5569_v7 = vand.u32 2147483647, %v15442_v43  ;;  %v15451_v61 = vmul.f32 0.70710677, %v15439_v52  ;;  %v5697_v12 = vmul.f32 1.442695, %v5687_v39 }
0x1a67   : > { %v5572_v49 = vand.u32 2147483647, %v15445_v16  ;;  %v5579_v48 = vmul.f32 0.3275911, %v5571_v60  ;;  %v5683_v63 = vsub.f32 0.0, %v5571_v60  ;;  %vm5731_vm4 = vcmp.ge.f32.partialorder %v15437_v31, 0.0 }
0x1a68   : > { %v5577_v1 = vmul.f32 0.3275911, %v5569_v7  ;;  %v5570_v15 = vand.u32 2147483647, %v15451_v61  ;;  %v5681_v58 = vsub.f32 0.0, %v5569_v7  ;;  %vm5732_vm5 = vcmp.ge.f32.partialorder %v15445_v16, 0.0 }
0x1a69   : > { %v5580_v62 = vmul.f32 0.3275911, %v5572_v49  ;;  %v5587_v27 = vadd.f32 1.0, %v5579_v48  ;;  %v5693_v13 = vmul.f32 1.442695, %v5685_v51  ;;  %v5691_v37 = vmul.f32 %v5683_v63, %v5571_v60 }
0x1a6a   : > { %v5585_v0 = vadd.f32 1.0, %v5577_v1  ;;  %v5578_v34 = vmul.f32 0.3275911, %v5570_v15  ;;  %v5684_v40 = vsub.f32 0.0, %v5572_v49  ;;  %v5699_v20 = vmul.f32 1.442695, %v5688_v25 }
0x1a6b   : > { %13132 = vrcp.f32 %v5587_v27  ;;  %v5588_v50 = vadd.f32 1.0, %v5580_v62  ;;  %v5695_v56 = vmul.f32 1.442695, %v5686_v45  ;;  %v5689_v24 = vmul.f32 %v5681_v58, %v5569_v7 }
0x1a6c   : > { %v15455_v28 = vpop.eup %13124  ;;  %13134 = vrcp.f32 %v5585_v0  ;;  %v5586_v9 = vadd.f32 1.0, %v5578_v34  ;;  %v5705_v18 = vmul.f32 1.442695, %v5691_v37  ;;  %v5692_v48 = vmul.f32 %v5684_v40, %v5572_v49 }
0x1a6d   : > { %v15458_v35 = vpop.eup %13126  ;;  %v5607_v19 = vmul.f32 1.0614054, %v15455_v28  ;;  %13136 = vrcp.f32 %v5588_v50  ;;  %v5701_v7 = vmul.f32 1.442695, %v5689_v24  ;;  %v5682_v27 = vsub.f32 0.0, %v5570_v15 }
0x1a6e   : > { %v5605_v10 = vmul.f32 1.0614054, %v15458_v35  ;;  %v15462_v3 = vpop.eup %13128  ;;  %13138 = vpow2.f32 %v5697_v12  ;;  %v15477_v49 = vmul.f32 0.5, %v15409_v59  ;;  %vm5729_vm6 = vcmp.ge.f32.partialorder %v15442_v43, 0.0 }
0x1a6f   : > { %v5615_v44 = vadd.f32 -1.4531521, %v5607_v19  ;;  %v5608_v5 = vmul.f32 1.0614054, %v15462_v3  ;;  %v15466_v38 = vpop.eup %13130  ;;  %13140 = vrcp.f32 %v5586_v9  ;;  %v5690_v37 = vmul.f32 %v5682_v27, %v5570_v15 }
0x1a70   : > { %v5613_v47 = vadd.f32 -1.4531521, %v5605_v10  ;;  %v5606_v14 = vmul.f32 1.0614054, %v15466_v38  ;;  %13142 = vpow2.f32 %v5693_v13  ;;  %v5707_v10 = vmul.f32 1.442695, %v5692_v48 }
0x1a71   : > { %v5623_v46 = vmul.f32 %v15455_v28, %v5615_v44  ;;  %v5616_v55 = vadd.f32 -1.4531521, %v5608_v5  ;;  %13144 = vpow2.f32 %v5699_v20  ;;  %vm5730_vm7 = vcmp.ge.f32.partialorder %v15451_v61, 0.0 }
0x1a72   : > { %v5621_v8 = vmul.f32 %v15458_v35, %v5613_v47  ;;  %v5614_v62 = vadd.f32 -1.4531521, %v5606_v14  ;;  %13146 = vpow2.f32 %v5695_v56 }
0x1a73   : > { %v5631_v53 = vadd.f32 1.4214138, %v5623_v46  ;;  %v5624_v1 = vmul.f32 %v15462_v3, %v5616_v55  ;;  %13148 = vpow2.f32 %v5705_v18 }
0x1a74   : > { %v5629_v60 = vadd.f32 1.4214138, %v5621_v8  ;;  %v5622_v25 = vmul.f32 %v15466_v38, %v5614_v62  ;;  %13150 = vpow2.f32 %v5701_v7  ;;  %v15491_v8 = vmul.f32 0.5, %v15413_v32 }
0x1a75   : > { %v5639_v39 = vmul.f32 %v15455_v28, %v5631_v53  ;;  %v5632_v19 = vadd.f32 1.4214138, %v5624_v1  ;;  %v15474_v45 = vpop.eup %13132  ;;  %13152 = vpow2.f32 %v5707_v10 }
0x1a76   : > { %v5637_v51 = vmul.f32 %v15458_v35, %v5629_v60  ;;  %v15479_v58 = vpop.eup %13134  ;;  %v5630_v12 = vadd.f32 1.4214138, %v5622_v25  ;;  %v5611_v34 = vmul.f32 1.0614054, %v15474_v45 }
0x1a77   : > { %v5647_v63 = vadd.f32 -0.28449672, %v5639_v39  ;;  %v5640_v44 = vmul.f32 %v15462_v3, %v5632_v19  ;;  %v5609_v13 = vmul.f32 1.0614054, %v15479_v58  ;;  %v15487_v20 = vpop.eup %13136  ;;  %v5703_v39 = vmul.f32 1.442695, %v5690_v37 }
0x1a78   : > { %v5645_v0 = vadd.f32 -0.28449672, %v5637_v51  ;;  %v5638_v46 = vmul.f32 %v15466_v38, %v5630_v12  ;;  %v5619_v5 = vadd.f32 -1.4531521, %v5611_v34  ;;  %v13139_v24 = vpop.eup %13138  ;;  %v5612_v32 = vmul.f32 1.0614054, %v15487_v20 }
0x1a79   : > { %v5655_v50 = vmul.f32 %v15455_v28, %v5647_v63  ;;  %v5648_v40 = vadd.f32 -0.28449672, %v5640_v44  ;;  %v5617_v56 = vadd.f32 -1.4531521, %v5609_v13  ;;  %v15497_v60 = vpop.eup %13140  ;;  %13154 = vpow2.f32 %v5703_v39 }
0x1a7a   : > { %v5653_v47 = vmul.f32 %v15458_v35, %v5645_v0  ;;  %v5646_v55 = vadd.f32 -0.28449672, %v5638_v46  ;;  %v5627_v14 = vmul.f32 %v15474_v45, %v5619_v5  ;;  %v13143_v1 = vpop.eup %13142  ;;  %v5620_v25 = vadd.f32 -1.4531521, %v5612_v32 }
0x1a7b   : > { %v5663_v59 = vadd.f32 0.2548296, %v5655_v50  ;;  %v5656_v15 = vmul.f32 %v15462_v3, %v5648_v40  ;;  %v5625_v48 = vmul.f32 %v15479_v58, %v5617_v56  ;;  %v13145_v27 = vpop.eup %13144  ;;  %v5610_v0 = vmul.f32 1.0614054, %v15497_v60 }
0x1a7c   : > { %v5661_v9 = vadd.f32 0.2548296, %v5653_v47  ;;  %v5635_v7 = vadd.f32 1.4214138, %v5627_v14  ;;  %v5628_v37 = vmul.f32 %v15487_v20, %v5620_v25 }
0x1a7d   : > { %v5671_v53 = vmul.f32 %v15455_v28, %v5663_v59  ;;  %v5664_v51 = vadd.f32 0.2548296, %v5656_v15  ;;  %v5654_v28 = vmul.f32 %v15466_v38, %v5646_v55  ;;  %v5633_v19 = vadd.f32 1.4214138, %v5625_v48 }
0x1a7e   : > { %v5669_v18 = vmul.f32 %v15458_v35, %v5661_v9  ;;  %v13147_v35 = vpop.eup %13146  ;;  %v5643_v12 = vmul.f32 %v15474_v45, %v5635_v7  ;;  %v5618_v59 = vadd.f32 -1.4531521, %v5610_v0  ;;  %v5636_v15 = vadd.f32 1.4214138, %v5628_v37 }
0x1a7f   : > { %v5711_v62 = vmul.f32 %v13139_v24, %v5671_v53  ;;  %v5672_v50 = vmul.f32 %v15462_v3, %v5664_v51  ;;  %v5662_v44 = vadd.f32 0.2548296, %v5654_v28  ;;  %v13149_v34 = vpop.eup %13148  ;;  %v5641_v13 = vmul.f32 %v15479_v58, %v5633_v19 }
0x1a80   : > { %v5709_v63 = vmul.f32 %v13143_v1, %v5669_v18  ;;  %v5651_v9 = vadd.f32 -0.28449672, %v5643_v12  ;;  %v13151_v56 = vpop.eup %13150  ;;  %v5626_v3 = vmul.f32 %v15497_v60, %v5618_v59 }
0x1a81   : > { %v5719_v10 = vsub.f32 1.0, %v5711_v62  ;;  %v5712_v46 = vmul.f32 %v13145_v27, %v5672_v50  ;;  %v5670_v5 = vmul.f32 %v15466_v38, %v5662_v44  ;;  %v5649_v53 = vadd.f32 -0.28449672, %v5641_v13  ;;  %v13153_v32 = vpop.eup %13152 }
0x1a82   : > { %v5717_v47 = vsub.f32 1.0, %v5709_v63  ;;  %v5659_v48 = vmul.f32 %v15474_v45, %v5651_v9  ;;  %v5644_v62 = vmul.f32 %v15487_v20, %v5636_v15  ;;  %v5634_v19 = vadd.f32 1.4214138, %v5626_v3 }
0x1a83   : > { %v5735_v40 = vsub.f32 0.0, %v5719_v10  ;;  %v5720_v14 = vsub.f32 1.0, %v5712_v46  ;;  %v5710_v18 = vmul.f32 %v13147_v35, %v5670_v5  ;;  %v5657_v38 = vmul.f32 %v15479_v58, %v5649_v53 }
0x1a84   : > { %v5733_v24 = vsub.f32 0.0, %v5717_v47  ;;  %v5667_v27 = vadd.f32 0.2548296, %v5659_v48  ;;  %v5652_v63 = vadd.f32 -0.28449672, %v5644_v62  ;;  %v5642_v12 = vmul.f32 %v15497_v60, %v5634_v19 }
0x1a85   : > { %v5743_v55 = vsel %vm5727_vm12, %v5719_v10, %v5735_v40  ;;  %v5736_v28 = vsub.f32 0.0, %v5720_v14  ;;  %v5718_v7 = vsub.f32 1.0, %v5710_v18  ;;  %v5665_v36 = vadd.f32 0.2548296, %v5657_v38 }
0x1a86   : > { %v5741_v1 = vsel %vm5725_vm13, %v5717_v47, %v5733_v24  ;;  %v5751_v51 = vadd.f32 1.0, %v5743_v55  ;;  %v5675_v35 = vmul.f32 %v15474_v45, %v5667_v27  ;;  %v5660_v44 = vmul.f32 %v15487_v20, %v5652_v63 }
0x1a87   : > { %v5749_v25 = vadd.f32 1.0, %v5741_v1  ;;  %v5744_v0 = vsel %vm5728_vm14, %v5720_v14, %v5736_v28  ;;  %v5734_v57 = vsub.f32 0.0, %v5718_v7  ;;  %v5673_v50 = vmul.f32 %v15479_v58, %v5665_v36 }
0x1a88   : > { %v5752_v10 = vadd.f32 1.0, %v5744_v0  ;;  %v5759_v47 = vmul.f32 %v5751_v51, %v15453_v4  ;;  %v5550_v13 = vmul.f32 0.5, %v15418_v22  ;;  %v5715_v37 = vmul.f32 %v13149_v34, %v5675_v35  ;;  %v13155_v34 = vpop.eup %13154 }
0x1a89   : > { %v5742_v39 = vsel %vm5726_vm15, %v5718_v7, %v5734_v57  ;;  %v5713_v40 = vmul.f32 %v13151_v56, %v5673_v50  ;;  %v5668_v45 = vadd.f32 0.2548296, %v5660_v44  ;;  %v5650_v5 = vadd.f32 -0.28449672, %v5642_v12 }
0x1a8a   : > { %v5760_v33 = vmul.f32 %v5752_v10, %v15491_v8  ;;  %v5750_v59 = vadd.f32 1.0, %v5742_v39  ;;  %v5723_v46 = vsub.f32 1.0, %v5715_v37  ;;  %v5757_v58 = vmul.f32 %v5749_v25, %v15477_v49 }
0x1a8b   : > { %v5676_v53 = vmul.f32 %v15487_v20, %v5668_v45  ;;  %v5721_v15 = vsub.f32 1.0, %v5713_v40  ;;  %v5658_v22 = vmul.f32 %v15497_v60, %v5650_v5  ;;  %v5555_v1 = vmul.f32 0.5, %v15430_v6 }
0x1a8c   : > { %v5766_v9 = vpack.c.bf16 %v5760_v33, %v5759_v47  ;;  %v5758_v24 = vmul.f32 %v5750_v59, %v5550_v13  ;;  %v5739_v4 = vsub.f32 0.0, %v5723_v46  ;;  %v5556_v38 = vmul.f32 0.5, %v15434_v41  ;;  %v10950_v41 = vld [vmem:[%s16602_s11] ss:$0 sm:$0xff]  ;;  %s16603_s11 = sld [smem:[#allocation33_spill]] }
0x1a8d   : > { %v5716_v21 = vmul.f32 %v13153_v32, %v5676_v53  ;;  %v5666_v8 = vadd.f32 0.2548296, %v5658_v22  ;;  %v5737_v14 = vsub.f32 0.0, %v5721_v15  ;;  %v5553_v63 = vmul.f32 0.5, %v15432_v11 }
0x1a8e   : > { %v5765_v3 = vpack.c.bf16 %v5758_v24, %v5757_v58  ;;  %v5747_v56 = vsel %vm5731_vm4, %v5723_v46, %v5739_v4  ;;  %v5554_v6 = vmul.f32 0.5, %v15439_v52 }
0x1a8f   : > { %v5724_v55 = vsub.f32 1.0, %v5716_v21  ;;  %v5674_v49 = vmul.f32 %v15497_v60, %v5666_v8  ;;  %v5755_v48 = vadd.f32 1.0, %v5747_v56  ;;  %v5745_v31 = vsel %vm5729_vm6, %v5721_v15, %v5737_v14 }
0x1a90   : > { %11804 = vmatprep.mubr.bf16.mxu0 %v5765_v3  ;;  %v5753_v27 = vadd.f32 1.0, %v5745_v31 }
0x1a91   : > { %11805 = vmatmul.mubr.bf16.vlgmr.msra.gmra.mrb[96].mxu0 %v5766_v9  ;;  %v5740_v18 = vsub.f32 0.0, %v5724_v55  ;;  %v5714_v20 = vmul.f32 %v13155_v34, %v5674_v49  ;;  %v5763_v28 = vmul.f32 %v5755_v48, %v5555_v1 }
0x1a92   : > { %v5761_v19 = vmul.f32 %v5753_v27, %v5553_v63 }
0x1a93   : > { %v5748_v32 = vsel %vm5732_vm5, %v5724_v55, %v5740_v18  ;;  %v5722_v51 = vsub.f32 1.0, %v5714_v20 }
0x1a94   : > { %v5756_v62 = vadd.f32 1.0, %v5748_v32 }
0x1a95   : > { %v5738_v60 = vsub.f32 0.0, %v5722_v51 }
0x1a96   : > { %v5764_v7 = vmul.f32 %v5756_v62, %v5556_v38 }
0x1a97   : > { %v5746_v36 = vsel %vm5730_vm7, %v5722_v51, %v5738_v60 }
0x1a98   : > { %v5768_v16 = vpack.c.bf16 %v5764_v7, %v5763_v28  ;;  %v5754_v43 = vadd.f32 1.0, %v5746_v36 }
0x1a9a   : > { %v5762_v25 = vmul.f32 %v5754_v43, %v5554_v6 }
0x1a9c   : > { %v5767_v0 = vpack.c.bf16 %v5762_v25, %v5761_v19 }
0x1a9e   : > { %11808 = vmatprep.mubr.bf16.mxu0 %v5767_v0 }
0x1a9f   : > { %11809 = vmatmul.mubr.bf16.gmra.mrb[100].mxu0 %v5768_v16 }
0x1b64   : > { %v11806_v57 = vpop.f32.mrb[96].mxu0 }
0x1b65   : > { %v5857_v35 = vpop.f32.mrb[97].mxu0  ;;  %v5866_v12 = vadd.f32 %v11806_v57, %v10950_v41 }
0x1b66   : > { %v5858_v10 = vadd.f32 %v10950_v41, %v5857_v35  ;;  %v11807_v50 = vpop.f32.mrb[98].mxu0 }
0x1b67   : > { %v5860_v44 = vpop.f32.mrb[99].mxu0  ;;  %v5869_v11 = vadd.f32 %v11807_v50, %v10950_v41  ;;  %v5894_v13 = vsel %vm2074_vm1, %v5866_v12, 0.0 }
0x1b68   : > { %v5861_v61 = vadd.f32 %v10950_v41, %v5860_v44  ;;  %v5888_v47 = vsel %vm2074_vm1, %v5858_v10, 0.0 }
0x1b69   : > { %5889 = vadd.xlane.f32.xlu0 %v5888_v47  ;;  %v5897_v39 = vsel %vm2074_vm1, %v5869_v11, 0.0 }
0x1b6a   : > { %v5891_v52 = vsel %vm2074_vm1, %v5861_v61, 0.0 }
0x1b6b   : > { %5892 = vadd.xlane.f32.xlu1 %v5891_v52 }
0x1b6d   : > { %5895 = vadd.xlane.f32.xlu0 %v5894_v13 }
0x1b6f   : > { %5898 = vadd.xlane.f32.xlu1 %v5897_v39 }
0x1b72   : > { %v11810_v37 = vpop.f32.mrb[100].mxu0 }
0x1b73   : > { %v5873_v33 = vpop.f32.mrb[101].mxu0  ;;  %v5882_v46 = vadd.f32 %v11810_v37, %v10950_v41 }
0x1b74   : > { %v5874_v59 = vadd.f32 %v10950_v41, %v5873_v33  ;;  %v11811_v40 = vpop.f32.mrb[102].mxu0 }
0x1b75   : > { %v5876_v45 = vpop.f32.mrb[103].mxu0  ;;  %v5885_v9 = vadd.f32 %v11811_v40, %v10950_v41  ;;  %v5906_v53 = vsel %vm2074_vm1, %v5882_v46, 0.0 }
0x1b76   : > { %v5877_v5 = vadd.f32 %v10950_v41, %v5876_v45  ;;  %v5900_v58 = vsel %vm2074_vm1, %v5874_v59, 0.0 }
0x1b77   : > { %5901 = vadd.xlane.f32.xlu0 %v5900_v58  ;;  %v5909_v4 = vsel %vm2074_vm1, %v5885_v9, 0.0 }
0x1b78   : > { %v5903_v24 = vsel %vm2074_vm1, %v5877_v5, 0.0 }
0x1b79   : > { %5904 = vadd.xlane.f32.xlu1 %v5903_v24 }
0x1b7b   : > { %5907 = vadd.xlane.f32.xlu0 %v5906_v53  ;;  %v10959_v53 = vld [vmem:[%s16604_s8] ss:$0 sm:$0xff]  ;;  %s16606_s8 = sld [smem:[#allocation34_spill]] }
0x1b7d   : > { %5910 = vadd.xlane.f32.xlu1 %v5909_v4 }
0x1bf6   : > { %v5890_v15 = vpop.xlane.xlu0 %5889 }
0x1bf7   : > { %v5912_v22 = vmul.f32 0.03125, %v5890_v15 }
0x1bf8   : > { %v5893_v21 = vpop.xlane.xlu1 %5892 }
0x1bf9   : > { %v15551_v3 = vsub.f32 %v5858_v10, %v5912_v22  ;;  %v5913_v8 = vmul.f32 0.03125, %v5893_v21  ;;  %v10960_v21 = vld [vmem:[%s16605_s13] ss:$0 sm:$0xff]  ;;  %s16607_s13 = sld [smem:[#allocation38_spill]] }
0x1bfa   : > { %v5896_v34 = vpop.xlane.xlu0 %5895 }
0x1bfb   : > { %v15553_v56 = vsub.f32 %v5861_v61, %v5913_v8  ;;  %v5914_v55 = vmul.f32 0.03125, %v5896_v34  ;;  %v5928_v14 = vmul.f32 %v15551_v3, %v15551_v3 }
0x1bfc   : > { %v5899_v49 = vpop.xlane.xlu1 %5898 }
0x1bfd   : > { %v15557_v18 = vsub.f32 %v5866_v12, %v5914_v55  ;;  %v5915_v48 = vmul.f32 0.03125, %v5899_v49  ;;  %v5936_v20 = vsel %vm2074_vm1, %v5928_v14, 0.0  ;;  %v5929_v1 = vmul.f32 %v15553_v56, %v15553_v56 }
0x1bfe   : > { %5937 = vadd.xlane.f32.xlu0 %v5936_v20 }
0x1bff   : > { %v15562_v32 = vsub.f32 %v5869_v11, %v5915_v48  ;;  %v5939_v31 = vsel %vm2074_vm1, %v5929_v1, 0.0  ;;  %v5930_v38 = vmul.f32 %v15557_v18, %v15557_v18  ;;  %v6046_v11 = vld [vmem:[%s16603_s11] sm:$0xff] }
0x1c00   : > { %5940 = vadd.xlane.f32.xlu1 %v5939_v31  ;;  %11828 = vmatprep.mubr.msk.f32.mxu1 %vm2607_vm3, %v6046_v11 }
0x1c01   : > { %v5942_v62 = vsel %vm2074_vm1, %v5930_v38, 0.0  ;;  %v5931_v51 = vmul.f32 %v15562_v32, %v15562_v32 }
0x1c02   : > { %5943 = vadd.xlane.f32.xlu0 %v5942_v62 }
0x1c03   : > { %v5945_v28 = vsel %vm2074_vm1, %v5931_v51, 0.0 }
0x1c04   : > { %5946 = vadd.xlane.f32.xlu1 %v5945_v28  ;;  %v5902_v7 = vpop.xlane.xlu0 %5901 }
0x1c05   : > { %v5916_v60 = vmul.f32 0.03125, %v5902_v7 }
0x1c06   : > { %v5905_v27 = vpop.xlane.xlu1 %5904 }
0x1c07   : > { %v15571_v36 = vsub.f32 %v5874_v59, %v5916_v60  ;;  %v5917_v16 = vmul.f32 0.03125, %v5905_v27 }
0x1c08   : > { %v5908_v63 = vpop.xlane.xlu0 %5907 }
0x1c09   : > { %v15573_v6 = vsub.f32 %v5877_v5, %v5917_v16  ;;  %v5918_v43 = vmul.f32 0.03125, %v5908_v63  ;;  %v5932_v19 = vmul.f32 %v15571_v36, %v15571_v36 }
0x1c0a   : > { %v5911_v25 = vpop.xlane.xlu1 %5910 }
0x1c0b   : > { %v15577_v0 = vsub.f32 %v5882_v46, %v5918_v43  ;;  %v5919_v41 = vmul.f32 0.03125, %v5911_v25  ;;  %v5948_v57 = vsel %vm2074_vm1, %v5932_v19, 0.0  ;;  %v5933_v35 = vmul.f32 %v15573_v6, %v15573_v6 }
0x1c0c   : > { %5949 = vadd.xlane.f32.xlu0 %v5948_v57 }
0x1c0d   : > { %v15582_v10 = vsub.f32 %v5885_v9, %v5919_v41  ;;  %v5951_v50 = vsel %vm2074_vm1, %v5933_v35, 0.0  ;;  %v5934_v44 = vmul.f32 %v15577_v0, %v15577_v0 }
0x1c0e   : > { %5952 = vadd.xlane.f32.xlu1 %v5951_v50 }
0x1c0f   : > { %v5954_v12 = vsel %vm2074_vm1, %v5934_v44, 0.0  ;;  %v5935_v61 = vmul.f32 %v15582_v10, %v15582_v10 }
0x1c10   : > { %5955 = vadd.xlane.f32.xlu0 %v5954_v12 }
0x1c11   : > { %v5957_v47 = vsel %vm2074_vm1, %v5935_v61, 0.0 }
0x1c12   : > { %5958 = vadd.xlane.f32.xlu1 %v5957_v47 }
0x1c8b   : > { %v5938_v52 = vpop.xlane.xlu0 %5937 }
0x1c8c   : > { %v5960_v13 = vmul.f32 0.03125, %v5938_v52 }
0x1c8d   : > { %v5941_v39 = vpop.xlane.xlu1 %5940 }
0x1c8e   : > { %v5968_v37 = vadd.f32 1e-05, %v5960_v13  ;;  %v5961_v33 = vmul.f32 0.03125, %v5941_v39 }
0x1c8f   : > { %v5944_v59 = vpop.xlane.xlu0 %5943 }
0x1c90   : > { %13156 = vrsqrt.f32 %v5968_v37  ;;  %v5969_v40 = vadd.f32 1e-05, %v5961_v33  ;;  %v5962_v45 = vmul.f32 0.03125, %v5944_v59 }
0x1c91   : > { %v5947_v46 = vpop.xlane.xlu1 %5946 }
0x1c92   : > { %13158 = vrsqrt.f32 %v5969_v40  ;;  %v5970_v5 = vadd.f32 1e-05, %v5962_v45  ;;  %v5963_v58 = vmul.f32 0.03125, %v5947_v46 }
0x1c94   : > { %13160 = vrsqrt.f32 %v5970_v5  ;;  %v5971_v9 = vadd.f32 1e-05, %v5963_v58 }
0x1c96   : > { %13162 = vrsqrt.f32 %v5971_v9  ;;  %v10980_v9 = vld [vmem:[%s16603_s11 + $0x30] sm:$0xff] }
0x1c99   : > { %v5950_v15 = vpop.xlane.xlu0 %5949 }
0x1c9a   : > { %v13157_v24 = vpop.eup %13156  ;;  %v5964_v8 = vmul.f32 0.03125, %v5950_v15  ;;  %v12613_v15 = vld [vmem:[%s16606_s8 + $0x18] sm:$0xff]  }
0x1c9b   : > { %v5984_v4 = vmul.f32 %v13157_v24, %v15551_v3  ;;  %v5953_v14 = vpop.xlane.xlu1 %5952  ;;  %v10981_v24 = vld [vmem:[%s16603_s11 + $0x38] sm:$0xff] }
0x1c9c   : > { %v13159_v22 = vpop.eup %13158  ;;  %v5972_v48 = vadd.f32 1e-05, %v5964_v8  ;;  %v5965_v20 = vmul.f32 0.03125, %v5953_v14  ;;  %v12614_v14 = vld [vmem:[%s16606_s8] sm:$0xff]  }
0x1c9d   : > { %v5998_v34 = vmul.f32 %v10959_v53, %v5984_v4  ;;  %v5985_v55 = vmul.f32 %v13159_v22, %v15553_v56  ;;  %v5956_v62 = vpop.xlane.xlu0 %5955  ;;  %v13512_v4 = vmov 0.0  }
0x1c9e   : > { %v13161_v49 = vpop.eup %13160  ;;  %13164 = vrsqrt.f32 %v5972_v48  ;;  %v5973_v28 = vadd.f32 1e-05, %v5965_v20  ;;  %v5966_v3 = vmul.f32 0.03125, %v5956_v62  ;;  %11850 = vmatprep.subr.bf16.mxu0 %v13512_v4  ;;  %11854 = vmatprep.mubr.msk.bf16.mxu0 %vm13513_vm8, %v13512_v4  ;;  %v12615_v48 = vld [vmem:[%s16606_s8 + $0x8] sm:$0xff]   ;;  %v12616_v20 = vld [vmem:[%s16606_s8 + $0x20] sm:$0xff]  }
0x1c9f   : > { %v6012_v1 = vadd.f32 %v10960_v21, %v5998_v34  ;;  %v5999_v31 = vmul.f32 %v10959_v53, %v5985_v55  ;;  %v5986_v38 = vmul.f32 %v13161_v49, %v15557_v18  ;;  %v5959_v16 = vpop.xlane.xlu1 %5958 }
0x1ca0   : > { %v13163_v51 = vpop.eup %13162  ;;  %13166 = vrsqrt.f32 %v5973_v28  ;;  %v5974_v56 = vadd.f32 1e-05, %v5966_v3  ;;  %v5967_v63 = vmul.f32 0.03125, %v5959_v16  ;;  %v12619_v28 = vld [vmem:[%s16606_s8 + $0x38] sm:$0xff]  }
0x1ca1   : > { %v6013_v7 = vadd.f32 %v10960_v21, %v5999_v31  ;;  %v6000_v60 = vmul.f32 %v10959_v53, %v5986_v38  ;;  %v5987_v27 = vmul.f32 %v13163_v51, %v15562_v32  ;;  %v6020_v43 = vadd.f32 %v6012_v1, %v15361_v30  ;;  %v12617_v38 = vld [vmem:[%s16606_s8 + $0x28] sm:$0xff]   ;;  %v12618_v51 = vld [vmem:[%s16606_s8 + $0x30] sm:$0xff]  }
0x1ca2   : > { %13168 = vrsqrt.f32 %v5974_v56  ;;  %v5975_v18 = vadd.f32 1e-05, %v5967_v63 }
0x1ca3   : > { %v6021_v19 = vadd.f32 %v6013_v7, %v15364_v26  ;;  %v6014_v25 = vadd.f32 %v10960_v21, %v6000_v60  ;;  %v6001_v41 = vmul.f32 %v10959_v53, %v5987_v27 }
0x1ca4   : > { %13170 = vrsqrt.f32 %v5975_v18 }
0x1ca5   : > { %v15601_v57 = vpack.c.bf16 %v6021_v19, %v6020_v43  ;;  %v6015_v35 = vadd.f32 %v10960_v21, %v6001_v41  ;;  %v6022_v50 = vadd.f32 %v6014_v25, %v15372_v2 }
0x1ca7   : > { %v6023_v32 = vadd.f32 %v6015_v35, %v15375_v42  ;;  %12233 = vmatprep.subr.bf16.mxu1 %v15601_v57 }
0x1ca8   : > { %12235 = vmatpush3.bf16.msra.mxu1 %v15601_v57  ;;  %v13165_v30 = vpop.eup %13164 }
0x1ca9   : > { %v12236_v44 = vpack.c.bf16 %v6023_v32, %v6022_v50  ;;  %v5988_v26 = vmul.f32 %v13165_v30, %v15571_v36 }
0x1caa   : > { %v13167_v12 = vpop.eup %13166 }
0x1cab   : > { %12237 = vmatprep.subr.bf16.mxu1 %v12236_v44  ;;  %v6002_v61 = vmul.f32 %v10959_v53, %v5988_v26  ;;  %v5989_v47 = vmul.f32 %v13167_v12, %v15573_v6  ;;  %v12622_v12 = vld [vmem:[%s16607_s13 + $0x4] ss:$8 sps:$4 sm:$0xff]  }
0x1cac   : > { %12239 = vmatpush3.bf16.msra.mxu1 %v12236_v44  ;;  %v13169_v11 = vpop.eup %13168 }
0x1cad   : > { %v6016_v52 = vadd.f32 %v10960_v21, %v6002_v61  ;;  %v6003_v13 = vmul.f32 %v10959_v53, %v5989_v47  ;;  %v5990_v2 = vmul.f32 %v13169_v11, %v15577_v0  ;;  %v12620_v61 = vld [vmem:[%s16607_s13] ss:$8 sps:$4 sm:$0xff]   ;;  %v12625_v47 = vld [vmem:[%s16607_s13 + $0x14] ss:$8 sps:$4 sm:$0xff]   ;;  %v12623_v11 = vld [vmem:[%s16607_s13 + $0x10] ss:$8 sps:$4 sm:$0xff]  }
0x1cae   : > { %v13171_v42 = vpop.eup %13170 }
0x1caf   : > { %v6017_v39 = vadd.f32 %v10960_v21, %v6003_v13  ;;  %v6004_v37 = vmul.f32 %v10959_v53, %v5990_v2  ;;  %v5991_v33 = vmul.f32 %v13171_v42, %v15582_v10  ;;  %v6024_v36 = vadd.f32 %v6016_v52, %v15386_v54  ;;  %v6047_v10 = vld [vmem:[%s16603_s11 + $0x8] sm:$0xff]  ;;  %v10963_v54 = vld [vmem:[%s16603_s11 + $0x10] sm:$0xff] }
0x1cb0   : > { %v12628_v52 = vld [vmem:[%s16607_s13 + $0x24] ss:$8 sps:$4 sm:$0xff]   ;;  %v12626_v13 = vld [vmem:[%s16607_s13 + $0x20] ss:$8 sps:$4 sm:$0xff]   ;;  %v12629_v2 = vld [vmem:[%s16607_s13 + $0x30] ss:$8 sps:$4 sm:$0xff]  }
0x1cb1   : > { %v6025_v59 = vadd.f32 %v6017_v39, %v15383_v29  ;;  %v6018_v40 = vadd.f32 %v10960_v21, %v6004_v37  ;;  %v6005_v45 = vmul.f32 %v10959_v53, %v5991_v33  ;;  %v10964_v29 = vld [vmem:[%s16603_s11 + $0x18] sm:$0xff]  ;;  %v12612_v53 = vld [vmem:[%s16606_s8 + $0x10] sm:$0xff]   ;;  %s16608_s8 = sld [smem:[#allocation35_spill]]  ;;  %v13514_v39 = vmov 0  }
0x1cb2   : > { %11851 = vmatpush3.bf16.msra.mxu0 %v12612_v53  ;;  %v12631_v42 = vld [vmem:[%s16607_s13 + $0x34] ss:$8 sps:$4 sm:$0xff]   ;;  %s16617_s13 = sld [smem:[#allocation46_spill]] }
0x1cb3   : > { %v12240_v46 = vpack.c.bf16 %v6025_v59, %v6024_v36  ;;  %v6019_v6 = vadd.f32 %v10960_v21, %v6005_v45  ;;  %v6026_v5 = vadd.f32 %v6018_v40, %v15395_v17  ;;  %v10974_v17 = vld [vmem:[%s16603_s11 + $0x28] sm:$0xff]  ;;  %11852 = vmatprep.subr.bf16.mxu0 %v13512_v4 }
0x1cb5   : > { %v6027_v58 = vadd.f32 %v6019_v6, %v15391_v23  ;;  %12241 = vmatprep.subr.bf16.mxu1 %v12240_v46  ;;  %v10973_v23 = vld [vmem:[%s16603_s11 + $0x20] sm:$0xff]  ;;  %s16609_s11 = sld [smem:[#allocation36_spill]] }
0x1cb6   : > { %12243 = vmatpush3.bf16.msra.mxu1 %v12240_v46  ;;  %11853 = vmatpush3.bf16.msra.mxu0 %v12613_v15 }
0x1cb7   : > { %v12244_v0 = vpack.c.bf16 %v6027_v58, %v6026_v5  ;;  %11858 = vmatprep.subr.bf16.mxu0 %v13512_v4  ;;  %v10987_v6 = vld [vmem:[%s16608_s8] ss:$0 sm:$0xff]  ;;  %s15756_s8 = sld [smem:[#allocation2 + $0xa]] }
0x1cb9   : > { %12245 = vmatprep.subr.bf16.mxu1 %v12244_v0 }
0x1cba   : > { %12247 = vmatpush3.bf16.msra.mxu1 %v12244_v0 }
0x1cbb   : > { %12249 = vmatprep.subr.bf16.mxu1 %v15601_v57 }
0x1cbd   : > { %11829 = vmatmul.mubr.msk.f32.vlgmr.msra.gmra.mrb[32].mxu1 %vm2607_vm3, %v6047_v10 }
0x1cbe   : > { %12251 = vmatpush3.bf16.msra.mxu1 %v15601_v57  ;;  %11847 = vmatprep.mubr.msk.f32.mxu1 %vm2607_vm3, %v10963_v54  ;;  %v10988_v54 = vld [vmem:[%s16609_s11] ss:$0 sm:$0xff]  ;;  %s15750_s11 = sld [smem:[#allocation2 + $0x9]] }
0x1cbf   : > { %12253 = vmatprep.subr.bf16.mxu1 %v12236_v44 }
0x1cc2   : > { %12255 = vmatpush3.bf16.msra.mxu1 %v12236_v44 }
0x1cc3   : > { %12257 = vmatprep.subr.bf16.mxu1 %v12240_v46 }
0x1cc6   : > { %12259 = vmatpush3.bf16.msra.mxu1 %v12240_v46 }
0x1cc7   : > { %12261 = vmatprep.subr.bf16.mxu1 %v12244_v0 }
0x1cca   : > { %12263 = vmatpush3.bf16.msra.mxu1 %v12244_v0 }
0x1ccb   : > { %12265 = vmatprep.subr.bf16.mxu1 %v15601_v57 }
0x1ccd   : > { %11848 = vmatmul.mubr.msk.f32.vlgmr.msra.gmra.mrb[34].mxu1 %vm2607_vm3, %v10964_v29 }
0x1cce   : > { %12267 = vmatpush3.bf16.msra.mxu1 %v15601_v57  ;;  %11882 = vmatprep.mubr.msk.f32.mxu1 %vm2607_vm3, %v10973_v23 }
0x1ccf   : > { %12269 = vmatprep.subr.bf16.mxu1 %v12236_v44 }
0x1cd2   : > { %12271 = vmatpush3.bf16.msra.mxu1 %v12236_v44 }
0x1cd3   : > { %12273 = vmatprep.subr.bf16.mxu1 %v12240_v46 }
0x1cd6   : > { %12275 = vmatpush3.bf16.msra.mxu1 %v12240_v46 }
0x1cd7   : > { %12277 = vmatprep.subr.bf16.mxu1 %v12244_v0 }
0x1cda   : > { %12279 = vmatpush3.bf16.msra.mxu1 %v12244_v0 }
0x1cdb   : > { %12281 = vmatprep.subr.bf16.mxu1 %v15601_v57 }
0x1cdd   : > { %11883 = vmatmul.mubr.msk.f32.vlgmr.msra.gmra.mrb[36].mxu1 %vm2607_vm3, %v10974_v17 }
0x1cde   : > { %12283 = vmatpush3.bf16.msra.mxu1 %v15601_v57  ;;  %11909 = vmatprep.mubr.msk.f32.mxu1 %vm2607_vm3, %v10980_v9 }
0x1cdf   : > { %12285 = vmatprep.subr.bf16.mxu1 %v12236_v44 }
0x1ce2   : > { %12287 = vmatpush3.bf16.msra.mxu1 %v12236_v44 }
0x1ce3   : > { %12289 = vmatprep.subr.bf16.mxu1 %v12240_v46 }
0x1ce6   : > { %12291 = vmatpush3.bf16.msra.mxu1 %v12240_v46 }
0x1ce7   : > { %12293 = vmatprep.subr.bf16.mxu1 %v12244_v0 }
0x1cea   : > { %12295 = vmatpush3.bf16.msra.mxu1 %v12244_v0 }
0x1ceb   : > { %11920 = vmatprep.subr.bf16.mxu1 %v13512_v4 }
0x1ced   : > { %11910 = vmatmul.mubr.msk.f32.vlgmr.msra.gmra.mrb[38].mxu1 %vm2607_vm3, %v10981_v24  ;;  %v6722_v24 = vlaneseq }
0x1cee   : > { %11922 = vmatprep.mubr.msk.bf16.mxu1 %vm13513_vm8, %v13512_v4 }
0x1cef   : > { %v6723_v53 = vshrl.u32 %v6722_v24, 7 }
0x1cf1   : > { %v15691_v15 = vsub.s32 0, %v6723_v53 }
0x1d90   : > { %v11830_v22 = vpop.f32.mrb[32].mxu1 }
0x1d91   : > { %v6120_v21 = vpop.f32.mrb[33].mxu1 }
0x1d92   : > { %v6129_v8 = vpack.c.bf16 %v11830_v22, %v6120_v21  ;;  %v6664_v22 = vld [vmem:[%s16610_s14] sm:$0x3]  ;;  %v15694_v21 = vsub.s32 1, %v6723_v53  ;;  %s16505_s14 = smov 32  }
0x1da0   : > { %v11849_v34 = vpop.f32.mrb[34].mxu1 }
0x1da1   : > { %v6205_v55 = vpop.f32.mrb[35].mxu1 }
0x1da2   : > { %v6214_v49 = vpack.c.bf16 %v11849_v34, %v6205_v55  ;;  %v6729_v55 = vrot.slane %v6664_v22, %v15694_v21 }
0x1da4   : > { %11855 = vmatmul.mubr.msk.bf16.vlgmr.msra.gmra.mrb[104].mxu0 %vm2074_vm1, %v6214_v49 }
0x1da5   : > { %11859 = vmatpush3.bf16.msra.mxu0 %v12614_v14  ;;  %11862 = vmatprep.mubr.msk.bf16.mxu0 %vm13513_vm8, %v13512_v4 }
0x1da6   : > { %11860 = vmatprep.subr.bf16.mxu0 %v13512_v4 }
0x1da9   : > { %11861 = vmatpush3.bf16.msra.mxu0 %v12615_v48 }
0x1daa   : > { %11885 = vmatprep.subr.bf16.mxu0 %v13512_v4 }
0x1db0   : > { %11863 = vmatmul.mubr.msk.bf16.vlgmr.msra.gmra.mrb[104].mxu0 %vm2074_vm1, %v6129_v8  ;;  %v11884_v1 = vpop.f32.mrb[36].mxu1  ;;  %v6725_v8 = vrot.slane %v6664_v22, %v15691_v15 }
0x1db1   : > { %11886 = vmatpush3.bf16.msra.mxu0 %v12616_v20  ;;  %v6402_v31 = vpop.f32.mrb[37].mxu1  ;;  %11889 = vmatprep.mubr.msk.bf16.mxu0 %vm13513_vm8, %v13512_v4 }
0x1db2   : > { %v6411_v62 = vpack.c.bf16 %v11884_v1, %v6402_v31  ;;  %11887 = vmatprep.subr.bf16.mxu0 %v13512_v4 }
0x1db5   : > { %11888 = vmatpush3.bf16.msra.mxu0 %v12617_v38 }
0x1db6   : > { %11912 = vmatprep.subr.bf16.mxu0 %v13512_v4 }
0x1dbc   : > { %11890 = vmatmul.mubr.msk.bf16.vlgmr.msra.gmra.mrb[104].mxu0 %vm2074_vm1, %v6411_v62 }
0x1dbd   : > { %11913 = vmatpush3.bf16.msra.mxu0 %v12618_v51  ;;  %11916 = vmatprep.mubr.msk.bf16.mxu0 %vm13513_vm8, %v13512_v4 }
0x1dbe   : > { %11914 = vmatprep.subr.bf16.mxu0 %v13512_v4 }
0x1dc0   : > { %v11911_v3 = vpop.f32.mrb[38].mxu1 }
0x1dc1   : > { %11915 = vmatpush3.bf16.msra.mxu0 %v12619_v28  ;;  %v6545_v7 = vpop.f32.mrb[39].mxu1 }
0x1dc2   : > { %v6554_v60 = vpack.c.bf16 %v11911_v3, %v6545_v7  ;;  %6775 = vmatprep.subr.bf16.mxu0 %v12622_v12 }
0x1dc8   : > { %11917 = vmatmul.mubr.msk.bf16.vlgmr.msra.gmra.mrb[104].mxu0 %vm2074_vm1, %v6554_v60 }
0x1dc9   : > { %6776 = vmatpush1.bf16.msra.mxu0 %v12620_v61  ;;  %6807 = vmatprep.mubr.bf16.mxu0 %v13514_v39 }
0x1dca   : > { %6777 = vmatprep.subr.bf16.mxu0 %v12625_v47 }
0x1dcd   : > { %6778 = vmatpush1.bf16.msra.mxu0 %v12623_v11 }
0x1dce   : > { %6779 = vmatprep.subr.bf16.mxu0 %v12628_v52 }
0x1dd1   : > { %6780 = vmatpush1.bf16.msra.mxu0 %v12626_v13 }
0x1dd2   : > { %6781 = vmatprep.subr.bf16.mxu0 %v12631_v42 }
0x1dd5   : > { %6782 = vmatpush1.bf16.msra.mxu0 %v12629_v2 }
0x1dd6   : > { %11932 = vmatprep.subr.bf16.mxu0 %v13512_v4 }
0x1e9b   : > { %v6604_v27 = vpop.f32.mrb[104].mxu0 }
0x1e9c   : > { %v11918_v16 = vpop.f32.mrb[105].mxu0  ;;  %v6613_v56 = vsel %vm2607_vm3, %v6604_v27, 0.0 }
0x1e9d   : > { %6614 = vadd.xlane.f32.xlu0 %v6613_v56  ;;  %v6607_v63 = vpop.f32.mrb[106].mxu0 }
0x1e9e   : > { %v11919_v43 = vpop.f32.mrb[107].mxu0  ;;  %v6616_v19 = vsel %vm2607_vm3, %v6607_v63, 0.0 }
0x1e9f   : > { %6617 = vadd.xlane.f32.xlu1 %v6616_v19 }
0x1f2a   : > { %v6615_v25 = vpop.xlane.xlu0 %6614 }
0x1f2b   : > { %v6620_v41 = vmul.f32 0.015625, %v6615_v25 }
0x1f2c   : > { %v6618_v18 = vpop.xlane.xlu1 %6617 }
0x1f2d   : > { %v6622_v57 = vsub.f32 %v6604_v27, %v6620_v41  ;;  %v6621_v35 = vmul.f32 0.015625, %v6618_v18 }
0x1f2f   : > { %v6623_v50 = vsub.f32 %v6607_v63, %v6621_v35  ;;  %v6624_v32 = vmul.f32 %v6622_v57, %v6622_v57 }
0x1f31   : > { %v6626_v44 = vsel %vm2607_vm3, %v6624_v32, 0.0  ;;  %v6625_v30 = vmul.f32 %v6623_v50, %v6623_v50 }
0x1f32   : > { %6627 = vadd.xlane.f32.xlu0 %v6626_v44 }
0x1f33   : > { %v6629_v26 = vsel %vm2607_vm3, %v6625_v30, 0.0 }
0x1f34   : > { %6630 = vadd.xlane.f32.xlu1 %v6629_v26 }
0x1fbf   : > { %v6628_v37 = vpop.xlane.xlu0 %6627 }
0x1fc0   : > { %v6632_v33 = vmul.f32 0.015625, %v6628_v37 }
0x1fc1   : > { %v6631_v36 = vpop.xlane.xlu1 %6630 }
0x1fc2   : > { %v6634_v59 = vadd.f32 1e-05, %v6632_v33  ;;  %v6633_v40 = vmul.f32 0.015625, %v6631_v36 }
0x1fc4   : > { %13172 = vrsqrt.f32 %v6634_v59  ;;  %v6635_v45 = vadd.f32 1e-05, %v6633_v40 }
0x1fc6   : > { %13174 = vrsqrt.f32 %v6635_v45 }
0x1fce   : > { %v13173_v46 = vpop.eup %13172 }
0x1fcf   : > { %v6638_v5 = vmul.f32 %v13173_v46, %v6622_v57 }
0x1fd0   : > { %v13175_v58 = vpop.eup %13174 }
0x1fd1   : > { %v6646_v0 = vmul.f32 %v10987_v6, %v6638_v5  ;;  %v6639_v10 = vmul.f32 %v13175_v58, %v6623_v50 }
0x1fd3   : > { %v6647_v29 = vmul.f32 %v10987_v6, %v6639_v10  ;;  %v15682_v23 = vadd.f32 %v10988_v54, %v6646_v0 }
0x1fd5   : > { %v15684_v17 = vadd.f32 %v10988_v54, %v6647_v29 }
0x1fd7   : > { %v6720_v9 = vpack.c.bf16 %v15684_v17, %v15682_v23 }
0x1fd9   : > { %10997 = vmatmul.mubr.msk.bf16.vlgmr.msra.gmra.mrb[108].mxu0 %vm2607_vm3, %v6720_v9 }
0x1fda   : > { %11934 = vmatprep.mubr.msk.bf16.mxu0 %vm13513_vm8, %v13512_v4 }
0x20ac   : > { %v6809_v34 = vpop.f32.mrb[108].mxu0 }
0x20ad   : > { %v15698_v14 = vadd.f32 %v6809_v34, %v6725_v8  ;;  %v6811_v49 = vpop.f32.mrb[109].mxu0 }
0x20ae   : > { %v6813_v48 = vpop.f32.mrb[110].mxu0  ;;  %v6812_v38 = vadd.f32 %v6811_v49, %v6729_v55 }
0x20af   : > { %v15700_v20 = vadd.f32 %v6813_v48, %v6725_v8  ;;  %v6815_v1 = vpop.f32.mrb[111].mxu0  ;;  %v15704_v31 = vmul.f32 %v15698_v14, %v15698_v14 }
0x20b0   : > { %v6816_v62 = vadd.f32 %v6815_v1, %v6729_v55 }
0x20b1   : > { %6834 = vrot.lane.b32.xlu0 %v15704_v31, %s16593_s6  ;;  %v6819_v51 = vmul.f32 %v15700_v20, %v15700_v20  ;;  %v6820_v36 = vsel %vm2351_vm2, %v15704_v31, 0.0 }
0x20b2   : > { %v15710_v28 = vpack.c.bf16 %v6816_v62, %v6812_v38 }
0x20b3   : > { %6836 = vrot.lane.b32.xlu1 %v6819_v51, %s16593_s6  ;;  %v6823_v33 = vsel %vm2351_vm2, %v6819_v51, 0.0 }
0x20b5   : > { %6978 = vrot.lane.b32.xlu0 %v15704_v31, %s16590_s28 }
0x20b7   : > { %6996 = vrot.lane.b32.xlu1 %v15704_v31, %s16592_s5 }
0x20b9   : > { %7165 = vrot.lane.b32.xlu0 %v15704_v31, %s16505_s14 }
0x20bb   : > { %6998 = vrot.lane.b32.xlu1 %v6819_v51, %s16592_s5 }
0x20bd   : > { %7147 = vrot.lane.b32.xlu0 %v15704_v31, %s16589_s3 }
0x20bf   : > { %6980 = vrot.lane.b32.xlu1 %v6819_v51, %s16590_s28 }
0x20c1   : > { %7333 = vrot.lane.b32.xlu0 %v15704_v31, %s16595_s9 }
0x20c3   : > { %7167 = vrot.lane.b32.xlu1 %v6819_v51, %s16505_s14 }
0x20c5   : > { %7315 = vrot.lane.b32.xlu0 %v15704_v31, %s16588_s1 }
0x20c7   : > { %7149 = vrot.lane.b32.xlu1 %v6819_v51, %s16589_s3 }
0x20cb   : > { %7335 = vrot.lane.b32.xlu1 %v6819_v51, %s16595_s9 }
0x20cf   : > { %7317 = vrot.lane.b32.xlu1 %v6819_v51, %s16588_s1 }
0x2123   : > { %v6835_v3 = vpop.permute.xlu0 %6834 }
0x2124   : > { %v6840_v7 = vsel %vm2351_vm2, %v6835_v3, 0.0 }
0x2125   : > { %v6837_v60 = vpop.permute.xlu1 %6836  ;;  %6841 = vadd.xlane.f32.xlu0 %v6840_v7 }
0x2126   : > { %v6843_v27 = vsel %vm2351_vm2, %v6837_v60, 0.0 }
0x2127   : > { %6844 = vadd.xlane.f32.xlu1 %v6843_v27  ;;  %v6979_v16 = vpop.permute.xlu0 %6978 }
0x2128   : > { %v6984_v57 = vsel %vm2351_vm2, %v6979_v16, 0.0 }
0x2129   : > { %v6997_v56 = vpop.permute.xlu1 %6996 }
0x212a   : > { %v7002_v63 = vsel %vm2351_vm2, %v6997_v56, 0.0 }
0x212b   : > { %7003 = vadd.xlane.f32.xlu0 %v7002_v63  ;;  %v7166_v43 = vpop.permute.xlu0 %7165 }
0x212c   : > { %v7171_v44 = vsel %vm2351_vm2, %v7166_v43, 0.0 }
0x212d   : > { %v6999_v19 = vpop.permute.xlu1 %6998 }
0x212e   : > { %v7005_v25 = vsel %vm2351_vm2, %v6999_v19, 0.0 }
0x212f   : > { %7006 = vadd.xlane.f32.xlu0 %v7005_v25  ;;  %v7148_v35 = vpop.permute.xlu0 %7147 }
0x2130   : > { %v7153_v61 = vsel %vm2351_vm2, %v7148_v35, 0.0 }
0x2131   : > { %v6981_v41 = vpop.permute.xlu1 %6980 }
0x2132   : > { %v6987_v18 = vsel %vm2351_vm2, %v6981_v41, 0.0  ;;  %v7015_v41 = vstv %s15750_s11  ;;  %s11011_s11 = sld [smem:[#allocation2 + $0xb]] }
0x2133   : > { %6988 = vadd.xlane.f32.xlu1 %v6987_v18  ;;  %6985 = vadd.xlane.f32.xlu0 %v6984_v57  ;;  %v7334_v30 = vpop.permute.xlu0 %7333 }
0x2134   : > { %v7339_v52 = vsel %vm2351_vm2, %v7334_v30, 0.0 }
0x2135   : > { %v7168_v50 = vpop.permute.xlu1 %7167 }
0x2136   : > { %v7174_v32 = vsel %vm2351_vm2, %v7168_v50, 0.0 }
0x2137   : > { %7175 = vadd.xlane.f32.xlu1 %v7174_v32  ;;  %7172 = vadd.xlane.f32.xlu0 %v7171_v44  ;;  %v7316_v13 = vpop.permute.xlu0 %7315 }
0x2138   : > { %v7321_v37 = vsel %vm2351_vm2, %v7316_v13, 0.0 }
0x2139   : > { %v7150_v26 = vpop.permute.xlu1 %7149 }
0x213a   : > { %v7156_v12 = vsel %vm2351_vm2, %v7150_v26, 0.0 }
0x213b   : > { %7157 = vadd.xlane.f32.xlu1 %v7156_v12  ;;  %7154 = vadd.xlane.f32.xlu0 %v7153_v61 }
0x213d   : > { %v7336_v47 = vpop.permute.xlu1 %7335 }
0x213e   : > { %v7342_v11 = vsel %vm2351_vm2, %v7336_v47, 0.0 }
0x213f   : > { %7343 = vadd.xlane.f32.xlu1 %v7342_v11  ;;  %7340 = vadd.xlane.f32.xlu0 %v7339_v52 }
0x2141   : > { %v7318_v2 = vpop.permute.xlu1 %7317 }
0x2142   : > { %v7324_v42 = vsel %vm2351_vm2, %v7318_v2, 0.0 }
0x2143   : > { %7325 = vadd.xlane.f32.xlu1 %v7324_v42  ;;  %7322 = vadd.xlane.f32.xlu0 %v7321_v37  ;;  %v7184_v42 = vstv %s15756_s8  ;;  %s10998_s8 = sld [smem:[#allocation2 + $0x8]] }
0x2147   : > { %6824 = vadd.xlane.f32.xlu1 %v6823_v33  ;;  %6821 = vadd.xlane.f32.xlu0 %v6820_v36 }
0x21b2   : > { %v6842_v59 = vpop.xlane.xlu0 %6841 }
0x21b3   : > { %v6846_v40 = vmax.f32 %v6842_v59, 1e-24 }
0x21b4   : > { %v6845_v45 = vpop.xlane.xlu1 %6844 }
0x21b5   : > { %13176 = vrsqrt.f32 %v6846_v40  ;;  %v6847_v46 = vmax.f32 %v6845_v45, 1e-24 }
0x21b7   : > { %13178 = vrsqrt.f32 %v6847_v46 }
0x21b8   : > { %v7004_v6 = vpop.xlane.xlu0 %7003 }
0x21b9   : > { %v7008_v5 = vmax.f32 %v7004_v6, 1e-24 }
0x21bb   : > { %13180 = vrsqrt.f32 %v7008_v5 }
0x21bc   : > { %v7007_v58 = vpop.xlane.xlu0 %7006 }
0x21bd   : > { %v7009_v0 = vmax.f32 %v7007_v58, 1e-24 }
0x21bf   : > { %v13177_v10 = vpop.eup %13176  ;;  %13182 = vrsqrt.f32 %v7009_v0 }
0x21c0   : > { %v6989_v54 = vpop.xlane.xlu1 %6988  ;;  %v6986_v29 = vpop.xlane.xlu0 %6985  ;;  %v6850_v22 = vmul.f32 %v13177_v10, %v15698_v14 }
0x21c1   : > { %v13179_v9 = vpop.eup %13178  ;;  %v6991_v24 = vmax.f32 %v6989_v54, 1e-24  ;;  %v6990_v53 = vmax.f32 %v6986_v29, 1e-24  ;;  %v7352_v29 = vstv %s11011_s11  ;;  %s16611_s11 = sld [smem:[#allocation37_spill]] }
0x21c2   : > { %v6851_v8 = vmul.f32 %v13179_v9, %v15700_v20 }
0x21c3   : > { %13184 = vrsqrt.f32 %v6991_v24 }
0x21c4   : > { %13186 = vrsqrt.f32 %v6990_v53  ;;  %v7176_v34 = vpop.xlane.xlu1 %7175  ;;  %v7173_v55 = vpop.xlane.xlu0 %7172  ;;  %v6857_v49 = vpack.c.bf16 %v6851_v8, %v6850_v22 }
0x21c5   : > { %v7178_v48 = vmax.f32 %v7176_v34, 1e-24  ;;  %v7177_v1 = vmax.f32 %v7173_v55, 1e-24  ;;  %v13181_v31 = vpop.eup %13180 }
0x21c6   : > { %6861 = vrot.lane.b32.xlu0 %v6857_v49, %s16593_s6  ;;  %v7012_v60 = vmul.f32 %v13181_v31, %v15698_v14 }
0x21c7   : > { %13188 = vrsqrt.f32 %v7178_v48 }
0x21c8   : > { %13190 = vrsqrt.f32 %v7177_v1  ;;  %v7158_v38 = vpop.xlane.xlu1 %7157  ;;  %v7155_v62 = vpop.xlane.xlu0 %7154 }
0x21c9   : > { %v13183_v51 = vpop.eup %13182  ;;  %v7160_v3 = vmax.f32 %v7158_v38, 1e-24  ;;  %v7159_v7 = vmax.f32 %v7155_v62, 1e-24 }
0x21ca   : > { %v7013_v27 = vmul.f32 %v13183_v51, %v15700_v20 }
0x21cb   : > { %13192 = vrsqrt.f32 %v7160_v3 }
0x21cc   : > { %13194 = vrsqrt.f32 %v7159_v7  ;;  %v7344_v16 = vpop.xlane.xlu1 %7343  ;;  %v7341_v56 = vpop.xlane.xlu0 %7340  ;;  %v7019_v63 = vpack.c.bf16 %v7013_v27, %v7012_v60  ;;  %v6853_v7 = vstv %s10998_s8  ;;  %s16612_s8 = sld [smem:[#allocation40_spill]] }
0x21cd   : > { %v13185_v43 = vpop.eup %13184  ;;  %v7346_v19 = vmax.f32 %v7344_v16, 1e-24  ;;  %v7345_v25 = vmax.f32 %v7341_v56, 1e-24 }
0x21ce   : > { %v13187_v18 = vpop.eup %13186  ;;  %7027 = vrot.lane.b32.xlu1 %v7019_v63, %s16592_s5  ;;  %v6995_v57 = vmul.f32 %v13185_v43, %v15700_v20 }
0x21cf   : > { %13196 = vrsqrt.f32 %v7346_v19  ;;  %v6994_v35 = vmul.f32 %v13187_v18, %v15698_v14 }
0x21d0   : > { %13198 = vrsqrt.f32 %v7345_v25  ;;  %v7326_v50 = vpop.xlane.xlu1 %7325  ;;  %v7323_v32 = vpop.xlane.xlu0 %7322  ;;  %v7017_v44 = vmul.f32 %v7015_v41, %v6995_v57 }
0x21d1   : > { %v13189_v30 = vpop.eup %13188  ;;  %v7328_v26 = vmax.f32 %v7326_v50, 1e-24  ;;  %v7327_v12 = vmax.f32 %v7323_v32, 1e-24  ;;  %v7016_v61 = vmul.f32 %v7015_v41, %v6994_v35  ;;  %v6858_v35 = vld [vmem:[%s16611_s11] sm:$0xff]  ;;  %v6859_v32 = vld [vmem:[%s16611_s11 + $0x8] sm:$0xff] }
0x21d2   : > { %v13191_v47 = vpop.eup %13190  ;;  %v7182_v13 = vmul.f32 %v13189_v30, %v15700_v20 }
0x21d3   : > { %13200 = vrsqrt.f32 %v7328_v26  ;;  %v7018_v11 = vpack.c.bf16 %v7017_v44, %v7016_v61  ;;  %v7181_v52 = vmul.f32 %v13191_v47, %v15698_v14 }
0x21d4   : > { %13202 = vrsqrt.f32 %v7327_v12  ;;  %v6825_v55 = vpop.xlane.xlu1 %6824  ;;  %v6822_v49 = vpop.xlane.xlu0 %6821 }
0x21d5   : > { %v13193_v2 = vpop.eup %13192  ;;  %7024 = vrot.lane.b32.xlu1 %v7018_v11, %s16590_s28  ;;  %v7188_v36 = vpack.c.bf16 %v7182_v13, %v7181_v52  ;;  %v6827_v48 = vmax.f32 %v6825_v55, 1e-24  ;;  %v6826_v1 = vmax.f32 %v6822_v49, 1e-24  ;;  %v11002_v52 = vld [vmem:[%s16611_s11 + $0x10] sm:$0xff] }
0x21d6   : > { %v13195_v37 = vpop.eup %13194  ;;  %v7164_v33 = vmul.f32 %v13193_v2, %v15700_v20  ;;  %v11003_v2 = vld [vmem:[%s16611_s11 + $0x18] sm:$0xff] }
0x21d7   : > { %v7163_v59 = vmul.f32 %v13195_v37, %v15698_v14  ;;  %13204 = vrsqrt.f32 %v6827_v48 }
0x21d8   : > { %v7186_v40 = vmul.f32 %v7184_v42, %v7164_v33  ;;  %13206 = vrsqrt.f32 %v6826_v1 }
0x21d9   : > { %v13197_v45 = vpop.eup %13196  ;;  %7196 = vrot.lane.b32.xlu1 %v7188_v36, %s16505_s14  ;;  %v7185_v46 = vmul.f32 %v7184_v42, %v7163_v59 }
0x21da   : > { %v13199_v6 = vpop.eup %13198  ;;  %v7350_v5 = vmul.f32 %v13197_v45, %v15700_v20 }
0x21db   : > { %v7187_v58 = vpack.c.bf16 %v7186_v40, %v7185_v46  ;;  %v7349_v0 = vmul.f32 %v13199_v6, %v15698_v14  ;;  %v11007_v46 = vld [vmem:[%s16611_s11 + $0x20] sm:$0xff] }
0x21dd   : > { %v13201_v10 = vpop.eup %13200  ;;  %7193 = vrot.lane.b32.xlu0 %v7187_v58, %s16589_s3  ;;  %v7356_v54 = vpack.c.bf16 %v7350_v5, %v7349_v0  ;;  %v11008_v5 = vld [vmem:[%s16611_s11 + $0x28] sm:$0xff] }
0x21de   : > { %v13203_v9 = vpop.eup %13202  ;;  %v7332_v24 = vmul.f32 %v13201_v10, %v15700_v20 }
0x21df   : > { %7364 = vrot.lane.b32.xlu1 %v7356_v54, %s16595_s9  ;;  %v7331_v53 = vmul.f32 %v13203_v9, %v15698_v14 }
0x21e0   : > { %v7354_v22 = vmul.f32 %v7352_v29, %v7332_v24 }
0x21e1   : > { %v7353_v8 = vmul.f32 %v7352_v29, %v7331_v53  ;;  %v13205_v31 = vpop.eup %13204  ;;  %v11012_v53 = vld [vmem:[%s16611_s11 + $0x30] sm:$0xff] }
0x21e2   : > { %v13207_v38 = vpop.eup %13206  ;;  %v6831_v62 = vmul.f32 %v13205_v31, %v15700_v20 }
0x21e3   : > { %v7355_v34 = vpack.c.bf16 %v7354_v22, %v7353_v8  ;;  %v6830_v51 = vmul.f32 %v13207_v38, %v15698_v14  ;;  %v11013_v8 = vld [vmem:[%s16611_s11 + $0x38] sm:$0xff]  ;;  %s16613_s11 = sld [smem:[#allocation41_spill]] }
0x21e4   : > { %v6855_v16 = vmul.f32 %v6853_v7, %v6831_v62 }
0x21e5   : > { %7361 = vrot.lane.b32.xlu0 %v7355_v34, %s16588_s1  ;;  %v6854_v27 = vmul.f32 %v6853_v7, %v6830_v51 }
0x21e7   : > { %v6856_v56 = vpack.c.bf16 %v6855_v16, %v6854_v27 }
0x2238   : > { %v6862_v3 = vpop.permute.xlu0 %6861 }
0x2239   : > { %v6867_v60 = vsel %vm2351_vm2, %v6862_v3, 0 }
0x223a   : > { %11921 = vmatpush3.bf16.xpose.msra.mxu1 %v6867_v60 }
0x223b   : > { %11926 = vmatprep.subr.bf16.mxu1 %v13512_v4 }
0x2240   : > { %v7028_v63 = vpop.permute.xlu1 %7027 }
0x2241   : > { %v7033_v43 = vsel %vm2351_vm2, %v7028_v63, 0  ;;  %11923 = vmatmul.mubr.msk.bf16.vlgmr.msra.gmra.mrb[40].mxu1 %vm2351_vm2, %v6856_v56 }
0x2242   : > { %11927 = vmatpush3.bf16.msra.mxu1 %v15710_v28  ;;  %11933 = vmatpush3.bf16.xpose.msra.mxu0 %v7033_v43 }
0x2243   : > { %11944 = vmatprep.subr.bf16.mxu0 %v13512_v4  ;;  %11928 = vmatprep.mubr.msk.bf16.mxu1 %vm13513_vm8, %v13512_v4 }
0x2244   : > { %11938 = vmatprep.subr.bf16.mxu1 %v13512_v4 }
0x2247   : > { %v7025_v14 = vpop.permute.xlu1 %7024 }
0x2249   : > { %11935 = vmatmul.mubr.msk.bf16.vlgmr.msra.gmra.mrb[112].mxu0 %vm2351_vm2, %v7025_v14 }
0x224a   : > { %11946 = vmatprep.mubr.msk.bf16.mxu0 %vm13513_vm8, %v13512_v4 }
0x224b   : > { %v7197_v20 = vpop.permute.xlu1 %7196 }
0x224c   : > { %v7202_v19 = vsel %vm2351_vm2, %v7197_v20, 0 }
0x224d   : > { %11945 = vmatpush3.bf16.xpose.msra.mxu0 %v7202_v19 }
0x224e   : > { %11956 = vmatprep.subr.bf16.mxu0 %v13512_v4 }
0x224f   : > { %v7194_v41 = vpop.permute.xlu0 %7193 }
0x2251   : > { %v7365_v25 = vpop.permute.xlu1 %7364 }
0x2252   : > { %v7370_v18 = vsel %vm2351_vm2, %v7365_v25, 0 }
0x2254   : > { %11947 = vmatmul.mubr.msk.bf16.vlgmr.msra.gmra.mrb[116].mxu0 %vm2351_vm2, %v7194_v41 }
0x2255   : > { %11957 = vmatpush3.bf16.xpose.msra.mxu0 %v7370_v18  ;;  %11958 = vmatprep.mubr.msk.bf16.mxu0 %vm13513_vm8, %v13512_v4 }
0x2256   : > { %11968 = vmatprep.subr.bf16.mxu0 %v13512_v4 }
0x2257   : > { %v7362_v57 = vpop.permute.xlu0 %7361 }
0x225c   : > { %11959 = vmatmul.mubr.msk.bf16.vlgmr.msra.gmra.mrb[120].mxu0 %vm2351_vm2, %v7362_v57 }
0x225d   : > { %11976 = vmatprep.mubr.msk.bf16.mxu0 %vm13513_vm8, %v13512_v4 }
0x2314   : > { %v6903_v50 = vpop.f32.mrb[40].mxu1 }
0x2315   : > { %v6904_v44 = vadd.f32 %v6903_v50, %v6858_v35  ;;  %v11924_v30 = vpop.f32.mrb[41].mxu1 }
0x2316   : > { %v6906_v26 = vpop.f32.mrb[42].mxu1 }
0x2317   : > { %v6907_v12 = vadd.f32 %v6906_v26, %v6859_v32  ;;  %v11925_v61 = vpop.f32.mrb[43].mxu1  ;;  %v6910_v47 = vsel %vm2351_vm2, %v6904_v44, -inf }
0x2318   : > { %6911 = vmax.xlane.f32.xlu1 %v6910_v47 }
0x2319   : > { %v6913_v11 = vsel %vm2351_vm2, %v6907_v12, -inf }
0x231a   : > { %6914 = vmax.xlane.f32.xlu0 %v6913_v11 }
0x231c   : > { %v7069_v13 = vpop.f32.mrb[112].mxu0 }
0x231d   : > { %v15805_v42 = vadd.f32 %v11002_v52, %v7069_v13  ;;  %v11936_v37 = vpop.f32.mrb[113].mxu0 }
0x231e   : > { %v7072_v33 = vpop.f32.mrb[114].mxu0 }
0x231f   : > { %v7073_v36 = vadd.f32 %v11003_v2, %v7072_v33  ;;  %v11937_v59 = vpop.f32.mrb[115].mxu0  ;;  %v7076_v40 = vsel %vm2351_vm2, %v15805_v42, -inf }
0x2320   : > { %7077 = vmax.xlane.f32.xlu0 %v7076_v40 }
0x2321   : > { %v7079_v45 = vsel %vm2351_vm2, %v7073_v36, -inf }
0x2324   : > { %7080 = vmax.xlane.f32.xlu0 %v7079_v45 }
0x2327   : > { %v7238_v6 = vpop.f32.mrb[116].mxu0 }
0x2328   : > { %v15812_v58 = vadd.f32 %v11007_v46, %v7238_v6  ;;  %v11948_v0 = vpop.f32.mrb[117].mxu0 }
0x2329   : > { %v7241_v10 = vpop.f32.mrb[118].mxu0 }
0x232a   : > { %v7242_v54 = vadd.f32 %v11008_v5, %v7241_v10  ;;  %v11949_v29 = vpop.f32.mrb[119].mxu0  ;;  %v7245_v9 = vsel %vm2351_vm2, %v15812_v58, -inf }
0x232b   : > { %7246 = vmax.xlane.f32.xlu1 %v7245_v9 }
0x232c   : > { %v7248_v24 = vsel %vm2351_vm2, %v7242_v54, -inf }
0x232d   : > { %7249 = vmax.xlane.f32.xlu0 %v7248_v24 }
0x232f   : > { %v7406_v22 = vpop.f32.mrb[120].mxu0 }
0x2330   : > { %v7407_v34 = vadd.f32 %v11012_v53, %v7406_v22  ;;  %v11960_v55 = vpop.f32.mrb[121].mxu0 }
0x2331   : > { %v7409_v49 = vpop.f32.mrb[122].mxu0 }
0x2332   : > { %v7410_v48 = vadd.f32 %v11013_v8, %v7409_v49  ;;  %v11961_v1 = vpop.f32.mrb[123].mxu0  ;;  %v7413_v31 = vsel %vm2351_vm2, %v7407_v34, -inf }
0x2333   : > { %7414 = vmax.xlane.f32.xlu1 %v7413_v31 }
0x2334   : > { %v7416_v38 = vsel %vm2351_vm2, %v7410_v48, -inf }
0x2335   : > { %7417 = vmax.xlane.f32.xlu0 %v7416_v38 }
0x23a5   : > { %v6912_v62 = vpop.xlane.xlu1 %6911 }
0x23a6   : > { %v6916_v51 = vsub.f32 %v6904_v44, %v6912_v62 }
0x23a7   : > { %v6915_v3 = vpop.xlane.xlu0 %6914 }
0x23a8   : > { %v6918_v7 = vmul.f32 1.442695, %v6916_v51  ;;  %v6917_v60 = vsub.f32 %v6907_v12, %v6915_v3 }
0x23aa   : > { %13208 = vpow2.f32 %v6918_v7  ;;  %v6920_v27 = vmul.f32 1.442695, %v6917_v60 }
0x23ac   : > { %13210 = vpow2.f32 %v6920_v27 }
0x23ad   : > { %v7078_v16 = vpop.xlane.xlu0 %7077 }
0x23ae   : > { %v7082_v11 = vsub.f32 %v15805_v42, %v7078_v16 }
0x23b0   : > { %v7084_v13 = vmul.f32 1.442695, %v7082_v11 }
0x23b1   : > { %v7081_v56 = vpop.xlane.xlu0 %7080 }
0x23b2   : > { %v7083_v63 = vsub.f32 %v7073_v36, %v7081_v56 }
0x23b4   : > { %v13209_v43 = vpop.eup %13208  ;;  %v7086_v14 = vmul.f32 1.442695, %v7083_v63 }
0x23b5   : > { %v6922_v20 = vsel %vm2351_vm2, %v13209_v43, 0.0 }
0x23b6   : > { %v13211_v19 = vpop.eup %13210  ;;  %13212 = vpow2.f32 %v7086_v14  ;;  %6923 = vadd.xlane.f32.xlu1 %v6922_v20 }
0x23b7   : > { %v6925_v25 = vsel %vm2351_vm2, %v13211_v19, 0.0 }
0x23b8   : > { %6926 = vadd.xlane.f32.xlu0 %v6925_v25  ;;  %v7247_v52 = vpop.xlane.xlu1 %7246 }
0x23b9   : > { %v7251_v2 = vsub.f32 %v15812_v58, %v7247_v52  ;;  %v12635_v52 = vld [vmem:[%s16612_s8 + $0x18] sm:$0xff]  }
0x23ba   : > { %v7250_v41 = vpop.xlane.xlu0 %7249 }
0x23bb   : > { %v7252_v18 = vsub.f32 %v7242_v54, %v7250_v41  ;;  %v7253_v33 = vmul.f32 1.442695, %v7251_v2 }
0x23bd   : > { %v7255_v57 = vmul.f32 1.442695, %v7252_v18 }
0x23bf   : > { %13214 = vpow2.f32 %v7255_v57 }
0x23c0   : > { %v13213_v35 = vpop.eup %13212  ;;  %v7415_v37 = vpop.xlane.xlu1 %7414 }
0x23c1   : > { %v7091_v50 = vsel %vm2351_vm2, %v13213_v35, 0.0  ;;  %v7419_v36 = vsub.f32 %v7407_v34, %v7415_v37 }
0x23c2   : > { %v7418_v32 = vpop.xlane.xlu0 %7417  ;;  %7092 = vadd.xlane.f32.xlu0 %v7091_v50 }
0x23c3   : > { %v7420_v44 = vsub.f32 %v7410_v48, %v7418_v32  ;;  %v7421_v59 = vmul.f32 1.442695, %v7419_v36 }
0x23c5   : > { %v7423_v30 = vmul.f32 1.442695, %v7420_v44  ;;  %v12633_v44 = vld [vmem:[%s16612_s8 + $0x8] sm:$0xff]  }
0x23c7   : > { %13216 = vpow2.f32 %v7423_v30  ;;  %7100 = vrot.lane.b32.xlu1 %v15710_v28, %s16590_s28 }
0x23c8   : > { %13218 = vpow2.f32 %v7084_v13 }
0x23c9   : > { %v15826_v26 = vpop.eup %13214  ;;  %13220 = vpow2.f32 %v7253_v33 }
0x23ca   : > { %v7260_v12 = vsel %vm2351_vm2, %v15826_v26, 0.0  ;;  %13222 = vpow2.f32 %v7421_v59 }
0x23cb   : > { %7261 = vadd.xlane.f32.xlu0 %v7260_v12 }
0x23d1   : > { %v15830_v61 = vpop.eup %13216 }
0x23d2   : > { %v7428_v47 = vsel %vm2351_vm2, %v15830_v61, 0.0  ;;  %v13219_v40 = vpop.eup %13218 }
0x23d3   : > { %7429 = vadd.xlane.f32.xlu0 %v7428_v47  ;;  %v7088_v45 = vsel %vm2351_vm2, %v13219_v40, 0.0  ;;  %v13221_v46 = vpop.eup %13220 }
0x23d4   : > { %v7257_v42 = vsel %vm2351_vm2, %v13221_v46, 0.0  ;;  %v13223_v6 = vpop.eup %13222 }
0x23d5   : > { %v7425_v5 = vsel %vm2351_vm2, %v13223_v6, 0.0 }
0x23e9   : > { %7268 = vrot.lane.b32.xlu0 %v15710_v28, %s16589_s3 }
0x23eb   : > { %7089 = vadd.xlane.f32.xlu1 %v7088_v45 }
0x23ef   : > { %7258 = vadd.xlane.f32.xlu1 %v7257_v42 }
0x23f3   : > { %7426 = vadd.xlane.f32.xlu1 %v7425_v5 }
0x2404   : > { %7436 = vrot.lane.b32.xlu1 %v15710_v28, %s16588_s1 }
0x2443   : > { %v6924_v58 = vpop.xlane.xlu1 %6923 }
0x2444   : > { %13224 = vrcp.f32 %v6924_v58 }
0x2445   : > { %v6927_v0 = vpop.xlane.xlu0 %6926 }
0x2446   : > { %13226 = vrcp.f32 %v6927_v0 }
0x2447   : > { %v7101_v53 = vpop.permute.xlu1 %7100 }
0x244e   : > { %v13225_v10 = vpop.eup %13224 }
0x244f   : > { %v6929_v29 = vmul.f32 %v13225_v10, %v13209_v43  ;;  %v7093_v22 = vpop.xlane.xlu0 %7092 }
0x2450   : > { %v13227_v54 = vpop.eup %13226  ;;  %13228 = vrcp.f32 %v7093_v22 }
0x2451   : > { %v6931_v9 = vmul.f32 %v13227_v54, %v13211_v19 }
0x2453   : > { %v6932_v24 = vpack.c.bf16 %v6931_v9, %v6929_v29 }
0x2455   : > { %11929 = vmatmul.mubr.msk.bf16.vlgmr.msra.gmra.mrb[44].mxu1 %vm2351_vm2, %v6932_v24 }
0x2456   : > { %11939 = vmatpush3.bf16.msra.mxu1 %v7101_v53  ;;  %11940 = vmatprep.mubr.msk.bf16.mxu1 %vm13513_vm8, %v13512_v4 }
0x2457   : > { %11950 = vmatprep.subr.bf16.mxu1 %v13512_v4 }
0x2458   : > { %v7262_v8 = vpop.xlane.xlu0 %7261 }
0x245a   : > { %v13229_v55 = vpop.eup %13228 }
0x245b   : > { %v7097_v31 = vmul.f32 %v13229_v55, %v13213_v35  ;;  %v12632_v35 = vld [vmem:[%s16612_s8] sm:$0xff]  }
0x245c   : > { %11969 = vmatpush3.bf16.msra.mxu0 %v12632_v35  ;;  %v11016_v55 = vld [vmem:[%s16613_s11] ss:$0 sm:$0xff]  ;;  %s16615_s11 = sld [smem:[#allocation42_spill]] }
0x245d   : > { %11970 = vmatprep.subr.bf16.mxu0 %v13512_v4 }
0x2460   : > { %v7430_v49 = vpop.xlane.xlu0 %7429  ;;  %11971 = vmatpush3.bf16.msra.mxu0 %v12633_v44 }
0x2461   : > { %11972 = vmatprep.subr.bf16.mxu0 %v13512_v4 }
0x2464   : > { %v7269_v3 = vpop.permute.xlu0 %7268 }
0x2478   : > { %v7090_v28 = vpop.xlane.xlu1 %7089 }
0x2479   : > { %13230 = vrcp.f32 %v7090_v28 }
0x247c   : > { %v7259_v34 = vpop.xlane.xlu1 %7258 }
0x247d   : > { %13232 = vrcp.f32 %v7259_v34 }
0x247e   : > { %13234 = vrcp.f32 %v7262_v8 }
0x2480   : > { %v7427_v48 = vpop.xlane.xlu1 %7426 }
0x2481   : > { %13236 = vrcp.f32 %v7427_v48 }
0x2482   : > { %13238 = vrcp.f32 %v7430_v49 }
0x2483   : > { %v13231_v1 = vpop.eup %13230 }
0x2484   : > { %v7095_v38 = vmul.f32 %v13231_v1, %v13219_v40  ;;  %v7437_v63 = vpop.permute.xlu1 %7436 }
0x2486   : > { %v7098_v62 = vpack.c.bf16 %v7097_v31, %v7095_v38 }
0x2487   : > { %v13233_v51 = vpop.eup %13232 }
0x2488   : > { %11941 = vmatmul.mubr.msk.bf16.vlgmr.msra.gmra.mrb[48].mxu1 %vm2351_vm2, %v7098_v62  ;;  %v13235_v7 = vpop.eup %13234  ;;  %v7264_v60 = vmul.f32 %v13233_v51, %v13221_v46 }
0x2489   : > { %11951 = vmatpush3.bf16.msra.mxu1 %v7269_v3  ;;  %11952 = vmatprep.mubr.msk.bf16.mxu1 %vm13513_vm8, %v13512_v4  ;;  %v7266_v27 = vmul.f32 %v13235_v7, %v15826_v26 }
0x248a   : > { %11962 = vmatprep.subr.bf16.mxu1 %v13512_v4 }
0x248b   : > { %v7267_v16 = vpack.c.bf16 %v7266_v27, %v7264_v60  ;;  %v13237_v56 = vpop.eup %13236 }
0x248c   : > { %v13239_v43 = vpop.eup %13238  ;;  %v7432_v14 = vmul.f32 %v13237_v56, %v13223_v6 }
0x248d   : > { %v7434_v20 = vmul.f32 %v13239_v43, %v15830_v61  ;;  %v12634_v61 = vld [vmem:[%s16612_s8 + $0x10] sm:$0xff]   ;;  %s16616_s8 = sld [smem:[#allocation43_spill]] }
0x248e   : > { %11973 = vmatpush3.bf16.msra.mxu0 %v12634_v61 }
0x248f   : > { %v7435_v19 = vpack.c.bf16 %v7434_v20, %v7432_v14  ;;  %11974 = vmatprep.subr.bf16.mxu0 %v13512_v4 }
0x2490   : > { %11953 = vmatmul.mubr.msk.bf16.vlgmr.msra.gmra.mrb[52].mxu1 %vm2351_vm2, %v7267_v16 }
0x2491   : > { %11963 = vmatpush3.bf16.msra.mxu1 %v7437_v63  ;;  %11964 = vmatprep.mubr.msk.bf16.mxu1 %vm13513_vm8, %v13512_v4 }
0x2492   : > { %11975 = vmatpush3.bf16.msra.mxu0 %v12635_v52 }
0x2498   : > { %11965 = vmatmul.mubr.msk.bf16.vlgmr.msra.gmra.mrb[56].mxu1 %vm2351_vm2, %v7435_v19 }
0x2499   : > { %7719 = vmatprep.mubr.bf16.mxu1 %v13514_v39 }
0x2528   : > { %v6971_v25 = vpop.f32.mrb[44].mxu1 }
0x2529   : > { %v11930_v41 = vpop.f32.mrb[45].mxu1 }
0x252a   : > { %v6974_v18 = vpop.f32.mrb[46].mxu1 }
0x252b   : > { %v11931_v57 = vpop.f32.mrb[47].mxu1 }
0x255b   : > { %v7140_v50 = vpop.f32.mrb[48].mxu1 }
0x255c   : > { %v11942_v32 = vpop.f32.mrb[49].mxu1 }
0x255d   : > { %v7143_v30 = vpop.f32.mrb[50].mxu1 }
0x255e   : > { %v12551_v26 = vpack.i.bf16 %v7143_v30, %v7140_v50  ;;  %v11943_v12 = vpop.f32.mrb[51].mxu1 }
0x2560   : > { %12552 = vrot.lane.b32.xlu1 %v12551_v26, %s16595_s9 }
0x2563   : > { %v7308_v47 = vpop.f32.mrb[52].mxu1 }
0x2564   : > { %v11954_v11 = vpop.f32.mrb[53].mxu1 }
0x2565   : > { %v7311_v13 = vpop.f32.mrb[54].mxu1 }
0x2566   : > { %v12556_v2 = vpack.i.bf16 %v7311_v13, %v7308_v47  ;;  %v11955_v37 = vpop.f32.mrb[55].mxu1  ;;  %v11022_v13 = vld [vmem:[%s16615_s11] ss:$0 sm:$0xff]  ;;  %s16619_s11 = sld [smem:[#allocation47_spill]] }
0x2568   : > { %12557 = vrot.lane.b32.xlu1 %v12556_v2, %s16505_s14  ;;  %s16614_s14 = sld [smem:[#allocation44_spill]] }
0x256b   : > { %v7476_v33 = vpop.f32.mrb[56].mxu1 }
0x256c   : > { %v11966_v36 = vpop.f32.mrb[57].mxu1 }
0x256d   : > { %v7479_v59 = vpop.f32.mrb[58].mxu1  ;;  %v11023_v36 = vld [vmem:[%s16616_s8] ss:$0 sm:$0xff]  ;;  %s16618_s8 = sld [smem:[#allocation45_spill]] }
0x256e   : > { %v12561_v40 = vpack.i.bf16 %v7479_v59, %v7476_v33  ;;  %v11967_v45 = vpop.f32.mrb[59].mxu1  ;;  %v12636_v41 = vld [vmem:[%s16614_s14] ss:$8 sps:$4 sm:$0xff]   ;;  %v12639_v57 = vld [vmem:[%s16614_s14 + $0x10] ss:$8 sps:$4 sm:$0xff]  }
0x256f   : > { %v12644_v35 = vld [vmem:[%s16614_s14 + $0x24] ss:$8 sps:$4 sm:$0xff]   ;;  %v12642_v50 = vld [vmem:[%s16614_s14 + $0x20] ss:$8 sps:$4 sm:$0xff]   ;;  %v12647_v32 = vld [vmem:[%s16614_s14 + $0x34] ss:$8 sps:$4 sm:$0xff]  }
0x2570   : > { %12562 = vrot.lane.b32.xlu0 %v12561_v40, %s16592_s5  ;;  %v12645_v44 = vld [vmem:[%s16614_s14 + $0x30] ss:$8 sps:$4 sm:$0xff]  }
0x25d2   : > { %v12553_v46 = vpop.permute.xlu1 %12552 }
0x25d3   : > { %v12555_v6 = vunpack.i.h.bf16 %v12553_v46  ;;  %v12554_v5 = vunpack.i.l.bf16 %v12553_v46 }
0x25d5   : > { %v7508_v54 = vsel %vm2351_vm2, %v6974_v18, %v12555_v6  ;;  %v7507_v29 = vsel %vm2351_vm2, %v6971_v25, %v12554_v5  ;;  %v12638_v25 = vld [vmem:[%s16614_s14 + $0x4] ss:$8 sps:$4 sm:$0xff]   ;;  %v12641_v18 = vld [vmem:[%s16614_s14 + $0x14] ss:$8 sps:$4 sm:$0xff]   ;;  %s16623_s14 = sld [smem:[#allocation52_spill]] }
0x25d6   : > { %7687 = vmatprep.subr.bf16.mxu1 %v12638_v25 }
0x25d7   : > { %7688 = vmatpush1.bf16.msra.mxu1 %v12636_v41 }
0x25d8   : > { %7689 = vmatprep.subr.bf16.mxu1 %v12641_v18 }
0x25da   : > { %v12558_v42 = vpop.permute.xlu1 %12557 }
0x25db   : > { %v12560_v58 = vunpack.i.h.bf16 %v12558_v42  ;;  %v12559_v0 = vunpack.i.l.bf16 %v12558_v42  ;;  %7690 = vmatpush1.bf16.msra.mxu1 %v12639_v57 }
0x25dc   : > { %7691 = vmatprep.subr.bf16.mxu1 %v12644_v35 }
0x25dd   : > { %v7510_v53 = vsel %vm2074_vm1, %v7508_v54, %v12560_v58  ;;  %v7509_v22 = vsel %vm2074_vm1, %v7507_v29, %v12559_v0  ;;  %v12648_v58 = vld [vmem:[%s16617_s13 + $0x40] sm:$0xff]   ;;  %v12653_v54 = vld [vmem:[%s16617_s13 + $0x10] sm:$0xff]   ;;  %v12654_v29 = vld [vmem:[%s16617_s13 + $0x58] sm:$0xff]  }
0x25de   : > { %v12649_v0 = vld [vmem:[%s16617_s13] sm:$0xff]   ;;  %11405 = vmatprep.subr.bf16.mxu0 %v12648_v58 }
0x25df   : > { %7692 = vmatpush1.bf16.msra.mxu1 %v12642_v50 }
0x25e0   : > { %7693 = vmatprep.subr.bf16.mxu1 %v12647_v32 }
0x25e2   : > { %v12563_v10 = vpop.permute.xlu0 %12562 }
0x25e3   : > { %v12565_v9 = vunpack.i.h.bf16 %v12563_v10  ;;  %v12564_v24 = vunpack.i.l.bf16 %v12563_v10  ;;  %7694 = vmatpush1.bf16.msra.mxu1 %v12645_v44  ;;  %v12651_v10 = vld [vmem:[%s16617_s13 + $0x8] sm:$0xff]  }
0x25e5   : > { %v7512_v28 = vsel %vm1996_vm0, %v7510_v53, %v12565_v9  ;;  %v7511_v8 = vsel %vm1996_vm0, %v7509_v22, %v12564_v24  ;;  %v12655_v9 = vld [vmem:[%s16617_s13 + $0x18] sm:$0xff]   ;;  %v12656_v24 = vld [vmem:[%s16617_s13 + $0x60] sm:$0xff]   ;;  %v12658_v22 = vld [vmem:[%s16617_s13 + $0x68] sm:$0xff]  }
0x25e6   : > { %v7513_v34 = vpack.c.bf16 %v7512_v28, %v7511_v8  ;;  %v12657_v53 = vld [vmem:[%s16617_s13 + $0x20] sm:$0xff]   ;;  %v12659_v28 = vld [vmem:[%s16617_s13 + $0x28] sm:$0xff]   ;;  %v12660_v8 = vld [vmem:[%s16617_s13 + $0x70] sm:$0xff]  }
0x25e8   : > { %11977 = vmatmul.mubr.msk.bf16.vlgmr.msra.gmra.mrb[124].mxu0 %vm2607_vm3, %v7513_v34  ;;  %v12661_v34 = vld [vmem:[%s16617_s13 + $0x30] sm:$0xff]  }
0x25e9   : > { %11406 = vmatpush3.bf16.msra.mxu0 %v12649_v0 }
0x26bb   : > { %v7581_v49 = vpop.f32.mrb[124].mxu0 }
0x26bc   : > { %v7582_v48 = vadd.f32 %v11016_v55, %v7581_v49  ;;  %v11978_v1 = vpop.f32.mrb[125].mxu0  ;;  %v12663_v49 = vld [vmem:[%s16617_s13 + $0x38] sm:$0xff]  }
0x26bd   : > { %v7584_v31 = vpop.f32.mrb[126].mxu0 }
0x26be   : > { %v7585_v38 = vadd.f32 %v11016_v55, %v7584_v31  ;;  %v11979_v62 = vpop.f32.mrb[127].mxu0  ;;  %v7588_v51 = vsel %vm2607_vm3, %v7582_v48, 0.0  ;;  %v12662_v55 = vld [vmem:[%s16617_s13 + $0x78] sm:$0xff]  }
0x26bf   : > { %7589 = vadd.xlane.f32.xlu1 %v7588_v51 }
0x26c0   : > { %v7591_v3 = vsel %vm2607_vm3, %v7585_v38, 0.0 }
0x26c1   : > { %7592 = vadd.xlane.f32.xlu0 %v7591_v3 }
0x274c   : > { %v7590_v7 = vpop.xlane.xlu1 %7589 }
0x274d   : > { %v7594_v60 = vmul.f32 0.015625, %v7590_v7 }
0x274e   : > { %v7593_v27 = vpop.xlane.xlu0 %7592 }
0x274f   : > { %v7596_v16 = vsub.f32 %v7582_v48, %v7594_v60  ;;  %v7595_v56 = vmul.f32 0.015625, %v7593_v27  ;;  %v6684_v48 = vld [vmem:[%s16618_s8] sm:$0x3]  ;;  %s16620_s8 = sld [smem:[#allocation51_spill]] }
0x2750   : > { %v7637_v1 = vrot.slane %v6684_v48, %v15691_v15  ;;  %v7641_v31 = vrot.slane %v6684_v48, %v15694_v21 }
0x2751   : > { %v7597_v63 = vsub.f32 %v7585_v38, %v7595_v56  ;;  %v7598_v43 = vmul.f32 %v7596_v16, %v7596_v16 }
0x2753   : > { %v7600_v14 = vsel %vm2607_vm3, %v7598_v43, 0.0  ;;  %v7599_v20 = vmul.f32 %v7597_v63, %v7597_v63 }
0x2754   : > { %7601 = vadd.xlane.f32.xlu0 %v7600_v14 }
0x2755   : > { %v7603_v19 = vsel %vm2607_vm3, %v7599_v20, 0.0 }
0x2758   : > { %7604 = vadd.xlane.f32.xlu0 %v7603_v19 }
0x27e1   : > { %v7602_v30 = vpop.xlane.xlu0 %7601 }
0x27e2   : > { %v7606_v26 = vmul.f32 0.015625, %v7602_v30 }
0x27e4   : > { %v7608_v12 = vadd.f32 1e-05, %v7606_v26 }
0x27e5   : > { %v7605_v61 = vpop.xlane.xlu0 %7604 }
0x27e6   : > { %13240 = vrsqrt.f32 %v7608_v12  ;;  %v7607_v47 = vmul.f32 0.015625, %v7605_v61 }
0x27e8   : > { %v7609_v11 = vadd.f32 1e-05, %v7607_v47 }
0x27ea   : > { %13242 = vrsqrt.f32 %v7609_v11 }
0x27f0   : > { %v13241_v52 = vpop.eup %13240 }
0x27f1   : > { %v7612_v2 = vmul.f32 %v13241_v52, %v7596_v16 }
0x27f3   : > { %v7620_v37 = vmul.f32 %v11022_v13, %v7612_v2 }
0x27f4   : > { %v13243_v33 = vpop.eup %13242 }
0x27f5   : > { %v7613_v59 = vmul.f32 %v13243_v33, %v7597_v63  ;;  %v7628_v45 = vadd.f32 %v11023_v36, %v7620_v37 }
0x27f7   : > { %v7621_v40 = vmul.f32 %v11022_v13, %v7613_v59  ;;  %v15891_v42 = vadd.f32 %v7628_v45, %v15682_v23  ;;  %v12650_v23 = vld [vmem:[%s16617_s13 + $0x48] sm:$0xff]  }
0x27f8   : > { %11407 = vmatprep.subr.bf16.mxu0 %v12650_v23 }
0x27f9   : > { %v7629_v46 = vadd.f32 %v11023_v36, %v7621_v40  ;;  %11408 = vmatpush3.bf16.msra.mxu0 %v12651_v10 }
0x27fb   : > { %v15894_v6 = vadd.f32 %v7629_v46, %v15684_v17  ;;  %v12652_v17 = vld [vmem:[%s16617_s13 + $0x50] sm:$0xff]   ;;  %s16622_s13 = sld [smem:[#allocation49_spill]] }
0x27fc   : > { %11409 = vmatprep.subr.bf16.mxu0 %v12652_v17 }
0x27fd   : > { %v7632_v5 = vpack.c.bf16 %v15894_v6, %v15891_v42  ;;  %11410 = vmatpush3.bf16.msra.mxu0 %v12653_v54 }
0x27fe   : > { %11411 = vmatprep.subr.bf16.mxu0 %v12654_v29 }
0x27ff   : > { %11032 = vmatmul.mubr.msk.bf16.vlgmr.msra.gmra.mrb[60].mxu1 %vm2607_vm3, %v7632_v5 }
0x2800   : > { %8178 = vmatprep.mubr.bf16.mxu1 %v13514_v39 }
0x2801   : > { %11412 = vmatpush3.bf16.msra.mxu0 %v12655_v9 }
0x2802   : > { %11413 = vmatprep.subr.bf16.mxu0 %v12656_v24 }
0x2805   : > { %11414 = vmatpush3.bf16.msra.mxu0 %v12657_v53 }
0x2806   : > { %11415 = vmatprep.subr.bf16.mxu0 %v12658_v22 }
0x2809   : > { %11416 = vmatpush3.bf16.msra.mxu0 %v12659_v28 }
0x280a   : > { %11417 = vmatprep.subr.bf16.mxu0 %v12660_v8 }
0x280d   : > { %11418 = vmatpush3.bf16.msra.mxu0 %v12661_v34 }
0x280e   : > { %11419 = vmatprep.subr.bf16.mxu0 %v12662_v55 }
0x2811   : > { %11420 = vmatpush3.bf16.msra.mxu0 %v12663_v49 }
0x2812   : > { %11992 = vmatprep.subr.bf16.mxu0 %v13512_v4 }
0x28d2   : > { %v7721_v38 = vpop.f32.mrb[60].mxu1 }
0x28d3   : > { %v15920_v62 = vadd.f32 %v7721_v38, %v7637_v1  ;;  %v7723_v51 = vpop.f32.mrb[61].mxu1 }
0x28d4   : > { %v15922_v3 = vadd.f32 %v7723_v51, %v7641_v31  ;;  %v7725_v7 = vpop.f32.mrb[62].mxu1 }
0x28d5   : > { %v15925_v60 = vmul.f32 0.70710677, %v15920_v62  ;;  %v15927_v27 = vadd.f32 %v7725_v7, %v7637_v1  ;;  %v7727_v16 = vpop.f32.mrb[63].mxu1 }
0x28d6   : > { %v15930_v56 = vmul.f32 0.70710677, %v15922_v3  ;;  %v15932_v63 = vadd.f32 %v7727_v16, %v7641_v31 }
0x28d7   : > { %v7738_v43 = vand.u32 2147483647, %v15925_v60  ;;  %v15936_v14 = vmul.f32 0.70710677, %v15927_v27  ;;  %vm7818_vm9 = vcmp.ge.f32.partialorder %v15925_v60, 0.0 }
0x28d8   : > { %v7739_v20 = vand.u32 2147483647, %v15930_v56  ;;  %v15940_v19 = vmul.f32 0.70710677, %v15932_v63  ;;  %vm7819_vm10 = vcmp.ge.f32.partialorder %v15930_v56, 0.0 }
0x28d9   : > { %v7742_v25 = vmul.f32 0.3275911, %v7738_v43  ;;  %v7740_v41 = vand.u32 2147483647, %v15936_v14  ;;  %v7794_v12 = vsub.f32 0.0, %v7738_v43  ;;  %vm7820_vm11 = vcmp.ge.f32.partialorder %v15936_v14, 0.0 }
0x28da   : > { %v7743_v18 = vmul.f32 0.3275911, %v7739_v20  ;;  %v7741_v57 = vand.u32 2147483647, %v15940_v19  ;;  %v7795_v61 = vsub.f32 0.0, %v7739_v20  ;;  %vm7821_vm12 = vcmp.ge.f32.partialorder %v15940_v19, 0.0 }
0x28db   : > { %v7746_v35 = vadd.f32 1.0, %v7742_v25  ;;  %v7744_v50 = vmul.f32 0.3275911, %v7740_v41  ;;  %v7798_v11 = vmul.f32 %v7794_v12, %v7738_v43  ;;  %v7796_v52 = vsub.f32 0.0, %v7740_v41 }
0x28dc   : > { %v7747_v32 = vadd.f32 1.0, %v7743_v18  ;;  %v7745_v44 = vmul.f32 0.3275911, %v7741_v57  ;;  %v7799_v37 = vmul.f32 %v7795_v61, %v7739_v20  ;;  %v7797_v36 = vsub.f32 0.0, %v7741_v57 }
0x28dd   : > { %13244 = vrcp.f32 %v7746_v35  ;;  %v7748_v30 = vadd.f32 1.0, %v7744_v50  ;;  %v7802_v45 = vmul.f32 1.442695, %v7798_v11  ;;  %v7800_v5 = vmul.f32 %v7796_v52, %v7740_v41 }
0x28de   : > { %13246 = vrcp.f32 %v7747_v32  ;;  %v7749_v26 = vadd.f32 1.0, %v7745_v44  ;;  %v7804_v0 = vmul.f32 1.442695, %v7799_v37  ;;  %v7801_v54 = vmul.f32 %v7797_v36, %v7741_v57 }
0x28df   : > { %13248 = vrcp.f32 %v7748_v30  ;;  %v7806_v22 = vmul.f32 1.442695, %v7800_v5 }
0x28e0   : > { %13250 = vrcp.f32 %v7749_v26  ;;  %v7808_v49 = vmul.f32 1.442695, %v7801_v54 }
0x28e1   : > { %13252 = vpow2.f32 %v7802_v45 }
0x28e2   : > { %13254 = vpow2.f32 %v7804_v0 }
0x28e3   : > { %13256 = vpow2.f32 %v7806_v22  ;;  %v7731_v22 = vmul.f32 0.5, %v15922_v3 }
0x28e4   : > { %13258 = vpow2.f32 %v7808_v49 }
0x28e7   : > { %v13245_v47 = vpop.eup %13244 }
0x28e8   : > { %v13247_v13 = vpop.eup %13246  ;;  %v7758_v2 = vmul.f32 1.0614054, %v13245_v47 }
0x28e9   : > { %v7759_v33 = vmul.f32 1.0614054, %v13247_v13  ;;  %v13249_v40 = vpop.eup %13248 }
0x28ea   : > { %v7762_v59 = vadd.f32 -1.4531521, %v7758_v2  ;;  %v7760_v23 = vmul.f32 1.0614054, %v13249_v40  ;;  %v13251_v10 = vpop.eup %13250 }
0x28eb   : > { %v7763_v46 = vadd.f32 -1.4531521, %v7759_v33  ;;  %v7761_v24 = vmul.f32 1.0614054, %v13251_v10  ;;  %v13253_v32 = vpop.eup %13252 }
0x28ec   : > { %v7766_v58 = vmul.f32 %v13245_v47, %v7762_v59  ;;  %v7764_v9 = vadd.f32 -1.4531521, %v7760_v23  ;;  %v13255_v30 = vpop.eup %13254 }
0x28ed   : > { %v7767_v17 = vmul.f32 %v13247_v13, %v7763_v46  ;;  %v7765_v34 = vadd.f32 -1.4531521, %v7761_v24  ;;  %v13257_v33 = vpop.eup %13256 }
0x28ee   : > { %v7770_v29 = vadd.f32 1.4214138, %v7766_v58  ;;  %v7768_v8 = vmul.f32 %v13249_v40, %v7764_v9  ;;  %v13259_v5 = vpop.eup %13258 }
0x28ef   : > { %v7771_v53 = vadd.f32 1.4214138, %v7767_v17  ;;  %v7769_v31 = vmul.f32 %v13251_v10, %v7765_v34  ;;  %v7733_v34 = vmul.f32 0.5, %v15932_v63 }
0x28f0   : > { %v7774_v28 = vmul.f32 %v13245_v47, %v7770_v29  ;;  %v7772_v1 = vadd.f32 1.4214138, %v7768_v8 }
0x28f1   : > { %v7775_v55 = vmul.f32 %v13247_v13, %v7771_v53  ;;  %v7773_v16 = vadd.f32 1.4214138, %v7769_v31  ;;  %v7732_v53 = vmul.f32 0.5, %v15927_v27 }
0x28f2   : > { %v7778_v48 = vadd.f32 -0.28449672, %v7774_v28  ;;  %v7776_v7 = vmul.f32 %v13249_v40, %v7772_v1  ;;  %v11033_v1 = vld [vmem:[%s16619_s11] ss:$0 sm:$0xff]  ;;  %s16621_s11 = sld [smem:[#allocation48_spill]] }
0x28f3   : > { %v7779_v38 = vadd.f32 -0.28449672, %v7775_v55  ;;  %v7777_v41 = vmul.f32 %v13251_v10, %v7773_v16 }
0x28f4   : > { %v7782_v51 = vmul.f32 %v13245_v47, %v7778_v48  ;;  %v7780_v25 = vadd.f32 -0.28449672, %v7776_v7 }
0x28f5   : > { %v7783_v43 = vmul.f32 %v13247_v13, %v7779_v38  ;;  %v7781_v50 = vadd.f32 -0.28449672, %v7777_v41 }
0x28f6   : > { %v7786_v20 = vadd.f32 0.2548296, %v7782_v51  ;;  %v7784_v35 = vmul.f32 %v13249_v40, %v7780_v25 }
0x28f7   : > { %v7787_v18 = vadd.f32 0.2548296, %v7783_v43  ;;  %v7785_v61 = vmul.f32 %v13251_v10, %v7781_v50 }
0x28f8   : > { %v7790_v57 = vmul.f32 %v13245_v47, %v7786_v20  ;;  %v7788_v12 = vadd.f32 0.2548296, %v7784_v35 }
0x28f9   : > { %v7791_v44 = vmul.f32 %v13247_v13, %v7787_v18  ;;  %v7789_v37 = vadd.f32 0.2548296, %v7785_v61  ;;  %v12669_v61 = vld [vmem:[%s16620_s8 + $0x14] ss:$8 sps:$4 sm:$0xff]  }
0x28fa   : > { %v7810_v26 = vmul.f32 %v13253_v32, %v7790_v57  ;;  %v7792_v2 = vmul.f32 %v13249_v40, %v7788_v12  ;;  %v7730_v40 = vmul.f32 0.5, %v15920_v62  ;;  %v12664_v12 = vld [vmem:[%s16620_s8] ss:$8 sps:$4 sm:$0xff]  }
0x28fb   : > { %v7811_v11 = vmul.f32 %v13255_v30, %v7791_v44  ;;  %v7793_v46 = vmul.f32 %v13251_v10, %v7789_v37  ;;  %v12675_v37 = vld [vmem:[%s16620_s8 + $0x34] ss:$8 sps:$4 sm:$0xff]  }
0x28fc   : > { %v7814_v52 = vsub.f32 1.0, %v7810_v26  ;;  %v7812_v45 = vmul.f32 %v13257_v33, %v7792_v2  ;;  %v12666_v26 = vld [vmem:[%s16620_s8 + $0x4] ss:$8 sps:$4 sm:$0xff]   ;;  %v12670_v2 = vld [vmem:[%s16620_s8 + $0x20] ss:$8 sps:$4 sm:$0xff]  }
0x28fd   : > { %v7815_v36 = vsub.f32 1.0, %v7811_v11  ;;  %v7813_v13 = vmul.f32 %v13259_v5, %v7793_v46  ;;  %8146 = vmatprep.subr.bf16.mxu1 %v12666_v26  ;;  %v12667_v11 = vld [vmem:[%s16620_s8 + $0x10] ss:$8 sps:$4 sm:$0xff]  }
0x28fe   : > { %v7822_v59 = vsub.f32 0.0, %v7814_v52  ;;  %v7816_v0 = vsub.f32 1.0, %v7812_v45  ;;  %8147 = vmatpush1.bf16.msra.mxu1 %v12664_v12  ;;  %v12673_v33 = vld [vmem:[%s16620_s8 + $0x30] ss:$8 sps:$4 sm:$0xff]  }
0x28ff   : > { %v7823_v47 = vsub.f32 0.0, %v7815_v36  ;;  %v7817_v54 = vsub.f32 1.0, %v7813_v13  ;;  %8148 = vmatprep.subr.bf16.mxu1 %v12669_v61 }
0x2900   : > { %v7826_v58 = vsel %vm7818_vm9, %v7814_v52, %v7822_v59  ;;  %v7824_v17 = vsub.f32 0.0, %v7816_v0  ;;  %v12672_v52 = vld [vmem:[%s16620_s8 + $0x24] ss:$8 sps:$4 sm:$0xff]  }
0x2901   : > { %v7827_v23 = vsel %vm7819_vm10, %v7815_v36, %v7823_v47  ;;  %v7830_v29 = vadd.f32 1.0, %v7826_v58  ;;  %v7825_v24 = vsub.f32 0.0, %v7817_v54 }
0x2902   : > { %v7828_v9 = vsel %vm7820_vm11, %v7816_v0, %v7824_v17  ;;  %v7831_v10 = vadd.f32 1.0, %v7827_v23  ;;  %8149 = vmatpush1.bf16.msra.mxu1 %v12667_v11  ;;  %v11050_v0 = vld [vmem:[%s16621_s11] ss:$0 sm:$0xff]  ;;  %s11074_s11 = sld [smem:[#allocation2 + $0xf]] }
0x2903   : > { %v7832_v60 = vadd.f32 1.0, %v7828_v9  ;;  %v7829_v56 = vsel %vm7821_vm12, %v7817_v54, %v7825_v24  ;;  %v7834_v28 = vmul.f32 %v7830_v29, %v7730_v40  ;;  %8150 = vmatprep.subr.bf16.mxu1 %v12672_v52  ;;  %v11051_v17 = vld [vmem:[%s16622_s13] ss:$0 sm:$0xff]  ;;  %s16624_s13 = smov 32  }
0x2904   : > { %v7833_v55 = vadd.f32 1.0, %v7829_v56  ;;  %v7835_v14 = vmul.f32 %v7831_v10, %v7731_v22  ;;  %v8035_v22 = vld [vmem:[%s16623_s14] sm:$0x3]  ;;  %s16026_s14 = sld [smem:[#allocation2 + $0xd]] }
0x2905   : > { %v7836_v8 = vmul.f32 %v7832_v60, %v7732_v53  ;;  %v8096_v56 = vrot.slane %v8035_v22, %v15691_v15 }
0x2906   : > { %v7837_v62 = vmul.f32 %v7833_v55, %v7733_v34  ;;  %8151 = vmatpush1.bf16.msra.mxu1 %v12670_v2 }
0x2907   : > { %v7838_v49 = vpack.c.bf16 %v7836_v8, %v7834_v28  ;;  %8152 = vmatprep.subr.bf16.mxu1 %v12675_v37  ;;  %v8100_v8 = vrot.slane %v8035_v22, %v15694_v21 }
0x2908   : > { %v7839_v48 = vpack.c.bf16 %v7837_v62, %v7835_v14 }
0x290a   : > { %7974 = vmatprep.mubr.bf16.mxu0 %v7839_v48  ;;  %8153 = vmatpush1.bf16.msra.mxu1 %v12673_v33 }
0x290b   : > { %7975 = vmatmul.mubr.bf16.vlgmr.msra.gmra.mrb[128].mxu0 %v7838_v49  ;;  %11980 = vmatprep.subr.bf16.mxu1 %v13512_v4 }
0x290c   : > { %11994 = vmatprep.mubr.msk.bf16.mxu0 %vm13513_vm8, %v13512_v4 }
0x29de   : > { %v11421_v27 = vpop.f32.mrb[128].mxu0 }
0x29df   : > { %v11422_v19 = vpop.f32.mrb[129].mxu0 }
0x29e0   : > { %v11423_v31 = vadd.f32 %v11422_v19, %v11421_v27  ;;  %v11424_v3 = vpop.f32.mrb[130].mxu0 }
0x29e1   : > { %v11425_v38 = vpop.f32.mrb[131].mxu0 }
0x29e2   : > { %v7977_v51 = vadd.f32 %v11423_v31, %v11033_v1  ;;  %v11426_v7 = vadd.f32 %v11425_v38, %v11424_v3 }
0x29e4   : > { %v7980_v16 = vadd.f32 %v11426_v7, %v11033_v1  ;;  %v7983_v63 = vsel %vm2607_vm3, %v7977_v51, 0.0 }
0x29e5   : > { %7984 = vadd.xlane.f32.xlu1 %v7983_v63 }
0x29e6   : > { %v7986_v43 = vsel %vm2607_vm3, %v7980_v16, 0.0 }
0x29e7   : > { %7987 = vadd.xlane.f32.xlu0 %v7986_v43 }
0x2a72   : > { %v7985_v20 = vpop.xlane.xlu1 %7984 }
0x2a73   : > { %v7989_v25 = vmul.f32 0.015625, %v7985_v20 }
0x2a74   : > { %v7988_v41 = vpop.xlane.xlu0 %7987 }
0x2a75   : > { %v7991_v18 = vsub.f32 %v7977_v51, %v7989_v25  ;;  %v7990_v57 = vmul.f32 0.015625, %v7988_v41 }
0x2a77   : > { %v7992_v35 = vsub.f32 %v7980_v16, %v7990_v57  ;;  %v7993_v50 = vmul.f32 %v7991_v18, %v7991_v18 }
0x2a79   : > { %v7995_v32 = vsel %vm2607_vm3, %v7993_v50, 0.0  ;;  %v7994_v44 = vmul.f32 %v7992_v35, %v7992_v35 }
0x2a7a   : > { %7996 = vadd.xlane.f32.xlu1 %v7995_v32 }
0x2a7b   : > { %v7998_v30 = vsel %vm2607_vm3, %v7994_v44, 0.0 }
0x2a7c   : > { %7999 = vadd.xlane.f32.xlu0 %v7998_v30 }
0x2b07   : > { %v7997_v36 = vpop.xlane.xlu1 %7996 }
0x2b08   : > { %v8001_v59 = vmul.f32 0.015625, %v7997_v36 }
0x2b09   : > { %v8000_v45 = vpop.xlane.xlu0 %7999 }
0x2b0a   : > { %v8003_v46 = vadd.f32 1e-05, %v8001_v59  ;;  %v8002_v5 = vmul.f32 0.015625, %v8000_v45 }
0x2b0c   : > { %13260 = vrsqrt.f32 %v8003_v46  ;;  %v8004_v47 = vadd.f32 1e-05, %v8002_v5 }
0x2b0e   : > { %13262 = vrsqrt.f32 %v8004_v47 }
0x2b16   : > { %v13261_v58 = vpop.eup %13260 }
0x2b17   : > { %v8007_v13 = vmul.f32 %v13261_v58, %v7991_v18 }
0x2b18   : > { %v13263_v23 = vpop.eup %13262 }
0x2b19   : > { %v8015_v54 = vmul.f32 %v11050_v0, %v8007_v13  ;;  %v8008_v29 = vmul.f32 %v13263_v23, %v7992_v35 }
0x2b1b   : > { %v8016_v40 = vmul.f32 %v11050_v0, %v8008_v29  ;;  %v8023_v9 = vadd.f32 %v11051_v17, %v8015_v54 }
0x2b1d   : > { %v8024_v24 = vadd.f32 %v11051_v17, %v8016_v40  ;;  %v15971_v10 = vadd.f32 %v8023_v9, %v15891_v42 }
0x2b1f   : > { %v15974_v53 = vadd.f32 %v8024_v24, %v15894_v6 }
0x2b21   : > { %v8091_v60 = vpack.c.bf16 %v15974_v53, %v15971_v10 }
0x2b23   : > { %11060 = vmatmul.mubr.msk.bf16.vlgmr.msra.gmra.mrb[64].mxu1 %vm2607_vm3, %v8091_v60 }
0x2b24   : > { %11982 = vmatprep.mubr.msk.bf16.mxu1 %vm13513_vm8, %v13512_v4 }
0x2bf6   : > { %v8180_v28 = vpop.f32.mrb[64].mxu1 }
0x2bf7   : > { %v15984_v34 = vadd.f32 %v8180_v28, %v8096_v56  ;;  %v8182_v42 = vpop.f32.mrb[65].mxu1 }
0x2bf8   : > { %v8184_v55 = vpop.f32.mrb[66].mxu1  ;;  %v8183_v62 = vadd.f32 %v8182_v42, %v8100_v8 }
0x2bf9   : > { %v15986_v6 = vadd.f32 %v8184_v55, %v8096_v56  ;;  %v8186_v14 = vpop.f32.mrb[67].mxu1  ;;  %v8189_v49 = vmul.f32 %v15984_v34, %v15984_v34 }
0x2bfa   : > { %v8187_v48 = vadd.f32 %v8186_v14, %v8100_v8 }
0x2bfb   : > { %8205 = vrot.lane.b32.xlu1 %v8189_v49, %s16593_s6  ;;  %v8190_v27 = vmul.f32 %v15986_v6, %v15986_v6  ;;  %v8191_v59 = vsel %vm2351_vm2, %v8189_v49, 0.0 }
0x2bfc   : > { %v15993_v1 = vpack.c.bf16 %v8187_v48, %v8183_v62 }
0x2bfd   : > { %8207 = vrot.lane.b32.xlu0 %v8190_v27, %s16593_s6  ;;  %v8194_v45 = vsel %vm2351_vm2, %v8190_v27, 0.0 }
0x2bff   : > { %8367 = vrot.lane.b32.xlu1 %v8189_v49, %s16592_s5 }
0x2c01   : > { %8351 = vrot.lane.b32.xlu0 %v8190_v27, %s16590_s28 }
0x2c03   : > { %8369 = vrot.lane.b32.xlu1 %v8190_v27, %s16592_s5 }
0x2c05   : > { %8538 = vrot.lane.b32.xlu0 %v8190_v27, %s16624_s13 }
0x2c07   : > { %8349 = vrot.lane.b32.xlu1 %v8189_v49, %s16590_s28 }
0x2c09   : > { %8520 = vrot.lane.b32.xlu0 %v8190_v27, %s16589_s3 }
0x2c0b   : > { %8536 = vrot.lane.b32.xlu1 %v8189_v49, %s16624_s13 }
0x2c0d   : > { %8706 = vrot.lane.b32.xlu0 %v8190_v27, %s16595_s9 }
0x2c0f   : > { %8518 = vrot.lane.b32.xlu1 %v8189_v49, %s16589_s3 }
0x2c11   : > { %8688 = vrot.lane.b32.xlu0 %v8190_v27, %s16588_s1 }
0x2c13   : > { %8704 = vrot.lane.b32.xlu1 %v8189_v49, %s16595_s9 }
0x2c17   : > { %8686 = vrot.lane.b32.xlu1 %v8189_v49, %s16588_s1 }
0x2c6d   : > { %v8206_v19 = vpop.permute.xlu1 %8205 }
0x2c6e   : > { %v8211_v31 = vsel %vm2351_vm2, %v8206_v19, 0.0 }
0x2c6f   : > { %v8208_v3 = vpop.permute.xlu0 %8207  ;;  %8212 = vadd.xlane.f32.xlu1 %v8211_v31 }
0x2c70   : > { %v8214_v38 = vsel %vm2351_vm2, %v8208_v3, 0.0 }
0x2c71   : > { %8215 = vadd.xlane.f32.xlu0 %v8214_v38  ;;  %v8368_v51 = vpop.permute.xlu1 %8367 }
0x2c72   : > { %v8373_v16 = vsel %vm2351_vm2, %v8368_v51, 0.0 }
0x2c73   : > { %v8352_v7 = vpop.permute.xlu0 %8351 }
0x2c74   : > { %v8358_v18 = vsel %vm2351_vm2, %v8352_v7, 0.0 }
0x2c75   : > { %8374 = vadd.xlane.f32.xlu0 %v8373_v16  ;;  %v8370_v63 = vpop.permute.xlu1 %8369 }
0x2c76   : > { %v8376_v20 = vsel %vm2351_vm2, %v8370_v63, 0.0 }
0x2c77   : > { %v8539_v43 = vpop.permute.xlu0 %8538 }
0x2c78   : > { %v8545_v32 = vsel %vm2351_vm2, %v8539_v43, 0.0 }
0x2c79   : > { %8377 = vadd.xlane.f32.xlu0 %v8376_v20  ;;  %v8350_v25 = vpop.permute.xlu1 %8349 }
0x2c7a   : > { %v8355_v41 = vsel %vm2351_vm2, %v8350_v25, 0.0 }
0x2c7b   : > { %8356 = vadd.xlane.f32.xlu1 %v8355_v41  ;;  %v8521_v57 = vpop.permute.xlu0 %8520 }
0x2c7c   : > { %v8527_v12 = vsel %vm2351_vm2, %v8521_v57, 0.0 }
0x2c7d   : > { %8359 = vadd.xlane.f32.xlu0 %v8358_v18  ;;  %v8537_v35 = vpop.permute.xlu1 %8536  ;;  %v8386_v18 = vstv %s16026_s14  ;;  %s11061_s14 = sld [smem:[#allocation2 + $0xc]] }
0x2c7e   : > { %v8542_v50 = vsel %vm2351_vm2, %v8537_v35, 0.0 }
0x2c7f   : > { %8543 = vadd.xlane.f32.xlu1 %v8542_v50  ;;  %v8707_v26 = vpop.permute.xlu0 %8706 }
0x2c80   : > { %v8713_v52 = vsel %vm2351_vm2, %v8707_v26, 0.0 }
0x2c81   : > { %8546 = vadd.xlane.f32.xlu0 %v8545_v32  ;;  %v8519_v44 = vpop.permute.xlu1 %8518 }
0x2c82   : > { %v8524_v30 = vsel %vm2351_vm2, %v8519_v44, 0.0 }
0x2c83   : > { %8525 = vadd.xlane.f32.xlu1 %v8524_v30  ;;  %v8689_v2 = vpop.permute.xlu0 %8688 }
0x2c84   : > { %v8695_v36 = vsel %vm2351_vm2, %v8689_v2, 0.0 }
0x2c85   : > { %8528 = vadd.xlane.f32.xlu0 %v8527_v12  ;;  %v8705_v61 = vpop.permute.xlu1 %8704 }
0x2c86   : > { %v8710_v11 = vsel %vm2351_vm2, %v8705_v61, 0.0 }
0x2c87   : > { %8711 = vadd.xlane.f32.xlu1 %v8710_v11 }
0x2c89   : > { %8714 = vadd.xlane.f32.xlu0 %v8713_v52  ;;  %v8687_v37 = vpop.permute.xlu1 %8686 }
0x2c8a   : > { %v8692_v33 = vsel %vm2351_vm2, %v8687_v37, 0.0 }
0x2c8b   : > { %8693 = vadd.xlane.f32.xlu1 %v8692_v33 }
0x2c8d   : > { %8696 = vadd.xlane.f32.xlu0 %v8695_v36 }
0x2c8f   : > { %8192 = vadd.xlane.f32.xlu1 %v8191_v59 }
0x2c91   : > { %8195 = vadd.xlane.f32.xlu0 %v8194_v45 }
0x2cfc   : > { %v8213_v46 = vpop.xlane.xlu1 %8212 }
0x2cfd   : > { %v8217_v5 = vmax.f32 %v8213_v46, 1e-24 }
0x2cfe   : > { %v8216_v47 = vpop.xlane.xlu0 %8215 }
0x2cff   : > { %13264 = vrsqrt.f32 %v8217_v5  ;;  %v8218_v58 = vmax.f32 %v8216_v47, 1e-24 }
0x2d01   : > { %13266 = vrsqrt.f32 %v8218_v58 }
0x2d02   : > { %v8375_v0 = vpop.xlane.xlu0 %8374 }
0x2d03   : > { %v8379_v13 = vmax.f32 %v8375_v0, 1e-24 }
0x2d05   : > { %13268 = vrsqrt.f32 %v8379_v13 }
0x2d06   : > { %v8378_v23 = vpop.xlane.xlu0 %8377 }
0x2d07   : > { %v8380_v17 = vmax.f32 %v8378_v23, 1e-24 }
0x2d08   : > { %v8357_v54 = vpop.xlane.xlu1 %8356 }
0x2d09   : > { %v13265_v29 = vpop.eup %13264  ;;  %13270 = vrsqrt.f32 %v8380_v17  ;;  %v8361_v40 = vmax.f32 %v8357_v54, 1e-24 }
0x2d0a   : > { %v8360_v9 = vpop.xlane.xlu0 %8359  ;;  %v8221_v56 = vmul.f32 %v13265_v29, %v15984_v34 }
0x2d0b   : > { %v13267_v24 = vpop.eup %13266  ;;  %13272 = vrsqrt.f32 %v8361_v40  ;;  %v8362_v60 = vmax.f32 %v8360_v9, 1e-24 }
0x2d0c   : > { %v8544_v22 = vpop.xlane.xlu1 %8543  ;;  %v8222_v28 = vmul.f32 %v13267_v24, %v15986_v6  ;;  %v8723_v24 = vstv %s11074_s11  ;;  %s16632_s11 = sld [smem:[#allocation58_spill]] }
0x2d0d   : > { %13274 = vrsqrt.f32 %v8362_v60  ;;  %v8548_v8 = vmax.f32 %v8544_v22, 1e-24 }
0x2d0e   : > { %v8547_v42 = vpop.xlane.xlu0 %8546  ;;  %v8228_v55 = vpack.c.bf16 %v8222_v28, %v8221_v56 }
0x2d0f   : > { %v8549_v14 = vmax.f32 %v8547_v42, 1e-24  ;;  %13276 = vrsqrt.f32 %v8548_v8  ;;  %v13269_v62 = vpop.eup %13268 }
0x2d10   : > { %v8526_v49 = vpop.xlane.xlu1 %8525  ;;  %8232 = vrot.lane.b32.xlu1 %v8228_v55, %s16593_s6  ;;  %v8383_v38 = vmul.f32 %v13269_v62, %v15984_v34  ;;  %s11069_s6 = sld [smem:[#allocation2 + $0xe]] }
0x2d11   : > { %13278 = vrsqrt.f32 %v8549_v14  ;;  %v8530_v48 = vmax.f32 %v8526_v49, 1e-24 }
0x2d12   : > { %v8529_v27 = vpop.xlane.xlu0 %8528 }
0x2d13   : > { %v13271_v19 = vpop.eup %13270  ;;  %13280 = vrsqrt.f32 %v8530_v48  ;;  %v8531_v31 = vmax.f32 %v8529_v27, 1e-24 }
0x2d14   : > { %v8712_v3 = vpop.xlane.xlu1 %8711  ;;  %v8384_v51 = vmul.f32 %v13271_v19, %v15986_v6 }
0x2d15   : > { %v13273_v7 = vpop.eup %13272  ;;  %13282 = vrsqrt.f32 %v8531_v31  ;;  %v8716_v16 = vmax.f32 %v8712_v3, 1e-24  ;;  %v8224_v3 = vstv %s11061_s14  ;;  %s16633_s14 = sld [smem:[#allocation60_spill]] }
0x2d16   : > { %v8715_v63 = vpop.xlane.xlu0 %8714  ;;  %v8390_v43 = vpack.c.bf16 %v8384_v51, %v8383_v38  ;;  %v8365_v20 = vmul.f32 %v13273_v7, %v15984_v34  ;;  %v8555_v59 = vstv %s11069_s6  ;;  %s16625_s6 = sld [smem:[#allocation50_spill]] }
0x2d17   : > { %v13275_v25 = vpop.eup %13274  ;;  %13284 = vrsqrt.f32 %v8716_v16  ;;  %v8717_v41 = vmax.f32 %v8715_v63, 1e-24 }
0x2d18   : > { %8398 = vrot.lane.b32.xlu0 %v8390_v43, %s16592_s5  ;;  %v8694_v57 = vpop.xlane.xlu1 %8693  ;;  %v8366_v35 = vmul.f32 %v13275_v25, %v15986_v6  ;;  %v8387_v30 = vmul.f32 %v8386_v18, %v8365_v20 }
0x2d19   : > { %13286 = vrsqrt.f32 %v8717_v41  ;;  %v8698_v50 = vmax.f32 %v8694_v57, 1e-24  ;;  %v13277_v32 = vpop.eup %13276 }
0x2d1a   : > { %v8697_v44 = vpop.xlane.xlu0 %8696  ;;  %v8388_v26 = vmul.f32 %v8386_v18, %v8366_v35  ;;  %v8552_v37 = vmul.f32 %v13277_v32, %v15984_v34 }
0x2d1b   : > { %v13279_v12 = vpop.eup %13278  ;;  %13288 = vrsqrt.f32 %v8698_v50  ;;  %v8699_v61 = vmax.f32 %v8697_v44, 1e-24 }
0x2d1c   : > { %v8389_v11 = vpack.c.bf16 %v8388_v26, %v8387_v30  ;;  %v8553_v52 = vmul.f32 %v13279_v12, %v15986_v6  ;;  %v8193_v42 = vpop.xlane.xlu1 %8192  ;;  %v8229_v57 = vld [vmem:[%s16625_s6] sm:$0xff]  ;;  %v8230_v50 = vld [vmem:[%s16625_s6 + $0x8] sm:$0xff] }
0x2d1d   : > { %v13281_v2 = vpop.eup %13280  ;;  %13290 = vrsqrt.f32 %v8699_v61  ;;  %v8197_v14 = vmax.f32 %v8193_v42, 1e-24 }
0x2d1e   : > { %8395 = vrot.lane.b32.xlu1 %v8389_v11, %s16590_s28  ;;  %v8534_v33 = vmul.f32 %v13281_v2, %v15984_v34  ;;  %v8559_v45 = vpack.c.bf16 %v8553_v52, %v8552_v37  ;;  %v8196_v8 = vpop.xlane.xlu0 %8195  ;;  %v11065_v52 = vld [vmem:[%s16625_s6 + $0x10] sm:$0xff]  ;;  %v11066_v37 = vld [vmem:[%s16625_s6 + $0x18] sm:$0xff] }
0x2d1f   : > { %v13283_v36 = vpop.eup %13282  ;;  %v8198_v55 = vmax.f32 %v8196_v8, 1e-24 }
0x2d20   : > { %v8535_v46 = vmul.f32 %v13283_v36, %v15986_v6  ;;  %v8556_v47 = vmul.f32 %v8555_v59, %v8534_v33 }
0x2d21   : > { %v13285_v5 = vpop.eup %13284  ;;  %13292 = vrsqrt.f32 %v8198_v55 }
0x2d22   : > { %8567 = vrot.lane.b32.xlu1 %v8559_v45, %s16624_s13  ;;  %v8557_v58 = vmul.f32 %v8555_v59, %v8535_v46  ;;  %v8720_v23 = vmul.f32 %v13285_v5, %v15984_v34  ;;  %13294 = vrsqrt.f32 %v8197_v14 }
0x2d23   : > { %v13287_v0 = vpop.eup %13286 }
0x2d24   : > { %v8558_v13 = vpack.c.bf16 %v8557_v58, %v8556_v47  ;;  %v8721_v17 = vmul.f32 %v13287_v0, %v15986_v6  ;;  %v11070_v58 = vld [vmem:[%s16625_s6 + $0x20] sm:$0xff] }
0x2d25   : > { %v13289_v54 = vpop.eup %13288 }
0x2d26   : > { %8564 = vrot.lane.b32.xlu1 %v8558_v13, %s16589_s3  ;;  %v8727_v29 = vpack.c.bf16 %v8721_v17, %v8720_v23  ;;  %v8702_v40 = vmul.f32 %v13289_v54, %v15984_v34  ;;  %v11071_v13 = vld [vmem:[%s16625_s6 + $0x28] sm:$0xff] }
0x2d27   : > { %v13291_v9 = vpop.eup %13290 }
0x2d28   : > { %8735 = vrot.lane.b32.xlu0 %v8727_v29, %s16595_s9  ;;  %v8703_v60 = vmul.f32 %v13291_v9, %v15986_v6  ;;  %v8724_v22 = vmul.f32 %v8723_v24, %v8702_v40 }
0x2d2a   : > { %v8725_v56 = vmul.f32 %v8723_v24, %v8703_v60  ;;  %v11075_v60 = vld [vmem:[%s16625_s6 + $0x30] sm:$0xff] }
0x2d2b   : > { %v13293_v49 = vpop.eup %13292 }
0x2d2c   : > { %v8726_v28 = vpack.c.bf16 %v8725_v56, %v8724_v22  ;;  %v13295_v62 = vpop.eup %13294  ;;  %v8202_v48 = vmul.f32 %v13293_v49, %v15986_v6  ;;  %v11076_v56 = vld [vmem:[%s16625_s6 + $0x38] sm:$0xff] }
0x2d2d   : > { %v8201_v19 = vmul.f32 %v13295_v62, %v15984_v34 }
0x2d2e   : > { %8732 = vrot.lane.b32.xlu1 %v8726_v28, %s16588_s1  ;;  %v8226_v38 = vmul.f32 %v8224_v3, %v8202_v48 }
0x2d2f   : > { %v8225_v51 = vmul.f32 %v8224_v3, %v8201_v19 }
0x2d31   : > { %v8227_v7 = vpack.c.bf16 %v8226_v38, %v8225_v51 }
0x2d82   : > { %v8233_v27 = vpop.permute.xlu1 %8232 }
0x2d83   : > { %v8238_v31 = vsel %vm2351_vm2, %v8233_v27, 0 }
0x2d84   : > { %11981 = vmatpush3.bf16.xpose.msra.mxu1 %v8238_v31 }
0x2d85   : > { %11986 = vmatprep.subr.bf16.mxu1 %v13512_v4 }
0x2d8a   : > { %v8399_v16 = vpop.permute.xlu0 %8398 }
0x2d8b   : > { %v8404_v63 = vsel %vm2351_vm2, %v8399_v16, 0  ;;  %11983 = vmatmul.mubr.msk.bf16.vlgmr.msra.gmra.mrb[68].mxu1 %vm2351_vm2, %v8227_v7 }
0x2d8c   : > { %11987 = vmatpush3.bf16.msra.mxu1 %v15993_v1  ;;  %11993 = vmatpush3.bf16.xpose.msra.mxu0 %v8404_v63 }
0x2d8d   : > { %12004 = vmatprep.subr.bf16.mxu0 %v13512_v4  ;;  %11988 = vmatprep.mubr.msk.bf16.mxu1 %vm13513_vm8, %v13512_v4 }
0x2d8e   : > { %11998 = vmatprep.subr.bf16.mxu1 %v13512_v4 }
0x2d90   : > { %v8396_v34 = vpop.permute.xlu1 %8395 }
0x2d93   : > { %11995 = vmatmul.mubr.msk.bf16.vlgmr.msra.gmra.mrb[132].mxu0 %vm2351_vm2, %v8396_v34 }
0x2d94   : > { %v8568_v6 = vpop.permute.xlu1 %8567  ;;  %12006 = vmatprep.mubr.msk.bf16.mxu0 %vm13513_vm8, %v13512_v4 }
0x2d95   : > { %v8573_v43 = vsel %vm2351_vm2, %v8568_v6, 0 }
0x2d96   : > { %12005 = vmatpush3.bf16.xpose.msra.mxu0 %v8573_v43 }
0x2d97   : > { %12016 = vmatprep.subr.bf16.mxu0 %v13512_v4 }
0x2d98   : > { %v8565_v25 = vpop.permute.xlu1 %8564 }
0x2d9a   : > { %v8736_v20 = vpop.permute.xlu0 %8735 }
0x2d9b   : > { %v8741_v41 = vsel %vm2351_vm2, %v8736_v20, 0 }
0x2d9d   : > { %12007 = vmatmul.mubr.msk.bf16.vlgmr.msra.gmra.mrb[136].mxu0 %vm2351_vm2, %v8565_v25 }
0x2d9e   : > { %12017 = vmatpush3.bf16.xpose.msra.mxu0 %v8741_v41  ;;  %12018 = vmatprep.mubr.msk.bf16.mxu0 %vm13513_vm8, %v13512_v4 }
0x2d9f   : > { %12028 = vmatprep.subr.bf16.mxu0 %v13512_v4 }
0x2da0   : > { %v8733_v18 = vpop.permute.xlu1 %8732 }
0x2da5   : > { %12019 = vmatmul.mubr.msk.bf16.vlgmr.msra.gmra.mrb[140].mxu0 %vm2351_vm2, %v8733_v18 }
0x2da6   : > { %12036 = vmatprep.mubr.msk.bf16.mxu0 %vm13513_vm8, %v13512_v4 }
0x2e5e   : > { %v8274_v35 = vpop.f32.mrb[68].mxu1 }
0x2e5f   : > { %v8275_v32 = vadd.f32 %v8274_v35, %v8229_v57  ;;  %v11984_v44 = vpop.f32.mrb[69].mxu1 }
0x2e60   : > { %v8277_v30 = vpop.f32.mrb[70].mxu1 }
0x2e61   : > { %v8278_v26 = vadd.f32 %v8277_v30, %v8230_v50  ;;  %v11985_v12 = vpop.f32.mrb[71].mxu1  ;;  %v8281_v61 = vsel %vm2351_vm2, %v8275_v32, -inf }
0x2e62   : > { %8282 = vmax.xlane.f32.xlu0 %v8281_v61 }
0x2e63   : > { %v8284_v11 = vsel %vm2351_vm2, %v8278_v26, -inf }
0x2e64   : > { %8285 = vmax.xlane.f32.xlu1 %v8284_v11 }
0x2e66   : > { %v8440_v2 = vpop.f32.mrb[132].mxu0 }
0x2e67   : > { %v8441_v33 = vadd.f32 %v11065_v52, %v8440_v2  ;;  %v11996_v36 = vpop.f32.mrb[133].mxu0 }
0x2e68   : > { %v8443_v59 = vpop.f32.mrb[134].mxu0 }
0x2e69   : > { %v8444_v45 = vadd.f32 %v11066_v37, %v8443_v59  ;;  %v11997_v46 = vpop.f32.mrb[135].mxu0  ;;  %v8447_v5 = vsel %vm2351_vm2, %v8441_v33, -inf }
0x2e6a   : > { %8448 = vmax.xlane.f32.xlu0 %v8447_v5 }
0x2e6b   : > { %v8450_v47 = vsel %vm2351_vm2, %v8444_v45, -inf }
0x2e6e   : > { %8451 = vmax.xlane.f32.xlu0 %v8450_v47 }
0x2e70   : > { %v8609_v0 = vpop.f32.mrb[136].mxu0 }
0x2e71   : > { %v8610_v23 = vadd.f32 %v11070_v58, %v8609_v0  ;;  %v12008_v17 = vpop.f32.mrb[137].mxu0 }
0x2e72   : > { %v8612_v54 = vpop.f32.mrb[138].mxu0 }
0x2e73   : > { %v8613_v29 = vadd.f32 %v11071_v13, %v8612_v54  ;;  %v12009_v40 = vpop.f32.mrb[139].mxu0  ;;  %v8616_v9 = vsel %vm2351_vm2, %v8610_v23, -inf }
0x2e74   : > { %8617 = vmax.xlane.f32.xlu0 %v8616_v9 }
0x2e75   : > { %v8619_v24 = vsel %vm2351_vm2, %v8613_v29, -inf }
0x2e76   : > { %8620 = vmax.xlane.f32.xlu1 %v8619_v24 }
0x2e78   : > { %v8777_v22 = vpop.f32.mrb[140].mxu0 }
0x2e79   : > { %v8778_v28 = vadd.f32 %v11075_v60, %v8777_v22  ;;  %v12020_v8 = vpop.f32.mrb[141].mxu0 }
0x2e7a   : > { %v8780_v42 = vpop.f32.mrb[142].mxu0 }
0x2e7b   : > { %v8781_v55 = vadd.f32 %v11076_v56, %v8780_v42  ;;  %v12021_v14 = vpop.f32.mrb[143].mxu0  ;;  %v8784_v49 = vsel %vm2351_vm2, %v8778_v28, -inf }
0x2e7c   : > { %8785 = vmax.xlane.f32.xlu0 %v8784_v49 }
0x2e7d   : > { %v8787_v62 = vsel %vm2351_vm2, %v8781_v55, -inf }
0x2e7e   : > { %8788 = vmax.xlane.f32.xlu1 %v8787_v62 }
0x2eef   : > { %v8283_v48 = vpop.xlane.xlu0 %8282 }
0x2ef0   : > { %v8287_v27 = vsub.f32 %v8275_v32, %v8283_v48 }
0x2ef1   : > { %v8286_v19 = vpop.xlane.xlu1 %8285 }
0x2ef2   : > { %v8289_v31 = vmul.f32 1.442695, %v8287_v27  ;;  %v8288_v3 = vsub.f32 %v8278_v26, %v8286_v19 }
0x2ef4   : > { %13296 = vpow2.f32 %v8289_v31  ;;  %v8291_v38 = vmul.f32 1.442695, %v8288_v3 }
0x2ef6   : > { %13298 = vpow2.f32 %v8291_v38 }
0x2ef7   : > { %v8449_v51 = vpop.xlane.xlu0 %8448 }
0x2ef8   : > { %v8453_v7 = vsub.f32 %v8441_v33, %v8449_v51 }
0x2efa   : > { %v8455_v16 = vmul.f32 1.442695, %v8453_v7 }
0x2efb   : > { %v8452_v63 = vpop.xlane.xlu0 %8451 }
0x2efc   : > { %13300 = vpow2.f32 %v8455_v16  ;;  %v8454_v34 = vsub.f32 %v8444_v45, %v8452_v63 }
0x2efe   : > { %v13297_v6 = vpop.eup %13296  ;;  %v8457_v43 = vmul.f32 1.442695, %v8454_v34 }
0x2eff   : > { %v8293_v20 = vsel %vm2351_vm2, %v13297_v6, 0.0 }
0x2f00   : > { %v13299_v25 = vpop.eup %13298  ;;  %13302 = vpow2.f32 %v8457_v43  ;;  %8294 = vadd.xlane.f32.xlu0 %v8293_v20 }
0x2f01   : > { %v8618_v41 = vpop.xlane.xlu0 %8617  ;;  %v8296_v18 = vsel %vm2351_vm2, %v13299_v25, 0.0 }
0x2f02   : > { %v8622_v57 = vsub.f32 %v8610_v23, %v8618_v41  ;;  %8297 = vadd.xlane.f32.xlu1 %v8296_v18 }
0x2f03   : > { %v8621_v35 = vpop.xlane.xlu1 %8620 }
0x2f04   : > { %v8624_v50 = vmul.f32 1.442695, %v8622_v57  ;;  %v8623_v32 = vsub.f32 %v8613_v29, %v8621_v35 }
0x2f06   : > { %v13301_v44 = vpop.eup %13300  ;;  %13304 = vpow2.f32 %v8624_v50  ;;  %v8626_v30 = vmul.f32 1.442695, %v8623_v32 }
0x2f07   : > { %v8459_v26 = vsel %vm2351_vm2, %v13301_v44, 0.0 }
0x2f08   : > { %13306 = vpow2.f32 %v8626_v30  ;;  %8460 = vadd.xlane.f32.xlu0 %v8459_v26 }
0x2f09   : > { %v8786_v12 = vpop.xlane.xlu0 %8785 }
0x2f0a   : > { %v13303_v61 = vpop.eup %13302  ;;  %v8790_v11 = vsub.f32 %v8778_v28, %v8786_v12 }
0x2f0b   : > { %v8462_v52 = vsel %vm2351_vm2, %v13303_v61, 0.0  ;;  %v8789_v5 = vpop.xlane.xlu1 %8788 }
0x2f0c   : > { %v8792_v2 = vmul.f32 1.442695, %v8790_v11  ;;  %8463 = vadd.xlane.f32.xlu1 %v8462_v52  ;;  %v8791_v47 = vsub.f32 %v8781_v55, %v8789_v5 }
0x2f0e   : > { %13308 = vpow2.f32 %v8792_v2  ;;  %v8794_v58 = vmul.f32 1.442695, %v8791_v47 }
0x2f10   : > { %v13305_v37 = vpop.eup %13304  ;;  %13310 = vpow2.f32 %v8794_v58 }
0x2f11   : > { %v8628_v33 = vsel %vm2351_vm2, %v13305_v37, 0.0 }
0x2f12   : > { %v13307_v36 = vpop.eup %13306  ;;  %8629 = vadd.xlane.f32.xlu0 %v8628_v33 }
0x2f13   : > { %v8631_v59 = vsel %vm2351_vm2, %v13307_v36, 0.0 }
0x2f14   : > { %8632 = vadd.xlane.f32.xlu1 %v8631_v59 }
0x2f18   : > { %v13309_v45 = vpop.eup %13308 }
0x2f19   : > { %v8796_v46 = vsel %vm2351_vm2, %v13309_v45, 0.0 }
0x2f1a   : > { %8797 = vadd.xlane.f32.xlu0 %v8796_v46  ;;  %v13311_v0 = vpop.eup %13310 }
0x2f1b   : > { %v8799_v13 = vsel %vm2351_vm2, %v13311_v0, 0.0 }
0x2f25   : > { %8639 = vrot.lane.b32.xlu1 %v15993_v1, %s16589_s3  ;;  %s16626_s3 = sld [smem:[#allocation53_spill]] }
0x2f2b   : > { %v12676_v32 = vld [vmem:[%s16626_s3] sm:$0xff]   ;;  %v12677_v26 = vld [vmem:[%s16626_s3 + $0x8] sm:$0xff]  }
0x2f2c   : > { %12029 = vmatpush3.bf16.msra.mxu0 %v12676_v32 }
0x2f2d   : > { %12030 = vmatprep.subr.bf16.mxu0 %v13512_v4 }
0x2f30   : > { %8471 = vrot.lane.b32.xlu0 %v15993_v1, %s16590_s28  ;;  %12031 = vmatpush3.bf16.msra.mxu0 %v12677_v26  ;;  %s16629_s28 = sld [smem:[#allocation55_spill]] }
0x2f31   : > { %12032 = vmatprep.subr.bf16.mxu0 %v13512_v4 }
0x2f49   : > { %8800 = vadd.xlane.f32.xlu1 %v8799_v13 }
0x2f5a   : > { %8807 = vrot.lane.b32.xlu1 %v15993_v1, %s16588_s1  ;;  %s16628_s1 = sld [smem:[#allocation57_spill]] }
0x2f8d   : > { %v8295_v23 = vpop.xlane.xlu0 %8294 }
0x2f8e   : > { %13312 = vrcp.f32 %v8295_v23 }
0x2f8f   : > { %v8298_v17 = vpop.xlane.xlu1 %8297 }
0x2f90   : > { %13314 = vrcp.f32 %v8298_v17 }
0x2f95   : > { %v8461_v60 = vpop.xlane.xlu0 %8460 }
0x2f98   : > { %v13313_v54 = vpop.eup %13312 }
0x2f99   : > { %v8464_v29 = vpop.xlane.xlu1 %8463  ;;  %v8300_v9 = vmul.f32 %v13313_v54, %v13297_v6 }
0x2f9a   : > { %v13315_v40 = vpop.eup %13314  ;;  %13316 = vrcp.f32 %v8464_v29 }
0x2f9b   : > { %v8302_v24 = vmul.f32 %v13315_v40, %v13299_v25  ;;  %13318 = vrcp.f32 %v8461_v60 }
0x2f9d   : > { %v8303_v22 = vpack.c.bf16 %v8302_v24, %v8300_v9 }
0x2f9f   : > { %11989 = vmatmul.mubr.msk.bf16.vlgmr.msra.gmra.mrb[72].mxu1 %vm2351_vm2, %v8303_v22  ;;  %v8630_v1 = vpop.xlane.xlu0 %8629 }
0x2fa0   : > { %12000 = vmatprep.mubr.msk.bf16.mxu1 %vm13513_vm8, %v13512_v4 }
0x2fa1   : > { %v8633_v56 = vpop.xlane.xlu1 %8632 }
0x2fa2   : > { %13320 = vrcp.f32 %v8633_v56 }
0x2fa3   : > { %13322 = vrcp.f32 %v8630_v1 }
0x2fa4   : > { %v13317_v28 = vpop.eup %13316 }
0x2fa5   : > { %v13319_v42 = vpop.eup %13318  ;;  %v8468_v55 = vmul.f32 %v13317_v28, %v13303_v61  ;;  %v8640_v27 = vpop.permute.xlu1 %8639 }
0x2fa6   : > { %v8466_v14 = vmul.f32 %v13319_v42, %v13301_v44 }
0x2fa7   : > { %v8798_v8 = vpop.xlane.xlu0 %8797 }
0x2fa8   : > { %v8469_v62 = vpack.c.bf16 %v8468_v55, %v8466_v14  ;;  %13324 = vrcp.f32 %v8798_v8 }
0x2fab   : > { %v8472_v49 = vpop.permute.xlu0 %8471 }
0x2fac   : > { %11999 = vmatpush3.bf16.msra.mxu1 %v8472_v49  ;;  %v13321_v48 = vpop.eup %13320 }
0x2fad   : > { %12010 = vmatprep.subr.bf16.mxu1 %v13512_v4  ;;  %v13323_v19 = vpop.eup %13322  ;;  %v8637_v31 = vmul.f32 %v13321_v48, %v13307_v36 }
0x2fae   : > { %v8635_v3 = vmul.f32 %v13323_v19, %v13305_v37  ;;  %v12679_v37 = vld [vmem:[%s16626_s3 + $0x18] sm:$0xff]  }
0x2faf   : > { %12001 = vmatmul.mubr.msk.bf16.vlgmr.msra.gmra.mrb[76].mxu1 %vm2351_vm2, %v8469_v62 }
0x2fb0   : > { %12011 = vmatpush3.bf16.msra.mxu1 %v8640_v27  ;;  %12012 = vmatprep.mubr.msk.bf16.mxu1 %vm13513_vm8, %v13512_v4  ;;  %v8638_v38 = vpack.c.bf16 %v8637_v31, %v8635_v3 }
0x2fb1   : > { %12022 = vmatprep.subr.bf16.mxu1 %v13512_v4 }
0x2fb2   : > { %v13325_v16 = vpop.eup %13324 }
0x2fb3   : > { %v8803_v34 = vmul.f32 %v13325_v16, %v13309_v45 }
0x2fb7   : > { %12013 = vmatmul.mubr.msk.bf16.vlgmr.msra.gmra.mrb[80].mxu1 %vm2351_vm2, %v8638_v38 }
0x2fb8   : > { %12024 = vmatprep.mubr.msk.bf16.mxu1 %vm13513_vm8, %v13512_v4 }
0x2fd6   : > { %v8801_v51 = vpop.xlane.xlu1 %8800 }
0x2fd7   : > { %13326 = vrcp.f32 %v8801_v51 }
0x2fda   : > { %v8808_v7 = vpop.permute.xlu1 %8807 }
0x2fdb   : > { %12023 = vmatpush3.bf16.msra.mxu1 %v8808_v7 }
0x2fe1   : > { %v13327_v63 = vpop.eup %13326 }
0x2fe2   : > { %v8805_v6 = vmul.f32 %v13327_v63, %v13311_v0 }
0x2fe4   : > { %v8806_v43 = vpack.c.bf16 %v8805_v6, %v8803_v34 }
0x2fe6   : > { %12025 = vmatmul.mubr.msk.bf16.vlgmr.msra.gmra.mrb[84].mxu1 %vm2351_vm2, %v8806_v43  ;;  %v12682_v43 = vld [vmem:[%s16628_s1 + $0x4] ss:$8 sps:$4 sm:$0xff]  }
0x2fe7   : > { %9090 = vmatprep.mubr.bf16.mxu1 %v13514_v39  ;;  %v12678_v39 = vld [vmem:[%s16626_s3 + $0x10] sm:$0xff]   ;;  %9058 = vmatprep.subr.bf16.mxu1 %v12682_v43 }
0x2fe8   : > { %12033 = vmatpush3.bf16.msra.mxu0 %v12678_v39 }
0x2fe9   : > { %12034 = vmatprep.subr.bf16.mxu0 %v13512_v4 }
0x2fec   : > { %12035 = vmatpush3.bf16.msra.mxu0 %v12679_v37 }
0x3072   : > { %v8342_v20 = vpop.f32.mrb[72].mxu1 }
0x3073   : > { %v11990_v25 = vpop.f32.mrb[73].mxu1 }
0x3074   : > { %v8345_v41 = vpop.f32.mrb[74].mxu1  ;;  %v12685_v25 = vld [vmem:[%s16628_s1 + $0x14] ss:$8 sps:$4 sm:$0xff]  }
0x3075   : > { %v11991_v18 = vpop.f32.mrb[75].mxu1 }
0x3076   : > { %v12688_v18 = vld [vmem:[%s16628_s1 + $0x24] ss:$8 sps:$4 sm:$0xff]  }
0x3082   : > { %v8511_v57 = vpop.f32.mrb[76].mxu1 }
0x3083   : > { %v12002_v35 = vpop.f32.mrb[77].mxu1 }
0x3084   : > { %v8514_v50 = vpop.f32.mrb[78].mxu1  ;;  %v12691_v35 = vld [vmem:[%s16628_s1 + $0x34] ss:$8 sps:$4 sm:$0xff]  }
0x3085   : > { %v12566_v44 = vpack.i.bf16 %v8514_v50, %v8511_v57  ;;  %v12003_v30 = vpop.f32.mrb[79].mxu1  ;;  %v12686_v57 = vld [vmem:[%s16628_s1 + $0x20] ss:$8 sps:$4 sm:$0xff]   ;;  %v12689_v50 = vld [vmem:[%s16628_s1 + $0x30] ss:$8 sps:$4 sm:$0xff]  }
0x3087   : > { %12567 = vrot.lane.b32.xlu1 %v12566_v44, %s16595_s9  ;;  %s16627_s9 = sld [smem:[#allocation54_spill]] }
0x308a   : > { %v8679_v12 = vpop.f32.mrb[80].mxu1 }
0x308b   : > { %v12014_v61 = vpop.f32.mrb[81].mxu1 }
0x308c   : > { %v8682_v11 = vpop.f32.mrb[82].mxu1 }
0x308d   : > { %v12571_v52 = vpack.i.bf16 %v8682_v11, %v8679_v12  ;;  %v12015_v2 = vpop.f32.mrb[83].mxu1  ;;  %v11079_v28 = vld [vmem:[%s16627_s9] ss:$0 sm:$0xff]  ;;  %s16634_s9 = sld [smem:[#allocation61_spill]] }
0x308e   : > { %v11085_v11 = vld [vmem:[%s16629_s28] ss:$0 sm:$0xff]  ;;  %s16635_s28 = sld [smem:[#allocation62_spill]] }
0x308f   : > { %12572 = vrot.lane.b32.xlu0 %v12571_v52, %s16624_s13  ;;  %s16631_s13 = sld [smem:[#allocation59_spill]] }
0x30b9   : > { %v8847_v33 = vpop.f32.mrb[84].mxu1 }
0x30ba   : > { %v12026_v36 = vpop.f32.mrb[85].mxu1 }
0x30bb   : > { %v8850_v59 = vpop.f32.mrb[86].mxu1 }
0x30bc   : > { %v12576_v45 = vpack.i.bf16 %v8850_v59, %v8847_v33  ;;  %v12027_v46 = vpop.f32.mrb[87].mxu1 }
0x30be   : > { %12577 = vrot.lane.b32.xlu1 %v12576_v45, %s16592_s5  ;;  %s16630_s5 = sld [smem:[#allocation56_spill]] }
0x30c4   : > { %v11086_v33 = vld [vmem:[%s16630_s5] ss:$0 sm:$0xff]  ;;  %s16636_s5 = sld [smem:[#allocation63_spill]] }
0x30f9   : > { %v12568_v5 = vpop.permute.xlu1 %12567 }
0x30fa   : > { %v12570_v58 = vunpack.i.h.bf16 %v12568_v5  ;;  %v12569_v0 = vunpack.i.l.bf16 %v12568_v5 }
0x30fc   : > { %v8879_v54 = vsel %vm2351_vm2, %v8345_v41, %v12570_v58  ;;  %v8878_v29 = vsel %vm2351_vm2, %v8342_v20, %v12569_v0  ;;  %v12680_v20 = vld [vmem:[%s16628_s1] ss:$8 sps:$4 sm:$0xff]   ;;  %v12683_v41 = vld [vmem:[%s16628_s1 + $0x10] ss:$8 sps:$4 sm:$0xff]  }
0x30fd   : > { %9059 = vmatpush1.bf16.msra.mxu1 %v12680_v20  ;;  %v12692_v0 = vld [vmem:[%s16631_s13 + $0x40] sm:$0xff]  }
0x30fe   : > { %9060 = vmatprep.subr.bf16.mxu1 %v12685_v25  ;;  %11448 = vmatprep.subr.bf16.mxu0 %v12692_v0 }
0x3101   : > { %v12573_v47 = vpop.permute.xlu0 %12572  ;;  %9061 = vmatpush1.bf16.msra.mxu1 %v12683_v41 }
0x3102   : > { %v12575_v13 = vunpack.i.h.bf16 %v12573_v47  ;;  %v12574_v23 = vunpack.i.l.bf16 %v12573_v47  ;;  %9062 = vmatprep.subr.bf16.mxu1 %v12688_v18 }
0x3104   : > { %v8880_v24 = vsel %vm2074_vm1, %v8878_v29, %v12574_v23  ;;  %v8881_v60 = vsel %vm2074_vm1, %v8879_v54, %v12575_v13  ;;  %v12693_v13 = vld [vmem:[%s16631_s13] sm:$0xff]   ;;  %v12696_v23 = vld [vmem:[%s16631_s13 + $0x50] sm:$0xff]   ;;  %v12698_v54 = vld [vmem:[%s16631_s13 + $0x58] sm:$0xff]  }
0x3105   : > { %9063 = vmatpush1.bf16.msra.mxu1 %v12686_v57  ;;  %v12699_v29 = vld [vmem:[%s16631_s13 + $0x18] sm:$0xff]  }
0x3106   : > { %9064 = vmatprep.subr.bf16.mxu1 %v12691_v35 }
0x3109   : > { %9065 = vmatpush1.bf16.msra.mxu1 %v12689_v50 }
0x310a   : > { %12040 = vmatprep.subr.bf16.mxu1 %v13512_v4 }
0x3130   : > { %v12578_v17 = vpop.permute.xlu1 %12577 }
0x3131   : > { %v12580_v40 = vunpack.i.h.bf16 %v12578_v17  ;;  %v12579_v9 = vunpack.i.l.bf16 %v12578_v17  ;;  %v12697_v17 = vld [vmem:[%s16631_s13 + $0x10] sm:$0xff]  }
0x3133   : > { %v8882_v22 = vsel %vm1996_vm0, %v8880_v24, %v12579_v9  ;;  %v8883_v56 = vsel %vm1996_vm0, %v8881_v60, %v12580_v40  ;;  %v12700_v40 = vld [vmem:[%s16631_s13 + $0x60] sm:$0xff]   ;;  %v12702_v24 = vld [vmem:[%s16631_s13 + $0x68] sm:$0xff]  }
0x3134   : > { %v8884_v1 = vpack.c.bf16 %v8883_v56, %v8882_v22  ;;  %v12701_v9 = vld [vmem:[%s16631_s13 + $0x20] sm:$0xff]   ;;  %v12703_v60 = vld [vmem:[%s16631_s13 + $0x28] sm:$0xff]   ;;  %v12704_v22 = vld [vmem:[%s16631_s13 + $0x70] sm:$0xff]  }
0x3135   : > { %v12705_v56 = vld [vmem:[%s16631_s13 + $0x30] sm:$0xff]  }
0x3136   : > { %12037 = vmatmul.mubr.msk.bf16.vlgmr.msra.gmra.mrb[144].mxu0 %vm2607_vm3, %v8884_v1  ;;  %v12706_v1 = vld [vmem:[%s16631_s13 + $0x78] sm:$0xff]  }
0x3137   : > { %11449 = vmatpush3.bf16.msra.mxu0 %v12693_v13 }
0x3209   : > { %v8952_v8 = vpop.f32.mrb[144].mxu0 }
0x320a   : > { %v8953_v42 = vadd.f32 %v11079_v28, %v8952_v8  ;;  %v12038_v55 = vpop.f32.mrb[145].mxu0  ;;  %v8055_v8 = vld [vmem:[%s16632_s11] sm:$0x3]  ;;  %s1943_s11 = sand.u32 1, %s13429_s16  }
0x320b   : > { %v8955_v14 = vpop.f32.mrb[146].mxu0  ;;  %v9012_v55 = vrot.slane %v8055_v8, %v15694_v21  ;;  %s10679_s1 = scalar_lea.sflag [#allocation3], %s1943_s11 }
0x320c   : > { %v8956_v49 = vadd.f32 %v11079_v28, %v8955_v14  ;;  %v12039_v62 = vpop.f32.mrb[147].mxu0  ;;  %v8959_v48 = vsel %vm2607_vm3, %v8953_v42, 0.0  ;;  %v12707_v28 = vld [vmem:[%s16631_s13 + $0x38] sm:$0xff]  }
0x320d   : > { %8960 = vadd.xlane.f32.xlu0 %v8959_v48 }
0x320e   : > { %v8962_v27 = vsel %vm2607_vm3, %v8956_v49, 0.0 }
0x320f   : > { %8963 = vadd.xlane.f32.xlu1 %v8962_v27 }
0x329a   : > { %v8961_v19 = vpop.xlane.xlu0 %8960 }
0x329b   : > { %v8965_v31 = vmul.f32 0.015625, %v8961_v19 }
0x329c   : > { %v8964_v3 = vpop.xlane.xlu1 %8963 }
0x329d   : > { %v8967_v38 = vsub.f32 %v8953_v42, %v8965_v31  ;;  %v8966_v51 = vmul.f32 0.015625, %v8964_v3  ;;  %v9008_v42 = vrot.slane %v8055_v8, %v15691_v15 }
0x329f   : > { %v8968_v7 = vsub.f32 %v8956_v49, %v8966_v51  ;;  %v8969_v16 = vmul.f32 %v8967_v38, %v8967_v38 }
0x32a1   : > { %v8971_v63 = vsel %vm2607_vm3, %v8969_v16, 0.0  ;;  %v8970_v34 = vmul.f32 %v8968_v7, %v8968_v7 }
0x32a2   : > { %8972 = vadd.xlane.f32.xlu0 %v8971_v63 }
0x32a3   : > { %v8974_v6 = vsel %vm2607_vm3, %v8970_v34, 0.0 }
0x32a6   : > { %8975 = vadd.xlane.f32.xlu0 %v8974_v6 }
0x332f   : > { %v8973_v32 = vpop.xlane.xlu0 %8972 }
0x3330   : > { %v8977_v44 = vmul.f32 0.015625, %v8973_v32 }
0x3332   : > { %v8979_v30 = vadd.f32 1e-05, %v8977_v44 }
0x3333   : > { %v8976_v26 = vpop.xlane.xlu0 %8975 }
0x3334   : > { %13328 = vrsqrt.f32 %v8979_v30  ;;  %v8978_v12 = vmul.f32 0.015625, %v8976_v26 }
0x3336   : > { %v8980_v39 = vadd.f32 1e-05, %v8978_v12 }
0x3338   : > { %13330 = vrsqrt.f32 %v8980_v39 }
0x333e   : > { %v13329_v61 = vpop.eup %13328 }
0x333f   : > { %v8983_v52 = vmul.f32 %v13329_v61, %v8967_v38 }
0x3341   : > { %v8991_v2 = vmul.f32 %v11085_v11, %v8983_v52 }
0x3342   : > { %v13331_v37 = vpop.eup %13330 }
0x3343   : > { %v8984_v36 = vmul.f32 %v13331_v37, %v8968_v7  ;;  %v8999_v45 = vadd.f32 %v11086_v33, %v8991_v2 }
0x3345   : > { %v8992_v59 = vmul.f32 %v11085_v11, %v8984_v36  ;;  %v16149_v5 = vadd.f32 %v8999_v45, %v15971_v10  ;;  %v12694_v10 = vld [vmem:[%s16631_s13 + $0x48] sm:$0xff]  }
0x3346   : > { %11450 = vmatprep.subr.bf16.mxu0 %v12694_v10 }
0x3347   : > { %v9000_v46 = vadd.f32 %v11086_v33, %v8992_v59 }
0x3349   : > { %v16152_v47 = vadd.f32 %v9000_v46, %v15974_v53  ;;  %v12695_v53 = vld [vmem:[%s16631_s13 + $0x8] sm:$0xff]  }
0x334a   : > { %11451 = vmatpush3.bf16.msra.mxu0 %v12695_v53 }
0x334b   : > { %v9003_v58 = vpack.c.bf16 %v16152_v47, %v16149_v5  ;;  %11452 = vmatprep.subr.bf16.mxu0 %v12696_v23 }
0x334d   : > { %11095 = vmatmul.mubr.msk.bf16.vlgmr.msra.gmra.mrb[88].mxu1 %vm2607_vm3, %v9003_v58 }
0x334e   : > { %12048 = vmatprep.mubr.msk.bf16.mxu1 %vm13513_vm8, %v13512_v4  ;;  %11453 = vmatpush3.bf16.msra.mxu0 %v12697_v17 }
0x334f   : > { %11454 = vmatprep.subr.bf16.mxu0 %v12698_v54 }
0x3352   : > { %11455 = vmatpush3.bf16.msra.mxu0 %v12699_v29 }
0x3353   : > { %11456 = vmatprep.subr.bf16.mxu0 %v12700_v40 }
0x3356   : > { %11457 = vmatpush3.bf16.msra.mxu0 %v12701_v9 }
0x3357   : > { %11458 = vmatprep.subr.bf16.mxu0 %v12702_v24 }
0x335a   : > { %11459 = vmatpush3.bf16.msra.mxu0 %v12703_v60 }
0x335b   : > { %11460 = vmatprep.subr.bf16.mxu0 %v12704_v22 }
0x335e   : > { %11461 = vmatpush3.bf16.msra.mxu0 %v12705_v56 }
0x335f   : > { %11462 = vmatprep.subr.bf16.mxu0 %v12706_v1 }
0x3362   : > { %11463 = vmatpush3.bf16.msra.mxu0 %v12707_v28 }
0x3420   : > { %v9092_v14 = vpop.f32.mrb[88].mxu1 }
0x3421   : > { %v16178_v49 = vadd.f32 %v9092_v14, %v9008_v42  ;;  %v9094_v62 = vpop.f32.mrb[89].mxu1 }
0x3422   : > { %v16180_v48 = vadd.f32 %v9094_v62, %v9012_v55  ;;  %v9096_v27 = vpop.f32.mrb[90].mxu1 }
0x3423   : > { %v16183_v19 = vmul.f32 0.70710677, %v16178_v49  ;;  %v16185_v31 = vadd.f32 %v9096_v27, %v9008_v42  ;;  %v9098_v3 = vpop.f32.mrb[91].mxu1 }
0x3424   : > { %v16188_v38 = vmul.f32 0.70710677, %v16180_v48  ;;  %v16190_v51 = vadd.f32 %v9098_v3, %v9012_v55 }
0x3425   : > { %v9109_v15 = vand.u32 2147483647, %v16183_v19  ;;  %v16194_v21 = vmul.f32 0.70710677, %v16185_v31  ;;  %vm9189_vm0 = vcmp.ge.f32.partialorder %v16183_v19, 0.0 }
0x3426   : > { %v9110_v7 = vand.u32 2147483647, %v16188_v38  ;;  %v16198_v16 = vmul.f32 0.70710677, %v16190_v51  ;;  %vm9190_vm1 = vcmp.ge.f32.partialorder %v16188_v38, 0.0 }
0x3427   : > { %v9113_v63 = vmul.f32 0.3275911, %v9109_v15  ;;  %v9111_v34 = vand.u32 2147483647, %v16194_v21  ;;  %v9165_v50 = vsub.f32 0.0, %v9109_v15  ;;  %vm9191_vm2 = vcmp.ge.f32.partialorder %v16194_v21, 0.0 }
0x3428   : > { %v9114_v6 = vmul.f32 0.3275911, %v9110_v7  ;;  %v9112_v43 = vand.u32 2147483647, %v16198_v16  ;;  %v9166_v32 = vsub.f32 0.0, %v9110_v7  ;;  %vm9192_vm13 = vcmp.ge.f32.partialorder %v16198_v16, 0.0 }
0x3429   : > { %v9117_v20 = vadd.f32 1.0, %v9113_v63  ;;  %v9115_v25 = vmul.f32 0.3275911, %v9111_v34  ;;  %v9169_v30 = vmul.f32 %v9165_v50, %v9109_v15  ;;  %v9167_v26 = vsub.f32 0.0, %v9111_v34 }
0x342a   : > { %v9118_v41 = vadd.f32 1.0, %v9114_v6  ;;  %v9116_v18 = vmul.f32 0.3275911, %v9112_v43  ;;  %v9170_v61 = vmul.f32 %v9166_v32, %v9110_v7  ;;  %v9168_v52 = vsub.f32 0.0, %v9112_v43 }
0x342b   : > { %13332 = vrcp.f32 %v9117_v20  ;;  %v9119_v57 = vadd.f32 1.0, %v9115_v25  ;;  %v9173_v33 = vmul.f32 1.442695, %v9169_v30  ;;  %v9171_v59 = vmul.f32 %v9167_v26, %v9111_v34 }
0x342c   : > { %13334 = vrcp.f32 %v9118_v41  ;;  %v9120_v35 = vadd.f32 1.0, %v9116_v18  ;;  %v9175_v46 = vmul.f32 1.442695, %v9170_v61  ;;  %v9172_v10 = vmul.f32 %v9168_v52, %v9112_v43 }
0x342d   : > { %13336 = vrcp.f32 %v9119_v57  ;;  %v9177_v29 = vmul.f32 1.442695, %v9171_v59 }
0x342e   : > { %13338 = vrcp.f32 %v9120_v35  ;;  %v9179_v22 = vmul.f32 1.442695, %v9172_v10 }
0x342f   : > { %13340 = vpow2.f32 %v9173_v33 }
0x3430   : > { %13342 = vpow2.f32 %v9175_v46 }
0x3431   : > { %13344 = vpow2.f32 %v9177_v29  ;;  %v9104_v29 = vmul.f32 0.5, %v16190_v51 }
0x3432   : > { %13346 = vpow2.f32 %v9179_v22 }
0x3435   : > { %v13333_v44 = vpop.eup %13332 }
0x3436   : > { %v13335_v12 = vpop.eup %13334  ;;  %v9129_v39 = vmul.f32 1.0614054, %v13333_v44 }
0x3437   : > { %v9130_v11 = vmul.f32 1.0614054, %v13335_v12  ;;  %v13337_v37 = vpop.eup %13336 }
0x3438   : > { %v9133_v2 = vadd.f32 -1.4531521, %v9129_v39  ;;  %v9131_v58 = vmul.f32 1.0614054, %v13337_v37  ;;  %v13339_v0 = vpop.eup %13338 }
0x3439   : > { %v9134_v36 = vadd.f32 -1.4531521, %v9130_v11  ;;  %v9132_v17 = vmul.f32 1.0614054, %v13339_v0  ;;  %v13341_v43 = vpop.eup %13340 }
0x343a   : > { %v9137_v45 = vmul.f32 %v13333_v44, %v9133_v2  ;;  %v9135_v23 = vadd.f32 -1.4531521, %v9131_v58  ;;  %v13343_v25 = vpop.eup %13342 }
0x343b   : > { %v9138_v13 = vmul.f32 %v13335_v12, %v9134_v36  ;;  %v9136_v24 = vadd.f32 -1.4531521, %v9132_v17  ;;  %v13345_v26 = vpop.eup %13344 }
0x343c   : > { %v9141_v53 = vadd.f32 1.4214138, %v9137_v45  ;;  %v9139_v9 = vmul.f32 %v13337_v37, %v9135_v23  ;;  %v13347_v2 = vpop.eup %13346  ;;  %v9102_v23 = vmul.f32 0.5, %v16180_v48 }
0x343d   : > { %v9142_v54 = vadd.f32 1.4214138, %v9138_v13  ;;  %v9140_v28 = vmul.f32 %v13339_v0, %v9136_v24 }
0x343e   : > { %v9145_v40 = vmul.f32 %v13333_v44, %v9141_v53  ;;  %v9143_v1 = vadd.f32 1.4214138, %v9139_v9  ;;  %v9103_v53 = vmul.f32 0.5, %v16185_v31  ;;  %v11096_v31 = vld [vmem:[%s16633_s14] ss:$0 sm:$0xff]  ;;  %s11197_s14 = sshll.u32 %s13878_s0, 4 }
0x343f   : > { %v9146_v60 = vmul.f32 %v13335_v12, %v9142_v54  ;;  %v9144_v14 = vadd.f32 1.4214138, %v9140_v28  ;;  %s13516_s0 = smov [#allocation5]  }
0x3440   : > { %v9149_v56 = vadd.f32 -0.28449672, %v9145_v40  ;;  %v9147_v55 = vmul.f32 %v13337_v37, %v9143_v1 }
0x3441   : > { %v9150_v8 = vadd.f32 -0.28449672, %v9146_v60  ;;  %v9148_v15 = vmul.f32 %v13339_v0, %v9144_v14 }
0x3442   : > { %v9153_v42 = vmul.f32 %v13333_v44, %v9149_v56  ;;  %v9151_v3 = vadd.f32 -0.28449672, %v9147_v55 }
0x3443   : > { %v9154_v62 = vmul.f32 %v13335_v12, %v9150_v8  ;;  %v9152_v6 = vadd.f32 -0.28449672, %v9148_v15 }
0x3444   : > { %v9157_v27 = vadd.f32 0.2548296, %v9153_v42  ;;  %v9155_v34 = vmul.f32 %v13337_v37, %v9151_v3 }
0x3445   : > { %v9158_v7 = vadd.f32 0.2548296, %v9154_v62  ;;  %v9156_v57 = vmul.f32 %v13339_v0, %v9152_v6 }
0x3446   : > { %v9161_v63 = vmul.f32 %v13333_v44, %v9157_v27  ;;  %v9159_v18 = vadd.f32 0.2548296, %v9155_v34 }
0x3447   : > { %v9162_v20 = vmul.f32 %v13335_v12, %v9158_v7  ;;  %v9160_v30 = vadd.f32 0.2548296, %v9156_v57 }
0x3448   : > { %v9181_v41 = vmul.f32 %v13341_v43, %v9161_v63  ;;  %v9163_v32 = vmul.f32 %v13337_v37, %v9159_v18  ;;  %v9101_v37 = vmul.f32 0.5, %v16178_v49 }
0x3449   : > { %v9182_v35 = vmul.f32 %v13343_v25, %v9162_v20  ;;  %v9164_v52 = vmul.f32 %v13339_v0, %v9160_v30 }
0x344a   : > { %v9185_v50 = vsub.f32 1.0, %v9181_v41  ;;  %v9183_v11 = vmul.f32 %v13345_v26, %v9163_v32  ;;  %v11114_v26 = vld [vmem:[%s16635_s28] ss:$0 sm:$0xff] }
0x344b   : > { %v9186_v39 = vsub.f32 1.0, %v9182_v35  ;;  %v9184_v12 = vmul.f32 %v13347_v2, %v9164_v52 }
0x344c   : > { %v9193_v61 = vsub.f32 0.0, %v9185_v50  ;;  %v9187_v36 = vsub.f32 1.0, %v9183_v11 }
0x344d   : > { %v9194_v44 = vsub.f32 0.0, %v9186_v39  ;;  %v9188_v46 = vsub.f32 1.0, %v9184_v12 }
0x344e   : > { %v9197_v33 = vsel %vm9189_vm0, %v9185_v50, %v9193_v61  ;;  %v9195_v45 = vsub.f32 0.0, %v9187_v36  ;;  %v11113_v50 = vld [vmem:[%s16634_s9] ss:$0 sm:$0xff]  ;;  %s1944_s9 = scalar_lea.vmem [#allocation5], %s1943_s11 }
0x344f   : > { %v9198_v59 = vsel %vm9190_vm1, %v9186_v39, %v9194_v44  ;;  %v9201_v58 = vadd.f32 1.0, %v9197_v33  ;;  %v9196_v10 = vsub.f32 0.0, %v9188_v46  ;;  %s10691_s28 = sshll.u32 %s1944_s9, 4  ;;  %s16425_s28 = int_to_ptr.vmem [resolvable:$true] %s10691_s28 }
0x3450   : > { %v9199_v13 = vsel %vm9191_vm2, %v9187_v36, %v9195_v45  ;;  %v9202_v0 = vadd.f32 1.0, %v9198_v59  ;;  %s13371_s3 = scalar_lea.vmem %s16425_s28, 16 }
0x3451   : > { %v9203_v19 = vadd.f32 1.0, %v9199_v13  ;;  %v9200_v38 = vsel %vm9192_vm13, %v9188_v46, %v9196_v10  ;;  %v9205_v17 = vmul.f32 %v9201_v58, %v9101_v37  ;;  %p13372_p6 = scmp.ne.s32.totalorder %s16425_s28, %s13371_s3 }
0x3452   : > { %v9204_v40 = vadd.f32 1.0, %v9200_v38  ;;  %v9206_v21 = vmul.f32 %v9202_v0, %v9102_v23  ;;  %v12710_v23 = vld [vmem:[%s13845_s27 + $0x10] sm:$0xff]   ;;  %v12711_v38 = vld [vmem:[%s13845_s27 + $0x18] sm:$0xff]  }
0x3453   : > { %v9207_v54 = vmul.f32 %v9203_v19, %v9103_v53  ;;  %v12708_v53 = vld [vmem:[%s13845_s27] sm:$0xff]   ;;  %v12709_v19 = vld [vmem:[%s13845_s27 + $0x8] sm:$0xff]   ;;  %p13373_p8 = pnand %p13372_p6, %p16638_p7 }
0x3454   : > { %v9208_v49 = vmul.f32 %v9204_v40, %v9104_v29  ;;  %12041 = vmatpush3.bf16.msra.mxu1 %v12708_v53  ;;  %v12746_v53 = vld [vmem:[%s13845_s27 + $0x130] sm:$0xff]  }
0x3455   : > { %v9209_v9 = vpack.c.bf16 %v9207_v54, %v9205_v17  ;;  %12042 = vmatprep.subr.bf16.mxu1 %v13512_v4  ;;  %p13374_p9 = pneg %p13373_p8 }
0x3456   : > { %v9210_v24 = vpack.c.bf16 %v9208_v49, %v9206_v21 }
0x3458   : > { %9345 = vmatprep.mubr.bf16.mxu0 %v9210_v24  ;;  %12043 = vmatpush3.bf16.msra.mxu1 %v12709_v19  ;;  %v11115_v24 = vld [vmem:[%s16636_s5] ss:$0 sm:$0xff]  ;;  %v12747_v19 = vld [vmem:[%s13845_s27 + $0x138] sm:$0xff]   ;;  %s16423_s5 = scalar_lea.hbm %s13855_s12, %s11197_s14 }
0x3459   : > { %9346 = vmatmul.mubr.bf16.vlgmr.msra.gmra.mrb[148].mxu0 %v9209_v9  ;;  %12044 = vmatprep.subr.bf16.mxu1 %v13512_v4 }
0x345c   : > { %12045 = vmatpush3.bf16.msra.mxu1 %v12710_v23  ;;  %v12748_v23 = vld [vmem:[%s13845_s27 + $0x140] sm:$0xff]  }
0x345d   : > { %12046 = vmatprep.subr.bf16.mxu1 %v13512_v4 }
0x3460   : > { %12047 = vmatpush3.bf16.msra.mxu1 %v12711_v38 }
0x3461   : > { %12052 = vmatprep.subr.bf16.mxu1 %v13512_v4 }
0x352c   : > { %v11464_v60 = vpop.f32.mrb[148].mxu0 }
0x352d   : > { %v11465_v22 = vpop.f32.mrb[149].mxu0 }
0x352e   : > { %v11466_v56 = vadd.f32 %v11465_v22, %v11464_v60  ;;  %v11467_v1 = vpop.f32.mrb[150].mxu0 }
0x352f   : > { %v11468_v16 = vpop.f32.mrb[151].mxu0 }
0x3530   : > { %v9348_v28 = vadd.f32 %v11466_v56, %v11096_v31  ;;  %v11469_v48 = vadd.f32 %v11468_v16, %v11467_v1  ;;  %v11116_v1 = vld [vmem:[%s13840_s20] ss:$0 sm:$0xff] }
0x3532   : > { %v9351_v8 = vadd.f32 %v11469_v48, %v11096_v31  ;;  %v9354_v42 = vsel %vm2607_vm3, %v9348_v28, 0.0 }
0x3533   : > { %9355 = vadd.xlane.f32.xlu0 %v9354_v42 }
0x3534   : > { %v9357_v51 = vsel %vm2607_vm3, %v9351_v8, 0.0 }
0x3535   : > { %9358 = vadd.xlane.f32.xlu1 %v9357_v51  ;;  %v12713_v51 = vld [vmem:[%s13845_s27 + $0x28] sm:$0xff]  }
0x35c0   : > { %v9356_v55 = vpop.xlane.xlu0 %9355 }
0x35c1   : > { %v9360_v14 = vmul.f32 0.015625, %v9356_v55  ;;  %v12714_v55 = vld [vmem:[%s13845_s27 + $0x30] sm:$0xff]  }
0x35c2   : > { %v9359_v62 = vpop.xlane.xlu1 %9358 }
0x35c3   : > { %v9362_v27 = vsub.f32 %v9348_v28, %v9360_v14  ;;  %v9361_v3 = vmul.f32 0.015625, %v9359_v62  ;;  %v12715_v14 = vld [vmem:[%s13845_s27 + $0x38] sm:$0xff]   ;;  %v12716_v62 = vld [vmem:[%s13845_s27 + $0x40] sm:$0xff]  }
0x35c5   : > { %v9363_v15 = vsub.f32 %v9351_v8, %v9361_v3  ;;  %v9364_v7 = vmul.f32 %v9362_v27, %v9362_v27  ;;  %v12712_v8 = vld [vmem:[%s13845_s27 + $0x20] sm:$0xff]   ;;  %v12717_v3 = vld [vmem:[%s13845_s27 + $0x48] sm:$0xff]  }
0x35c7   : > { %v9366_v63 = vsel %vm2607_vm3, %v9364_v7, 0.0  ;;  %v9365_v34 = vmul.f32 %v9363_v15, %v9363_v15  ;;  %v12719_v7 = vld [vmem:[%s13845_s27 + $0x58] sm:$0xff]  }
0x35c8   : > { %9367 = vadd.xlane.f32.xlu0 %v9366_v63  ;;  %v12720_v63 = vld [vmem:[%s13845_s27 + $0x60] sm:$0xff]  }
0x35c9   : > { %v9369_v6 = vsel %vm2607_vm3, %v9365_v34, 0.0 }
0x35ca   : > { %9370 = vadd.xlane.f32.xlu1 %v9369_v6  ;;  %v12721_v6 = vld [vmem:[%s13845_s27 + $0x68] sm:$0xff]  }
0x3655   : > { %v9368_v43 = vpop.xlane.xlu0 %9367 }
0x3656   : > { %v9372_v20 = vmul.f32 0.015625, %v9368_v43  ;;  %v12722_v43 = vld [vmem:[%s13845_s27 + $0x70] sm:$0xff]  }
0x3657   : > { %v9371_v25 = vpop.xlane.xlu1 %9370 }
0x3658   : > { %v9374_v41 = vadd.f32 1e-05, %v9372_v20  ;;  %v9373_v18 = vmul.f32 0.015625, %v9371_v25  ;;  %v12723_v20 = vld [vmem:[%s13845_s27 + $0x78] sm:$0xff]   ;;  %v12724_v25 = vld [vmem:[%s13845_s27 + $0x80] sm:$0xff]  }
0x365a   : > { %13348 = vrsqrt.f32 %v9374_v41  ;;  %v9375_v57 = vadd.f32 1e-05, %v9373_v18  ;;  %v12725_v18 = vld [vmem:[%s13845_s27 + $0x88] sm:$0xff]  }
0x365c   : > { %13350 = vrsqrt.f32 %v9375_v57  ;;  %v12726_v57 = vld [vmem:[%s13845_s27 + $0x90] sm:$0xff]  }
0x3664   : > { %v13349_v35 = vpop.eup %13348 }
0x3665   : > { %v9378_v32 = vmul.f32 %v13349_v35, %v9362_v27  ;;  %v12727_v35 = vld [vmem:[%s13845_s27 + $0x98] sm:$0xff]  }
0x3666   : > { %v13351_v30 = vpop.eup %13350 }
0x3667   : > { %v9386_v39 = vmul.f32 %v11113_v50, %v9378_v32  ;;  %v9379_v61 = vmul.f32 %v13351_v30, %v9363_v15  ;;  %v12718_v15 = vld [vmem:[%s13845_s27 + $0x50] sm:$0xff]   ;;  %v12729_v30 = vld [vmem:[%s13845_s27 + $0xa8] sm:$0xff]  }
0x3669   : > { %v9394_v11 = vadd.f32 %v11114_v26, %v9386_v39  ;;  %v9387_v52 = vmul.f32 %v11113_v50, %v9379_v61  ;;  %v12728_v50 = vld [vmem:[%s13845_s27 + $0xa0] sm:$0xff]   ;;  %v12731_v39 = vld [vmem:[%s13845_s27 + $0xb8] sm:$0xff]  }
0x366a   : > { %v12732_v61 = vld [vmem:[%s13845_s27 + $0xc0] sm:$0xff]  }
0x366b   : > { %v9396_v2 = vadd.f32 %v9394_v11, %v16149_v5  ;;  %v9395_v44 = vadd.f32 %v11114_v26, %v9387_v52  ;;  %v12730_v26 = vld [vmem:[%s13845_s27 + $0xb0] sm:$0xff]   ;;  %v12733_v52 = vld [vmem:[%s13845_s27 + $0xc8] sm:$0xff]  }
0x366d   : > { %v9400_v33 = vsel %vm2607_vm3, %v9396_v2, 0.0  ;;  %v9397_v36 = vadd.f32 %v9395_v44, %v16152_v47  ;;  %v12735_v44 = vld [vmem:[%s13845_s27 + $0xd8] sm:$0xff]  }
0x366e   : > { %9401 = vadd.xlane.f32.xlu0 %v9400_v33  ;;  %v12736_v33 = vld [vmem:[%s13845_s27 + $0xe0] sm:$0xff]  }
0x366f   : > { %v9403_v12 = vsel %vm2607_vm3, %v9397_v36, 0.0 }
0x3670   : > { %9404 = vadd.xlane.f32.xlu1 %v9403_v12  ;;  %v12737_v12 = vld [vmem:[%s13845_s27 + $0xe8] sm:$0xff]  }
0x36fb   : > { %v9402_v59 = vpop.xlane.xlu0 %9401 }
0x36fc   : > { %v9406_v45 = vmul.f32 0.015625, %v9402_v59  ;;  %v12738_v59 = vld [vmem:[%s13845_s27 + $0xf0] sm:$0xff]  }
0x36fd   : > { %v9405_v46 = vpop.xlane.xlu1 %9404 }
0x36fe   : > { %v9408_v58 = vsub.f32 %v9396_v2, %v9406_v45  ;;  %v9407_v37 = vmul.f32 0.015625, %v9405_v46  ;;  %v12734_v2 = vld [vmem:[%s13845_s27 + $0xd0] sm:$0xff]   ;;  %v12739_v45 = vld [vmem:[%s13845_s27 + $0xf8] sm:$0xff]   ;;  %v12740_v46 = vld [vmem:[%s13845_s27 + $0x100] sm:$0xff]  }
0x3700   : > { %v9409_v13 = vsub.f32 %v9397_v36, %v9407_v37  ;;  %v9410_v5 = vmul.f32 %v9408_v58, %v9408_v58  ;;  %v12741_v37 = vld [vmem:[%s13845_s27 + $0x108] sm:$0xff]  }
0x3702   : > { %v9412_v10 = vsel %vm2607_vm3, %v9410_v5, 0.0  ;;  %v9411_v0 = vmul.f32 %v9409_v13, %v9409_v13  ;;  %v12743_v5 = vld [vmem:[%s13845_s27 + $0x118] sm:$0xff]  }
0x3703   : > { %9413 = vadd.xlane.f32.xlu0 %v9412_v10  ;;  %v12744_v10 = vld [vmem:[%s13845_s27 + $0x120] sm:$0xff]  }
0x3704   : > { %v9415_v47 = vsel %vm2607_vm3, %v9411_v0, 0.0 }
0x3705   : > { %9416 = vadd.xlane.f32.xlu1 %v9415_v47  ;;  %v12745_v47 = vld [vmem:[%s13845_s27 + $0x128] sm:$0xff]  }
0x3790   : > { %v9414_v17 = vpop.xlane.xlu0 %9413 }
0x3791   : > { %v9418_v54 = vmul.f32 0.015625, %v9414_v17  ;;  %v12749_v17 = vld [vmem:[%s13845_s27 + $0x148] sm:$0xff]  }
0x3792   : > { %v9417_v29 = vpop.xlane.xlu1 %9416 }
0x3793   : > { %v9420_v40 = vadd.f32 1e-05, %v9418_v54  ;;  %v9419_v21 = vmul.f32 0.015625, %v9417_v29  ;;  %v12750_v54 = vld [vmem:[%s13845_s27 + $0x150] sm:$0xff]   ;;  %v12751_v29 = vld [vmem:[%s13845_s27 + $0x158] sm:$0xff]  }
0x3795   : > { %13352 = vrsqrt.f32 %v9420_v40  ;;  %v9421_v9 = vadd.f32 1e-05, %v9419_v21  ;;  %v12752_v40 = vld [vmem:[%s13845_s27 + $0x160] sm:$0xff]  }
0x3797   : > { %13354 = vrsqrt.f32 %v9421_v9  ;;  %v12753_v9 = vld [vmem:[%s13845_s27 + $0x168] sm:$0xff]  }
0x379f   : > { %v13353_v49 = vpop.eup %13352 }
0x37a0   : > { %v9424_v60 = vmul.f32 %v13353_v49, %v9408_v58  ;;  %v12754_v49 = vld [vmem:[%s13845_s27 + $0x170] sm:$0xff]  }
0x37a1   : > { %v13355_v31 = vpop.eup %13354 }
0x37a2   : > { %v9432_v22 = vmul.f32 %v11115_v24, %v9424_v60  ;;  %v9425_v56 = vmul.f32 %v13355_v31, %v9409_v13  ;;  %v12742_v13 = vld [vmem:[%s13845_s27 + $0x110] sm:$0xff]   ;;  %v12756_v60 = vld [vmem:[%s13845_s27 + $0x180] sm:$0xff]  }
0x37a4   : > { %v9433_v16 = vmul.f32 %v11115_v24, %v9425_v56  ;;  %v9440_v28 = vadd.f32 %v11116_v1, %v9432_v22  ;;  %v12755_v24 = vld [vmem:[%s13845_s27 + $0x178] sm:$0xff]   ;;  %v12757_v22 = vld [vmem:[%s13845_s27 + $0x188] sm:$0xff]   ;;  %v12758_v56 = vld [vmem:[%s13845_s27 + $0x190] sm:$0xff]  }
0x37a6   : > { %v9441_v48 = vadd.f32 %v11116_v1, %v9433_v16  ;;  %v12759_v1 = vld [vmem:[%s13845_s27 + $0x198] sm:$0xff]   ;;  %v12760_v16 = vld [vmem:[%s13845_s27 + $0x1a0] sm:$0xff]  }
0x37a8   : > { %v16234_v42 = vpack.c.bf16 %v9441_v48, %v9440_v28  ;;  %v12761_v48 = vld [vmem:[%s13845_s27 + $0x1a8] sm:$0xff]  }
0x37aa   : > { %12049 = vmatmul.mubr.msk.bf16.vlgmr.msra.gmra.mrb[92].mxu1 %vm2607_vm3, %v16234_v42  ;;  %v16248_v27 = vshrl.u32 %v16234_v42, 16  ;;  %v9607_v34 = vrot.slane %v16234_v42, 1  ;;  %v9761_v32 = vrot.slane %v16234_v42, 2  ;;  %v9915_v36 = vrot.slane %v16234_v42, 3 }
0x37ab   : > { %12053 = vmatpush3.bf16.msra.mxu1 %v12712_v8  ;;  %12060 = vmatprep.mubr.msk.bf16.mxu1 %vm13513_vm8, %v13512_v4  ;;  %v10069_v0 = vrot.slane %v16234_v42, 4  ;;  %v10223_v21 = vrot.slane %v16234_v42, 5  ;;  %v10377_v28 = vrot.slane %v16234_v42, 6  ;;  %v12762_v8 = vld [vmem:[%s13845_s27 + $0x1b0] sm:$0xff]  }
0x37ac   : > { %12054 = vmatprep.subr.bf16.mxu1 %v13512_v4  ;;  %v9684_v41 = vrot.slane %v16248_v27, 1  ;;  %v9838_v11 = vrot.slane %v16248_v27, 2  ;;  %v9992_v58 = vrot.slane %v16248_v27, 3  ;;  %v10146_v38 = vrot.slane %v16248_v27, 4 }
0x37ad   : > { %v10300_v31 = vrot.slane %v16248_v27, 5 }
0x37af   : > { %12055 = vmatpush3.bf16.msra.mxu1 %v12713_v51  ;;  %v12763_v51 = vld [vmem:[%s13845_s27 + $0x1b8] sm:$0xff]  }
0x37b0   : > { %12056 = vmatprep.subr.bf16.mxu1 %v13512_v4 }
0x37b3   : > { %12057 = vmatpush3.bf16.msra.mxu1 %v12714_v55  ;;  %v12764_v55 = vld [vmem:[%s13845_s27 + $0x1c0] sm:$0xff]  }
0x37b4   : > { %12058 = vmatprep.subr.bf16.mxu1 %v13512_v4 }
0x37b7   : > { %12059 = vmatpush3.bf16.msra.mxu1 %v12715_v14  ;;  %v10454_v14 = vrot.slane %v16248_v27, 6 }
0x37b8   : > { %12064 = vmatprep.subr.bf16.mxu1 %v13512_v4 }
0x37ba   : > { %12061 = vmatmul.mubr.msk.bf16.vlgmr.msra.gmra.mrb[92].mxu1 %vm2607_vm3, %v16248_v27 }
0x37bb   : > { %12065 = vmatpush3.bf16.msra.mxu1 %v12716_v62  ;;  %12072 = vmatprep.mubr.msk.bf16.mxu1 %vm13513_vm8, %v13512_v4  ;;  %v12765_v62 = vld [vmem:[%s13845_s27 + $0x1c8] sm:$0xff]  }
0x37bc   : > { %12066 = vmatprep.subr.bf16.mxu1 %v13512_v4 }
0x37bf   : > { %12067 = vmatpush3.bf16.msra.mxu1 %v12717_v3  ;;  %v12766_v3 = vld [vmem:[%s13845_s27 + $0x1d0] sm:$0xff]  }
0x37c0   : > { %12068 = vmatprep.subr.bf16.mxu1 %v13512_v4 }
0x37c3   : > { %12069 = vmatpush3.bf16.msra.mxu1 %v12718_v15  ;;  %v12767_v15 = vld [vmem:[%s13845_s27 + $0x1d8] sm:$0xff]  }
0x37c4   : > { %12070 = vmatprep.subr.bf16.mxu1 %v13512_v4 }
0x37c7   : > { %12071 = vmatpush3.bf16.msra.mxu1 %v12719_v7  ;;  %v12768_v7 = vld [vmem:[%s13845_s27 + $0x1e0] sm:$0xff]  }
0x37c8   : > { %12076 = vmatprep.subr.bf16.mxu1 %v13512_v4 }
0x37ca   : > { %12073 = vmatmul.mubr.msk.bf16.vlgmr.msra.gmra.mrb[92].mxu1 %vm2607_vm3, %v9607_v34  ;;  %v12769_v34 = vld [vmem:[%s13845_s27 + $0x1e8] sm:$0xff]  }
0x37cb   : > { %12077 = vmatpush3.bf16.msra.mxu1 %v12720_v63  ;;  %12084 = vmatprep.mubr.msk.bf16.mxu1 %vm13513_vm8, %v13512_v4  ;;  %v10531_v63 = vrot.slane %v16234_v42, 7  ;;  %v12771_v42 = vld [vmem:[%s13845_s27 + $0x1f8] sm:$0xff]  }
0x37cc   : > { %12078 = vmatprep.subr.bf16.mxu1 %v13512_v4 }
0x37cf   : > { %12079 = vmatpush3.bf16.msra.mxu1 %v12721_v6  ;;  %v12770_v6 = vld [vmem:[%s13845_s27 + $0x1f0] sm:$0xff]  }
0x37d0   : > { %12080 = vmatprep.subr.bf16.mxu1 %v13512_v4 }
0x37d3   : > { %12081 = vmatpush3.bf16.msra.mxu1 %v12722_v43  ;;  %v10608_v43 = vrot.slane %v16248_v27, 7 }
0x37d4   : > { %12082 = vmatprep.subr.bf16.mxu1 %v13512_v4 }
0x37d7   : > { %12083 = vmatpush3.bf16.msra.mxu1 %v12723_v20  ;;  %v9442_v20 = vld [vmem:[%s16637_s4] sm:$0x1]  ;;  %s13375_s4 = sshll.u32 %s13516_s0, 4  ;;  %s13376_s4 = int_to_ptr.vmem [resolvable:$false] %s13375_s4 }
0x37d8   : > { %12088 = vmatprep.subr.bf16.mxu1 %v13512_v4  ;;  %s13377_s6 = scalar_lea.vmem %s13376_s4, 32  ;;  %p13378_p10 = scmp.lt.s32.totalorder %s16425_s28, %s13376_s4 }
0x37d9   : > { %p13379_p11 = scmp.lt.s32.totalorder %s13377_s6, %s13371_s3 }
0x37da   : > { %12085 = vmatmul.mubr.msk.bf16.vlgmr.msra.gmra.mrb[92].mxu1 %vm2607_vm3, %v9684_v41 }
0x37db   : > { %12089 = vmatpush3.bf16.msra.mxu1 %v12724_v25  ;;  %12096 = vmatprep.mubr.msk.bf16.mxu1 %vm13513_vm8, %v13512_v4  ;;  %p13380_p12 = por %p13379_p11, %p13378_p10 }
0x37dc   : > { %12090 = vmatprep.subr.bf16.mxu1 %v13512_v4 }
0x37dd   : > { %p13381_p13 = pnand %p13380_p12, %p13374_p9 }
0x37df   : > { %12091 = vmatpush3.bf16.msra.mxu1 %v12725_v18 }
0x37e0   : > { %12092 = vmatprep.subr.bf16.mxu1 %v13512_v4 }
0x37e3   : > { %12093 = vmatpush3.bf16.msra.mxu1 %v12726_v57 }
0x37e4   : > { %12094 = vmatprep.subr.bf16.mxu1 %v13512_v4 }
0x37e7   : > { %12095 = vmatpush3.bf16.msra.mxu1 %v12727_v35 }
0x37e8   : > { %12100 = vmatprep.subr.bf16.mxu1 %v13512_v4 }
0x37ea   : > { %12097 = vmatmul.mubr.msk.bf16.vlgmr.msra.gmra.mrb[92].mxu1 %vm2607_vm3, %v9761_v32 }
0x37eb   : > { %12101 = vmatpush3.bf16.msra.mxu1 %v12728_v50  ;;  %12108 = vmatprep.mubr.msk.bf16.mxu1 %vm13513_vm8, %v13512_v4 }
0x37ec   : > { %12102 = vmatprep.subr.bf16.mxu1 %v13512_v4 }
0x37ef   : > { %12103 = vmatpush3.bf16.msra.mxu1 %v12729_v30 }
0x37f0   : > { %12104 = vmatprep.subr.bf16.mxu1 %v13512_v4 }
0x37f3   : > { %12105 = vmatpush3.bf16.msra.mxu1 %v12730_v26 }
0x37f4   : > { %12106 = vmatprep.subr.bf16.mxu1 %v13512_v4 }
0x37f7   : > { %12107 = vmatpush3.bf16.msra.mxu1 %v12731_v39 }
0x37f8   : > { %12112 = vmatprep.subr.bf16.mxu1 %v13512_v4 }
0x37fa   : > { %12109 = vmatmul.mubr.msk.bf16.vlgmr.msra.gmra.mrb[92].mxu1 %vm2607_vm3, %v9838_v11 }
0x37fb   : > { %12113 = vmatpush3.bf16.msra.mxu1 %v12732_v61  ;;  %12120 = vmatprep.mubr.msk.bf16.mxu1 %vm13513_vm8, %v13512_v4 }
0x37fc   : > { %12114 = vmatprep.subr.bf16.mxu1 %v13512_v4 }
0x37ff   : > { %12115 = vmatpush3.bf16.msra.mxu1 %v12733_v52 }
0x3800   : > { %12116 = vmatprep.subr.bf16.mxu1 %v13512_v4 }
0x3803   : > { %12117 = vmatpush3.bf16.msra.mxu1 %v12734_v2 }
0x3804   : > { %12118 = vmatprep.subr.bf16.mxu1 %v13512_v4 }
0x3807   : > { %12119 = vmatpush3.bf16.msra.mxu1 %v12735_v44 }
0x3808   : > { %12124 = vmatprep.subr.bf16.mxu1 %v13512_v4 }
0x380a   : > { %12121 = vmatmul.mubr.msk.bf16.vlgmr.msra.gmra.mrb[92].mxu1 %vm2607_vm3, %v9915_v36 }
0x380b   : > { %12125 = vmatpush3.bf16.msra.mxu1 %v12736_v33  ;;  %12132 = vmatprep.mubr.msk.bf16.mxu1 %vm13513_vm8, %v13512_v4 }
0x380c   : > { %12126 = vmatprep.subr.bf16.mxu1 %v13512_v4 }
0x380f   : > { %12127 = vmatpush3.bf16.msra.mxu1 %v12737_v12 }
0x3810   : > { %12128 = vmatprep.subr.bf16.mxu1 %v13512_v4 }
0x3813   : > { %12129 = vmatpush3.bf16.msra.mxu1 %v12738_v59 }
0x3814   : > { %12130 = vmatprep.subr.bf16.mxu1 %v13512_v4 }
0x3817   : > { %12131 = vmatpush3.bf16.msra.mxu1 %v12739_v45 }
0x3818   : > { %12136 = vmatprep.subr.bf16.mxu1 %v13512_v4 }
0x381a   : > { %12133 = vmatmul.mubr.msk.bf16.vlgmr.msra.gmra.mrb[92].mxu1 %vm2607_vm3, %v9992_v58 }
0x381b   : > { %12137 = vmatpush3.bf16.msra.mxu1 %v12740_v46  ;;  %12144 = vmatprep.mubr.msk.bf16.mxu1 %vm13513_vm8, %v13512_v4 }
0x381c   : > { %12138 = vmatprep.subr.bf16.mxu1 %v13512_v4 }
0x381f   : > { %12139 = vmatpush3.bf16.msra.mxu1 %v12741_v37 }
0x3820   : > { %12140 = vmatprep.subr.bf16.mxu1 %v13512_v4 }
0x3823   : > { %12141 = vmatpush3.bf16.msra.mxu1 %v12742_v13 }
0x3824   : > { %12142 = vmatprep.subr.bf16.mxu1 %v13512_v4 }
0x3827   : > { %12143 = vmatpush3.bf16.msra.mxu1 %v12743_v5 }
0x3828   : > { %12148 = vmatprep.subr.bf16.mxu1 %v13512_v4 }
0x382a   : > { %12145 = vmatmul.mubr.msk.bf16.vlgmr.msra.gmra.mrb[92].mxu1 %vm2607_vm3, %v10069_v0 }
0x382b   : > { %12149 = vmatpush3.bf16.msra.mxu1 %v12744_v10  ;;  %12156 = vmatprep.mubr.msk.bf16.mxu1 %vm13513_vm8, %v13512_v4 }
0x382c   : > { %12150 = vmatprep.subr.bf16.mxu1 %v13512_v4 }
0x382f   : > { %12151 = vmatpush3.bf16.msra.mxu1 %v12745_v47 }
0x3830   : > { %12152 = vmatprep.subr.bf16.mxu1 %v13512_v4 }
0x3833   : > { %12153 = vmatpush3.bf16.msra.mxu1 %v12746_v53 }
0x3834   : > { %12154 = vmatprep.subr.bf16.mxu1 %v13512_v4 }
0x3837   : > { %12155 = vmatpush3.bf16.msra.mxu1 %v12747_v19 }
0x3838   : > { %12160 = vmatprep.subr.bf16.mxu1 %v13512_v4 }
0x383a   : > { %12157 = vmatmul.mubr.msk.bf16.vlgmr.msra.gmra.mrb[92].mxu1 %vm2607_vm3, %v10146_v38 }
0x383b   : > { %12161 = vmatpush3.bf16.msra.mxu1 %v12748_v23  ;;  %12168 = vmatprep.mubr.msk.bf16.mxu1 %vm13513_vm8, %v13512_v4 }
0x383c   : > { %12162 = vmatprep.subr.bf16.mxu1 %v13512_v4 }
0x383f   : > { %12163 = vmatpush3.bf16.msra.mxu1 %v12749_v17 }
0x3840   : > { %12164 = vmatprep.subr.bf16.mxu1 %v13512_v4 }
0x3843   : > { %12165 = vmatpush3.bf16.msra.mxu1 %v12750_v54 }
0x3844   : > { %12166 = vmatprep.subr.bf16.mxu1 %v13512_v4 }
0x3847   : > { %12167 = vmatpush3.bf16.msra.mxu1 %v12751_v29 }
0x3848   : > { %12172 = vmatprep.subr.bf16.mxu1 %v13512_v4 }
0x384a   : > { %12169 = vmatmul.mubr.msk.bf16.vlgmr.msra.gmra.mrb[92].mxu1 %vm2607_vm3, %v10223_v21 }
0x384b   : > { %12173 = vmatpush3.bf16.msra.mxu1 %v12752_v40  ;;  %12180 = vmatprep.mubr.msk.bf16.mxu1 %vm13513_vm8, %v13512_v4 }
0x384c   : > { %12174 = vmatprep.subr.bf16.mxu1 %v13512_v4 }
0x384f   : > { %12175 = vmatpush3.bf16.msra.mxu1 %v12753_v9 }
0x3850   : > { %12176 = vmatprep.subr.bf16.mxu1 %v13512_v4 }
0x3853   : > { %12177 = vmatpush3.bf16.msra.mxu1 %v12754_v49 }
0x3854   : > { %12178 = vmatprep.subr.bf16.mxu1 %v13512_v4 }
0x3857   : > { %12179 = vmatpush3.bf16.msra.mxu1 %v12755_v24 }
0x3858   : > { %12184 = vmatprep.subr.bf16.mxu1 %v13512_v4 }
0x385a   : > { %12181 = vmatmul.mubr.msk.bf16.vlgmr.msra.gmra.mrb[92].mxu1 %vm2607_vm3, %v10300_v31 }
0x385b   : > { %12185 = vmatpush3.bf16.msra.mxu1 %v12756_v60  ;;  %12192 = vmatprep.mubr.msk.bf16.mxu1 %vm13513_vm8, %v13512_v4 }
0x385c   : > { %12186 = vmatprep.subr.bf16.mxu1 %v13512_v4 }
0x385f   : > { %12187 = vmatpush3.bf16.msra.mxu1 %v12757_v22 }
0x3860   : > { %12188 = vmatprep.subr.bf16.mxu1 %v13512_v4 }
0x3863   : > { %12189 = vmatpush3.bf16.msra.mxu1 %v12758_v56 }
0x3864   : > { %12190 = vmatprep.subr.bf16.mxu1 %v13512_v4 }
0x3867   : > { %12191 = vmatpush3.bf16.msra.mxu1 %v12759_v1 }
0x3868   : > { %12196 = vmatprep.subr.bf16.mxu1 %v13512_v4 }
0x386a   : > { %12193 = vmatmul.mubr.msk.bf16.vlgmr.msra.gmra.mrb[92].mxu1 %vm2607_vm3, %v10377_v28 }
0x386b   : > { %12197 = vmatpush3.bf16.msra.mxu1 %v12760_v16  ;;  %12204 = vmatprep.mubr.msk.bf16.mxu1 %vm13513_vm8, %v13512_v4 }
0x386c   : > { %12198 = vmatprep.subr.bf16.mxu1 %v13512_v4 }
0x386f   : > { %12199 = vmatpush3.bf16.msra.mxu1 %v12761_v48 }
0x3870   : > { %12200 = vmatprep.subr.bf16.mxu1 %v13512_v4 }
0x3873   : > { %12201 = vmatpush3.bf16.msra.mxu1 %v12762_v8 }
0x3874   : > { %12202 = vmatprep.subr.bf16.mxu1 %v13512_v4 }
0x3877   : > { %12203 = vmatpush3.bf16.msra.mxu1 %v12763_v51 }
0x3878   : > { %12208 = vmatprep.subr.bf16.mxu1 %v13512_v4 }
0x387a   : > { %12205 = vmatmul.mubr.msk.bf16.vlgmr.msra.gmra.mrb[92].mxu1 %vm2607_vm3, %v10454_v14 }
0x387b   : > { %12209 = vmatpush3.bf16.msra.mxu1 %v12764_v55  ;;  %12216 = vmatprep.mubr.msk.bf16.mxu1 %vm13513_vm8, %v13512_v4 }
0x387c   : > { %12210 = vmatprep.subr.bf16.mxu1 %v13512_v4 }
0x387f   : > { %12211 = vmatpush3.bf16.msra.mxu1 %v12765_v62 }
0x3880   : > { %12212 = vmatprep.subr.bf16.mxu1 %v13512_v4 }
0x3883   : > { %12213 = vmatpush3.bf16.msra.mxu1 %v12766_v3 }
0x3884   : > { %12214 = vmatprep.subr.bf16.mxu1 %v13512_v4 }
0x3887   : > { %12215 = vmatpush3.bf16.msra.mxu1 %v12767_v15 }
0x3888   : > { %12220 = vmatprep.subr.bf16.mxu1 %v13512_v4 }
0x388a   : > { %12217 = vmatmul.mubr.msk.bf16.vlgmr.msra.gmra.mrb[92].mxu1 %vm2607_vm3, %v10531_v63 }
0x388b   : > { %12221 = vmatpush3.bf16.msra.mxu1 %v12768_v7  ;;  %12228 = vmatprep.mubr.msk.bf16.mxu1 %vm13513_vm8, %v13512_v4 }
0x388c   : > { %12222 = vmatprep.subr.bf16.mxu1 %v13512_v4 }
0x388f   : > { %12223 = vmatpush3.bf16.msra.mxu1 %v12769_v34 }
0x3890   : > { %12224 = vmatprep.subr.bf16.mxu1 %v13512_v4 }
0x3893   : > { %12225 = vmatpush3.bf16.msra.mxu1 %v12770_v6 }
0x3894   : > { %12226 = vmatprep.subr.bf16.mxu1 %v13512_v4 }
0x3897   : > { %12227 = vmatpush3.bf16.msra.mxu1 %v12771_v42 }
0x389a   : > { %12229 = vmatmul.mubr.msk.bf16.vlgmr.msra.gmra.mrb[92].mxu1 %vm2607_vm3, %v10608_v43 }
0x396d   : > { %v10670_v25 = vpop.f32.mrb[92].mxu1 }
0x396e   : > { %v12296_v41 = vadd.f32 %v10670_v25, %v9442_v20  ;;  %v12230_v18 = vpop.f32.mrb[93].mxu1 }
0x396f   : > { %v10673_v4 = vpop.f32.mrb[94].mxu1 }
0x3970   : > { %10677 = vst [vmem:[%s1944_s9] sm:$0x1] %v12296_v41  ;;  %v12231_v27 = vpop.f32.mrb[95].mxu1 }
0x3971   : > { %13384 = shalt.err (!%p13381_p13)
}
0x3972   : > { %s13385_s11 = scalar_lea.hbm %s16423_s5, 16  ;;  %s13389_s14 = scalar_lea.hbm %s13855_s12, 32 }
0x3973   : > { %p13386_p0 = scmp.ne.s32.totalorder %s16423_s5, %s13385_s11  ;;  %p13390_p3 = scmp.lt.u32.totalorder %s16423_s5, %s13855_s12 }
0x3974   : > { %p13391_p4 = scmp.lt.u32.totalorder %s13389_s14, %s13385_s11  ;;  %p13393_p6 = scmp.lt.u32.totalorder %s13385_s11, %s16423_s5 }
0x3975   : > { %p13387_p1 = pnand %p13386_p0, %p16638_p7 }
0x3976   : > { %p13392_p5 = por %p13391_p4, %p13390_p3 }
0x3977   : > { %p13388_p2 = pneg %p13387_p1 }
0x3978   : > { %p13394_p8 = por %p13393_p6, %p13392_p5 }
0x397a   : > { %p13395_p9 = pnand %p13394_p8, %p13388_p2 }
0x397c   : > { %13398 = shalt.err (!%p13395_p9)
}
0x397d   : > { %12389 = dma.vmem_to_hbm [thread:$0]  (%p16638_p7), %s16425_s28, 16, %s16423_s5, %s10679_s1  }
0x397e PF: > { %p12401_p10 = scmp.ge.s32.totalorder %s13437_s22, 2  ;;  %s10703_s4 = sand.u32 1, %s13425_s15  }
0x397f   : > { %p16639_p11 = scmp.ne.s32.totalorder %s16577_s10, 0  ;;  %s10704_s6 = scalar_lea.sflag [#allocation3], %s10703_s4 }
0x3981   : > { %p12396_p12 = pnand %p12401_p10, %p16639_p11 }
0x3983   : > { %13420 = dma.done.wait (!%p12396_p12), %s10704_s6, 16  }
0x3984   : > { %13422 = vsyncadd (!%p12396_p12), %s10704_s6, 4294967280  ;;  %p144_p13 = scmp.ge.s32.totalorder %s13882_s26, 4   ;;  %s16640_s15 = smov %s13429_s16 }
0x3985   : > { %s16641_s16 = smov %s13433_s18  ;;  %s16642_s18 = smov %s13893_s2 }
0x3986   : > { %s16643_s22 = smov %s13882_s26  ;;  %146 = sbr.rel (!%p144_p13) target bundleno = 155 (0x9b), region = 401 }
0x398d   :  { %10708 = vsyncpa [#allocation3], 1 }
0x398e   :  { %10710 = vsyncpa [#allocation3 + $0x1], 1 }
0x398f   :  { %10711 = vsyncpa [#allocation4], 1 }
0x3990   :  { %10713 = vsyncpa [#allocation4 + $0x1], 1 }

</bundles_post_ra>
